<compile_context>
chip_gen: v7x
topology: tpu7x:2x2x1
jax: 0.10.0
libtpu: 0.0.40
codegen_flags: <defaults>
</compile_context>

<pallas_src>
import functools

import jax
import jax.numpy as jnp
from jax.experimental import pallas as pl
from jax.experimental.pallas import tpu as pltpu


def _decoder_layer_kernel(n_heads, d_head,
                          xq_ref, xkv_ref,
                          wq_ref, wkv_ref, wo_ref,
                          bq_ref, bkv_ref, bo_ref,
                          w1_ref, b1_ref, w2_ref, b2_ref,
                          gamma_ref, beta_ref,
                          o_ref,
                          q_sc, m_sc, l_sc, acc_sc):
    """Grid = (batch, q_block, kv_block); kv_block is the innermost reduction axis.

    xq_ref:    (1, D, Tq)  query-block tile of x (Conv1d layout)
    xkv_ref:   (1, D, Tk)  kv-block tile of x (Conv1d layout)
    o_ref:     (1, D, Tq)  output tile, written only on the last kv step
    q_sc:      (Tq, D)     bf16 scaled+biased Q for the current query block
    m_sc/l_sc: (Tq, H)     f32 online-softmax running max / denominator (one column per head)
    acc_sc:    (Tq, D)     f32 merged-head context accumulator (head h -> lanes [h*dh,(h+1)*dh))
    """
    H, dh = n_heads, d_head
    D = wq_ref.shape[0]
    kv_idx = pl.program_id(2)

    # ---- first KV step for this (batch, q_block): reset state, project Q ----
    @pl.when(kv_idx == 0)
    def _():
        m_sc[...] = jnp.full(m_sc.shape, -jnp.inf, dtype=jnp.float32)
        l_sc[...] = jnp.zeros(l_sc.shape, dtype=jnp.float32)
        acc_sc[...] = jnp.zeros(acc_sc.shape, dtype=jnp.float32)
        xq = jnp.transpose(xq_ref[0]).astype(jnp.bfloat16)          # (Tq, D), XLU transpose
        q = jnp.dot(xq, wq_ref[...],
                    preferred_element_type=jnp.float32) + bq_ref[...]
        q_sc[...] = q.astype(jnp.bfloat16)     # 1/sqrt(dh) already folded into wq/bq

    # ---- K|V projection for this KV block: one fused (Tk, D) @ (D, 2D) matmul ----
    xkv = jnp.transpose(xkv_ref[0]).astype(jnp.bfloat16)            # (Tk, D)
    kvp = jnp.dot(xkv, wkv_ref[...],
                  preferred_element_type=jnp.float32) + bkv_ref[...]
    kvp = kvp.astype(jnp.bfloat16)                                  # (Tk, 2D), single bf16 copy

    # ---- per-head online softmax (flash); head split = static lane slices ----
    for h in range(H):
        hs = slice(h * dh, (h + 1) * dh)
        qh = q_sc[:, hs]                                            # (Tq, dh) bf16
        kh = kvp[:, h * dh:(h + 1) * dh]                            # (Tk, dh) bf16
        vh = kvp[:, D + h * dh:D + (h + 1) * dh]                    # (Tk, dh) bf16

        s = jnp.einsum('qd,kd->qk', qh, kh,
                       preferred_element_type=jnp.float32)          # (Tq, Tk) f32

        m_prev = m_sc[:, h:h + 1]                                   # (Tq, 1)
        m_new = jnp.maximum(m_prev, jnp.max(s, axis=-1, keepdims=True))
        alpha = jnp.exp(m_prev - m_new)
        p = jnp.exp(s - m_new)                                      # f32 on the EUP
        l_sc[:, h:h + 1] = alpha * l_sc[:, h:h + 1] + jnp.sum(p, axis=-1, keepdims=True)
        ctx = jnp.dot(p.astype(jnp.bfloat16), vh,
                      preferred_element_type=jnp.float32)           # (Tq, dh) f32
        acc_sc[:, hs] = alpha * acc_sc[:, hs] + ctx
        m_sc[:, h:h + 1] = m_new

    # ---- last KV step: finish attention, FFN, LayerNorm, store ----
    @pl.when(kv_idx == pl.num_programs(2) - 1)
    def _():
        # normalize the merged-head context (approx reciprocal -> EUP slot)
        for h in range(H):
            hs = slice(h * dh, (h + 1) * dh)
            acc_sc[:, hs] = acc_sc[:, hs] * pl.reciprocal(l_sc[:, h:h + 1], approx=True)

        # output projection: one matmul with full contraction depth K = D
        ctx_all = acc_sc[...].astype(jnp.bfloat16)                  # (Tq, D)
        attn = jnp.dot(ctx_all, wo_ref[...],
                       preferred_element_type=jnp.float32) + bo_ref[...]

        # dropout: identity (inference / training=False)

        # ffn1 (Conv1d k=1 == per-position linear) + ReLU
        h1 = jnp.dot(attn.astype(jnp.bfloat16), w1_ref[...],
                     preferred_element_type=jnp.float32) + b1_ref[...]
        h1 = jnp.maximum(h1, 0.0)

        # dropout: identity (inference)

        # ffn2 + ReLU
        h2 = jnp.dot(h1.astype(jnp.bfloat16), w2_ref[...],
                     preferred_element_type=jnp.float32) + b2_ref[...]
        h2 = jnp.maximum(h2, 0.0)

        # LayerNorm over d_model (post-norm, norm_first=False), f32 on the VPU
        mean = jnp.mean(h2, axis=-1, keepdims=True)
        cent = h2 - mean
        var = jnp.mean(cent * cent, axis=-1, keepdims=True)
        y = cent * jax.lax.rsqrt(var + 1e-5) * gamma_ref[...] + beta_ref[...]

        o_ref[0] = jnp.transpose(y).astype(o_ref.dtype)             # store back as (D, Tq)


def _pick_vmem_limit_bytes():
    """Generation-aware scoped-VMEM limit: leave headroom on v7x (64 MiB physical)."""
    try:
        cap = pltpu.get_tpu_info().vmem_capacity_bytes
    except Exception:
        cap = 64 * 1024 * 1024  # conservative fallback (valid on every generation)
    return int(min(cap - 16 * 1024 * 1024, 100 * 1024 * 1024))


def transformer_decoder_layer(x_ncl, params, *, n_heads, block_q=128, block_kv=128):
    """x_ncl: (B, d_model, T) float32 -> (B, d_model, T) float32 (PyTorch Conv1d layout)."""
    B, D, T = x_ncl.shape
    assert D % n_heads == 0
    H = n_heads
    dh = D // H
    F = params["w1"].shape[1]

    block_q = min(block_q, T)
    block_kv = min(block_kv, T)
    assert T % block_q == 0 and T % block_kv == 0, "T must be divisible by the sequence tiles"
    nq, nkv = T // block_q, T // block_kv

    x_ncl = x_ncl.astype(jnp.float32)

    # Fold the 1/sqrt(d_head) attention scale into the Q projection (weights + bias).
    scale = 1.0 / (dh ** 0.5)
    wq = (params["wq"] * scale).astype(jnp.bfloat16)                                   # (D, D)
    bq = (params["bq"] * scale).astype(jnp.float32)                                    # (1, D)
    # Fused K|V projection.
    wkv = jnp.concatenate([params["wk"], params["wv"]], axis=1).astype(jnp.bfloat16)   # (D, 2D)
    bkv = jnp.concatenate([params["bk"], params["bv"]], axis=1).astype(jnp.float32)    # (1, 2D)
    wo = params["wo"].astype(jnp.bfloat16)                                             # (D, D)
    bo = params["bo"].astype(jnp.float32)                                              # (1, D)
    w1 = params["w1"].astype(jnp.bfloat16)                                             # (D, F)
    b1 = params["b1"].astype(jnp.float32)                                              # (1, F)
    w2 = params["w2"].astype(jnp.bfloat16)                                             # (F, D)
    b2 = params["b2"].astype(jnp.float32)                                              # (1, D)
    gamma = params["gamma"].astype(jnp.float32)                                        # (1, D)
    beta = params["beta"].astype(jnp.float32)                                          # (1, D)

    def rep(shape):
        zeros = (0,) * len(shape)
        return pl.BlockSpec(shape, lambda b, qi, ki, _z=zeros: _z)

    kernel = functools.partial(_decoder_layer_kernel, H, dh)

    flops = (2 * B * T * D * D                 # Q projection
             + 2 * B * nq * T * D * 2 * D      # K|V projection (recomputed per q block)
             + 4 * B * T * T * D               # scores + context
             + 2 * B * T * D * D               # output projection
             + 4 * B * T * D * F)              # ffn1 + ffn2
    transcendentals = B * H * T * T
    bytes_accessed = (B * D * T * 4 * (2 + nq)
                      + (2 * D * D + 2 * D * D + 2 * D * F) * 2
                      + (6 * D + 2 * F) * 4)
    cost = pl.CostEstimate(flops=flops, transcendentals=transcendentals,
                           bytes_accessed=bytes_accessed)

    out = pl.pallas_call(
        kernel,
        out_shape=jax.ShapeDtypeStruct((B, D, T), jnp.float32),
        grid_spec=pltpu.PrefetchScalarGridSpec(
            num_scalar_prefetch=0,
            grid=(B, nq, nkv),
            in_specs=[
                pl.BlockSpec((1, D, block_q), lambda b, qi, ki: (b, 0, qi)),    # x (query tile)
                pl.BlockSpec((1, D, block_kv), lambda b, qi, ki: (b, 0, ki)),   # x (kv tile)
                rep((D, D)),        # wq (scale folded)
                rep((D, 2 * D)),    # wkv (k|v fused)
                rep((D, D)),        # wo
                rep((1, D)),        # bq (scale folded)
                rep((1, 2 * D)),    # bkv
                rep((1, D)),        # bo
                rep((D, F)),        # ffn1 w
                rep((1, F)),        # ffn1 b
                rep((F, D)),        # ffn2 w
                rep((1, D)),        # ffn2 b
                rep((1, D)),        # layernorm gamma
                rep((1, D)),        # layernorm beta
            ],
            out_specs=pl.BlockSpec((1, D, block_q), lambda b, qi, ki: (b, 0, qi)),
            scratch_shapes=[
                pltpu.VMEM((block_q, D), jnp.bfloat16),   # Q (scaled, biased, bf16 once)
                pltpu.VMEM((block_q, H), jnp.float32),    # running max per head
                pltpu.VMEM((block_q, H), jnp.float32),    # running denominator per head
                pltpu.VMEM((block_q, D), jnp.float32),    # merged-head context accumulator
            ],
        ),
        compiler_params=pltpu.CompilerParams(
            dimension_semantics=("parallel", "parallel", "arbitrary"),
            vmem_limit_bytes=_pick_vmem_limit_bytes(),
        ),
        cost_estimate=cost,
    )(x_ncl, x_ncl,
      wq, wkv, wo, bq, bkv, bo,
      w1, b1, w2, b2, gamma, beta)

    return out  # already (B, d_model, T): no wrapper-side HBM transpose


def reference_decoder_layer(x_ncl, params, *, n_heads):
    """Pure-JAX f32 reference with the same forward semantics as the kernel."""
    B, D, T = x_ncl.shape
    H = n_heads
    dh = D // H
    x = jnp.transpose(x_ncl, (0, 2, 1))                              # (B, T, D)
    q = x @ params["wq"] + params["bq"]
    k = x @ params["wk"] + params["bk"]
    v = x @ params["wv"] + params["bv"]
    split = lambda a: a.reshape(B, T, H, dh).transpose(0, 2, 1, 3)   # (B, H, T, dh)
    qh, kh, vh = split(q), split(k), split(v)
    s = jnp.einsum('bhqd,bhkd->bhqk', qh, kh) / (dh ** 0.5)
    p = jax.nn.softmax(s, axis=-1)
    ctx = jnp.einsum('bhqk,bhkd->bhqd', p, vh)
    ctx = ctx.transpose(0, 2, 1, 3).reshape(B, T, D)
    attn = ctx @ params["wo"] + params["bo"]
    h1 = jnp.maximum(attn @ params["w1"] + params["b1"], 0.0)
    h2 = jnp.maximum(h1 @ params["w2"] + params["b2"], 0.0)
    mean = h2.mean(-1, keepdims=True)
    cent = h2 - mean
    var = (cent * cent).mean(-1, keepdims=True)
    y = cent * jax.lax.rsqrt(var + 1e-5) * params["gamma"] + params["beta"]
    return jnp.transpose(y, (0, 2, 1))                               # (B, D, T)


def init_params(key, d_model, d_ff):
    ks = jax.random.split(key, 12)
    s = 0.08
    return {
        "wq": s * jax.random.normal(ks[0], (d_model, d_model), jnp.float32),
        "wk": s * jax.random.normal(ks[1], (d_model, d_model), jnp.float32),
        "wv": s * jax.random.normal(ks[2], (d_model, d_model), jnp.float32),
        "wo": s * jax.random.normal(ks[3], (d_model, d_model), jnp.float32),
        "bq": 0.02 * jax.random.normal(ks[4], (1, d_model), jnp.float32),
        "bk": 0.02 * jax.random.normal(ks[5], (1, d_model), jnp.float32),
        "bv": 0.02 * jax.random.normal(ks[6], (1, d_model), jnp.float32),
        "bo": 0.02 * jax.random.normal(ks[7], (1, d_model), jnp.float32),
        "w1": s * jax.random.normal(ks[8], (d_model, d_ff), jnp.float32),
        "b1": 0.01 * jnp.ones((1, d_ff), jnp.float32),
        "w2": s * jax.random.normal(ks[9], (d_ff, d_model), jnp.float32),
        "b2": 0.01 * jnp.ones((1, d_model), jnp.float32),
        "gamma": 1.0 + 0.1 * jax.random.normal(ks[10], (1, d_model), jnp.float32),
        "beta": 0.05 * jax.random.normal(ks[11], (1, d_model), jnp.float32),
    }


if __name__ == "__main__":
    # Small demo shapes. T=256 with 128-wide sequence tiles exercises the
    # (batch, q_block, kv_block) flash grid with nq = nkv = 2 (lane-aligned blocks).
    B, d_model, T = 2, 64, 256
    n_heads, d_ff = 4, 128

    key = jax.random.PRNGKey(0)
    kx, kp = jax.random.split(key)
    x = jax.random.normal(kx, (B, d_model, T), jnp.float32)  # PyTorch Conv1d layout (B, C, T)
    params = init_params(kp, d_model, d_ff)

    out = transformer_decoder_layer(x, params, n_heads=n_heads, block_q=128, block_kv=128)
    jax.block_until_ready(out)
    assert out.shape == (B, d_model, T)

    # Loose sanity check vs. a pure-JAX f32 reference (the kernel feeds the MXU with
    # bf16 operands and uses an approximate EUP reciprocal, so this is not bit-exact).
    ref = reference_decoder_layer(x, params, n_heads=n_heads)
    max_err = float(jnp.max(jnp.abs(out - ref)))
    assert max_err < 0.15, f"kernel deviates from reference: max abs err {max_err}"

    print("KERNEL_OK")
</pallas_src>

<mosaic_0001>
module attributes {stable_mosaic.version = 11 : i64} {
  func.func @_decoder_layer_kernel(%arg0: i32, %arg1: i32, %arg2: i32, %arg3: memref<1x64x128xf32, #tpu.memory_space<vmem>>, %arg4: memref<1x64x128xf32, #tpu.memory_space<vmem>>, %arg5: memref<64x64xbf16, #tpu.memory_space<vmem>>, %arg6: memref<64x128xbf16, #tpu.memory_space<vmem>>, %arg7: memref<64x64xbf16, #tpu.memory_space<vmem>>, %arg8: memref<1x64xf32, #tpu.memory_space<vmem>>, %arg9: memref<1x128xf32, #tpu.memory_space<vmem>>, %arg10: memref<1x64xf32, #tpu.memory_space<vmem>>, %arg11: memref<64x128xbf16, #tpu.memory_space<vmem>>, %arg12: memref<1x128xf32, #tpu.memory_space<vmem>>, %arg13: memref<128x64xbf16, #tpu.memory_space<vmem>>, %arg14: memref<1x64xf32, #tpu.memory_space<vmem>>, %arg15: memref<1x64xf32, #tpu.memory_space<vmem>>, %arg16: memref<1x64xf32, #tpu.memory_space<vmem>>, %arg17: memref<1x64x128xf32, #tpu.memory_space<vmem>>, %arg18: memref<128x64xbf16, #tpu.memory_space<vmem>>, %arg19: memref<128x4xf32, #tpu.memory_space<vmem>>, %arg20: memref<128x4xf32, #tpu.memory_space<vmem>>, %arg21: memref<128x64xf32, #tpu.memory_space<vmem>>) attributes {dimension_semantics = [#tpu.dimension_semantics<parallel>, #tpu.dimension_semantics<parallel>, #tpu.dimension_semantics<arbitrary>], iteration_bounds = array<i64: 2, 2, 2>, scalar_prefetch = 0 : i64, scratch_operands = 4 : i64, tpu.core_type = #tpu.core_type<tc>, window_params = [{transform_indices = @transform_0, window_bounds = array<i64: 1, 64, 128>}, {transform_indices = @transform_1, window_bounds = array<i64: 1, 64, 128>}, {pipeline_mode = #tpu.pipeline_mode<synchronous>, transform_indices = @transform_2, window_bounds = array<i64: 64, 64>}, {pipeline_mode = #tpu.pipeline_mode<synchronous>, transform_indices = @transform_3, window_bounds = array<i64: 64, 128>}, {pipeline_mode = #tpu.pipeline_mode<synchronous>, transform_indices = @transform_4, window_bounds = array<i64: 64, 64>}, {pipeline_mode = #tpu.pipeline_mode<synchronous>, transform_indices = @transform_5, window_bounds = array<i64: 1, 64>}, {pipeline_mode = #tpu.pipeline_mode<synchronous>, transform_indices = @transform_6, window_bounds = array<i64: 1, 128>}, {pipeline_mode = #tpu.pipeline_mode<synchronous>, transform_indices = @transform_7, window_bounds = array<i64: 1, 64>}, {pipeline_mode = #tpu.pipeline_mode<synchronous>, transform_indices = @transform_8, window_bounds = array<i64: 64, 128>}, {pipeline_mode = #tpu.pipeline_mode<synchronous>, transform_indices = @transform_9, window_bounds = array<i64: 1, 128>}, {pipeline_mode = #tpu.pipeline_mode<synchronous>, transform_indices = @transform_10, window_bounds = array<i64: 128, 64>}, {pipeline_mode = #tpu.pipeline_mode<synchronous>, transform_indices = @transform_11, window_bounds = array<i64: 1, 64>}, {pipeline_mode = #tpu.pipeline_mode<synchronous>, transform_indices = @transform_12, window_bounds = array<i64: 1, 64>}, {pipeline_mode = #tpu.pipeline_mode<synchronous>, transform_indices = @transform_13, window_bounds = array<i64: 1, 64>}, {transform_indices = @transform_14, window_bounds = array<i64: 1, 64, 128>}]} {
    %c0_i32 = arith.constant 0 : i32
    %0 = arith.cmpi eq, %arg2, %c0_i32 : i32
    %1 = arith.extui %0 : i1 to i32
    %c0_i32_0 = arith.constant 0 : i32
    %2 = arith.cmpi ne, %1, %c0_i32_0 : i32
    scf.if %2 {
      %cst_74 = arith.constant 0xFF800000 : f32
      %124 = vector.broadcast %cst_74 : f32 to vector<128x4xf32>
      %c0_75 = arith.constant 0 : index
      %c0_76 = arith.constant 0 : index
      %125 = vector.load %arg19[%c0_75, %c0_76] : memref<128x4xf32, #tpu.memory_space<vmem>>, vector<128x4xf32>
      tpu.vector_store %arg19[%c0_75, %c0_76], %124 {strides = array<i32>} : memref<128x4xf32, #tpu.memory_space<vmem>>, vector<128x4xf32>,
      %cst_77 = arith.constant 0.000000e+00 : f32
      %126 = vector.broadcast %cst_77 : f32 to vector<128x4xf32>
      %c0_78 = arith.constant 0 : index
      %c0_79 = arith.constant 0 : index
      %127 = vector.load %arg20[%c0_78, %c0_79] : memref<128x4xf32, #tpu.memory_space<vmem>>, vector<128x4xf32>
      tpu.vector_store %arg20[%c0_78, %c0_79], %126 {strides = array<i32>} : memref<128x4xf32, #tpu.memory_space<vmem>>, vector<128x4xf32>,
      %cst_80 = arith.constant 0.000000e+00 : f32
      %128 = vector.broadcast %cst_80 : f32 to vector<128x64xf32>
      %c0_81 = arith.constant 0 : index
      %c0_82 = arith.constant 0 : index
      %129 = vector.load %arg21[%c0_81, %c0_82] : memref<128x64xf32, #tpu.memory_space<vmem>>, vector<128x64xf32>
      tpu.vector_store %arg21[%c0_81, %c0_82], %128 {strides = array<i32>} : memref<128x64xf32, #tpu.memory_space<vmem>>, vector<128x64xf32>,
      %c0_83 = arith.constant 0 : index
      %c0_84 = arith.constant 0 : index
      %c0_85 = arith.constant 0 : index
      %130 = vector.load %arg3[%c0_83, %c0_84, %c0_85] : memref<1x64x128xf32, #tpu.memory_space<vmem>>, vector<1x64x128xf32>
      %131 = vector.shape_cast %130 : vector<1x64x128xf32> to vector<64x128xf32>
      %132 = tpu.transpose %131, [1, 0] : vector<64x128xf32> -> vector<128x64xf32>
      %133 = arith.truncf %132 : vector<128x64xf32> to vector<128x64xbf16>
      %c0_86 = arith.constant 0 : index
      %c0_87 = arith.constant 0 : index
      %134 = vector.load %arg5[%c0_86, %c0_87] : memref<64x64xbf16, #tpu.memory_space<vmem>>, vector<64x64xbf16>
      %cst_88 = arith.constant dense<0.000000e+00> : vector<128x64xf32>
      %135 = tpu.matmul %133, %134, %cst_88 {dimension_numbers = #tpu.dot_dimension_numbers<[1], [0], [0], [1], [0, 0, 1, 1], [], []>} : vector<128x64xbf16>, vector<64x64xbf16>, vector<128x64xf32> -> vector<128x64xf32>
      %c0_89 = arith.constant 0 : index
      %c0_90 = arith.constant 0 : index
      %136 = vector.load %arg8[%c0_89, %c0_90] : memref<1x64xf32, #tpu.memory_space<vmem>>, vector<1x64xf32>
      %137 = vector.broadcast %136 : vector<1x64xf32> to vector<128x64xf32>
      %138 = arith.addf %135, %137 : vector<128x64xf32>
      %139 = arith.truncf %138 : vector<128x64xf32> to vector<128x64xbf16>
      %c0_91 = arith.constant 0 : index
      %c0_92 = arith.constant 0 : index
      %140 = vector.load %arg18[%c0_91, %c0_92] : memref<128x64xbf16, #tpu.memory_space<vmem>>, vector<128x64xbf16>
      tpu.vector_store %arg18[%c0_91, %c0_92], %139 {strides = array<i32>} : memref<128x64xbf16, #tpu.memory_space<vmem>>, vector<128x64xbf16>,
    } else {
    }
    %c0 = arith.constant 0 : index
    %c0_1 = arith.constant 0 : index
    %c0_2 = arith.constant 0 : index
    %3 = vector.load %arg4[%c0, %c0_1, %c0_2] : memref<1x64x128xf32, #tpu.memory_space<vmem>>, vector<1x64x128xf32>
    %4 = vector.shape_cast %3 : vector<1x64x128xf32> to vector<64x128xf32>
    %5 = tpu.transpose %4, [1, 0] : vector<64x128xf32> -> vector<128x64xf32>
    %6 = arith.truncf %5 : vector<128x64xf32> to vector<128x64xbf16>
    %c0_3 = arith.constant 0 : index
    %c0_4 = arith.constant 0 : index
    %7 = vector.load %arg6[%c0_3, %c0_4] : memref<64x128xbf16, #tpu.memory_space<vmem>>, vector<64x128xbf16>
    %cst = arith.constant dense<0.000000e+00> : vector<128x128xf32>
    %8 = tpu.matmul %6, %7, %cst {dimension_numbers = #tpu.dot_dimension_numbers<[1], [0], [0], [1], [0, 0, 1, 1], [], []>} : vector<128x64xbf16>, vector<64x128xbf16>, vector<128x128xf32> -> vector<128x128xf32>
    %c0_5 = arith.constant 0 : index
    %c0_6 = arith.constant 0 : index
    %9 = vector.load %arg9[%c0_5, %c0_6] : memref<1x128xf32, #tpu.memory_space<vmem>>, vector<1x128xf32>
    %10 = vector.broadcast %9 : vector<1x128xf32> to vector<128x128xf32>
    %11 = arith.addf %8, %10 : vector<128x128xf32>
    %12 = arith.truncf %11 : vector<128x128xf32> to vector<128x128xbf16>
    %c0_7 = arith.constant 0 : index
    %c0_8 = arith.constant 0 : index
    %13 = vector.load %arg18[%c0_7, %c0_8] : memref<128x64xbf16, #tpu.memory_space<vmem>>, vector<128x16xbf16>
    %14 = vector.extract_strided_slice %12 {offsets = [0, 0], sizes = [128, 16], strides = [1, 1]} : vector<128x128xbf16> to vector<128x16xbf16>
    %15 = vector.extract_strided_slice %12 {offsets = [0, 64], sizes = [128, 16], strides = [1, 1]} : vector<128x128xbf16> to vector<128x16xbf16>
    "tpu.trace_start"() <{level = 10 : i32, message = "qd,kd->qk"}> : () -> ()
    %cst_9 = arith.constant dense<0.000000e+00> : vector<128x128xf32>
    %16 = tpu.matmul %13, %14, %cst_9 {dimension_numbers = #tpu.dot_dimension_numbers<[1], [1], [0], [0], [0, 0, 1, 0], [], []>} : vector<128x16xbf16>, vector<128x16xbf16>, vector<128x128xf32> -> vector<128x128xf32>
    "tpu.trace_stop"() : () -> ()
    %c0_10 = arith.constant 0 : index
    %c0_11 = arith.constant 0 : index
    %17 = vector.load %arg19[%c0_10, %c0_11] : memref<128x4xf32, #tpu.memory_space<vmem>>, vector<128x1xf32>
    %cst_12 = arith.constant dense<0xFF800000> : vector<128xf32>
    %18 = vector.multi_reduction <maximumf>, %16, %cst_12 [1] : vector<128x128xf32> to vector<128xf32>
    %19 = vector.shape_cast %18 : vector<128xf32> to vector<128x1xf32>
    %20 = arith.maximumf %17, %19 : vector<128x1xf32>
    %21 = arith.subf %17, %20 : vector<128x1xf32>
    %22 = math.exp %21 : vector<128x1xf32>
    %23 = vector.broadcast %20 : vector<128x1xf32> to vector<128x128xf32>
    %24 = arith.subf %16, %23 : vector<128x128xf32>
    %25 = math.exp %24 : vector<128x128xf32>
    %c0_13 = arith.constant 0 : index
    %c0_14 = arith.constant 0 : index
    %26 = vector.load %arg20[%c0_13, %c0_14] : memref<128x4xf32, #tpu.memory_space<vmem>>, vector<128x1xf32>
    %27 = arith.mulf %22, %26 : vector<128x1xf32>
    %cst_15 = arith.constant dense<0.000000e+00> : vector<128xf32>
    %28 = vector.multi_reduction <add>, %25, %cst_15 [1] : vector<128x128xf32> to vector<128xf32>
    %29 = vector.shape_cast %28 : vector<128xf32> to vector<128x1xf32>
    %30 = arith.addf %27, %29 : vector<128x1xf32>
    %c0_16 = arith.constant 0 : index
    %c0_17 = arith.constant 0 : index
    %31 = vector.load %arg20[%c0_16, %c0_17] : memref<128x4xf32, #tpu.memory_space<vmem>>, vector<128x1xf32>
    tpu.vector_store %arg20[%c0_16, %c0_17], %30 {strides = array<i32>} : memref<128x4xf32, #tpu.memory_space<vmem>>, vector<128x1xf32>,
    %32 = arith.truncf %25 : vector<128x128xf32> to vector<128x128xbf16>
    %cst_18 = arith.constant dense<0.000000e+00> : vector<128x16xf32>
    %33 = tpu.matmul %32, %15, %cst_18 {dimension_numbers = #tpu.dot_dimension_numbers<[1], [0], [0], [1], [0, 0, 1, 1], [], []>} : vector<128x128xbf16>, vector<128x16xbf16>, vector<128x16xf32> -> vector<128x16xf32>
    %c0_19 = arith.constant 0 : index
    %c0_20 = arith.constant 0 : index
    %34 = vector.load %arg21[%c0_19, %c0_20] : memref<128x64xf32, #tpu.memory_space<vmem>>, vector<128x16xf32>
    %35 = vector.broadcast %22 : vector<128x1xf32> to vector<128x16xf32>
    %36 = arith.mulf %35, %34 : vector<128x16xf32>
    %37 = arith.addf %36, %33 : vector<128x16xf32>
    %c0_21 = arith.constant 0 : index
    %c0_22 = arith.constant 0 : index
    %38 = vector.load %arg21[%c0_21, %c0_22] : memref<128x64xf32, #tpu.memory_space<vmem>>, vector<128x16xf32>
    tpu.vector_store %arg21[%c0_21, %c0_22], %37 {strides = array<i32>} : memref<128x64xf32, #tpu.memory_space<vmem>>, vector<128x16xf32>,
    %c0_23 = arith.constant 0 : index
    %c0_24 = arith.constant 0 : index
    %39 = vector.load %arg19[%c0_23, %c0_24] : memref<128x4xf32, #tpu.memory_space<vmem>>, vector<128x1xf32>
    tpu.vector_store %arg19[%c0_23, %c0_24], %20 {strides = array<i32>} : memref<128x4xf32, #tpu.memory_space<vmem>>, vector<128x1xf32>,
    %c0_25 = arith.constant 0 : index
    %c16 = arith.constant 16 : index
    %40 = vector.load %arg18[%c0_25, %c16] : memref<128x64xbf16, #tpu.memory_space<vmem>>, vector<128x16xbf16>
    %41 = vector.extract_strided_slice %12 {offsets = [0, 16], sizes = [128, 16], strides = [1, 1]} : vector<128x128xbf16> to vector<128x16xbf16>
    %42 = vector.extract_strided_slice %12 {offsets = [0, 80], sizes = [128, 16], strides = [1, 1]} : vector<128x128xbf16> to vector<128x16xbf16>
    "tpu.trace_start"() <{level = 10 : i32, message = "qd,kd->qk"}> : () -> ()
    %cst_26 = arith.constant dense<0.000000e+00> : vector<128x128xf32>
    %43 = tpu.matmul %40, %41, %cst_26 {dimension_numbers = #tpu.dot_dimension_numbers<[1], [1], [0], [0], [0, 0, 1, 0], [], []>} : vector<128x16xbf16>, vector<128x16xbf16>, vector<128x128xf32> -> vector<128x128xf32>
    "tpu.trace_stop"() : () -> ()
    %c0_27 = arith.constant 0 : index
    %c1 = arith.constant 1 : index
    %44 = vector.load %arg19[%c0_27, %c1] : memref<128x4xf32, #tpu.memory_space<vmem>>, vector<128x1xf32>
    %cst_28 = arith.constant dense<0xFF800000> : vector<128xf32>
    %45 = vector.multi_reduction <maximumf>, %43, %cst_28 [1] : vector<128x128xf32> to vector<128xf32>
    %46 = vector.shape_cast %45 : vector<128xf32> to vector<128x1xf32>
    %47 = arith.maximumf %44, %46 : vector<128x1xf32>
    %48 = arith.subf %44, %47 : vector<128x1xf32>
    %49 = math.exp %48 : vector<128x1xf32>
    %50 = vector.broadcast %47 : vector<128x1xf32> to vector<128x128xf32>
    %51 = arith.subf %43, %50 : vector<128x128xf32>
    %52 = math.exp %51 : vector<128x128xf32>
    %c0_29 = arith.constant 0 : index
    %c1_30 = arith.constant 1 : index
    %53 = vector.load %arg20[%c0_29, %c1_30] : memref<128x4xf32, #tpu.memory_space<vmem>>, vector<128x1xf32>
    %54 = arith.mulf %49, %53 : vector<128x1xf32>
    %cst_31 = arith.constant dense<0.000000e+00> : vector<128xf32>
    %55 = vector.multi_reduction <add>, %52, %cst_31 [1] : vector<128x128xf32> to vector<128xf32>
    %56 = vector.shape_cast %55 : vector<128xf32> to vector<128x1xf32>
    %57 = arith.addf %54, %56 : vector<128x1xf32>
    %c0_32 = arith.constant 0 : index
    %c1_33 = arith.constant 1 : index
    %58 = vector.load %arg20[%c0_32, %c1_33] : memref<128x4xf32, #tpu.memory_space<vmem>>, vector<128x1xf32>
    tpu.vector_store %arg20[%c0_32, %c1_33], %57 {strides = array<i32>} : memref<128x4xf32, #tpu.memory_space<vmem>>, vector<128x1xf32>,
    %59 = arith.truncf %52 : vector<128x128xf32> to vector<128x128xbf16>
    %cst_34 = arith.constant dense<0.000000e+00> : vector<128x16xf32>
    %60 = tpu.matmul %59, %42, %cst_34 {dimension_numbers = #tpu.dot_dimension_numbers<[1], [0], [0], [1], [0, 0, 1, 1], [], []>} : vector<128x128xbf16>, vector<128x16xbf16>, vector<128x16xf32> -> vector<128x16xf32>
    %c0_35 = arith.constant 0 : index
    %c16_36 = arith.constant 16 : index
    %61 = vector.load %arg21[%c0_35, %c16_36] : memref<128x64xf32, #tpu.memory_space<vmem>>, vector<128x16xf32>
    %62 = vector.broadcast %49 : vector<128x1xf32> to vector<128x16xf32>
    %63 = arith.mulf %62, %61 : vector<128x16xf32>
    %64 = arith.addf %63, %60 : vector<128x16xf32>
    %c0_37 = arith.constant 0 : index
    %c16_38 = arith.constant 16 : index
    %65 = vector.load %arg21[%c0_37, %c16_38] : memref<128x64xf32, #tpu.memory_space<vmem>>, vector<128x16xf32>
    tpu.vector_store %arg21[%c0_37, %c16_38], %64 {strides = array<i32>} : memref<128x64xf32, #tpu.memory_space<vmem>>, vector<128x16xf32>,
    %c0_39 = arith.constant 0 : index
    %c1_40 = arith.constant 1 : index
    %66 = vector.load %arg19[%c0_39, %c1_40] : memref<128x4xf32, #tpu.memory_space<vmem>>, vector<128x1xf32>
    tpu.vector_store %arg19[%c0_39, %c1_40], %47 {strides = array<i32>} : memref<128x4xf32, #tpu.memory_space<vmem>>, vector<128x1xf32>,
    %c0_41 = arith.constant 0 : index
    %c32 = arith.constant 32 : index
    %67 = vector.load %arg18[%c0_41, %c32] : memref<128x64xbf16, #tpu.memory_space<vmem>>, vector<128x16xbf16>
    %68 = vector.extract_strided_slice %12 {offsets = [0, 32], sizes = [128, 16], strides = [1, 1]} : vector<128x128xbf16> to vector<128x16xbf16>
    %69 = vector.extract_strided_slice %12 {offsets = [0, 96], sizes = [128, 16], strides = [1, 1]} : vector<128x128xbf16> to vector<128x16xbf16>
    "tpu.trace_start"() <{level = 10 : i32, message = "qd,kd->qk"}> : () -> ()
    %cst_42 = arith.constant dense<0.000000e+00> : vector<128x128xf32>
    %70 = tpu.matmul %67, %68, %cst_42 {dimension_numbers = #tpu.dot_dimension_numbers<[1], [1], [0], [0], [0, 0, 1, 0], [], []>} : vector<128x16xbf16>, vector<128x16xbf16>, vector<128x128xf32> -> vector<128x128xf32>
    "tpu.trace_stop"() : () -> ()
    %c0_43 = arith.constant 0 : index
    %c2 = arith.constant 2 : index
    %71 = vector.load %arg19[%c0_43, %c2] : memref<128x4xf32, #tpu.memory_space<vmem>>, vector<128x1xf32>
    %cst_44 = arith.constant dense<0xFF800000> : vector<128xf32>
    %72 = vector.multi_reduction <maximumf>, %70, %cst_44 [1] : vector<128x128xf32> to vector<128xf32>
    %73 = vector.shape_cast %72 : vector<128xf32> to vector<128x1xf32>
    %74 = arith.maximumf %71, %73 : vector<128x1xf32>
    %75 = arith.subf %71, %74 : vector<128x1xf32>
    %76 = math.exp %75 : vector<128x1xf32>
    %77 = vector.broadcast %74 : vector<128x1xf32> to vector<128x128xf32>
    %78 = arith.subf %70, %77 : vector<128x128xf32>
    %79 = math.exp %78 : vector<128x128xf32>
    %c0_45 = arith.constant 0 : index
    %c2_46 = arith.constant 2 : index
    %80 = vector.load %arg20[%c0_45, %c2_46] : memref<128x4xf32, #tpu.memory_space<vmem>>, vector<128x1xf32>
    %81 = arith.mulf %76, %80 : vector<128x1xf32>
    %cst_47 = arith.constant dense<0.000000e+00> : vector<128xf32>
    %82 = vector.multi_reduction <add>, %79, %cst_47 [1] : vector<128x128xf32> to vector<128xf32>
    %83 = vector.shape_cast %82 : vector<128xf32> to vector<128x1xf32>
    %84 = arith.addf %81, %83 : vector<128x1xf32>
    %c0_48 = arith.constant 0 : index
    %c2_49 = arith.constant 2 : index
    %85 = vector.load %arg20[%c0_48, %c2_49] : memref<128x4xf32, #tpu.memory_space<vmem>>, vector<128x1xf32>
    tpu.vector_store %arg20[%c0_48, %c2_49], %84 {strides = array<i32>} : memref<128x4xf32, #tpu.memory_space<vmem>>, vector<128x1xf32>,
    %86 = arith.truncf %79 : vector<128x128xf32> to vector<128x128xbf16>
    %cst_50 = arith.constant dense<0.000000e+00> : vector<128x16xf32>
    %87 = tpu.matmul %86, %69, %cst_50 {dimension_numbers = #tpu.dot_dimension_numbers<[1], [0], [0], [1], [0, 0, 1, 1], [], []>} : vector<128x128xbf16>, vector<128x16xbf16>, vector<128x16xf32> -> vector<128x16xf32>
    %c0_51 = arith.constant 0 : index
    %c32_52 = arith.constant 32 : index
    %88 = vector.load %arg21[%c0_51, %c32_52] : memref<128x64xf32, #tpu.memory_space<vmem>>, vector<128x16xf32>
    %89 = vector.broadcast %76 : vector<128x1xf32> to vector<128x16xf32>
    %90 = arith.mulf %89, %88 : vector<128x16xf32>
    %91 = arith.addf %90, %87 : vector<128x16xf32>
    %c0_53 = arith.constant 0 : index
    %c32_54 = arith.constant 32 : index
    %92 = vector.load %arg21[%c0_53, %c32_54] : memref<128x64xf32, #tpu.memory_space<vmem>>, vector<128x16xf32>
    tpu.vector_store %arg21[%c0_53, %c32_54], %91 {strides = array<i32>} : memref<128x64xf32, #tpu.memory_space<vmem>>, vector<128x16xf32>,
    %c0_55 = arith.constant 0 : index
    %c2_56 = arith.constant 2 : index
    %93 = vector.load %arg19[%c0_55, %c2_56] : memref<128x4xf32, #tpu.memory_space<vmem>>, vector<128x1xf32>
    tpu.vector_store %arg19[%c0_55, %c2_56], %74 {strides = array<i32>} : memref<128x4xf32, #tpu.memory_space<vmem>>, vector<128x1xf32>,
    %c0_57 = arith.constant 0 : index
    %c48 = arith.constant 48 : index
    %94 = vector.load %arg18[%c0_57, %c48] : memref<128x64xbf16, #tpu.memory_space<vmem>>, vector<128x16xbf16>
    %95 = vector.extract_strided_slice %12 {offsets = [0, 48], sizes = [128, 16], strides = [1, 1]} : vector<128x128xbf16> to vector<128x16xbf16>
    %96 = vector.extract_strided_slice %12 {offsets = [0, 112], sizes = [128, 16], strides = [1, 1]} : vector<128x128xbf16> to vector<128x16xbf16>
    "tpu.trace_start"() <{level = 10 : i32, message = "qd,kd->qk"}> : () -> ()
    %cst_58 = arith.constant dense<0.000000e+00> : vector<128x128xf32>
    %97 = tpu.matmul %94, %95, %cst_58 {dimension_numbers = #tpu.dot_dimension_numbers<[1], [1], [0], [0], [0, 0, 1, 0], [], []>} : vector<128x16xbf16>, vector<128x16xbf16>, vector<128x128xf32> -> vector<128x128xf32>
    "tpu.trace_stop"() : () -> ()
    %c0_59 = arith.constant 0 : index
    %c3 = arith.constant 3 : index
    %98 = vector.load %arg19[%c0_59, %c3] : memref<128x4xf32, #tpu.memory_space<vmem>>, vector<128x1xf32>
    %cst_60 = arith.constant dense<0xFF800000> : vector<128xf32>
    %99 = vector.multi_reduction <maximumf>, %97, %cst_60 [1] : vector<128x128xf32> to vector<128xf32>
    %100 = vector.shape_cast %99 : vector<128xf32> to vector<128x1xf32>
    %101 = arith.maximumf %98, %100 : vector<128x1xf32>
    %102 = arith.subf %98, %101 : vector<128x1xf32>
    %103 = math.exp %102 : vector<128x1xf32>
    %104 = vector.broadcast %101 : vector<128x1xf32> to vector<128x128xf32>
    %105 = arith.subf %97, %104 : vector<128x128xf32>
    %106 = math.exp %105 : vector<128x128xf32>
    %c0_61 = arith.constant 0 : index
    %c3_62 = arith.constant 3 : index
    %107 = vector.load %arg20[%c0_61, %c3_62] : memref<128x4xf32, #tpu.memory_space<vmem>>, vector<128x1xf32>
    %108 = arith.mulf %103, %107 : vector<128x1xf32>
    %cst_63 = arith.constant dense<0.000000e+00> : vector<128xf32>
    %109 = vector.multi_reduction <add>, %106, %cst_63 [1] : vector<128x128xf32> to vector<128xf32>
    %110 = vector.shape_cast %109 : vector<128xf32> to vector<128x1xf32>
    %111 = arith.addf %108, %110 : vector<128x1xf32>
    %c0_64 = arith.constant 0 : index
    %c3_65 = arith.constant 3 : index
    %112 = vector.load %arg20[%c0_64, %c3_65] : memref<128x4xf32, #tpu.memory_space<vmem>>, vector<128x1xf32>
    tpu.vector_store %arg20[%c0_64, %c3_65], %111 {strides = array<i32>} : memref<128x4xf32, #tpu.memory_space<vmem>>, vector<128x1xf32>,
    %113 = arith.truncf %106 : vector<128x128xf32> to vector<128x128xbf16>
    %cst_66 = arith.constant dense<0.000000e+00> : vector<128x16xf32>
    %114 = tpu.matmul %113, %96, %cst_66 {dimension_numbers = #tpu.dot_dimension_numbers<[1], [0], [0], [1], [0, 0, 1, 1], [], []>} : vector<128x128xbf16>, vector<128x16xbf16>, vector<128x16xf32> -> vector<128x16xf32>
    %c0_67 = arith.constant 0 : index
    %c48_68 = arith.constant 48 : index
    %115 = vector.load %arg21[%c0_67, %c48_68] : memref<128x64xf32, #tpu.memory_space<vmem>>, vector<128x16xf32>
    %116 = vector.broadcast %103 : vector<128x1xf32> to vector<128x16xf32>
    %117 = arith.mulf %116, %115 : vector<128x16xf32>
    %118 = arith.addf %117, %114 : vector<128x16xf32>
    %c0_69 = arith.constant 0 : index
    %c48_70 = arith.constant 48 : index
    %119 = vector.load %arg21[%c0_69, %c48_70] : memref<128x64xf32, #tpu.memory_space<vmem>>, vector<128x16xf32>
    tpu.vector_store %arg21[%c0_69, %c48_70], %118 {strides = array<i32>} : memref<128x64xf32, #tpu.memory_space<vmem>>, vector<128x16xf32>,
    %c0_71 = arith.constant 0 : index
    %c3_72 = arith.constant 3 : index
    %120 = vector.load %arg19[%c0_71, %c3_72] : memref<128x4xf32, #tpu.memory_space<vmem>>, vector<128x1xf32>
    tpu.vector_store %arg19[%c0_71, %c3_72], %101 {strides = array<i32>} : memref<128x4xf32, #tpu.memory_space<vmem>>, vector<128x1xf32>,
    %c1_i32 = arith.constant 1 : i32
    %121 = arith.cmpi eq, %arg2, %c1_i32 : i32
    %122 = arith.extui %121 : i1 to i32
    %c0_i32_73 = arith.constant 0 : i32
    %123 = arith.cmpi ne, %122, %c0_i32_73 : i32
    scf.if %123 {
      %c0_74 = arith.constant 0 : index
      %c0_75 = arith.constant 0 : index
      %124 = vector.load %arg21[%c0_74, %c0_75] : memref<128x64xf32, #tpu.memory_space<vmem>>, vector<128x16xf32>
      %c0_76 = arith.constant 0 : index
      %c0_77 = arith.constant 0 : index
      %125 = vector.load %arg20[%c0_76, %c0_77] : memref<128x4xf32, #tpu.memory_space<vmem>>, vector<128x1xf32>
      %126 = tpu.reciprocal %125 {approx = true} : vector<128x1xf32> -> vector<128x1xf32>
      %127 = vector.broadcast %126 : vector<128x1xf32> to vector<128x16xf32>
      %128 = arith.mulf %124, %127 : vector<128x16xf32>
      %c0_78 = arith.constant 0 : index
      %c0_79 = arith.constant 0 : index
      %129 = vector.load %arg21[%c0_78, %c0_79] : memref<128x64xf32, #tpu.memory_space<vmem>>, vector<128x16xf32>
      tpu.vector_store %arg21[%c0_78, %c0_79], %128 {strides = array<i32>} : memref<128x64xf32, #tpu.memory_space<vmem>>, vector<128x16xf32>,
      %c0_80 = arith.constant 0 : index
      %c16_81 = arith.constant 16 : index
      %130 = vector.load %arg21[%c0_80, %c16_81] : memref<128x64xf32, #tpu.memory_space<vmem>>, vector<128x16xf32>
      %c0_82 = arith.constant 0 : index
      %c1_83 = arith.constant 1 : index
      %131 = vector.load %arg20[%c0_82, %c1_83] : memref<128x4xf32, #tpu.memory_space<vmem>>, vector<128x1xf32>
      %132 = tpu.reciprocal %131 {approx = true} : vector<128x1xf32> -> vector<128x1xf32>
      %133 = vector.broadcast %132 : vector<128x1xf32> to vector<128x16xf32>
      %134 = arith.mulf %130, %133 : vector<128x16xf32>
      %c0_84 = arith.constant 0 : index
      %c16_85 = arith.constant 16 : index
      %135 = vector.load %arg21[%c0_84, %c16_85] : memref<128x64xf32, #tpu.memory_space<vmem>>, vector<128x16xf32>
      tpu.vector_store %arg21[%c0_84, %c16_85], %134 {strides = array<i32>} : memref<128x64xf32, #tpu.memory_space<vmem>>, vector<128x16xf32>,
      %c0_86 = arith.constant 0 : index
      %c32_87 = arith.constant 32 : index
      %136 = vector.load %arg21[%c0_86, %c32_87] : memref<128x64xf32, #tpu.memory_space<vmem>>, vector<128x16xf32>
      %c0_88 = arith.constant 0 : index
      %c2_89 = arith.constant 2 : index
      %137 = vector.load %arg20[%c0_88, %c2_89] : memref<128x4xf32, #tpu.memory_space<vmem>>, vector<128x1xf32>
      %138 = tpu.reciprocal %137 {approx = true} : vector<128x1xf32> -> vector<128x1xf32>
      %139 = vector.broadcast %138 : vector<128x1xf32> to vector<128x16xf32>
      %140 = arith.mulf %136, %139 : vector<128x16xf32>
      %c0_90 = arith.constant 0 : index
      %c32_91 = arith.constant 32 : index
      %141 = vector.load %arg21[%c0_90, %c32_91] : memref<128x64xf32, #tpu.memory_space<vmem>>, vector<128x16xf32>
      tpu.vector_store %arg21[%c0_90, %c32_91], %140 {strides = array<i32>} : memref<128x64xf32, #tpu.memory_space<vmem>>, vector<128x16xf32>,
      %c0_92 = arith.constant 0 : index
      %c48_93 = arith.constant 48 : index
      %142 = vector.load %arg21[%c0_92, %c48_93] : memref<128x64xf32, #tpu.memory_space<vmem>>, vector<128x16xf32>
      %c0_94 = arith.constant 0 : index
      %c3_95 = arith.constant 3 : index
      %143 = vector.load %arg20[%c0_94, %c3_95] : memref<128x4xf32, #tpu.memory_space<vmem>>, vector<128x1xf32>
      %144 = tpu.reciprocal %143 {approx = true} : vector<128x1xf32> -> vector<128x1xf32>
      %145 = vector.broadcast %144 : vector<128x1xf32> to vector<128x16xf32>
      %146 = arith.mulf %142, %145 : vector<128x16xf32>
      %c0_96 = arith.constant 0 : index
      %c48_97 = arith.constant 48 : index
      %147 = vector.load %arg21[%c0_96, %c48_97] : memref<128x64xf32, #tpu.memory_space<vmem>>, vector<128x16xf32>
      tpu.vector_store %arg21[%c0_96, %c48_97], %146 {strides = array<i32>} : memref<128x64xf32, #tpu.memory_space<vmem>>, vector<128x16xf32>,
      %c0_98 = arith.constant 0 : index
      %c0_99 = arith.constant 0 : index
      %148 = vector.load %arg21[%c0_98, %c0_99] : memref<128x64xf32, #tpu.memory_space<vmem>>, vector<128x64xf32>
      %149 = arith.truncf %148 : vector<128x64xf32> to vector<128x64xbf16>
      %c0_100 = arith.constant 0 : index
      %c0_101 = arith.constant 0 : index
      %150 = vector.load %arg7[%c0_100, %c0_101] : memref<64x64xbf16, #tpu.memory_space<vmem>>, vector<64x64xbf16>
      %cst_102 = arith.constant dense<0.000000e+00> : vector<128x64xf32>
      %151 = tpu.matmul %149, %150, %cst_102 {dimension_numbers = #tpu.dot_dimension_numbers<[1], [0], [0], [1], [0, 0, 1, 1], [], []>} : vector<128x64xbf16>, vector<64x64xbf16>, vector<128x64xf32> -> vector<128x64xf32>
      %c0_103 = arith.constant 0 : index
      %c0_104 = arith.constant 0 : index
      %152 = vector.load %arg10[%c0_103, %c0_104] : memref<1x64xf32, #tpu.memory_space<vmem>>, vector<1x64xf32>
      %153 = vector.broadcast %152 : vector<1x64xf32> to vector<128x64xf32>
      %154 = arith.addf %151, %153 : vector<128x64xf32>
      %155 = arith.truncf %154 : vector<128x64xf32> to vector<128x64xbf16>
      %c0_105 = arith.constant 0 : index
      %c0_106 = arith.constant 0 : index
      %156 = vector.load %arg11[%c0_105, %c0_106] : memref<64x128xbf16, #tpu.memory_space<vmem>>, vector<64x128xbf16>
      %cst_107 = arith.constant dense<0.000000e+00> : vector<128x128xf32>
      %157 = tpu.matmul %155, %156, %cst_107 {dimension_numbers = #tpu.dot_dimension_numbers<[1], [0], [0], [1], [0, 0, 1, 1], [], []>} : vector<128x64xbf16>, vector<64x128xbf16>, vector<128x128xf32> -> vector<128x128xf32>
      %c0_108 = arith.constant 0 : index
      %c0_109 = arith.constant 0 : index
      %158 = vector.load %arg12[%c0_108, %c0_109] : memref<1x128xf32, #tpu.memory_space<vmem>>, vector<1x128xf32>
      %159 = vector.broadcast %158 : vector<1x128xf32> to vector<128x128xf32>
      %160 = arith.addf %157, %159 : vector<128x128xf32>
      %cst_110 = arith.constant 0.000000e+00 : f32
      %161 = vector.broadcast %cst_110 : f32 to vector<128x128xf32>
      %162 = arith.maximumf %160, %161 : vector<128x128xf32>
      %163 = arith.truncf %162 : vector<128x128xf32> to vector<128x128xbf16>
      %c0_111 = arith.constant 0 : index
      %c0_112 = arith.constant 0 : index
      %164 = vector.load %arg13[%c0_111, %c0_112] : memref<128x64xbf16, #tpu.memory_space<vmem>>, vector<128x64xbf16>
      %cst_113 = arith.constant dense<0.000000e+00> : vector<128x64xf32>
      %165 = tpu.matmul %163, %164, %cst_113 {dimension_numbers = #tpu.dot_dimension_numbers<[1], [0], [0], [1], [0, 0, 1, 1], [], []>} : vector<128x128xbf16>, vector<128x64xbf16>, vector<128x64xf32> -> vector<128x64xf32>
      %c0_114 = arith.constant 0 : index
      %c0_115 = arith.constant 0 : index
      %166 = vector.load %arg14[%c0_114, %c0_115] : memref<1x64xf32, #tpu.memory_space<vmem>>, vector<1x64xf32>
      %167 = vector.broadcast %166 : vector<1x64xf32> to vector<128x64xf32>
      %168 = arith.addf %165, %167 : vector<128x64xf32>
      %cst_116 = arith.constant 0.000000e+00 : f32
      %169 = vector.broadcast %cst_116 : f32 to vector<128x64xf32>
      %170 = arith.maximumf %168, %169 : vector<128x64xf32>
      %cst_117 = arith.constant dense<0.000000e+00> : vector<128xf32>
      %171 = vector.multi_reduction <add>, %170, %cst_117 [1] : vector<128x64xf32> to vector<128xf32>
      %172 = vector.shape_cast %171 : vector<128xf32> to vector<128x1xf32>
      %cst_118 = arith.constant 6.400000e+01 : f32
      %173 = vector.broadcast %cst_118 : f32 to vector<128x1xf32>
      %174 = arith.divf %172, %173 : vector<128x1xf32>
      %175 = vector.broadcast %174 : vector<128x1xf32> to vector<128x64xf32>
      %176 = arith.subf %170, %175 : vector<128x64xf32>
      %177 = arith.mulf %176, %176 : vector<128x64xf32>
      %cst_119 = arith.constant dense<0.000000e+00> : vector<128xf32>
      %178 = vector.multi_reduction <add>, %177, %cst_119 [1] : vector<128x64xf32> to vector<128xf32>
      %179 = vector.shape_cast %178 : vector<128xf32> to vector<128x1xf32>
      %cst_120 = arith.constant 6.400000e+01 : f32
      %180 = vector.broadcast %cst_120 : f32 to vector<128x1xf32>
      %181 = arith.divf %179, %180 : vector<128x1xf32>
      %cst_121 = arith.constant 9.99999974E-6 : f32
      %182 = vector.broadcast %cst_121 : f32 to vector<128x1xf32>
      %183 = arith.addf %181, %182 : vector<128x1xf32>
      %184 = math.rsqrt %183 : vector<128x1xf32>
      %185 = vector.broadcast %184 : vector<128x1xf32> to vector<128x64xf32>
      %186 = arith.mulf %176, %185 : vector<128x64xf32>
      %c0_122 = arith.constant 0 : index
      %c0_123 = arith.constant 0 : index
      %187 = vector.load %arg15[%c0_122, %c0_123] : memref<1x64xf32, #tpu.memory_space<vmem>>, vector<1x64xf32>
      %188 = vector.broadcast %187 : vector<1x64xf32> to vector<128x64xf32>
      %189 = arith.mulf %186, %188 : vector<128x64xf32>
      %c0_124 = arith.constant 0 : index
      %c0_125 = arith.constant 0 : index
      %190 = vector.load %arg16[%c0_124, %c0_125] : memref<1x64xf32, #tpu.memory_space<vmem>>, vector<1x64xf32>
      %191 = vector.broadcast %190 : vector<1x64xf32> to vector<128x64xf32>
      %192 = arith.addf %189, %191 : vector<128x64xf32>
      %193 = tpu.transpose %192, [1, 0] : vector<128x64xf32> -> vector<64x128xf32>
      %c0_126 = arith.constant 0 : index
      %c0_127 = arith.constant 0 : index
      %c0_128 = arith.constant 0 : index
      %194 = vector.load %arg17[%c0_126, %c0_127, %c0_128] : memref<1x64x128xf32, #tpu.memory_space<vmem>>, vector<1x64x128xf32>
      %195 = vector.shape_cast %194 : vector<1x64x128xf32> to vector<64x128xf32>
      %196 = vector.shape_cast %193 : vector<64x128xf32> to vector<1x64x128xf32>
      tpu.vector_store %arg17[%c0_126, %c0_127, %c0_128], %196 {strides = array<i32>} : memref<1x64x128xf32, #tpu.memory_space<vmem>>, vector<1x64x128xf32>,
    } else {
    }
    return
  }
  func.func @transform_0(%arg0: i32, %arg1: i32, %arg2: i32) -> (i32, i32, i32) {
    %c0_i32 = arith.constant 0 : i32
    %c0_i32_0 = arith.constant 0 : i32
    return %arg0, %c0_i32, %arg1 : i32, i32, i32
  }
  func.func @transform_1(%arg0: i32, %arg1: i32, %arg2: i32) -> (i32, i32, i32) {
    %c0_i32 = arith.constant 0 : i32
    %c0_i32_0 = arith.constant 0 : i32
    return %arg0, %c0_i32, %arg2 : i32, i32, i32
  }
  func.func @transform_2(%arg0: i32, %arg1: i32, %arg2: i32) -> (i32, i32) {
    %c0_i32 = arith.constant 0 : i32
    %c0_i32_0 = arith.constant 0 : i32
    %c0_i32_1 = arith.constant 0 : i32
    return %c0_i32, %c0_i32_0 : i32, i32
  }
  func.func @transform_3(%arg0: i32, %arg1: i32, %arg2: i32) -> (i32, i32) {
    %c0_i32 = arith.constant 0 : i32
    %c0_i32_0 = arith.constant 0 : i32
    %c0_i32_1 = arith.constant 0 : i32
    return %c0_i32, %c0_i32_0 : i32, i32
  }
  func.func @transform_4(%arg0: i32, %arg1: i32, %arg2: i32) -> (i32, i32) {
    %c0_i32 = arith.constant 0 : i32
    %c0_i32_0 = arith.constant 0 : i32
    %c0_i32_1 = arith.constant 0 : i32
    return %c0_i32, %c0_i32_0 : i32, i32
  }
  func.func @transform_5(%arg0: i32, %arg1: i32, %arg2: i32) -> (i32, i32) {
    %c0_i32 = arith.constant 0 : i32
    %c0_i32_0 = arith.constant 0 : i32
    %c0_i32_1 = arith.constant 0 : i32
    return %c0_i32, %c0_i32_0 : i32, i32
  }
  func.func @transform_6(%arg0: i32, %arg1: i32, %arg2: i32) -> (i32, i32) {
    %c0_i32 = arith.constant 0 : i32
    %c0_i32_0 = arith.constant 0 : i32
    %c0_i32_1 = arith.constant 0 : i32
    return %c0_i32, %c0_i32_0 : i32, i32
  }
  func.func @transform_7(%arg0: i32, %arg1: i32, %arg2: i32) -> (i32, i32) {
    %c0_i32 = arith.constant 0 : i32
    %c0_i32_0 = arith.constant 0 : i32
    %c0_i32_1 = arith.constant 0 : i32
    return %c0_i32, %c0_i32_0 : i32, i32
  }
  func.func @transform_8(%arg0: i32, %arg1: i32, %arg2: i32) -> (i32, i32) {
    %c0_i32 = arith.constant 0 : i32
    %c0_i32_0 = arith.constant 0 : i32
    %c0_i32_1 = arith.constant 0 : i32
    return %c0_i32, %c0_i32_0 : i32, i32
  }
  func.func @transform_9(%arg0: i32, %arg1: i32, %arg2: i32) -> (i32, i32) {
    %c0_i32 = arith.constant 0 : i32
    %c0_i32_0 = arith.constant 0 : i32
    %c0_i32_1 = arith.constant 0 : i32
    return %c0_i32, %c0_i32_0 : i32, i32
  }
  func.func @transform_10(%arg0: i32, %arg1: i32, %arg2: i32) -> (i32, i32) {
    %c0_i32 = arith.constant 0 : i32
    %c0_i32_0 = arith.constant 0 : i32
    %c0_i32_1 = arith.constant 0 : i32
    return %c0_i32, %c0_i32_0 : i32, i32
  }
  func.func @transform_11(%arg0: i32, %arg1: i32, %arg2: i32) -> (i32, i32) {
    %c0_i32 = arith.constant 0 : i32
    %c0_i32_0 = arith.constant 0 : i32
    %c0_i32_1 = arith.constant 0 : i32
    return %c0_i32, %c0_i32_0 : i32, i32
  }
  func.func @transform_12(%arg0: i32, %arg1: i32, %arg2: i32) -> (i32, i32) {
    %c0_i32 = arith.constant 0 : i32
    %c0_i32_0 = arith.constant 0 : i32
    %c0_i32_1 = arith.constant 0 : i32
    return %c0_i32, %c0_i32_0 : i32, i32
  }
  func.func @transform_13(%arg0: i32, %arg1: i32, %arg2: i32) -> (i32, i32) {
    %c0_i32 = arith.constant 0 : i32
    %c0_i32_0 = arith.constant 0 : i32
    %c0_i32_1 = arith.constant 0 : i32
    return %c0_i32, %c0_i32_0 : i32, i32
  }
  func.func @transform_14(%arg0: i32, %arg1: i32, %arg2: i32) -> (i32, i32, i32) {
    %c0_i32 = arith.constant 0 : i32
    %c0_i32_0 = arith.constant 0 : i32
    return %arg0, %c0_i32, %arg1 : i32, i32, i32
  }
}

</mosaic_0001>

<bundles_post_ra>
// kernel: tpu_custom_call.1
= control target key start
LH: loop header
LB: loop body
LE: loop exit
PB: predicated region body
PF: predicated region fallthrough
CT: control target
= control target key end

     0   :  { %s11156_s0 = inlined_call_operand.hbm [shape: f32[2,64,256], index: 0, kind: input, shape index: {}]   ;;  %s11157_s1 = inlined_call_operand.hbm [shape: f32[2,64,256], index: 1, kind: input, shape index: {}]   ;;  %s11158_s2 = inlined_call_operand.vmem [shape: bf16[64,64], index: 2, kind: input, shape index: {}]   ;;  %s11159_s3 = inlined_call_operand.vmem [shape: bf16[64,128], index: 3, kind: input, shape index: {}]   ;;  %s11160_s4 = inlined_call_operand.vmem [shape: bf16[64,64], index: 4, kind: input, shape index: {}]   ;;  %s11161_s5 = inlined_call_operand.vmem [shape: f32[1,64], index: 5, kind: input, shape index: {}]   ;;  %s11162_s6 = inlined_call_operand.vmem [shape: f32[1,128], index: 6, kind: input, shape index: {}]   ;;  %s11163_s7 = inlined_call_operand.vmem [shape: f32[1,64], index: 7, kind: input, shape index: {}]   ;;  %s11164_s8 = inlined_call_operand.hbm [shape: bf16[64,128], index: 8, kind: input, shape index: {}]   ;;  %s11165_s9 = inlined_call_operand.vmem [shape: f32[1,128], index: 9, kind: input, shape index: {}]   ;;  %s11166_s10 = inlined_call_operand.vmem [shape: bf16[128,64], index: 10, kind: input, shape index: {}]   ;;  %s11167_s11 = inlined_call_operand.vmem [shape: f32[1,64], index: 11, kind: input, shape index: {}]   ;;  %s11168_s12 = inlined_call_operand.vmem [shape: f32[1,64], index: 12, kind: input, shape index: {}]   ;;  %s11169_s13 = inlined_call_operand.vmem [shape: f32[1,64], index: 13, kind: input, shape index: {}]   ;;  %s11170_s14 = inlined_call_operand.hbm [shape: f32[2,64,256], index: 14, kind: output, shape index: {}]  }
   0x1   :  { %11322 = sst [smem:[#allocation131_spill]] %s11156_s0 }
   0x2   :  { %11323 = sst [smem:[#allocation132_spill]] %s11158_s2 }
   0x3   :  { %11324 = sst [smem:[#allocation133_spill]] %s11159_s3 }
   0x4   :  { %11325 = sst [smem:[#allocation134_spill]] %s11160_s4 }
   0x5   :  { %11326 = sst [smem:[#allocation135_spill]] %s11161_s5 }
   0x6   :  { %11327 = sst [smem:[#allocation136_spill]] %s11162_s6 }
   0x7   :  { %11328 = sst [smem:[#allocation137_spill]] %s11163_s7 }
   0x8   :  { %11329 = sst [smem:[#allocation138_spill]] %s11164_s8 }
   0x9   :  { %11330 = sst [smem:[#allocation139_spill]] %s11165_s9 }
   0xa   :  { %11331 = sst [smem:[#allocation140_spill]] %s11166_s10 }
   0xb   :  { %11332 = sst [smem:[#allocation141_spill]] %s11167_s11 }
   0xc   :  { %11333 = sst [smem:[#allocation142_spill]] %s11168_s12 }
   0xd   :  { %11334 = sst [smem:[#allocation143_spill]] %s11169_s13 }
   0xe   :  { %11335 = sst [smem:[#allocation144_spill]] %s11170_s14 }
   0xf   :  { %19 = vsyncpa [#allocation7], 0 }
  0x10   :  { %21 = vsyncpa [#allocation7 + $0x1], 0 }
  0x11   :  { %22 = vsyncpa [#allocation10], 0 }
  0x12   :  { %24 = vsyncpa [#allocation10 + $0x1], 0 }
  0x13   :  { %25 = vsyncpa [#allocation8], 0 }
  0x14   :  { %27 = vsyncpa [#allocation8 + $0x1], 0  ;;  %s7775_s29 = smov 0   ;;  %s7777_s30 = smov 0  }
  0x15   :  { %s7779_s15 = smov 0   ;;  %s7781_s16 = smov 0  }
  0x16   :  { %s7783_s17 = smov 0   ;;  %s7785_s18 = smov 0  }
  0x17   :  { %s7787_s19 = smov 0   ;;  %s7789_s20 = smov 0  }
  0x18   :  { %s7791_s21 = smov 0   ;;  %s7793_s22 = smov 0  }
  0x19   :  { %s7795_s23 = smov 0   ;;  %s7797_s24 = smov 0  }
  0x1a   :  { %s7799_s25 = smov 0  }
  0x1b LB: > { %11336 = sst [smem:[#allocation17_spill]] %s7625_s30  ;;  %s7839_s26 = sadd.s32 4294967295, %s7669_s25   ;;  %s7669_s25 = sphi %s7799_s25, %s33_s25   ;;  %s7665_s24 = sphi %s7797_s24, %s11777_s24   ;;  %s7661_s23 = sphi %s7795_s23, %s11776_s23   ;;  %s7657_s22 = sphi %s7793_s22, %s11775_s22   ;;  %s7653_s21 = sphi %s7791_s21, %s11774_s21   ;;  %s7649_s20 = sphi %s7789_s20, %s11773_s20   ;;  %s7645_s19 = sphi %s7787_s19, %s11772_s19   ;;  %s7641_s18 = sphi %s7785_s18, %s11771_s18   ;;  %s7637_s17 = sphi %s7783_s17, %s11770_s17   ;;  %s7633_s16 = sphi %s7781_s16, %s11769_s16   ;;  %s7629_s15 = sphi %s7779_s15, %s11768_s15   ;;  %s7625_s30 = sphi %s7777_s30, %s11767_s30   ;;  %s7621_s29 = sphi %s7775_s29, %s11763_s29  }
  0x1c   : > { %11337 = sst [smem:[#allocation18_spill]] %s7633_s16  ;;  %s6146_s27 = sadd.s32 4294967294, %s7669_s25  }
  0x1d   : > { %11338 = sst [smem:[#allocation19_spill]] %s7645_s19  ;;  %p11178_p0 = scmp.eq.s32.totalorder %s7669_s25, 0 }
  0x1e   : > { %11339 = sst [smem:[#allocation20_spill]] %s7649_s20  ;;  %p74_p1 = scmp.ne.s32.totalorder %s7637_s17, %s7633_s16 }
  0x1f   : > { %11340 = sst [smem:[#allocation21_spill]] %s7653_s21  ;;  %p11174_p2 = scmp.eq.s32.totalorder %s7839_s26, 0 }
  0x20   : > { %11341 = sst [smem:[#allocation22_spill]] %s7839_s26  ;;  %p96_p3 = scmp.ne.s32.totalorder %s7629_s15, %s7625_s30 }
  0x21   : > { %p102_p4 = scmp.ne.s32.totalorder %s7625_s30, %s7621_s29  ;;  %p7852_p6 = por %p11174_p2, %p74_p1 }
  0x22   : > { %p7858_p7 = por %p96_p3, %p11178_p0  ;;  %p386_p9 = scmp.eq.s32.totalorder %s6146_s27, 7 }
  0x23   : > { %s11342_s28 = scalar_select %p7852_p6, 1, 0 }
  0x24   : > { %p7864_p8 = por %p102_p4, %p11174_p2  ;;  %p6147_p10 = scmp.ge.s32.totalorder %s7669_s25, 1 }
  0x25   : > { %11343 = sst [smem:[#allocation23_spill]] %s11342_s28  ;;  %p393_p11 = scmp.lt.s32.totalorder %s7669_s25, 9 }
  0x26   : > { %s11345_s16 = scalar_select %p7864_p8, 1, 0 }
  0x27   : > { %p7870_p12 = por %p386_p9, %p74_p1  ;;  %p7874_p13 = pnand %p6147_p10, %p393_p11 }
  0x28   : > { %11346 = sst [smem:[#allocation24_spill]] %s11345_s16  ;;  %s7671_s21 = smov [#allocation11]  }
  0x29   : > { %s11347_s29 = scalar_select %p7870_p12, 1, 0 }
  0x2a   : > { %s11349_s20 = scalar_select %p7874_p13, 1, 0 }
  0x2b   : > { %11348 = sst [smem:[#allocation25_spill]] %s11347_s29  ;;  %s423_s13 = sshll.u32 %s7671_s21, 4  ;;  %s424_s13 = int_to_ptr.vmem [resolvable:$true] %s423_s13 }
  0x2c   : > { %p6905_p3 = pneg %p7874_p13  ;;  %p11177_p1 = scmp.lt.s32.totalorder %s7669_s25, 8 }
  0x2d   : > { %s11352_s8 = sld [smem:[#allocation138_spill]] }
  0x2e   : > { %p7882_p4 = pnand %p6905_p3, %p11174_p2  ;;  %p7891_p9 = pnand %p11177_p1, %p7858_p7 }
  0x30   : > { %s11351_s27 = scalar_select %p7891_p9, 1, 0 }
  0x31   : > { %p7437_p11 = pneg %p7882_p4 }
  0x33   : > { %s7435_s21 = scalar_lea.hbm %s11352_s8, 512 }
  0x34   : > { %p7436_p10 = scmp.ne.s32.totalorder %s11352_s8, %s7435_s21  ;;  %p7442_p5 = scmp.lt.u32.totalorder %s7435_s21, %s11352_s8 }
  0x36   : > { %p7438_p3 = pnand %p7437_p11, %p7436_p10 }
  0x38   : > { %p7439_p2 = pneg %p7438_p3 }
  0x3a   : > { %p7444_p7 = pnand %p7442_p5, %p7439_p2 }
  0x3c   : > { %7447 = shalt.err (!%p7444_p7)
}
  0x3d   : > { %s7448_s14 = scalar_lea.vmem %s424_s13, 512  ;;  %p7456_p8 = scmp.lt.s32.totalorder %s424_s13, %s424_s13 }
  0x3e   : > { %p7449_p1 = scmp.ne.s32.totalorder %s424_s13, %s7448_s14  ;;  %p7457_p6 = scmp.lt.s32.totalorder %s7448_s14, %s7448_s14 }
  0x40   : > { %p7451_p0 = pnand %p7449_p1, %p7437_p11  ;;  %p7458_p13 = por %p7457_p6, %p7456_p8 }
  0x42   : > { %p7452_p12 = pneg %p7451_p0 }
  0x44   : > { %p7459_p9 = pnand %p7458_p13, %p7452_p12 }
  0x46   : > { %7462 = shalt.err (!%p7459_p9)
}
  0x47   : > { %s7672_s7 = smov 64   ;;  %s7673_s4 = smov 4  }
  0x48   : > { %6908 = dma.hbm_to_vmem [thread:$0]  (!%p7882_p4), %s11352_s8, 512, %s424_s13, [#allocation10], %s7672_s7, %s7672_s7, %s7673_s4  }
  0x49   : > { %s45_s11 = sadd.s32 1, %s7657_s22  ;;  %s48_s29 = sadd.s32 1, %s7661_s23 }
  0x4a   : > { %p46_p0 = scmp.ge.s32.totalorder %s45_s11, 2  ;;  %s52_s21 = sadd.s32 1, %s7665_s24 }
  0x4b   : > { %s61_s14 = sadd.s32 1, %s7641_s18  ;;  %p68_p2 = scmp.ne.s32.totalorder %s7641_s18, %s7637_s17 }
  0x4c   : > { %s11779_s11 = smov (%p46_p0, %s45_s11), 0  ;;  %s11781_s29 = smov (!%p46_p0, %s48_s29), %s7661_s23 }
  0x4d   : > { %11353 = sst [smem:[#allocation26_spill]] %s11779_s11  ;;  %s85_s12 = ssub.s32 %s7657_s22, %s11779_s11 }
  0x4e   : > { %p50_p5 = scmp.ge.s32.totalorder %s11781_s29, 2  ;;  %s89_s9 = sadd.s32 1, %s7629_s15 }
  0x4f   : > { %p11354_p6 = scmp.eq.s32.totalorder %s7669_s25, 0  ;;  %p11356_p12 = scmp.eq.s32.totalorder %s7839_s26, 7 }
  0x50   : > { %s11783_s29 = smov (%p50_p5, %s11781_s29), 0  ;;  %s11785_s21 = smov (!%p50_p5, %s52_s21), %s7665_s24 }
  0x51   : > { %p7925_p8 = por %p11354_p6, %p68_p2  ;;  %p7931_p13 = por %p11356_p12, %p68_p2 }
  0x52   : > { %11359 = sst [smem:[#allocation28_spill]] %s11783_s29  ;;  %s57_s4 = ssub.s32 %s7661_s23, %s11783_s29 }
  0x53   : > { %s11357_s7 = scalar_select %p7931_p13, 1, 0 }
  0x54   : > { %s452_s10 = sand.u32 1, %s7641_s18   ;;  %p54_p4 = scmp.ge.s32.totalorder %s11785_s21, 2 }
  0x55   : > { %11358 = sst [smem:[#allocation27_spill]] %s11357_s7  ;;  %s6150_s8 = sshll.u32 %s452_s10, 6 }
  0x56   : > { %s11196_s11 = sshll.u32 %s7665_s24, 4  ;;  %s11787_s21 = smov (%p54_p4, %s11785_s21), 0 }
  0x57   : > { %s461_s6 = sadd.s32 %s7661_s23, %s11196_s11  ;;  %s56_s3 = ssub.s32 %s7665_s24, %s11787_s21 }
  0x58   : > { %s6152_s7 = sshll.u32 %s461_s6, 7  ;;  %s58_s5 = sor.u32 %s57_s4, %s56_s3 }
  0x59   : > { %s86_s2 = sor.u32 %s85_s12, %s56_s3  ;;  %p59_p1 = scmp.eq.s32.totalorder %s58_s5, 0 }
  0x5a   : > { %p87_p9 = scmp.eq.s32.totalorder %s86_s2, 0  ;;  %s11360_s0 = sld [smem:[#allocation131_spill]] }
  0x5b   : > { %s456_s30 = scalar_lea.vmem [#allocation6], %s6150_s8  ;;  %p11361_p10 = scmp.lt.s32.totalorder %s7669_s25, 8 }
  0x5c   : > { %s464_s26 = sshll.u32 %s456_s30, 4  ;;  %s7970_s3 = scalar_lea.sflag [#allocation7], %s452_s10  ;;  %s7960_s26 = int_to_ptr.vmem [resolvable:$true] %s464_s26 }
  0x5d   : > { %s7955_s28 = scalar_select %p59_p1, %s7641_s18, %s61_s14  }
  0x5e   : > { %s7958_s11 = scalar_select %p87_p9, %s7629_s15, %s89_s9  }
  0x5f   : > { %p7966_p11 = pnand %p11361_p10, %p7925_p8 }
  0x60   : > { %s7952_s16 = scalar_lea.hbm %s11360_s0, %s6152_s7  ;;  %s7468_s30 = scalar_lea.hbm %s11360_s0, 4096 }
  0x61   : > { %s7463_s5 = scalar_lea.hbm %s7952_s16, 1024  ;;  %p7465_p7 = pneg %p7966_p11 }
  0x62   : > { %p7464_p3 = scmp.ne.s32.totalorder %s7952_s16, %s7463_s5  ;;  %p7469_p5 = scmp.lt.u32.totalorder %s7952_s16, %s11360_s0 }
  0x63   : > { %p7470_p6 = scmp.lt.u32.totalorder %s7468_s30, %s7463_s5  ;;  %p7472_p12 = scmp.lt.u32.totalorder %s7463_s5, %s7952_s16 }
  0x64   : > { %p7466_p0 = pnand %p7465_p7, %p7464_p3 }
  0x65   : > { %p7471_p8 = por %p7470_p6, %p7469_p5 }
  0x66   : > { %p7467_p2 = pneg %p7466_p0 }
  0x67   : > { %p7473_p4 = por %p7472_p12, %p7471_p8 }
  0x69   : > { %p7474_p1 = pnand %p7473_p4, %p7467_p2 }
  0x6b   : > { %7477 = shalt.err (!%p7474_p1)
}
  0x6c   : > { %s7478_s14 = scalar_lea.vmem %s7960_s26, 1024  ;;  %s7674_s12 = smov [#allocation6]  }
  0x6d   : > { %p7479_p9 = scmp.ne.s32.totalorder %s7960_s26, %s7478_s14  ;;  %s7483_s9 = sshll.u32 %s7674_s12, 4  ;;  %s7484_s9 = int_to_ptr.vmem [resolvable:$false] %s7483_s9 }
  0x6e   : > { %s7485_s13 = scalar_lea.vmem %s7484_s9, 2048  ;;  %p7486_p0 = scmp.lt.s32.totalorder %s7960_s26, %s7484_s9 }
  0x6f   : > { %p7481_p10 = pnand %p7479_p9, %p7465_p7  ;;  %p7487_p5 = scmp.lt.s32.totalorder %s7485_s13, %s7478_s14 }
  0x71   : > { %p7482_p3 = pneg %p7481_p10  ;;  %p7488_p6 = por %p7487_p5, %p7486_p0 }
  0x73   : > { %p7489_p8 = pnand %p7488_p6, %p7482_p3 }
  0x75   : > { %7492 = shalt.err (!%p7489_p8)
}
  0x76   : > { %s7675_s7 = smov 256   ;;  %s7676_s4 = smov 128  }
  0x77   : > { %s7677_s10 = smov 8   ;;  %s11363_s5 = sshll.u32 %s7665_s24, 4 }
  0x78   : > { %6912 = dma.hbm_to_vmem [thread:$0]  (!%p7966_p11), %s7952_s16, 1024, %s7960_s26, %s7970_s3, %s7675_s7, %s7676_s4, %s7677_s10  }
  0x79   : > { %s483_s6 = sadd.s32 %s7657_s22, %s11363_s5  ;;  %s474_s8 = sand.u32 1, %s7669_s25  }
  0x7a   : > { %s6155_s30 = sshll.u32 %s483_s6, 7  ;;  %s476_s19 = sand.u32 1, %s7629_s15  }
  0x7b   : > { %s6153_s29 = sshll.u32 %s476_s19, 6  ;;  %s8009_s9 = scalar_lea.hbm %s11157_s1, %s6155_s30 }
  0x7c   : > { %s478_s2 = scalar_lea.vmem [#allocation9], %s6153_s29  ;;  %s8013_s16 = scalar_lea.sflag [#allocation10], %s474_s8 }
  0x7d   : > { %s486_s13 = sshll.u32 %s478_s2, 4  ;;  %s7493_s26 = scalar_lea.hbm %s8009_s9, 1024  ;;  %s8011_s13 = int_to_ptr.vmem [resolvable:$true] %s486_s13 }
  0x7e   : > { %p7494_p11 = scmp.ne.s32.totalorder %s8009_s9, %s7493_s26  ;;  %p11364_p7 = scmp.ne.s32.totalorder %s11351_s27, 0 }
  0x7f   : > { %s7498_s6 = scalar_lea.hbm %s11157_s1, 4096  ;;  %p7499_p1 = scmp.lt.u32.totalorder %s8009_s9, %s11157_s1 }
  0x80   : > { %p7495_p2 = pneg %p11364_p7  ;;  %p7500_p9 = scmp.lt.u32.totalorder %s7498_s6, %s7493_s26 }
  0x81   : > { %p7502_p3 = scmp.lt.u32.totalorder %s7493_s26, %s8009_s9 }
  0x82   : > { %p7496_p12 = pnand %p7495_p2, %p7494_p11  ;;  %p7501_p10 = por %p7500_p9, %p7499_p1 }
  0x84   : > { %p7497_p4 = pneg %p7496_p12  ;;  %p7503_p0 = por %p7502_p3, %p7501_p10 }
  0x86   : > { %p7504_p5 = pnand %p7503_p0, %p7497_p4 }
  0x88   : > { %7507 = shalt.err (!%p7504_p5)
}
  0x89   : > { %s7508_s8 = scalar_lea.vmem %s8011_s13, 1024  ;;  %s7678_s29 = smov [#allocation9]  }
  0x8a   : > { %p7509_p6 = scmp.ne.s32.totalorder %s8011_s13, %s7508_s8  ;;  %s7513_s14 = sshll.u32 %s7678_s29, 4  ;;  %s7514_s14 = int_to_ptr.vmem [resolvable:$false] %s7513_s14 }
  0x8b   : > { %s7515_s12 = scalar_lea.vmem %s7514_s14, 2048  ;;  %p7516_p12 = scmp.lt.s32.totalorder %s8011_s13, %s7514_s14 }
  0x8c   : > { %p7511_p8 = pnand %p7509_p6, %p7495_p2  ;;  %p7517_p1 = scmp.lt.s32.totalorder %s7515_s12, %s7508_s8 }
  0x8e   : > { %p7512_p11 = pneg %p7511_p8  ;;  %p7518_p9 = por %p7517_p1, %p7516_p12 }
  0x90   : > { %p7519_p10 = pnand %p7518_p9, %p7512_p11 }
  0x92   : > { %7522 = shalt.err (!%p7519_p10)
}
  0x93   : > { %6915 = dma.hbm_to_vmem [thread:$0]  (!%p11364_p7), %s8009_s9, 1024, %s8011_s13, %s8013_s16, %s7675_s7, %s7676_s4, %s7677_s10  }
  0x94   : > { %p11365_p2 = scmp.ne.s32.totalorder %s11349_s20, 0 }
  0x96   : > { %498 = sbr.rel (%p11365_p2) target bundleno = 5139 (0x1413), region = 76 }
  0x9d   : > { %s11366_s2 = sld [smem:[#allocation23_spill]]  ;;  %s8047_s26 = sand.u32 1, %s7637_s17  }
  0x9e   : > { %s6157_s3 = sshll.u32 %s8047_s26, 6  ;;  %s501_s5 = scalar_lea.sflag [#allocation7], %s8047_s26 }
  0x9f   : > { %s8051_s6 = scalar_lea.vmem [#allocation6], %s6157_s3 }
  0xa3   : > { %p11367_p4 = scmp.ne.s32.totalorder %s11366_s2, 0 }
  0xa5   : > { %7604 = dma.done.wait (%p11367_p4), %s501_s5, 1024  }
  0xa6   : > { %7606 = vsyncadd (%p11367_p4), %s501_s5, 4294966272  ;;  %s11368_s27 = sld [smem:[#allocation22_spill]]  ;;  %s11369_s7 = sld [smem:[#allocation17_spill]] }
  0xa7   : > { %s11370_s4 = sld [smem:[#allocation24_spill]] }
  0xac   : > { %s509_s20 = sand.u32 1, %s11368_s27   ;;  %s511_s10 = sand.u32 1, %s11369_s7  }
  0xad   : > { %s6158_s9 = sshll.u32 %s511_s10, 6  ;;  %s510_s13 = scalar_lea.sflag [#allocation10], %s509_s20 }
  0xae   : > { %s8059_s16 = scalar_lea.vmem [#allocation9], %s6158_s9  ;;  %p11371_p7 = scmp.ne.s32.totalorder %s11370_s4, 0 }
  0xb0   : > { %7608 = dma.done.wait (%p11371_p7), %s510_s13, 1024  }
  0xb1   : > { %7610 = vsyncadd (%p11371_p7), %s510_s13, 4294966272  ;;  %p11372_p3 = scmp.eq.s32.totalorder %s11368_s27, 0 }
  0xb3   : > { %7612 = dma.done.wait (%p11372_p3), [#allocation10], 512   ;;  %p11373_p0 = pmov %p11372_p3 }
  0xb4   : > { %s8069_s30 = scalar_lea.vmem [#allocation12], %s6157_s3  ;;  %s11374_s19 = sld [smem:[#allocation19_spill]] }
  0xb5   : > { %7614 = vsyncadd (%p11373_p0), [#allocation10], 4294966784 }
  0xba   : > { %p6161_p5 = scmp.ne.s32.totalorder %s11374_s19, 0 }
  0xbb   : > { %v622_v0 = vld [vmem:[%s8051_s6] sm:$0xff] (!%p6161_p5)  ;;  %v623_v1 = vld [vmem:[%s8051_s6 + $0x8] sm:$0xff] (!%p6161_p5)  ;;  %s11375_s14 = sld [smem:[#allocation132_spill]] (!%p6161_p5)  ;;  %v624_v4 = vld [vmem:[%s8051_s6 + $0x10] sm:$0xff] (!%p6161_p5)  ;;  %vm572_vm0 = vcmask (!%p6161_p5), 31744   ;;  %vm605_vm1 = vcmask (!%p6161_p5), 523264  }
  0xbc   : > { %571 = sbr.rel (%p6161_p5) target bundleno = 600 (0x258), region = 92  ;;  %630 = vxpose.xlu0.b32.start [1/8] (short) (!%p6161_p5), %v622_v0, 128  ;;  %v7679_v6 = vmov (!%p6161_p5), -inf   ;;  %v7680_v7 = vmov (!%p6161_p5), 0.0   ;;  %v625_v8 = vld [vmem:[%s8051_s6 + $0x18] sm:$0xff] (!%p6161_p5)  ;;  %v626_v10 = vld [vmem:[%s8051_s6 + $0x20] sm:$0xff] (!%p6161_p5)  ;;  %v627_v11 = vld [vmem:[%s8051_s6 + $0x28] sm:$0xff] (!%p6161_p5) }
  0xbd   : > { %573 = vst.msk [vmem:[#allocation3] sm:$0xff] (!%p6161_p5), %vm572_vm0, %v7679_v6  ;;  %574 = vst.msk [vmem:[#allocation3 + $0x8] sm:$0xff] (!%p6161_p5), %vm572_vm0, %v7679_v6  ;;  %v628_v12 = vld [vmem:[%s8051_s6 + $0x30] sm:$0xff] (!%p6161_p5)  ;;  %v629_v13 = vld [vmem:[%s8051_s6 + $0x38] sm:$0xff] (!%p6161_p5)  ;;  %s11376_s20 = sld [smem:[#allocation135_spill]] (!%p6161_p5) }
  0xbe   : > { %575 = vst.msk [vmem:[#allocation3 + $0x10] sm:$0xff] (!%p6161_p5), %vm572_vm0, %v7679_v6  ;;  %576 = vst.msk [vmem:[#allocation3 + $0x18] sm:$0xff] (!%p6161_p5), %vm572_vm0, %v7679_v6 }
  0xbf   : > { %577 = vst.msk [vmem:[#allocation3 + $0x20] sm:$0xff] (!%p6161_p5), %vm572_vm0, %v7679_v6  ;;  %578 = vst.msk [vmem:[#allocation3 + $0x28] sm:$0xff] (!%p6161_p5), %vm572_vm0, %v7679_v6 }
  0xc0   : > { %631 = vxpose.xlu0.b32.cont [2/8] (short) (!%p6161_p5), %v623_v1, 128  ;;  %579 = vst.msk [vmem:[#allocation3 + $0x30] sm:$0xff] (!%p6161_p5), %vm572_vm0, %v7679_v6  ;;  %580 = vst.msk [vmem:[#allocation3 + $0x38] sm:$0xff] (!%p6161_p5), %vm572_vm0, %v7679_v6 }
  0xc1   : > { %v7055_v2 = vld [vmem:[%s11375_s14] sm:$0xff] (!%p6161_p5)   ;;  %v8080_v3 = vld [vmem:[%s11375_s14 + $0x8] sm:$0xff] (!%p6161_p5)   ;;  %v8087_v5 = vld [vmem:[%s11375_s14 + $0x10] sm:$0xff] (!%p6161_p5)   ;;  %581 = vst.msk [vmem:[#allocation3 + $0x40] sm:$0xff] (!%p6161_p5), %vm572_vm0, %v7679_v6 }
  0xc2   : > { %6455 = vmatprep.subr.bf16.mxu0 (!%p6161_p5), %v7055_v2  ;;  %6839 = vmatprep.subr.bf16.mxu1 (!%p6161_p5), %v7055_v2  ;;  %582 = vst.msk [vmem:[#allocation3 + $0x48] sm:$0xff] (!%p6161_p5), %vm572_vm0, %v7679_v6  ;;  %583 = vst.msk [vmem:[#allocation3 + $0x50] sm:$0xff] (!%p6161_p5), %vm572_vm0, %v7679_v6  ;;  %v7058_v9 = vld [vmem:[%s11375_s14 + $0x18] sm:$0xff] (!%p6161_p5)  }
  0xc3   : > { %6456 = vmatpush3.bf16.msra.mxu0 %v7055_v2  ;;  %584 = vst.msk [vmem:[#allocation3 + $0x58] sm:$0xff] %vm572_vm0, %v7679_v6  ;;  %585 = vst.msk [vmem:[#allocation3 + $0x60] sm:$0xff] %vm572_vm0, %v7679_v6  ;;  %6843 = vmatpush3.bf16.msra.mxu1 %v7055_v2  ;;  %v6162_v39 = vld [vmem:[%s11376_s20] ss:$0 sm:$0xff] }
  0xc4   : > { %6457 = vmatprep.subr.bf16.mxu0 %v8080_v3  ;;  %586 = vst.msk [vmem:[#allocation3 + $0x68] sm:$0xff] %vm572_vm0, %v7679_v6  ;;  %587 = vst.msk [vmem:[#allocation3 + $0x70] sm:$0xff] %vm572_vm0, %v7679_v6  ;;  %6840 = vmatprep.subr.bf16.mxu1 %v8080_v3 }
  0xc5   : > { %588 = vst.msk [vmem:[#allocation3 + $0x78] sm:$0xff] %vm572_vm0, %v7679_v6  ;;  %589 = vst.msk [vmem:[#allocation4] sm:$0xff] %vm572_vm0, %v7680_v7  ;;  %632 = vxpose.xlu0.b32.cont [3/8] (short) %v624_v4, 128 }
  0xc6   : > { %590 = vst.msk [vmem:[#allocation4 + $0x8] sm:$0xff] %vm572_vm0, %v7680_v7  ;;  %591 = vst.msk [vmem:[#allocation4 + $0x10] sm:$0xff] %vm572_vm0, %v7680_v7 }
  0xc7   : > { %592 = vst.msk [vmem:[#allocation4 + $0x18] sm:$0xff] %vm572_vm0, %v7680_v7  ;;  %593 = vst.msk [vmem:[#allocation4 + $0x20] sm:$0xff] %vm572_vm0, %v7680_v7  ;;  %6458 = vmatpush3.bf16.msra.mxu0 %v8080_v3  ;;  %6844 = vmatpush3.bf16.msra.mxu1 %v8080_v3 }
  0xc8   : > { %594 = vst.msk [vmem:[#allocation4 + $0x28] sm:$0xff] %vm572_vm0, %v7680_v7  ;;  %595 = vst.msk [vmem:[#allocation4 + $0x30] sm:$0xff] %vm572_vm0, %v7680_v7  ;;  %6459 = vmatprep.subr.bf16.mxu0 %v8087_v5  ;;  %6841 = vmatprep.subr.bf16.mxu1 %v8087_v5 }
  0xc9   : > { %596 = vst.msk [vmem:[#allocation4 + $0x38] sm:$0xff] %vm572_vm0, %v7680_v7  ;;  %597 = vst.msk [vmem:[#allocation4 + $0x40] sm:$0xff] %vm572_vm0, %v7680_v7  ;;  %633 = vxpose.xlu0.b32.cont [4/8] (short) %v625_v8, 128 }
  0xca   : > { %598 = vst.msk [vmem:[#allocation4 + $0x48] sm:$0xff] %vm572_vm0, %v7680_v7  ;;  %599 = vst.msk [vmem:[#allocation4 + $0x50] sm:$0xff] %vm572_vm0, %v7680_v7 }
  0xcb   : > { %600 = vst.msk [vmem:[#allocation4 + $0x58] sm:$0xff] %vm572_vm0, %v7680_v7  ;;  %601 = vst.msk [vmem:[#allocation4 + $0x60] sm:$0xff] %vm572_vm0, %v7680_v7  ;;  %6460 = vmatpush3.bf16.msra.mxu0 %v8087_v5  ;;  %6845 = vmatpush3.bf16.msra.mxu1 %v8087_v5 }
  0xcc   : > { %602 = vst.msk [vmem:[#allocation4 + $0x68] sm:$0xff] %vm572_vm0, %v7680_v7  ;;  %603 = vst.msk [vmem:[#allocation4 + $0x70] sm:$0xff] %vm572_vm0, %v7680_v7  ;;  %6461 = vmatprep.subr.bf16.mxu0 %v7058_v9  ;;  %6842 = vmatprep.subr.bf16.mxu1 %v7058_v9 }
  0xcd   : > { %604 = vst.msk [vmem:[#allocation4 + $0x78] sm:$0xff] %vm572_vm0, %v7680_v7  ;;  %634 = vxpose.xlu0.b32.cont [5/8] (short) %v626_v10, 128 }
  0xce   : > { %606 = vst.msk [vmem:[#allocation5] sm:$0xff] %vm605_vm1, %v7680_v7  ;;  %607 = vst.msk [vmem:[#allocation5 + $0x8] sm:$0xff] %vm605_vm1, %v7680_v7 }
  0xcf   : > { %608 = vst.msk [vmem:[#allocation5 + $0x10] sm:$0xff] %vm605_vm1, %v7680_v7  ;;  %609 = vst.msk [vmem:[#allocation5 + $0x18] sm:$0xff] %vm605_vm1, %v7680_v7  ;;  %6462 = vmatpush3.bf16.msra.mxu0 %v7058_v9  ;;  %6846 = vmatpush3.bf16.msra.mxu1 %v7058_v9 }
  0xd0   : > { %610 = vst.msk [vmem:[#allocation5 + $0x20] sm:$0xff] %vm605_vm1, %v7680_v7  ;;  %611 = vst.msk [vmem:[#allocation5 + $0x28] sm:$0xff] %vm605_vm1, %v7680_v7 }
  0xd1   : > { %612 = vst.msk [vmem:[#allocation5 + $0x30] sm:$0xff] %vm605_vm1, %v7680_v7  ;;  %613 = vst.msk [vmem:[#allocation5 + $0x38] sm:$0xff] %vm605_vm1, %v7680_v7  ;;  %635 = vxpose.xlu0.b32.cont [6/8] (short) %v627_v11, 128 }
  0xd2   : > { %614 = vst.msk [vmem:[#allocation5 + $0x40] sm:$0xff] %vm605_vm1, %v7680_v7  ;;  %615 = vst.msk [vmem:[#allocation5 + $0x48] sm:$0xff] %vm605_vm1, %v7680_v7 }
  0xd3   : > { %616 = vst.msk [vmem:[#allocation5 + $0x50] sm:$0xff] %vm605_vm1, %v7680_v7  ;;  %617 = vst.msk [vmem:[#allocation5 + $0x58] sm:$0xff] %vm605_vm1, %v7680_v7 }
  0xd4   : > { %618 = vst.msk [vmem:[#allocation5 + $0x60] sm:$0xff] %vm605_vm1, %v7680_v7  ;;  %619 = vst.msk [vmem:[#allocation5 + $0x68] sm:$0xff] %vm605_vm1, %v7680_v7 }
  0xd5   : > { %620 = vst.msk [vmem:[#allocation5 + $0x70] sm:$0xff] %vm605_vm1, %v7680_v7  ;;  %621 = vst.msk [vmem:[#allocation5 + $0x78] sm:$0xff] %vm605_vm1, %v7680_v7  ;;  %636 = vxpose.xlu0.b32.cont [7/8] (short) %v628_v12, 128 }
  0xd9   : > { %637 = vxpose.xlu0.b32.end [8/8] (short) %v629_v13, 128 }
 0x13d   : > { %v646_v14 = vpop.trf.xlu0 }
 0x141   : > { %v647_v15 = vpop.trf.xlu0 }
 0x142   : > { %v662_v16 = vpack.c.bf16 %v647_v15, %v646_v14 }
 0x144   : > { %6463 = vmatprep.mubr.msk.bf16.mxu0 %vm605_vm1, %v662_v16 }
 0x145   : > { %v648_v17 = vpop.trf.xlu0 }
 0x149   : > { %v649_v18 = vpop.trf.xlu0 }
 0x14a   : > { %v663_v19 = vpack.c.bf16 %v649_v18, %v648_v17 }
 0x14c   : > { %6464 = vmatmul.mubr.msk.bf16.vlgmr.msra.gmra.mrb[0].mxu0 %vm605_vm1, %v663_v19 }
 0x14d   : > { %v650_v20 = vpop.trf.xlu0 }
 0x151   : > { %v651_v21 = vpop.trf.xlu0 }
 0x152   : > { %v664_v22 = vpack.c.bf16 %v651_v21, %v650_v20 }
 0x154   : > { %6467 = vmatprep.mubr.msk.bf16.mxu0 %vm605_vm1, %v664_v22 }
 0x155   : > { %v652_v23 = vpop.trf.xlu0 }
 0x159   : > { %v653_v24 = vpop.trf.xlu0 }
 0x15a   : > { %v665_v25 = vpack.c.bf16 %v653_v24, %v652_v23 }
 0x15c   : > { %6468 = vmatmul.mubr.msk.bf16.gmra.mrb[4].mxu0 %vm605_vm1, %v665_v25 }
 0x15d   : > { %v654_v26 = vpop.trf.xlu0 }
 0x161   : > { %v655_v27 = vpop.trf.xlu0 }
 0x162   : > { %v666_v28 = vpack.c.bf16 %v655_v27, %v654_v26 }
 0x164   : > { %6471 = vmatprep.mubr.msk.bf16.mxu1 %vm605_vm1, %v666_v28 }
 0x165   : > { %v656_v29 = vpop.trf.xlu0 }
 0x169   : > { %v657_v30 = vpop.trf.xlu0 }
 0x16a   : > { %v667_v31 = vpack.c.bf16 %v657_v30, %v656_v29 }
 0x16c   : > { %6472 = vmatmul.mubr.msk.bf16.vlgmr.msra.gmra.mrb[0].mxu1 %vm605_vm1, %v667_v31 }
 0x16d   : > { %v658_v32 = vpop.trf.xlu0 }
 0x171   : > { %v659_v33 = vpop.trf.xlu0 }
 0x172   : > { %v668_v34 = vpack.c.bf16 %v659_v33, %v658_v32 }
 0x174   : > { %6475 = vmatprep.mubr.msk.bf16.mxu1 %vm605_vm1, %v668_v34 }
 0x175   : > { %v660_v35 = vpop.trf.xlu0 }
 0x179   : > { %v661_v36 = vpop.trf.xlu0 }
 0x17a   : > { %v669_v37 = vpack.c.bf16 %v661_v36, %v660_v35 }
 0x17c   : > { %6476 = vmatmul.mubr.msk.bf16.gmra.mrb[4].mxu1 %vm605_vm1, %v669_v37 }
 0x21f   : > { %v6465_v38 = vpop.f32.mrb[0].mxu0 }
 0x220   : > { %v767_v40 = vpop.f32.mrb[1].mxu0  ;;  %v776_v42 = vadd.f32 %v6465_v38, %v6162_v39 }
 0x221   : > { %v6466_v41 = vpop.f32.mrb[2].mxu0  ;;  %v768_v45 = vadd.f32 %v6162_v39, %v767_v40 }
 0x222   : > { %v779_v43 = vadd.f32 %v6466_v41, %v6162_v39  ;;  %v770_v44 = vpop.f32.mrb[3].mxu0 }
 0x223   : > { %v771_v46 = vadd.f32 %v6162_v39, %v770_v44 }
 0x224   : > { %v831_v47 = vpack.c.bf16 %v779_v43, %v776_v42 }
 0x225   : > { %v830_v48 = vpack.c.bf16 %v771_v46, %v768_v45 }
 0x226   : > { %839 = vst.msk [vmem:[#allocation2 + $0x8] sm:$0xff] %vm605_vm1, %v831_v47 }
 0x227   : > { %838 = vst.msk [vmem:[#allocation2] sm:$0xff] %vm605_vm1, %v830_v48 }
 0x22f   : > { %v6469_v49 = vpop.f32.mrb[4].mxu0 }
 0x230   : > { %v783_v50 = vpop.f32.mrb[5].mxu0  ;;  %v792_v52 = vadd.f32 %v6469_v49, %v6162_v39 }
 0x231   : > { %v6470_v51 = vpop.f32.mrb[6].mxu0  ;;  %v784_v55 = vadd.f32 %v6162_v39, %v783_v50 }
 0x232   : > { %v795_v53 = vadd.f32 %v6470_v51, %v6162_v39  ;;  %v786_v54 = vpop.f32.mrb[7].mxu0 }
 0x233   : > { %v787_v56 = vadd.f32 %v6162_v39, %v786_v54 }
 0x234   : > { %v833_v57 = vpack.c.bf16 %v795_v53, %v792_v52 }
 0x235   : > { %v832_v58 = vpack.c.bf16 %v787_v56, %v784_v55 }
 0x236   : > { %841 = vst.msk [vmem:[#allocation2 + $0x18] sm:$0xff] %vm605_vm1, %v833_v57 }
 0x237   : > { %840 = vst.msk [vmem:[#allocation2 + $0x10] sm:$0xff] %vm605_vm1, %v832_v58 }
 0x23f   : > { %v6473_v59 = vpop.f32.mrb[0].mxu1 }
 0x240   : > { %v799_v60 = vpop.f32.mrb[1].mxu1  ;;  %v808_v62 = vadd.f32 %v6473_v59, %v6162_v39 }
 0x241   : > { %v6474_v61 = vpop.f32.mrb[2].mxu1  ;;  %v800_v1 = vadd.f32 %v6162_v39, %v799_v60 }
 0x242   : > { %v811_v63 = vadd.f32 %v6474_v61, %v6162_v39  ;;  %v802_v0 = vpop.f32.mrb[3].mxu1 }
 0x243   : > { %v803_v2 = vadd.f32 %v6162_v39, %v802_v0 }
 0x244   : > { %v835_v3 = vpack.c.bf16 %v811_v63, %v808_v62 }
 0x245   : > { %v834_v4 = vpack.c.bf16 %v803_v2, %v800_v1 }
 0x246   : > { %843 = vst.msk [vmem:[#allocation2 + $0x28] sm:$0xff] %vm605_vm1, %v835_v3 }
 0x247   : > { %842 = vst.msk [vmem:[#allocation2 + $0x20] sm:$0xff] %vm605_vm1, %v834_v4 }
 0x24f   : > { %v6477_v5 = vpop.f32.mrb[4].mxu1 }
 0x250   : > { %v815_v6 = vpop.f32.mrb[5].mxu1  ;;  %v824_v8 = vadd.f32 %v6477_v5, %v6162_v39 }
 0x251   : > { %v6478_v7 = vpop.f32.mrb[6].mxu1  ;;  %v816_v11 = vadd.f32 %v6162_v39, %v815_v6 }
 0x252   : > { %v827_v9 = vadd.f32 %v6478_v7, %v6162_v39  ;;  %v818_v10 = vpop.f32.mrb[7].mxu1 }
 0x253   : > { %v819_v12 = vadd.f32 %v6162_v39, %v818_v10 }
 0x254   : > { %v837_v13 = vpack.c.bf16 %v827_v9, %v824_v8 }
 0x255   : > { %v836_v14 = vpack.c.bf16 %v819_v12, %v816_v11 }
 0x256   : > { %845 = vst.msk [vmem:[#allocation2 + $0x38] sm:$0xff] %vm605_vm1, %v837_v13 }
 0x257   : > { %844 = vst.msk [vmem:[#allocation2 + $0x30] sm:$0xff] %vm605_vm1, %v836_v14 }
 0x258 PF: > { %v846_v15 = vld [vmem:[%s8059_s16] sm:$0xff]  ;;  %v847_v16 = vld [vmem:[%s8059_s16 + $0x8] sm:$0xff]  ;;  %s11377_s13 = sld [smem:[#allocation133_spill]]  ;;  %v848_v19 = vld [vmem:[%s8059_s16 + $0x10] sm:$0xff]  ;;  %vm933_vm2 = vcmask 523264   ;;  %vm1071_vm3 = vcmask 130048  }
 0x259   : > { %854 = vxpose.xlu0.b32.start [1/8] (short) %v846_v15, 128  ;;  %v849_v21 = vld [vmem:[%s8059_s16 + $0x18] sm:$0xff]  ;;  %v850_v23 = vld [vmem:[%s8059_s16 + $0x20] sm:$0xff]  ;;  %v851_v24 = vld [vmem:[%s8059_s16 + $0x28] sm:$0xff]  ;;  %s11378_s27 = sld [smem:[#allocation136_spill]]  ;;  %s7682_s7 = smov 64   ;;  %vm1537_vm4 = vcmask 7168  }
 0x25a   : > { %v852_v25 = vld [vmem:[%s8059_s16 + $0x30] sm:$0xff]  ;;  %v853_v26 = vld [vmem:[%s8059_s16 + $0x38] sm:$0xff]  ;;  %v8199_v51 = vld [vmem:[#allocation2] sm:$0xff]  ;;  %s7683_s6 = smov 112   ;;  %s7684_s4 = smov 48   ;;  %vm2364_vm5 = vcmask 15368  }
 0x25b   : > { %6519 = vmatprep.mubr.msk.bf16.mxu1 %vm1071_vm3, %v8199_v51  ;;  %s7686_s20 = smov 96   ;;  %s7687_s10 = smov 32   ;;  %vm3248_vm6 = vcmask 23568   ;;  %vm2702_vm7 = vcmask 261248   ;;  %vm4132_vm8 = vcmask 31768   ;;  %vm3586_vm9 = vcmask 392448  }
 0x25c   : > { %s7689_s9 = smov 80   ;;  %s7690_s19 = smov 16   ;;  %vm4470_vm10 = vcmask 523648  }
 0x25d   : > { %855 = vxpose.xlu0.b32.cont [2/8] (short) %v847_v16, 128  ;;  %s11746_s8 = sld [smem:[#allocation19_spill]] }
 0x25e   : > { %v7076_v17 = vld [vmem:[%s11377_s13] sm:$0xff]   ;;  %v7077_v18 = vld [vmem:[%s11377_s13 + $0x8] sm:$0xff]   ;;  %v7078_v20 = vld [vmem:[%s11377_s13 + $0x10] sm:$0xff]  }
 0x25f   : > { %6479 = vmatprep.subr.bf16.mxu0 %v7076_v17  ;;  %v7079_v22 = vld [vmem:[%s11377_s13 + $0x18] sm:$0xff]   ;;  %v6175_v53 = vld [vmem:[%s11378_s27] ss:$0 sm:$0xff] }
 0x260   : > { %6480 = vmatpush3.bf16.msra.mxu0 %v7076_v17 }
 0x261   : > { %6481 = vmatprep.subr.bf16.mxu0 %v7077_v18  ;;  %856 = vxpose.xlu0.b32.cont [3/8] (short) %v848_v19, 128 }
 0x263   : > { %p6220_p6 = scmp.ne.s32.totalorder %s11746_s8, 1 }
 0x264   : > { %6482 = vmatpush3.bf16.msra.mxu0 %v7077_v18  ;;  %s11747_s2 = sld [smem:[#allocation134_spill]] (!%p6220_p6)  ;;  %s11750_s16 = sld [smem:[#allocation139_spill]] (!%p6220_p6) }
 0x265   : > { %6483 = vmatprep.subr.bf16.mxu0 %v7078_v20  ;;  %857 = vxpose.xlu0.b32.cont [4/8] (short) %v849_v21, 128  ;;  %s11753_s8 = sld [smem:[#allocation143_spill]] (!%p6220_p6) }
 0x268   : > { %6484 = vmatpush3.bf16.msra.mxu0 %v7078_v20 }
 0x269   : > { %6485 = vmatprep.subr.bf16.mxu0 %v7079_v22  ;;  %858 = vxpose.xlu0.b32.cont [5/8] (short) %v850_v23, 128 }
 0x26c   : > { %6486 = vmatpush3.bf16.msra.mxu0 %v7079_v22 }
 0x26d   : > { %859 = vxpose.xlu0.b32.cont [6/8] (short) %v851_v24, 128 }
 0x271   : > { %860 = vxpose.xlu0.b32.cont [7/8] (short) %v852_v25, 128 }
 0x275   : > { %861 = vxpose.xlu0.b32.end [8/8] (short) %v853_v26, 128 }
 0x2d9   : > { %v870_v27 = vpop.trf.xlu0 }
 0x2dd   : > { %v871_v28 = vpop.trf.xlu0 }
 0x2de   : > { %v886_v29 = vpack.c.bf16 %v871_v28, %v870_v27 }
 0x2e0   : > { %6487 = vmatprep.mubr.msk.bf16.mxu0 %vm933_vm2, %v886_v29 }
 0x2e1   : > { %v872_v30 = vpop.trf.xlu0 }
 0x2e5   : > { %v873_v31 = vpop.trf.xlu0 }
 0x2e6   : > { %v887_v32 = vpack.c.bf16 %v873_v31, %v872_v30 }
 0x2e8   : > { %6488 = vmatmul.mubr.msk.bf16.vlgmr.msra.gmra.mrb[0].mxu0 %vm933_vm2, %v887_v32 }
 0x2e9   : > { %v874_v33 = vpop.trf.xlu0 }
 0x2ed   : > { %v875_v34 = vpop.trf.xlu0 }
 0x2ee   : > { %v888_v35 = vpack.c.bf16 %v875_v34, %v874_v33 }
 0x2f0   : > { %6491 = vmatprep.mubr.msk.bf16.mxu0 %vm933_vm2, %v888_v35 }
 0x2f1   : > { %v876_v36 = vpop.trf.xlu0 }
 0x2f5   : > { %v877_v37 = vpop.trf.xlu0 }
 0x2f6   : > { %v889_v38 = vpack.c.bf16 %v877_v37, %v876_v36  ;;  %v8254_v37 = vld [vmem:[#allocation2 + $0x8] sm:$0xff] }
 0x2f8   : > { %6492 = vmatmul.mubr.msk.bf16.gmra.mrb[4].mxu0 %vm933_vm2, %v889_v38  ;;  %v8256_v38 = vld [vmem:[#allocation2 + $0x10] sm:$0xff] }
 0x2f9   : > { %v878_v39 = vpop.trf.xlu0 }
 0x2fd   : > { %v879_v40 = vpop.trf.xlu0 }
 0x2fe   : > { %v890_v41 = vpack.c.bf16 %v879_v40, %v878_v39  ;;  %v8262_v39 = vld [vmem:[#allocation2 + $0x18] sm:$0xff]  ;;  %v8264_v40 = vld [vmem:[#allocation2 + $0x20] sm:$0xff] }
 0x300   : > { %6495 = vmatprep.mubr.msk.bf16.mxu0 %vm933_vm2, %v890_v41  ;;  %v8270_v41 = vld [vmem:[#allocation2 + $0x28] sm:$0xff] }
 0x301   : > { %v880_v42 = vpop.trf.xlu0 }
 0x305   : > { %v881_v43 = vpop.trf.xlu0 }
 0x306   : > { %v891_v44 = vpack.c.bf16 %v881_v43, %v880_v42  ;;  %v8272_v42 = vld [vmem:[#allocation2 + $0x30] sm:$0xff]  ;;  %v8278_v43 = vld [vmem:[#allocation2 + $0x38] sm:$0xff] }
 0x308   : > { %6496 = vmatmul.mubr.msk.bf16.gmra.mrb[8].mxu0 %vm933_vm2, %v891_v44 }
 0x309   : > { %v882_v45 = vpop.trf.xlu0 }
 0x30d   : > { %v883_v46 = vpop.trf.xlu0 }
 0x30e   : > { %v892_v47 = vpack.c.bf16 %v883_v46, %v882_v45 }
 0x310   : > { %6499 = vmatprep.mubr.msk.bf16.mxu0 %vm933_vm2, %v892_v47 }
 0x311   : > { %v884_v48 = vpop.trf.xlu0 }
 0x315   : > { %v885_v49 = vpop.trf.xlu0 }
 0x316   : > { %v893_v50 = vpack.c.bf16 %v885_v49, %v884_v48 }
 0x318   : > { %6500 = vmatmul.mubr.msk.bf16.gmra.mrb[12].mxu0 %vm933_vm2, %v893_v50 }
 0x3bb   : > { %v6489_v52 = vpop.f32.mrb[0].mxu0 }
 0x3bc   : > { %v992_v54 = vpop.f32.mrb[1].mxu0  ;;  %v1001_v56 = vadd.f32 %v6489_v52, %v6175_v53 }
 0x3bd   : > { %v6490_v55 = vpop.f32.mrb[2].mxu0  ;;  %v993_v59 = vadd.f32 %v6175_v53, %v992_v54  ;;  %v11197_v54 = vmov 0  }
 0x3be   : > { %v1004_v57 = vadd.f32 %v6490_v55, %v6175_v53  ;;  %v995_v58 = vpop.f32.mrb[3].mxu0  ;;  %7059 = vset.pattern.permute.xlu1 %v11197_v54  ;;  %7060 = vset.pattern.permute.xlu0 %v11197_v54  ;;  %v8491_v54 = vld [vmem:[#allocation3 + $0x78] sm:$0xff] }
 0x3bf   : > { %v996_v60 = vadd.f32 %v6175_v53, %v995_v58  ;;  %11400 = vst [vmem:[#allocation50_spill] sm:$0xff] %v8491_v54 }
 0x3c0   : > { %v8206_v61 = vpack.c.bf16 %v1004_v57, %v1001_v56 }
 0x3c1   : > { %v8208_v62 = vpack.c.bf16 %v996_v60, %v993_v59 }
 0x3c2   : > { %11379 = vst [vmem:[#allocation29_spill] sm:$0xff] %v8206_v61  ;;  %v1100_v1 = vsel %vm1071_vm3, %v8206_v61, 0 }
 0x3c3   : > { %11380 = vst [vmem:[#allocation30_spill] sm:$0xff] %v8208_v62  ;;  %6863 = vmatprep.subr.msk.bf16.mxu1 %vm1071_vm3, %v8208_v62  ;;  %v1097_v63 = vsel %vm1071_vm3, %v8208_v62, 0 }
 0x3c4   : > { %6504 = vmatpush3.bf16.xpose.msra.mxu1 %v1097_v63 }
 0x3c5   : > { %6864 = vmatprep.subr.msk.bf16.mxu1 %vm1071_vm3, %v8206_v61 }
 0x3cb   : > { %v6493_v0 = vpop.f32.mrb[4].mxu0 }
 0x3cc   : > { %v1008_v2 = vpop.f32.mrb[5].mxu0  ;;  %6506 = vmatpush3.bf16.xpose.msra.mxu1 %v1100_v1  ;;  %v1017_v4 = vadd.f32 %v6493_v0, %v6175_v53  ;;  %v8342_v0 = vld [vmem:[#allocation3 + $0x10] sm:$0xff] }
 0x3cd   : > { %v6494_v3 = vpop.f32.mrb[6].mxu0  ;;  %v1009_v7 = vadd.f32 %v6175_v53, %v1008_v2 }
 0x3ce   : > { %v1020_v5 = vadd.f32 %v6494_v3, %v6175_v53  ;;  %v1011_v6 = vpop.f32.mrb[7].mxu0  ;;  %v8347_v3 = vld [vmem:[#allocation3] sm:$0xff] }
 0x3cf   : > { %v1012_v8 = vadd.f32 %v6175_v53, %v1011_v6 }
 0x3d0   : > { %v8218_v9 = vpack.c.bf16 %v1020_v5, %v1017_v4  ;;  %v8481_v4 = vld [vmem:[#allocation3 + $0x60] sm:$0xff] }
 0x3d1   : > { %v8220_v10 = vpack.c.bf16 %v1012_v8, %v1009_v7  ;;  %v8357_v7 = vld [vmem:[#allocation3 + $0x18] sm:$0xff]  ;;  %11398 = vst [vmem:[#allocation48_spill] sm:$0xff] %v8481_v4 }
 0x3d2   : > { %11381 = vst [vmem:[#allocation31_spill] sm:$0xff] %v8218_v9  ;;  %v1106_v13 = vsel %vm1071_vm3, %v8218_v9, 0 }
 0x3d3   : > { %11382 = vst [vmem:[#allocation32_spill] sm:$0xff] %v8220_v10  ;;  %6865 = vmatprep.subr.msk.bf16.mxu1 %vm1071_vm3, %v8220_v10  ;;  %v1103_v11 = vsel %vm1071_vm3, %v8220_v10, 0 }
 0x3d4   : > { %6508 = vmatpush3.bf16.xpose.msra.mxu1 %v1103_v11 }
 0x3d5   : > { %6866 = vmatprep.subr.msk.bf16.mxu1 %vm1071_vm3, %v8218_v9 }
 0x3db   : > { %v6497_v12 = vpop.f32.mrb[8].mxu0 }
 0x3dc   : > { %v1024_v14 = vpop.f32.mrb[9].mxu0  ;;  %6510 = vmatpush3.bf16.xpose.msra.mxu1 %v1106_v13  ;;  %v1033_v16 = vadd.f32 %v6497_v12, %v6175_v53  ;;  %v8367_v13 = vld [vmem:[#allocation3 + $0x8] sm:$0xff] }
 0x3dd   : > { %v6498_v15 = vpop.f32.mrb[10].mxu0  ;;  %v1025_v19 = vadd.f32 %v6175_v53, %v1024_v14 }
 0x3de   : > { %v1036_v17 = vadd.f32 %v6498_v15, %v6175_v53  ;;  %v1027_v18 = vpop.f32.mrb[11].mxu0 }
 0x3df   : > { %v1028_v20 = vadd.f32 %v6175_v53, %v1027_v18  ;;  %v8471_v18 = vld [vmem:[#allocation3 + $0x70] sm:$0xff] }
 0x3e0   : > { %v8230_v21 = vpack.c.bf16 %v1036_v17, %v1033_v16  ;;  %v8377_v17 = vld [vmem:[#allocation3 + $0x30] sm:$0xff]  ;;  %11396 = vst [vmem:[#allocation46_spill] sm:$0xff] %v8471_v18 }
 0x3e1   : > { %v8232_v22 = vpack.c.bf16 %v1028_v20, %v1025_v19  ;;  %11386 = vst [vmem:[#allocation36_spill] sm:$0xff] %v8377_v17  ;;  %v8384_v19 = vld [vmem:[#allocation3 + $0x40] sm:$0xff] }
 0x3e2   : > { %11383 = vst [vmem:[#allocation33_spill] sm:$0xff] %v8230_v21  ;;  %v1112_v25 = vsel %vm1071_vm3, %v8230_v21, 0  ;;  %11387 = vst [vmem:[#allocation37_spill] sm:$0xff] %v8384_v19 }
 0x3e3   : > { %6867 = vmatprep.subr.msk.bf16.mxu1 %vm1071_vm3, %v8232_v22  ;;  %v1109_v23 = vsel %vm1071_vm3, %v8232_v22, 0 }
 0x3e4   : > { %6512 = vmatpush3.bf16.xpose.msra.mxu1 %v1109_v23 }
 0x3e5   : > { %6868 = vmatprep.subr.msk.bf16.mxu1 %vm1071_vm3, %v8230_v21 }
 0x3eb   : > { %v6501_v24 = vpop.f32.mrb[12].mxu0 }
 0x3ec   : > { %v1040_v26 = vpop.f32.mrb[13].mxu0  ;;  %6514 = vmatpush3.bf16.xpose.msra.mxu1 %v1112_v25  ;;  %v1049_v28 = vadd.f32 %v6501_v24, %v6175_v53 }
 0x3ed   : > { %v6502_v27 = vpop.f32.mrb[14].mxu0  ;;  %v1041_v31 = vadd.f32 %v6175_v53, %v1040_v26  ;;  %v8392_v26 = vld [vmem:[#allocation3 + $0x20] sm:$0xff] }
 0x3ee   : > { %v1052_v29 = vadd.f32 %v6502_v27, %v6175_v53  ;;  %v1043_v30 = vpop.f32.mrb[15].mxu0 }
 0x3ef   : > { %v1044_v32 = vadd.f32 %v6175_v53, %v1043_v30 }
 0x3f0   : > { %v8242_v33 = vpack.c.bf16 %v1052_v29, %v1049_v28 }
 0x3f1   : > { %v8244_v34 = vpack.c.bf16 %v1044_v32, %v1041_v31  ;;  %v8408_v31 = vld [vmem:[#allocation3 + $0x38] sm:$0xff]  ;;  %v8461_v32 = vld [vmem:[#allocation3 + $0x48] sm:$0xff] }
 0x3f2   : > { %11384 = vst [vmem:[#allocation34_spill] sm:$0xff] %v8242_v33  ;;  %v1118_v36 = vsel %vm1071_vm3, %v8242_v33, 0  ;;  %11394 = vst [vmem:[#allocation44_spill] sm:$0xff] %v8461_v32 }
 0x3f3   : > { %11385 = vst [vmem:[#allocation35_spill] sm:$0xff] %v8244_v34  ;;  %6869 = vmatprep.subr.msk.bf16.mxu1 %vm1071_vm3, %v8244_v34  ;;  %v1115_v35 = vsel %vm1071_vm3, %v8244_v34, 0 }
 0x3f4   : > { %6516 = vmatpush3.bf16.xpose.msra.mxu1 %v1115_v35 }
 0x3f5   : > { %6870 = vmatprep.subr.msk.bf16.mxu1 %vm1071_vm3, %v8242_v33 }
 0x3fc   : > { %6518 = vmatpush3.bf16.xpose.msra.mxu1 %v1118_v36 }
 0x403   : > { %6520 = vmatmul.mubr.msk.bf16.vlgmr.msra.gmra.mrb[0].mxu1 %vm1071_vm3, %v8254_v37 }
 0x404   : > { %6523 = vmatprep.mubr.msk.bf16.mxu1 %vm1071_vm3, %v8256_v38 }
 0x40b   : > { %6524 = vmatmul.mubr.msk.bf16.gmra.mrb[4].mxu1 %vm1071_vm3, %v8262_v39 }
 0x40c   : > { %6527 = vmatprep.mubr.msk.bf16.mxu1 %vm1071_vm3, %v8264_v40 }
 0x413   : > { %6528 = vmatmul.mubr.msk.bf16.gmra.mrb[8].mxu1 %vm1071_vm3, %v8270_v41 }
 0x414   : > { %6531 = vmatprep.mubr.msk.bf16.mxu1 %vm1071_vm3, %v8272_v42 }
 0x41b   : > { %6532 = vmatmul.mubr.msk.bf16.gmra.mrb[12].mxu1 %vm1071_vm3, %v8278_v43 }
 0x4d6   : > { %v8282_v44 = vpop.f32.mrb[0].mxu1 }
 0x4d7   : > { %1237 = vmax.xlane.f32.xlu1 %v8282_v44  ;;  %v8285_v45 = vpop.f32.mrb[1].mxu1 }
 0x4d8   : > { %v8287_v46 = vpop.f32.mrb[2].mxu1 }
 0x4d9   : > { %v8289_v47 = vpop.f32.mrb[3].mxu1 }
 0x4db   : > { %1233 = vmax.xlane.f32.xlu1 %v8285_v45 }
 0x4de   : > { %v8292_v48 = vpop.f32.mrb[4].mxu1 }
 0x4df   : > { %1239 = vmax.xlane.f32.xlu1 %v8287_v46  ;;  %v8295_v49 = vpop.f32.mrb[5].mxu1 }
 0x4e0   : > { %v8297_v50 = vpop.f32.mrb[6].mxu1 }
 0x4e1   : > { %v8299_v52 = vpop.f32.mrb[7].mxu1 }
 0x4e3   : > { %1235 = vmax.xlane.f32.xlu1 %v8289_v47 }
 0x4e6   : > { %v8302_v53 = vpop.f32.mrb[8].mxu1 }
 0x4e7   : > { %1245 = vmax.xlane.f32.xlu1 %v8292_v48  ;;  %v8307_v55 = vpop.f32.mrb[9].mxu1 }
 0x4e8   : > { %1249 = vmax.xlane.f32.xlu0 %v8307_v55  ;;  %v8310_v56 = vpop.f32.mrb[10].mxu1 }
 0x4e9   : > { %v8312_v57 = vpop.f32.mrb[11].mxu1 }
 0x4eb   : > { %1241 = vmax.xlane.f32.xlu1 %v8295_v49 }
 0x4ee   : > { %v8315_v58 = vpop.f32.mrb[12].mxu1 }
 0x4ef   : > { %1247 = vmax.xlane.f32.xlu1 %v8297_v50  ;;  %v8318_v59 = vpop.f32.mrb[13].mxu1 }
 0x4f0   : > { %v8320_v60 = vpop.f32.mrb[14].mxu1 }
 0x4f1   : > { %v8322_v63 = vpop.f32.mrb[15].mxu1 }
 0x4f3   : > { %1243 = vmax.xlane.f32.xlu1 %v8299_v52 }
 0x4f7   : > { %1253 = vmax.xlane.f32.xlu1 %v8302_v53 }
 0x4fe   : > { %1580 = vrot.lane.b32.xlu0 %v8230_v21, %s7682_s7 }
 0x508   : > { %1570 = vrot.lane.b32.xlu1 %v8208_v62, %s7682_s7 }
 0x50c   : > { %1572 = vrot.lane.b32.xlu1 %v8206_v61, %s7682_s7 }
 0x510   : > { %1574 = vrot.lane.b32.xlu1 %v8220_v10, %s7682_s7 }
 0x514   : > { %1576 = vrot.lane.b32.xlu1 %v8218_v9, %s7682_s7 }
 0x538   : > { %1255 = vmax.xlane.f32.xlu1 %v8310_v56 }
 0x53c   : > { %1251 = vmax.xlane.f32.xlu1 %v8312_v57 }
 0x540   : > { %1261 = vmax.xlane.f32.xlu1 %v8315_v58 }
 0x544   : > { %1257 = vmax.xlane.f32.xlu1 %v8318_v59 }
 0x548   : > { %1263 = vmax.xlane.f32.xlu1 %v8320_v60 }
 0x54c   : > { %1259 = vmax.xlane.f32.xlu1 %v8322_v63 }
 0x564   : > { %v1238_v1 = vpop.xlane.xlu1 %1237 }
 0x565   : > { %v8345_v2 = vmax.f32 %v8342_v0, %v1238_v1  ;;  %v8419_v1 = vld [vmem:[#allocation3 + $0x28] sm:$0xff] }
 0x567   : > { %1837 = vst.msk [vmem:[#allocation3 + $0x10] sm:$0xff] %vm1537_vm4, %v8345_v2  ;;  %1341 = vperm.xlu1 %7059, %v8345_v2  }
 0x568   : > { %v1234_v5 = vpop.xlane.xlu1 %1233 }
 0x569   : > { %v8355_v6 = vmax.f32 %v8347_v3, %v1234_v5 }
 0x56b   : > { %1835 = vst.msk [vmem:[#allocation3] sm:$0xff] %vm1537_vm4, %v8355_v6  ;;  %1331 = vperm.xlu1 %7059, %v8355_v6  }
 0x56c   : > { %v1240_v11 = vpop.xlane.xlu1 %1239 }
 0x56d   : > { %v8365_v12 = vmax.f32 %v8357_v7, %v1240_v11 }
 0x56f   : > { %1838 = vst.msk [vmem:[#allocation3 + $0x18] sm:$0xff] %vm1537_vm4, %v8365_v12  ;;  %1346 = vperm.xlu1 %7059, %v8365_v12  }
 0x570   : > { %v1236_v15 = vpop.xlane.xlu1 %1235 }
 0x571   : > { %v8375_v16 = vmax.f32 %v8367_v13, %v1236_v15 }
 0x573   : > { %1836 = vst.msk [vmem:[#allocation3 + $0x8] sm:$0xff] %vm1537_vm4, %v8375_v16  ;;  %1336 = vperm.xlu1 %7059, %v8375_v16  }
 0x574   : > { %v1246_v20 = vpop.xlane.xlu1 %1245 }
 0x575   : > { %v8387_v23 = vmax.f32 %v8377_v17, %v1246_v20  ;;  %v1250_v24 = vpop.xlane.xlu0 %1249  ;;  %v8430_v20 = vld [vmem:[#allocation3 + $0x50] sm:$0xff] }
 0x576   : > { %v8390_v25 = vmax.f32 %v8384_v19, %v1250_v24  ;;  %11390 = vst [vmem:[#allocation40_spill] sm:$0xff] %v8430_v20  ;;  %v8742_v17 = vld [vmem:[#allocation3 + $0x18] sm:$0xff] }
 0x577   : > { %11388 = vst [vmem:[#allocation38_spill] sm:$0xff] %v8387_v23  ;;  %1841 = vst.msk [vmem:[#allocation3 + $0x30] sm:$0xff] %vm1537_vm4, %v8387_v23  ;;  %1361 = vperm.xlu0 %7060, %v8387_v23   ;;  %1578 = vrot.lane.b32.xlu1 %v8232_v22, %s7682_s7 }
 0x578   : > { %11389 = vst [vmem:[#allocation39_spill] sm:$0xff] %v8390_v25  ;;  %1843 = vst.msk [vmem:[#allocation3 + $0x40] sm:$0xff] %vm1537_vm4, %v8390_v25  ;;  %v1242_v29 = vpop.xlane.xlu1 %1241 }
 0x579   : > { %v8406_v30 = vmax.f32 %v8392_v26, %v1242_v29  ;;  %11426 = vst [vmem:[#allocation76_spill] sm:$0xff] %v8742_v17 }
 0x57b   : > { %1839 = vst.msk [vmem:[#allocation3 + $0x20] sm:$0xff] %vm1537_vm4, %v8406_v30  ;;  %1582 = vrot.lane.b32.xlu1 %v8244_v34, %s7682_s7 }
 0x57c   : > { %v1248_v35 = vpop.xlane.xlu1 %1247 }
 0x57d   : > { %v8417_v36 = vmax.f32 %v8408_v31, %v1248_v35 }
 0x57f   : > { %1842 = vst.msk [vmem:[#allocation3 + $0x38] sm:$0xff] %vm1537_vm4, %v8417_v36  ;;  %1584 = vrot.lane.b32.xlu1 %v8242_v33, %s7682_s7  ;;  %s11751_s7 = sld [smem:[#allocation141_spill]] (!%p6220_p6) }
 0x580   : > { %v1244_v11 = vpop.xlane.xlu1 %1243 }
 0x581   : > { %v8428_v15 = vmax.f32 %v8419_v1, %v1244_v11 }
 0x583   : > { %1840 = vst.msk [vmem:[#allocation3 + $0x28] sm:$0xff] %vm1537_vm4, %v8428_v15  ;;  %1883 = vrot.lane.b32.xlu1 %v8208_v62, %s7683_s6 }
 0x584   : > { %v1254_v29 = vpop.xlane.xlu1 %1253 }
 0x585   : > { %v8439_v35 = vmax.f32 %v8430_v20, %v1254_v29 }
 0x587   : > { %11391 = vst [vmem:[#allocation41_spill] sm:$0xff] %v8439_v35  ;;  %1845 = vst.msk [vmem:[#allocation3 + $0x50] sm:$0xff] %vm1537_vm4, %v8439_v35  ;;  %1381 = vperm.xlu0 %7060, %v8439_v35   ;;  %1885 = vrot.lane.b32.xlu1 %v8206_v61, %s7683_s6  ;;  %v8501_v35 = vld [vmem:[#allocation3 + $0x68] sm:$0xff] }
 0x588   : > { %v1571_v28 = vpop.permute.xlu1 %1570  ;;  %11402 = vst [vmem:[#allocation52_spill] sm:$0xff] %v8501_v35 }
 0x589   : > { %6535 = vmatprep.subr.bf16.mxu0 %v1571_v28 }
 0x58a   : > { %6536 = vmatpush3.bf16.msra.mxu0 %v1571_v28  ;;  %v8456_v28 = vld [vmem:[#allocation3 + $0x58] sm:$0xff] }
 0x58b   : > { %1371 = vperm.xlu0 %7060, %v8390_v25   ;;  %1887 = vrot.lane.b32.xlu1 %v8220_v10, %s7683_s6  ;;  %11392 = vst [vmem:[#allocation42_spill] sm:$0xff] %v8456_v28 }
 0x58c   : > { %v1573_v29 = vpop.permute.xlu1 %1572 }
 0x58d   : > { %6537 = vmatprep.subr.bf16.mxu0 %v1573_v29 }
 0x58e   : > { %6538 = vmatpush3.bf16.msra.mxu0 %v1573_v29 }
 0x58f   : > { %1889 = vrot.lane.b32.xlu0 %v8218_v9, %s7683_s6  ;;  %1351 = vperm.xlu1 %7059, %v8406_v30  }
 0x590   : > { %v1575_v11 = vpop.permute.xlu1 %1574 }
 0x591   : > { %6539 = vmatprep.subr.bf16.mxu0 %v1575_v11 }
 0x592   : > { %6540 = vmatpush3.bf16.msra.mxu0 %v1575_v11 }
 0x593   : > { %1366 = vperm.xlu1 %7059, %v8417_v36  }
 0x594   : > { %v1577_v27 = vpop.permute.xlu1 %1576 }
 0x595   : > { %6541 = vmatprep.subr.bf16.mxu0 %v1577_v27 }
 0x596   : > { %6542 = vmatpush3.bf16.msra.mxu0 %v1577_v27 }
 0x597   : > { %1356 = vperm.xlu1 %7059, %v8428_v15  }
 0x5c5   : > { %v1256_v5 = vpop.xlane.xlu1 %1255 }
 0x5c6   : > { %v8459_v29 = vmax.f32 %v8456_v28, %v1256_v5  ;;  %v8723_v28 = vld [vmem:[#allocation3] sm:$0xff] }
 0x5c7   : > { %11422 = vst [vmem:[#allocation72_spill] sm:$0xff] %v8723_v28 }
 0x5c8   : > { %11393 = vst [vmem:[#allocation43_spill] sm:$0xff] %v8459_v29  ;;  %1846 = vst.msk [vmem:[#allocation3 + $0x58] sm:$0xff] %vm1537_vm4, %v8459_v29  ;;  %1386 = vperm.xlu1 %7059, %v8459_v29  }
 0x5c9   : > { %v1252_v11 = vpop.xlane.xlu1 %1251 }
 0x5ca   : > { %v8469_v27 = vmax.f32 %v8461_v32, %v1252_v11 }
 0x5cc   : > { %11395 = vst [vmem:[#allocation45_spill] sm:$0xff] %v8469_v27  ;;  %1844 = vst.msk [vmem:[#allocation3 + $0x48] sm:$0xff] %vm1537_vm4, %v8469_v27  ;;  %1376 = vperm.xlu1 %7059, %v8469_v27  }
 0x5cd   : > { %v1262_v24 = vpop.xlane.xlu1 %1261 }
 0x5ce   : > { %v8479_v14 = vmax.f32 %v8471_v18, %v1262_v24 }
 0x5d0   : > { %11397 = vst [vmem:[#allocation47_spill] sm:$0xff] %v8479_v14  ;;  %1849 = vst.msk [vmem:[#allocation3 + $0x70] sm:$0xff] %vm1537_vm4, %v8479_v14  ;;  %1401 = vperm.xlu1 %7059, %v8479_v14  }
 0x5d1   : > { %v1258_v5 = vpop.xlane.xlu1 %1257 }
 0x5d2   : > { %v8489_v8 = vmax.f32 %v8481_v4, %v1258_v5 }
 0x5d4   : > { %11399 = vst [vmem:[#allocation49_spill] sm:$0xff] %v8489_v8  ;;  %1847 = vst.msk [vmem:[#allocation3 + $0x60] sm:$0xff] %vm1537_vm4, %v8489_v8  ;;  %1391 = vperm.xlu1 %7059, %v8489_v8  }
 0x5d5   : > { %v1264_v11 = vpop.xlane.xlu1 %1263 }
 0x5d6   : > { %v8499_v18 = vmax.f32 %v8491_v54, %v1264_v11 }
 0x5d8   : > { %11401 = vst [vmem:[#allocation51_spill] sm:$0xff] %v8499_v18  ;;  %1850 = vst.msk [vmem:[#allocation3 + $0x78] sm:$0xff] %vm1537_vm4, %v8499_v18  ;;  %1891 = vrot.lane.b32.xlu1 %v8232_v22, %s7683_s6 }
 0x5d9   : > { %v1260_v24 = vpop.xlane.xlu1 %1259 }
 0x5da   : > { %v8510_v14 = vmax.f32 %v8501_v35, %v1260_v24 }
 0x5dc   : > { %11403 = vst [vmem:[#allocation53_spill] sm:$0xff] %v8510_v14  ;;  %1848 = vst.msk [vmem:[#allocation3 + $0x68] sm:$0xff] %vm1537_vm4, %v8510_v14  ;;  %1895 = vrot.lane.b32.xlu1 %v8244_v34, %s7683_s6  ;;  %1396 = vperm.xlu0 %7060, %v8510_v14  }
 0x5e0   : > { %1867 = vrot.lane.b32.xlu1 %v8199_v51, %s7683_s6  ;;  %1406 = vperm.xlu0 %7060, %v8499_v18  }
 0x5e4   : > { %1871 = vrot.lane.b32.xlu1 %v8256_v38, %s7683_s6  ;;  %1893 = vrot.lane.b32.xlu0 %v8230_v21, %s7683_s6 }
 0x5e6   : > { %v1342_v11 = vpop.permute.xlu1 %1341 }
 0x5e8   : > { %1875 = vrot.lane.b32.xlu1 %v8264_v40, %s7683_s6  ;;  %1897 = vrot.lane.b32.xlu0 %v8242_v33, %s7683_s6  ;;  %v1411_v40 = vsub.f32 %v8282_v44, %v1342_v11 }
 0x5ea   : > { %v1332_v24 = vpop.permute.xlu1 %1331 }
 0x5eb   : > { %v1409_v51 = vsub.f32 %v8285_v45, %v1332_v24  ;;  %v1429_v45 = vmul.f32 1.442695, %v1411_v40  ;;  %v1581_v24 = vpop.permute.xlu0 %1580 }
 0x5ec   : > { %1879 = vrot.lane.b32.xlu1 %v8272_v42, %s7683_s6  ;;  %1869 = vrot.lane.b32.xlu0 %v8254_v37, %s7683_s6 }
 0x5ed   : > { %v1425_v8 = vmul.f32 1.442695, %v1409_v51 }
 0x5ee   : > { %v1347_v38 = vpop.permute.xlu1 %1346 }
 0x5ef   : > { %v1412_v5 = vsub.f32 %v8287_v46, %v1347_v38  ;;  %7080 = vpow2.f32 %v1425_v8 }
 0x5f0   : > { %2391 = vrot.lane.b32.xlu1 %v8206_v61, %s7684_s4  ;;  %1873 = vrot.lane.b32.xlu0 %v8262_v39, %s7683_s6 }
 0x5f1   : > { %v1431_v54 = vmul.f32 1.442695, %v1412_v5 }
 0x5f2   : > { %v1337_v18 = vpop.permute.xlu1 %1336 }
 0x5f3   : > { %v1410_v42 = vsub.f32 %v8289_v47, %v1337_v18 }
 0x5f4   : > { %1877 = vrot.lane.b32.xlu0 %v8270_v41, %s7683_s6 }
 0x5f5   : > { %v1427_v37 = vmul.f32 1.442695, %v1410_v42 }
 0x5f6   : > { %v1579_v46 = vpop.permute.xlu1 %1578  ;;  %v1362_v40 = vpop.permute.xlu0 %1361 }
 0x5f7   : > { %7082 = vpow2.f32 %v1427_v37  ;;  %6543 = vmatprep.subr.bf16.mxu0 %v1579_v46 }
 0x5f8   : > { %7084 = vpow2.f32 %v1431_v54  ;;  %1881 = vrot.lane.b32.xlu0 %v8278_v43, %s7683_s6  ;;  %6544 = vmatpush3.bf16.msra.mxu0 %v1579_v46 }
 0x5f9   : > { %6545 = vmatprep.subr.bf16.mxu0 %v1581_v24  ;;  %7086 = vpow2.f32 %v1429_v45  ;;  %v8548_v44 = vpop.eup %7080 }
 0x5fa   : > { %v1583_v39 = vpop.permute.xlu1 %1582 }
 0x5fc   : > { %2389 = vrot.lane.b32.xlu0 %v8208_v62, %s7684_s4  ;;  %6546 = vmatpush3.bf16.msra.mxu0 %v1581_v24 }
 0x5fd   : > { %6547 = vmatprep.subr.bf16.mxu0 %v1583_v39 }
 0x5fe   : > { %v1585_v41 = vpop.permute.xlu1 %1584 }
 0x600   : > { %6548 = vmatpush3.bf16.msra.mxu0 %v1583_v39  ;;  %v1415_v39 = vsub.f32 %v8292_v48, %v1362_v40 }
 0x601   : > { %v8550_v47 = vpop.eup %7082  ;;  %6549 = vmatprep.subr.bf16.mxu0 %v1585_v41 }
 0x602   : > { %v8552_v54 = vpop.eup %7084  ;;  %v1884_v8 = vpop.permute.xlu1 %1883  ;;  %v1554_v43 = vpack.c.bf16 %v8550_v47, %v8548_v44  ;;  %v1437_v14 = vmul.f32 1.442695, %v1415_v39 }
 0x603   : > { %v8556_v18 = vpop.eup %7086  ;;  %v1924_v38 = vsel %vm1071_vm3, %v1884_v8, 0 }
 0x604   : > { %6550 = vmatpush3.bf16.msra.mxu0 %v1585_v41  ;;  %6551 = vmatprep.mubr.bf16.mxu0 %v1554_v43  ;;  %v1555_v5 = vpack.c.bf16 %v8552_v54, %v8556_v18 }
 0x605   : > { %6871 = vmatprep.subr.msk.bf16.mxu0 %vm1071_vm3, %v1884_v8 }
 0x606   : > { %v1886_v11 = vpop.permute.xlu1 %1885  ;;  %v1382_v37 = vpop.permute.xlu0 %1381 }
 0x607   : > { %6552 = vmatmul.mubr.bf16.vlgmr.msra.gmra.mrb[16].mxu0 %v1555_v5  ;;  %v1927_v41 = vsel %vm1071_vm3, %v1886_v11, 0 }
 0x60a   : > { %v1888_v51 = vpop.permute.xlu1 %1887 }
 0x60d   : > { %6568 = vmatpush3.bf16.xpose.msra.mxu0 %v1924_v38  ;;  %v1372_v38 = vpop.permute.xlu0 %1371 }
 0x60e   : > { %6872 = vmatprep.subr.msk.bf16.mxu0 %vm1071_vm3, %v1886_v11  ;;  %v1352_v42 = vpop.permute.xlu1 %1351 }
 0x60f   : > { %v1413_v45 = vsub.f32 %v8295_v49, %v1352_v42  ;;  %v1930_v49 = vsel %vm1071_vm3, %v1888_v51, 0 }
 0x611   : > { %v1433_v43 = vmul.f32 1.442695, %v1413_v45  ;;  %v1890_v48 = vpop.permute.xlu0 %1889 }
 0x612   : > { %v1367_v46 = vpop.permute.xlu1 %1366  ;;  %v1933_v40 = vsel %vm1071_vm3, %v1890_v48, 0 }
 0x613   : > { %v1416_v24 = vsub.f32 %v8297_v50, %v1367_v46  ;;  %7088 = vpow2.f32 %v1433_v43  ;;  %v1419_v46 = vsub.f32 %v8302_v53, %v1382_v37 }
 0x615   : > { %6570 = vmatpush3.bf16.xpose.msra.mxu0 %v1927_v41  ;;  %v1439_v5 = vmul.f32 1.442695, %v1416_v24 }
 0x616   : > { %6873 = vmatprep.subr.msk.bf16.mxu0 %vm1071_vm3, %v1888_v51  ;;  %v1357_v8 = vpop.permute.xlu1 %1356 }
 0x617   : > { %v1414_v4 = vsub.f32 %v8299_v52, %v1357_v8  ;;  %7090 = vpow2.f32 %v1439_v5  ;;  %v1445_v5 = vmul.f32 1.442695, %v1419_v46 }
 0x619   : > { %v1435_v35 = vmul.f32 1.442695, %v1414_v4 }
 0x61b   : > { %7092 = vpow2.f32 %v1435_v35  ;;  %v1417_v35 = vsub.f32 %v8307_v55, %v1372_v38 }
 0x61c   : > { %7094 = vpow2.f32 %v1437_v14 }
 0x61d   : > { %6572 = vmatpush3.bf16.xpose.msra.mxu0 %v1930_v49  ;;  %v8571_v50 = vpop.eup %7088  ;;  %v1441_v24 = vmul.f32 1.442695, %v1417_v35 }
 0x61e   : > { %6874 = vmatprep.subr.msk.bf16.mxu0 %vm1071_vm3, %v1890_v48 }
 0x61f   : > { %7096 = vpow2.f32 %v1441_v24 }
 0x621   : > { %v8573_v11 = vpop.eup %7090 }
 0x625   : > { %v8576_v42 = vpop.eup %7092  ;;  %6574 = vmatpush3.bf16.xpose.msra.mxu0 %v1933_v40 }
 0x626   : > { %v8578_v52 = vpop.eup %7094  ;;  %v1556_v4 = vpack.c.bf16 %v8576_v42, %v8571_v50 }
 0x627   : > { %v1557_v14 = vpack.c.bf16 %v8573_v11, %v8578_v52 }
 0x628   : > { %6555 = vmatprep.mubr.bf16.mxu0 %v1556_v4 }
 0x629   : > { %6556 = vmatmul.mubr.bf16.gmra.mrb[20].mxu0 %v1557_v14  ;;  %v8589_v40 = vpop.eup %7096 }
 0x647   : > { %v1387_v51 = vpop.permute.xlu1 %1386 }
 0x648   : > { %v1420_v45 = vsub.f32 %v8310_v56, %v1387_v51 }
 0x64a   : > { %v1447_v39 = vmul.f32 1.442695, %v1420_v45 }
 0x64b   : > { %v1377_v41 = vpop.permute.xlu1 %1376 }
 0x64c   : > { %v1418_v43 = vsub.f32 %v8312_v57, %v1377_v41  ;;  %7098 = vpow2.f32 %v1447_v39 }
 0x64e   : > { %v1443_v8 = vmul.f32 1.442695, %v1418_v43 }
 0x64f   : > { %v1402_v49 = vpop.permute.xlu1 %1401 }
 0x650   : > { %7100 = vpow2.f32 %v1443_v8  ;;  %v1423_v4 = vsub.f32 %v8315_v58, %v1402_v49 }
 0x651   : > { %7102 = vpow2.f32 %v1445_v5 }
 0x652   : > { %v1453_v24 = vmul.f32 1.442695, %v1423_v4 }
 0x653   : > { %v1392_v48 = vpop.permute.xlu1 %1391 }
 0x654   : > { %v1421_v55 = vsub.f32 %v8318_v59, %v1392_v48 }
 0x656   : > { %v8593_v56 = vpop.eup %7098  ;;  %v1449_v14 = vmul.f32 1.442695, %v1421_v55 }
 0x657   : > { %v1892_v38 = vpop.permute.xlu1 %1891 }
 0x658   : > { %6875 = vmatprep.subr.msk.bf16.mxu0 %vm1071_vm3, %v1892_v38  ;;  %v1936_v53 = vsel %vm1071_vm3, %v1892_v38, 0  ;;  %7104 = vpow2.f32 %v1449_v14 }
 0x659   : > { %6576 = vmatpush3.bf16.xpose.msra.mxu0 %v1936_v53 }
 0x65a   : > { %v8595_v57 = vpop.eup %7100 }
 0x65b   : > { %v8597_v37 = vpop.eup %7102  ;;  %v1397_v35 = vpop.permute.xlu0 %1396  ;;  %v1558_v59 = vpack.c.bf16 %v8595_v57, %v8589_v40 }
 0x65c   : > { %v1422_v51 = vsub.f32 %v8322_v63, %v1397_v35  ;;  %v1559_v45 = vpack.c.bf16 %v8593_v56, %v8597_v37  ;;  %v1896_v39 = vpop.permute.xlu1 %1895 }
 0x65d   : > { %6559 = vmatprep.mubr.bf16.mxu0 %v1558_v59  ;;  %v1942_v4 = vsel %vm1071_vm3, %v1896_v39, 0 }
 0x65e   : > { %v1451_v46 = vmul.f32 1.442695, %v1422_v51  ;;  %6560 = vmatmul.mubr.bf16.gmra.mrb[24].mxu0 %v1559_v45 }
 0x65f   : > { %v1407_v41 = vpop.permute.xlu0 %1406 }
 0x660   : > { %7106 = vpow2.f32 %v1451_v46  ;;  %v1424_v58 = vsub.f32 %v8320_v60, %v1407_v41  ;;  %v1868_v8 = vpop.permute.xlu1 %1867 }
 0x661   : > { %7108 = vpow2.f32 %v1453_v24 }
 0x662   : > { %v1455_v43 = vmul.f32 1.442695, %v1424_v58  ;;  %v8609_v48 = vpop.eup %7104 }
 0x663   : > { %v1894_v5 = vpop.permute.xlu0 %1893 }
 0x664   : > { %7110 = vpow2.f32 %v1455_v43  ;;  %6876 = vmatprep.subr.msk.bf16.mxu0 %vm1071_vm3, %v1894_v5  ;;  %v1939_v63 = vsel %vm1071_vm3, %v1894_v5, 0  ;;  %v1872_v38 = vpop.permute.xlu1 %1871 }
 0x665   : > { %6578 = vmatpush3.bf16.xpose.msra.mxu0 %v1939_v63 }
 0x666   : > { %6877 = vmatprep.subr.msk.bf16.mxu0 %vm1071_vm3, %v1896_v39 }
 0x667   : > { %v1898_v49 = vpop.permute.xlu0 %1897 }
 0x668   : > { %v1876_v45 = vpop.permute.xlu1 %1875  ;;  %v1945_v24 = vsel %vm1071_vm3, %v1898_v49, 0 }
 0x66a   : > { %v8611_v55 = vpop.eup %7106 }
 0x66b   : > { %v1870_v53 = vpop.permute.xlu0 %1869  ;;  %v1560_v60 = vpack.c.bf16 %v8611_v55, %v8609_v48  ;;  %v8616_v14 = vpop.eup %7108 }
 0x66c   : > { %v1880_v39 = vpop.permute.xlu1 %1879 }
 0x66d   : > { %6563 = vmatprep.mubr.bf16.mxu0 %v1560_v60  ;;  %6580 = vmatpush3.bf16.xpose.msra.mxu0 %v1942_v4 }
 0x66e   : > { %v8618_v35 = vpop.eup %7110  ;;  %6878 = vmatprep.subr.msk.bf16.mxu0 %vm1071_vm3, %v1898_v49 }
 0x66f   : > { %v1874_v59 = vpop.permute.xlu0 %1873  ;;  %v1561_v51 = vpack.c.bf16 %v8618_v35, %v8616_v14 }
 0x670   : > { %v2392_v43 = vpop.permute.xlu1 %2391 }
 0x671   : > { %6564 = vmatmul.mubr.bf16.gmra.mrb[28].mxu0 %v1561_v51 }
 0x672   : > { %6583 = vmatprep.mubr.msk.bf16.mxu0 %vm1071_vm3, %v1868_v8 }
 0x673   : > { %v1878_v46 = vpop.permute.xlu0 %1877 }
 0x675   : > { %6582 = vmatpush3.bf16.xpose.msra.mxu0 %v1945_v24 }
 0x677   : > { %v1882_v41 = vpop.permute.xlu0 %1881 }
 0x67b   : > { %v2390_v58 = vpop.permute.xlu0 %2389 }
 0x67c   : > { %6584 = vmatmul.mubr.msk.bf16.vlgmr.msra.gmra.mrb[32].mxu0 %vm1071_vm3, %v1870_v53  ;;  %6599 = vmatprep.subr.bf16.mxu1 %v2390_v58 }
 0x67d   : > { %6600 = vmatpush3.bf16.msra.mxu1 %v2390_v58  ;;  %6587 = vmatprep.mubr.msk.bf16.mxu0 %vm1071_vm3, %v1872_v38 }
 0x67e   : > { %6601 = vmatprep.subr.bf16.mxu1 %v2392_v43 }
 0x681   : > { %6602 = vmatpush3.bf16.msra.mxu1 %v2392_v43 }
 0x684   : > { %6588 = vmatmul.mubr.msk.bf16.gmra.mrb[36].mxu0 %vm1071_vm3, %v1874_v59 }
 0x685   : > { %6591 = vmatprep.mubr.msk.bf16.mxu0 %vm1071_vm3, %v1876_v45 }
 0x68c   : > { %6592 = vmatmul.mubr.msk.bf16.gmra.mrb[40].mxu0 %vm1071_vm3, %v1878_v46 }
 0x68d   : > { %6595 = vmatprep.mubr.msk.bf16.mxu0 %vm1071_vm3, %v1880_v39 }
 0x694   : > { %6596 = vmatmul.mubr.msk.bf16.gmra.mrb[44].mxu0 %vm1071_vm3, %v1882_v41 }
 0x6da   : > { %v8632_v5 = vpop.f32.mrb[16].mxu0 }
 0x6db   : > { %11404 = vst [vmem:[#allocation54_spill] sm:$0xff] %v8632_v5  ;;  %v8634_v63 = vpop.f32.mrb[17].mxu0 }
 0x6dc   : > { %11405 = vst [vmem:[#allocation55_spill] sm:$0xff] %v8634_v63  ;;  %v8636_v8 = vpop.f32.mrb[18].mxu0 }
 0x6dd   : > { %11406 = vst [vmem:[#allocation56_spill] sm:$0xff] %v8636_v8  ;;  %v8638_v49 = vpop.f32.mrb[19].mxu0  ;;  %v11208_v8 = vmov 1  }
 0x6de   : > { %11407 = vst [vmem:[#allocation57_spill] sm:$0xff] %v8638_v49  ;;  %7061 = vset.pattern.permute.xlu1 %v11208_v8  ;;  %7062 = vset.pattern.permute.xlu0 %v11208_v8  ;;  %v8718_v8 = vld [vmem:[#allocation3 + $0x10] sm:$0xff] }
 0x6df   : > { %11420 = vst [vmem:[#allocation70_spill] sm:$0xff] %v8718_v8 }
 0x6fc   : > { %v8640_v38 = vpop.f32.mrb[20].mxu0 }
 0x6fd   : > { %11408 = vst [vmem:[#allocation58_spill] sm:$0xff] %v8640_v38  ;;  %v8642_v53 = vpop.f32.mrb[21].mxu0 }
 0x6fe   : > { %11409 = vst [vmem:[#allocation59_spill] sm:$0xff] %v8642_v53  ;;  %v8644_v60 = vpop.f32.mrb[22].mxu0 }
 0x6ff   : > { %11410 = vst [vmem:[#allocation60_spill] sm:$0xff] %v8644_v60  ;;  %v8646_v4 = vpop.f32.mrb[23].mxu0 }
 0x700   : > { %11411 = vst [vmem:[#allocation61_spill] sm:$0xff] %v8646_v4 }
 0x731   : > { %v8648_v59 = vpop.f32.mrb[24].mxu0 }
 0x732   : > { %11412 = vst [vmem:[#allocation62_spill] sm:$0xff] %v8648_v59  ;;  %v8650_v51 = vpop.f32.mrb[25].mxu0 }
 0x733   : > { %11413 = vst [vmem:[#allocation63_spill] sm:$0xff] %v8650_v51  ;;  %v8652_v45 = vpop.f32.mrb[26].mxu0 }
 0x734   : > { %11414 = vst [vmem:[#allocation64_spill] sm:$0xff] %v8652_v45  ;;  %v8654_v46 = vpop.f32.mrb[27].mxu0 }
 0x735   : > { %11415 = vst [vmem:[#allocation65_spill] sm:$0xff] %v8654_v46 }
 0x744   : > { %v8656_v24 = vpop.f32.mrb[28].mxu0 }
 0x745   : > { %11416 = vst [vmem:[#allocation66_spill] sm:$0xff] %v8656_v24  ;;  %v8658_v39 = vpop.f32.mrb[29].mxu0 }
 0x746   : > { %11417 = vst [vmem:[#allocation67_spill] sm:$0xff] %v8658_v39  ;;  %v8660_v41 = vpop.f32.mrb[30].mxu0 }
 0x747   : > { %11418 = vst [vmem:[#allocation68_spill] sm:$0xff] %v8660_v41  ;;  %v8662_v58 = vpop.f32.mrb[31].mxu0 }
 0x748   : > { %11419 = vst [vmem:[#allocation69_spill] sm:$0xff] %v8662_v58 }
 0x74f   : > { %v8664_v43 = vpop.f32.mrb[32].mxu0 }
 0x750   : > { %2064 = vmax.xlane.f32.xlu0 %v8664_v43  ;;  %v8667_v38 = vpop.f32.mrb[33].mxu0 }
 0x751   : > { %2060 = vmax.xlane.f32.xlu1 %v8667_v38  ;;  %v8670_v59 = vpop.f32.mrb[34].mxu0 }
 0x752   : > { %v8672_v51 = vpop.f32.mrb[35].mxu0 }
 0x754   : > { %2062 = vmax.xlane.f32.xlu0 %v8672_v51 }
 0x755   : > { %2066 = vmax.xlane.f32.xlu1 %v8670_v59 }
 0x757   : > { %v8676_v24 = vpop.f32.mrb[36].mxu0 }
 0x758   : > { %v8678_v39 = vpop.f32.mrb[37].mxu0 }
 0x759   : > { %v8680_v41 = vpop.f32.mrb[38].mxu0 }
 0x75a   : > { %v8682_v53 = vpop.f32.mrb[39].mxu0 }
 0x75f   : > { %v8684_v58 = vpop.f32.mrb[40].mxu0 }
 0x760   : > { %v8688_v45 = vpop.f32.mrb[41].mxu0 }
 0x761   : > { %v8690_v49 = vpop.f32.mrb[42].mxu0 }
 0x762   : > { %v8692_v46 = vpop.f32.mrb[43].mxu0 }
 0x766   : > { %2393 = vrot.lane.b32.xlu1 %v8220_v10, %s7684_s4 }
 0x767   : > { %v8696_v60 = vpop.f32.mrb[44].mxu0 }
 0x768   : > { %v8698_v4 = vpop.f32.mrb[45].mxu0 }
 0x769   : > { %v8700_v5 = vpop.f32.mrb[46].mxu0 }
 0x76a   : > { %2395 = vrot.lane.b32.xlu0 %v8218_v9, %s7684_s4  ;;  %v8704_v63 = vpop.f32.mrb[47].mxu0 }
 0x789   : > { %2072 = vmax.xlane.f32.xlu0 %v8676_v24 }
 0x78a   : > { %2074 = vmax.xlane.f32.xlu1 %v8680_v41 }
 0x78d   : > { %2068 = vmax.xlane.f32.xlu0 %v8678_v39 }
 0x78e   : > { %2070 = vmax.xlane.f32.xlu1 %v8682_v53 }
 0x791   : > { %2080 = vmax.xlane.f32.xlu0 %v8684_v58 }
 0x792   : > { %2082 = vmax.xlane.f32.xlu1 %v8690_v49 }
 0x795   : > { %2076 = vmax.xlane.f32.xlu0 %v8688_v45 }
 0x796   : > { %2078 = vmax.xlane.f32.xlu1 %v8692_v46 }
 0x799   : > { %2088 = vmax.xlane.f32.xlu0 %v8696_v60 }
 0x79a   : > { %2090 = vmax.xlane.f32.xlu1 %v8700_v5 }
 0x79d   : > { %2084 = vmax.xlane.f32.xlu0 %v8698_v4 }
 0x79e   : > { %2086 = vmax.xlane.f32.xlu1 %v8704_v63 }
 0x7dd   : > { %v2065_v20 = vpop.xlane.xlu0 %2064 }
 0x7de   : > { %v8721_v29 = vmax.f32 %v8718_v8, %v2065_v20  ;;  %v2061_v25 = vpop.xlane.xlu1 %2060  ;;  %v8737_v20 = vld [vmem:[#allocation3 + $0x8] sm:$0xff] }
 0x7df   : > { %v8726_v19 = vmax.f32 %v8723_v28, %v2061_v25  ;;  %11424 = vst [vmem:[#allocation74_spill] sm:$0xff] %v8737_v20  ;;  %v8817_v28 = vld [vmem:[#allocation3 + $0x58] sm:$0xff] }
 0x7e0   : > { %11421 = vst [vmem:[#allocation71_spill] sm:$0xff] %v8721_v29  ;;  %2721 = vst.msk [vmem:[#allocation3 + $0x10] sm:$0xff] %vm2364_vm5, %v8721_v29  ;;  %2168 = vperm.xlu1 %7061, %v8721_v29  }
 0x7e1   : > { %11423 = vst [vmem:[#allocation73_spill] sm:$0xff] %v8726_v19  ;;  %2719 = vst.msk [vmem:[#allocation3] sm:$0xff] %vm2364_vm5, %v8726_v19  ;;  %v2063_v23 = vpop.xlane.xlu0 %2062 }
 0x7e2   : > { %v8740_v25 = vmax.f32 %v8737_v20, %v2063_v23  ;;  %v2067_v27 = vpop.xlane.xlu1 %2066  ;;  %11438 = vst [vmem:[#allocation88_spill] sm:$0xff] %v8817_v28 }
 0x7e3   : > { %v8745_v8 = vmax.f32 %v8742_v17, %v2067_v27 }
 0x7e4   : > { %11425 = vst [vmem:[#allocation75_spill] sm:$0xff] %v8740_v25  ;;  %2720 = vst.msk [vmem:[#allocation3 + $0x8] sm:$0xff] %vm2364_vm5, %v8740_v25  ;;  %2163 = vperm.xlu0 %7062, %v8740_v25   ;;  %2158 = vperm.xlu1 %7061, %v8726_v19   ;;  %v8797_v19 = vld [vmem:[#allocation3 + $0x28] sm:$0xff] }
 0x7e5   : > { %11427 = vst [vmem:[#allocation77_spill] sm:$0xff] %v8745_v8  ;;  %2722 = vst.msk [vmem:[#allocation3 + $0x18] sm:$0xff] %vm2364_vm5, %v8745_v8  ;;  %v2396_v27 = vpop.permute.xlu0 %2395 }
 0x7e6   : > { %v2394_v32 = vpop.permute.xlu1 %2393  ;;  %11434 = vst [vmem:[#allocation84_spill] sm:$0xff] %v8797_v19 }
 0x7e7   : > { %6603 = vmatprep.subr.bf16.mxu1 %v2394_v32 }
 0x7e8   : > { %2397 = vrot.lane.b32.xlu0 %v8232_v22, %s7684_s4  ;;  %2173 = vperm.xlu1 %7061, %v8745_v8  }
 0x7e9   : > { %6604 = vmatpush3.bf16.msra.mxu1 %v2394_v32  ;;  %v8772_v32 = vld [vmem:[#allocation3 + $0x30] sm:$0xff] }
 0x7ea   : > { %6605 = vmatprep.subr.bf16.mxu1 %v2396_v27  ;;  %11428 = vst [vmem:[#allocation78_spill] sm:$0xff] %v8772_v32 }
 0x7ec   : > { %2401 = vrot.lane.b32.xlu0 %v8244_v34, %s7684_s4  ;;  %2399 = vrot.lane.b32.xlu1 %v8230_v21, %s7684_s4 }
 0x7ed   : > { %6606 = vmatpush3.bf16.msra.mxu1 %v2396_v27  ;;  %v8777_v27 = vld [vmem:[#allocation3 + $0x38] sm:$0xff] }
 0x7ee   : > { %11430 = vst [vmem:[#allocation80_spill] sm:$0xff] %v8777_v27 }
 0x7f0   : > { %2767 = vrot.lane.b32.xlu0 %v8208_v62, %s7686_s20  ;;  %2403 = vrot.lane.b32.xlu1 %v8242_v33, %s7684_s4 }
 0x7f4   : > { %2771 = vrot.lane.b32.xlu0 %v8220_v10, %s7686_s20  ;;  %2769 = vrot.lane.b32.xlu1 %v8206_v61, %s7686_s20 }
 0x816   : > { %v2073_v23 = vpop.xlane.xlu0 %2072 }
 0x817   : > { %v8775_v29 = vmax.f32 %v8772_v32, %v2073_v23  ;;  %v2075_v8 = vpop.xlane.xlu1 %2074  ;;  %v8791_v23 = vld [vmem:[#allocation3 + $0x20] sm:$0xff] }
 0x818   : > { %v8780_v17 = vmax.f32 %v8777_v27, %v2075_v8  ;;  %11432 = vst [vmem:[#allocation82_spill] sm:$0xff] %v8791_v23 }
 0x819   : > { %11429 = vst [vmem:[#allocation79_spill] sm:$0xff] %v8775_v29  ;;  %2725 = vst.msk [vmem:[#allocation3 + $0x30] sm:$0xff] %vm2364_vm5, %v8775_v29  ;;  %2188 = vperm.xlu0 %7062, %v8775_v29  }
 0x81a   : > { %11431 = vst [vmem:[#allocation81_spill] sm:$0xff] %v8780_v17  ;;  %2726 = vst.msk [vmem:[#allocation3 + $0x38] sm:$0xff] %vm2364_vm5, %v8780_v17  ;;  %v2069_v25 = vpop.xlane.xlu0 %2068  ;;  %2193 = vperm.xlu1 %7061, %v8780_v17   ;;  %v8837_v17 = vld [vmem:[#allocation3 + $0x48] sm:$0xff] }
 0x81b   : > { %v8795_v8 = vmax.f32 %v8791_v23, %v2069_v25  ;;  %v2071_v32 = vpop.xlane.xlu1 %2070  ;;  %v8811_v25 = vld [vmem:[#allocation3 + $0x50] sm:$0xff]  ;;  %11442 = vst [vmem:[#allocation92_spill] sm:$0xff] %v8837_v17 }
 0x81c   : > { %v8800_v20 = vmax.f32 %v8797_v19, %v2071_v32  ;;  %11436 = vst [vmem:[#allocation86_spill] sm:$0xff] %v8811_v25  ;;  %v8857_v19 = vld [vmem:[#allocation3 + $0x78] sm:$0xff] }
 0x81d   : > { %11433 = vst [vmem:[#allocation83_spill] sm:$0xff] %v8795_v8  ;;  %2723 = vst.msk [vmem:[#allocation3 + $0x20] sm:$0xff] %vm2364_vm5, %v8795_v8  ;;  %2178 = vperm.xlu0 %7062, %v8795_v8  }
 0x81e   : > { %11435 = vst [vmem:[#allocation85_spill] sm:$0xff] %v8800_v20  ;;  %2724 = vst.msk [vmem:[#allocation3 + $0x28] sm:$0xff] %vm2364_vm5, %v8800_v20  ;;  %v2081_v27 = vpop.xlane.xlu0 %2080  ;;  %2183 = vperm.xlu1 %7061, %v8800_v20  }
 0x81f   : > { %v8815_v32 = vmax.f32 %v8811_v25, %v2081_v27  ;;  %v2083_v29 = vpop.xlane.xlu1 %2082  ;;  %v8830_v27 = vld [vmem:[#allocation3 + $0x40] sm:$0xff]  ;;  %11446 = vst [vmem:[#allocation96_spill] sm:$0xff] %v8857_v19 }
 0x820   : > { %v8820_v23 = vmax.f32 %v8817_v28, %v2083_v29  ;;  %11440 = vst [vmem:[#allocation90_spill] sm:$0xff] %v8830_v27  ;;  %v8878_v28 = vld [vmem:[#allocation3 + $0x68] sm:$0xff] }
 0x821   : > { %11437 = vst [vmem:[#allocation87_spill] sm:$0xff] %v8815_v32  ;;  %2729 = vst.msk [vmem:[#allocation3 + $0x50] sm:$0xff] %vm2364_vm5, %v8815_v32 }
 0x822   : > { %11439 = vst [vmem:[#allocation89_spill] sm:$0xff] %v8820_v23  ;;  %2730 = vst.msk [vmem:[#allocation3 + $0x58] sm:$0xff] %vm2364_vm5, %v8820_v23  ;;  %v2077_v20 = vpop.xlane.xlu0 %2076  ;;  %2208 = vperm.xlu1 %7061, %v8815_v32   ;;  %2213 = vperm.xlu0 %7062, %v8820_v23  }
 0x823   : > { %v8835_v29 = vmax.f32 %v8830_v27, %v2077_v20  ;;  %v2079_v8 = vpop.xlane.xlu1 %2078  ;;  %v8850_v20 = vld [vmem:[#allocation3 + $0x70] sm:$0xff]  ;;  %11450 = vst [vmem:[#allocation100_spill] sm:$0xff] %v8878_v28 }
 0x824   : > { %v8840_v25 = vmax.f32 %v8837_v17, %v2079_v8  ;;  %11444 = vst [vmem:[#allocation94_spill] sm:$0xff] %v8850_v20  ;;  %v8909_v17 = vld [vmem:[#allocation2 + $0x8] sm:$0xff] }
 0x825   : > { %11441 = vst [vmem:[#allocation91_spill] sm:$0xff] %v8835_v29  ;;  %2727 = vst.msk [vmem:[#allocation3 + $0x40] sm:$0xff] %vm2364_vm5, %v8835_v29 }
 0x826   : > { %11443 = vst [vmem:[#allocation93_spill] sm:$0xff] %v8840_v25  ;;  %2728 = vst.msk [vmem:[#allocation3 + $0x48] sm:$0xff] %vm2364_vm5, %v8840_v25  ;;  %v2089_v23 = vpop.xlane.xlu0 %2088  ;;  %2198 = vperm.xlu1 %7061, %v8835_v29   ;;  %2203 = vperm.xlu0 %7062, %v8840_v25  }
 0x827   : > { %v8855_v8 = vmax.f32 %v8850_v20, %v2089_v23  ;;  %v2091_v27 = vpop.xlane.xlu1 %2090  ;;  %v8870_v23 = vld [vmem:[#allocation3 + $0x60] sm:$0xff]  ;;  %11455 = vst [vmem:[#allocation104_spill] sm:$0xff] %v8909_v17 }
 0x828   : > { %v8860_v32 = vmax.f32 %v8857_v19, %v2091_v27  ;;  %11448 = vst [vmem:[#allocation98_spill] sm:$0xff] %v8870_v23  ;;  %v8907_v19 = vld [vmem:[#allocation2 + $0x10] sm:$0xff] }
 0x829   : > { %11445 = vst [vmem:[#allocation95_spill] sm:$0xff] %v8855_v8  ;;  %2733 = vst.msk [vmem:[#allocation3 + $0x70] sm:$0xff] %vm2364_vm5, %v8855_v8 }
 0x82a   : > { %11447 = vst [vmem:[#allocation97_spill] sm:$0xff] %v8860_v32  ;;  %2734 = vst.msk [vmem:[#allocation3 + $0x78] sm:$0xff] %vm2364_vm5, %v8860_v32  ;;  %v2085_v25 = vpop.xlane.xlu0 %2084  ;;  %2773 = vrot.lane.b32.xlu1 %v8218_v9, %s7686_s20  ;;  %2228 = vperm.xlu0 %7062, %v8855_v8   ;;  %v8925_v8 = vld [vmem:[#allocation2 + $0x28] sm:$0xff] }
 0x82b   : > { %v8876_v27 = vmax.f32 %v8870_v23, %v2085_v25  ;;  %v2087_v29 = vpop.xlane.xlu1 %2086  ;;  %v8900_v25 = vld [vmem:[#allocation2] sm:$0xff]  ;;  %11454 = vst [vmem:[#allocation103_spill] sm:$0xff] %v8907_v19  ;;  %11459 = vst [vmem:[#allocation108_spill] sm:$0xff] %v8925_v8 }
 0x82c   : > { %v8881_v20 = vmax.f32 %v8878_v28, %v2087_v29  ;;  %11452 = vst [vmem:[#allocation102_spill] sm:$0xff] %v8900_v25  ;;  %v11453_v29 = vmov 0   ;;  %v8923_v28 = vld [vmem:[#allocation2 + $0x30] sm:$0xff] }
 0x82d   : > { %11449 = vst [vmem:[#allocation99_spill] sm:$0xff] %v8876_v27  ;;  %2731 = vst.msk [vmem:[#allocation3 + $0x60] sm:$0xff] %vm2364_vm5, %v8876_v27 }
 0x82e   : > { %11451 = vst [vmem:[#allocation101_spill] sm:$0xff] %v8881_v20  ;;  %2732 = vst.msk [vmem:[#allocation3 + $0x68] sm:$0xff] %vm2364_vm5, %v8881_v20  ;;  %2218 = vperm.xlu0 %7062, %v8876_v27   ;;  %2223 = vperm.xlu1 %7061, %v8881_v20   ;;  %v8917_v20 = vld [vmem:[#allocation2 + $0x18] sm:$0xff] }
 0x82f   : > { %11457 = vst [vmem:[#allocation106_spill] sm:$0xff] %v8917_v20  ;;  %11458 = vst [vmem:[#allocation107_spill] sm:$0xff] %v8923_v28  ;;  %v8931_v27 = vld [vmem:[#allocation2 + $0x38] sm:$0xff] }
 0x832   : > { %2775 = vrot.lane.b32.xlu0 %v8232_v22, %s7686_s20  ;;  %2233 = vperm.xlu1 %7061, %v8860_v32   ;;  %v8915_v32 = vld [vmem:[#allocation2 + $0x20] sm:$0xff] }
 0x833   : > { %11456 = vst [vmem:[#allocation105_spill] sm:$0xff] %v8915_v32 }
 0x836   : > { %2779 = vrot.lane.b32.xlu0 %v8244_v34, %s7686_s20  ;;  %2777 = vrot.lane.b32.xlu1 %v8230_v21, %s7686_s20 }
 0x837   : > { %7063 = vset.pattern.permute.xlu1 %v11453_v29 }
 0x83a   : > { %2751 = vrot.lane.b32.xlu0 %v8900_v25, %s7686_s20  ;;  %2781 = vrot.lane.b32.xlu1 %v8242_v33, %s7686_s20 }
 0x83e   : > { %2755 = vrot.lane.b32.xlu0 %v8907_v19, %s7686_s20  ;;  %2753 = vrot.lane.b32.xlu1 %v8909_v17, %s7686_s20 }
 0x842   : > { %2759 = vrot.lane.b32.xlu0 %v8915_v32, %s7686_s20  ;;  %2757 = vrot.lane.b32.xlu1 %v8917_v20, %s7686_s20 }
 0x846   : > { %2763 = vrot.lane.b32.xlu0 %v8923_v28, %s7686_s20  ;;  %2761 = vrot.lane.b32.xlu1 %v8925_v8, %s7686_s20 }
 0x84a   : > { %2765 = vrot.lane.b32.xlu1 %v8931_v27, %s7686_s20  ;;  %s11749_s20 = sld [smem:[#allocation137_spill]] (!%p6220_p6) }
 0x85f   : > { %v2169_v23 = vpop.permute.xlu1 %2168 }
 0x860   : > { %v2238_v32 = vsub.f32 %v8664_v43, %v2169_v23 }
 0x862   : > { %v2256_v33 = vmul.f32 1.442695, %v2238_v32 }
 0x863   : > { %v2164_v19 = vpop.permute.xlu0 %2163  ;;  %v2159_v25 = vpop.permute.xlu1 %2158 }
 0x864   : > { %v2237_v20 = vsub.f32 %v8672_v51, %v2164_v19  ;;  %v2236_v17 = vsub.f32 %v8667_v38, %v2159_v25 }
 0x865   : > { %1489 = vadd.xlane.f32.xlu0 %v8548_v44 }
 0x866   : > { %v2254_v28 = vmul.f32 1.442695, %v2237_v20  ;;  %v2252_v29 = vmul.f32 1.442695, %v2236_v17 }
 0x867   : > { %v2398_v8 = vpop.permute.xlu0 %2397  ;;  %v2174_v34 = vpop.permute.xlu1 %2173 }
 0x868   : > { %7112 = vpow2.f32 %v2254_v28  ;;  %v2239_v21 = vsub.f32 %v8670_v59, %v2174_v34  ;;  %6607 = vmatprep.subr.bf16.mxu1 %v2398_v8 }
 0x869   : > { %7114 = vpow2.f32 %v2252_v29  ;;  %6608 = vmatpush3.bf16.msra.mxu1 %v2398_v8  ;;  %1493 = vadd.xlane.f32.xlu0 %v8556_v18 }
 0x86a   : > { %v2258_v43 = vmul.f32 1.442695, %v2239_v21  ;;  %7116 = vpow2.f32 %v2256_v33 }
 0x86b   : > { %v2400_v19 = vpop.permute.xlu1 %2399  ;;  %v2402_v38 = vpop.permute.xlu0 %2401 }
 0x86c   : > { %7118 = vpow2.f32 %v2258_v43  ;;  %6609 = vmatprep.subr.bf16.mxu1 %v2400_v19 }
 0x86d   : > { %1495 = vadd.xlane.f32.xlu0 %v8552_v54  ;;  %6610 = vmatpush3.bf16.msra.mxu1 %v2400_v19 }
 0x86e   : > { %1491 = vadd.xlane.f32.xlu1 %v8550_v47  ;;  %6611 = vmatprep.subr.bf16.mxu1 %v2402_v38 }
 0x86f   : > { %v2404_v17 = vpop.permute.xlu1 %2403  ;;  %v2768_v47 = vpop.permute.xlu0 %2767 }
 0x870   : > { %v2808_v18 = vsel %vm1071_vm3, %v2768_v47, 0 }
 0x871   : > { %1499 = vadd.xlane.f32.xlu0 %v8576_v42  ;;  %6612 = vmatpush3.bf16.msra.mxu1 %v2402_v38 }
 0x872   : > { %v8944_v34 = vpop.eup %7112  ;;  %1497 = vadd.xlane.f32.xlu1 %v8571_v50  ;;  %6613 = vmatprep.subr.bf16.mxu1 %v2404_v17 }
 0x873   : > { %v8947_v21 = vpop.eup %7114  ;;  %v2770_v50 = vpop.permute.xlu1 %2769 }
 0x874   : > { %v2381_v33 = vpack.c.bf16 %v8944_v34, %v8947_v21  ;;  %v8951_v28 = vpop.eup %7116  ;;  %v2772_v42 = vpop.permute.xlu0 %2771 }
 0x875   : > { %1503 = vadd.xlane.f32.xlu0 %v8573_v11  ;;  %6614 = vmatpush3.bf16.msra.mxu1 %v2404_v17  ;;  %v2811_v11 = vsel %vm1071_vm3, %v2770_v50, 0 }
 0x876   : > { %v8954_v44 = vpop.eup %7118  ;;  %6615 = vmatprep.mubr.bf16.mxu1 %v2381_v33  ;;  %1501 = vadd.xlane.f32.xlu1 %v8578_v52  ;;  %v11460_v52 = vsub.f32 %v8347_v3, %v8355_v6 }
 0x877   : > { %6879 = vmatprep.subr.msk.bf16.mxu1 %vm1071_vm3, %v2768_v47  ;;  %v2382_v54 = vpack.c.bf16 %v8954_v44, %v8951_v28 }
 0x879   : > { %1507 = vadd.xlane.f32.xlu0 %v8595_v57  ;;  %6616 = vmatmul.mubr.bf16.vlgmr.msra.gmra.mrb[16].mxu1 %v2382_v54 }
 0x87a   : > { %1505 = vadd.xlane.f32.xlu1 %v8589_v40  ;;  %v1297_v40 = vmul.f32 1.442695, %v11460_v52 }
 0x87c   : > { %7120 = vpow2.f32 %v1297_v40 }
 0x87d   : > { %1511 = vadd.xlane.f32.xlu0 %v8593_v56  ;;  %v2814_v56 = vsel %vm1071_vm3, %v2772_v42, 0 }
 0x87e   : > { %1509 = vadd.xlane.f32.xlu1 %v8597_v37  ;;  %6632 = vmatpush3.bf16.xpose.msra.mxu1 %v2808_v18 }
 0x87f   : > { %6880 = vmatprep.subr.msk.bf16.mxu1 %vm1071_vm3, %v2770_v50 }
 0x881   : > { %1515 = vadd.xlane.f32.xlu0 %v8611_v55 }
 0x882   : > { %1513 = vadd.xlane.f32.xlu1 %v8609_v48 }
 0x885   : > { %1519 = vadd.xlane.f32.xlu0 %v8618_v35 }
 0x886   : > { %1517 = vadd.xlane.f32.xlu1 %v8616_v14  ;;  %6634 = vmatpush3.bf16.xpose.msra.mxu1 %v2811_v11  ;;  %v8976_v57 = vpop.eup %7120 }
 0x887   : > { %6881 = vmatprep.subr.msk.bf16.mxu1 %vm1071_vm3, %v2772_v42 }
 0x88e   : > { %6636 = vmatpush3.bf16.xpose.msra.mxu1 %v2814_v56 }
 0x897   : > { %1709 = vperm.xlu1 %7063, %v8976_v57  }
 0x898   : > { %v2189_v37 = vpop.permute.xlu0 %2188 }
 0x899   : > { %v2242_v48 = vsub.f32 %v8676_v24, %v2189_v37  ;;  %v2194_v55 = vpop.permute.xlu1 %2193 }
 0x89a   : > { %v2243_v14 = vsub.f32 %v8680_v41, %v2194_v55 }
 0x89b   : > { %v2264_v35 = vmul.f32 1.442695, %v2242_v48  ;;  %3273 = vrot.lane.b32.xlu0 %v8208_v62, %s7687_s10  ;;  %3275 = vrot.lane.b32.xlu1 %v8206_v61, %s7687_s10 }
 0x89c   : > { %v2266_v3 = vmul.f32 1.442695, %v2243_v14  ;;  %v2179_v6 = vpop.permute.xlu0 %2178 }
 0x89d   : > { %v2240_v59 = vsub.f32 %v8678_v39, %v2179_v6  ;;  %v2184_v51 = vpop.permute.xlu1 %2183  ;;  %7122 = vpow2.f32 %v2264_v35 }
 0x89e   : > { %v2241_v32 = vsub.f32 %v8682_v53, %v2184_v51  ;;  %7124 = vpow2.f32 %v2266_v3 }
 0x89f   : > { %v2260_v24 = vmul.f32 1.442695, %v2240_v59  ;;  %3277 = vrot.lane.b32.xlu0 %v8220_v10, %s7687_s10 }
 0x8a0   : > { %v2262_v41 = vmul.f32 1.442695, %v2241_v32 }
 0x8a1   : > { %7126 = vpow2.f32 %v2260_v24  ;;  %v2214_v20 = vpop.permute.xlu0 %2213  ;;  %v2209_v8 = vpop.permute.xlu1 %2208 }
 0x8a2   : > { %7128 = vpow2.f32 %v2262_v41  ;;  %v2247_v23 = vsub.f32 %v8690_v49, %v2214_v20  ;;  %v2246_v25 = vsub.f32 %v8684_v58, %v2209_v8 }
 0x8a4   : > { %v2274_v29 = vmul.f32 1.442695, %v2247_v23  ;;  %v2272_v39 = vmul.f32 1.442695, %v2246_v25 }
 0x8a5   : > { %v2204_v43 = vpop.permute.xlu0 %2203  ;;  %v2199_v19 = vpop.permute.xlu1 %2198 }
 0x8a6   : > { %v2245_v53 = vsub.f32 %v8692_v46, %v2204_v43  ;;  %v2244_v38 = vsub.f32 %v8688_v45, %v2199_v19  ;;  %7130 = vpow2.f32 %v2274_v29 }
 0x8a7   : > { %v8993_v47 = vpop.eup %7122  ;;  %7132 = vpow2.f32 %v2272_v39 }
 0x8a8   : > { %v2270_v17 = vmul.f32 1.442695, %v2245_v53  ;;  %v2268_v33 = vmul.f32 1.442695, %v2244_v38  ;;  %v8995_v50 = vpop.eup %7124 }
 0x8a9   : > { %v2229_v54 = vpop.permute.xlu0 %2228  ;;  %v2774_v18 = vpop.permute.xlu1 %2773  ;;  %v2384_v37 = vpack.c.bf16 %v8995_v50, %v8993_v47 }
 0x8aa   : > { %7134 = vpow2.f32 %v2270_v17  ;;  %6882 = vmatprep.subr.msk.bf16.mxu1 %vm1071_vm3, %v2774_v18  ;;  %v2817_v49 = vsel %vm1071_vm3, %v2774_v18, 0  ;;  %v2250_v46 = vsub.f32 %v8696_v60, %v2229_v54 }
 0x8ab   : > { %v8999_v58 = vpop.eup %7126  ;;  %7136 = vpow2.f32 %v2268_v33  ;;  %6638 = vmatpush3.bf16.xpose.msra.mxu1 %v2817_v49 }
 0x8ac   : > { %v9001_v45 = vpop.eup %7128  ;;  %v2280_v14 = vmul.f32 1.442695, %v2250_v46 }
 0x8ad   : > { %v2219_v11 = vpop.permute.xlu0 %2218  ;;  %v2224_v42 = vpop.permute.xlu1 %2223  ;;  %v2383_v52 = vpack.c.bf16 %v9001_v45, %v8999_v58 }
 0x8ae   : > { %v2248_v40 = vsub.f32 %v8698_v4, %v2219_v11  ;;  %v2249_v56 = vsub.f32 %v8704_v63, %v2224_v42 }
 0x8af   : > { %6619 = vmatprep.mubr.bf16.mxu1 %v2383_v52  ;;  %v11461_v52 = vsub.f32 %v8342_v0, %v8345_v2  ;;  %v11465_v2 = vsub.f32 %v8392_v26, %v8406_v30  ;;  %v11470_v26 = vld [vmem:[#allocation44_spill] sm:$0xff]  ;;  %v11471_v30 = vld [vmem:[#allocation45_spill] sm:$0xff] }
 0x8b0   : > { %v2276_v48 = vmul.f32 1.442695, %v2248_v40  ;;  %v2278_v55 = vmul.f32 1.442695, %v2249_v56  ;;  %6620 = vmatmul.mubr.bf16.gmra.mrb[20].mxu1 %v2384_v37  ;;  %v9010_v60 = vpop.eup %7130  ;;  %v11462_v56 = vsub.f32 %v8357_v7, %v8365_v12  ;;  %v11466_v7 = vsub.f32 %v8408_v31, %v8417_v36  ;;  %v11473_v31 = vld [vmem:[#allocation37_spill] sm:$0xff]  ;;  %v11474_v36 = vld [vmem:[#allocation39_spill] sm:$0xff] }
 0x8b1   : > { %v2776_v35 = vpop.permute.xlu0 %2775  ;;  %v2234_v3 = vpop.permute.xlu1 %2233  ;;  %v1301_v40 = vmul.f32 1.442695, %v11461_v52  ;;  %v11479_v52 = vld [vmem:[#allocation40_spill] sm:$0xff] }
 0x8b2   : > { %7138 = vpow2.f32 %v2276_v48  ;;  %v2251_v6 = vsub.f32 %v8700_v5, %v2234_v3  ;;  %6883 = vmatprep.subr.msk.bf16.mxu1 %vm1071_vm3, %v2776_v35  ;;  %v2820_v4 = vsel %vm1071_vm3, %v2776_v35, 0  ;;  %v9015_v63 = vpop.eup %7132  ;;  %v1303_v37 = vmul.f32 1.442695, %v11462_v56 }
 0x8b3   : > { %7140 = vpow2.f32 %v2278_v55  ;;  %6640 = vmatpush3.bf16.xpose.msra.mxu1 %v2820_v4  ;;  %v2386_v41 = vpack.c.bf16 %v9010_v60, %v9015_v63  ;;  %v11463_v55 = vsub.f32 %v8367_v13, %v8375_v16  ;;  %v11464_v35 = vsub.f32 %v8419_v1, %v8428_v15  ;;  %v11467_v13 = vld [vmem:[#allocation36_spill] sm:$0xff]  ;;  %v11468_v16 = vld [vmem:[#allocation38_spill] sm:$0xff] }
 0x8b4   : > { %v9017_v59 = vpop.eup %7134  ;;  %v2282_v51 = vmul.f32 1.442695, %v2251_v6  ;;  %7142 = vpow2.f32 %v2280_v14  ;;  %v1305_v3 = vmul.f32 1.442695, %v11465_v2  ;;  %v1457_v6 = vld [vmem:[#allocation4] sm:$0xff]  ;;  %v11469_v4 = vsub.f32 %v11467_v13, %v11468_v16 }
 0x8b5   : > { %v9019_v32 = vpop.eup %7136  ;;  %v2778_v24 = vpop.permute.xlu1 %2777  ;;  %v1299_v14 = vmul.f32 1.442695, %v11463_v55  ;;  %v1307_v0 = vmul.f32 1.442695, %v11464_v35  ;;  %v1311_v12 = vmul.f32 1.442695, %v11466_v7 }
 0x8b6   : > { %7144 = vpow2.f32 %v2282_v51  ;;  %6884 = vmatprep.subr.msk.bf16.mxu1 %vm1071_vm3, %v2778_v24  ;;  %v2385_v5 = vpack.c.bf16 %v9017_v59, %v9019_v32  ;;  %v2823_v20 = vsel %vm1071_vm3, %v2778_v24, 0  ;;  %v2780_v8 = vpop.permute.xlu0 %2779  ;;  %v1309_v51 = vmul.f32 1.442695, %v11469_v4  ;;  %v1461_v7 = vld [vmem:[#allocation4 + $0x20] sm:$0xff] }
 0x8b7   : > { %v2826_v38 = vsel %vm1071_vm3, %v2780_v8, 0  ;;  %7146 = vpow2.f32 %v1301_v40  ;;  %v1473_v24 = vmul.f32 %v8976_v57, %v1457_v6  ;;  %v11480_v40 = vld [vmem:[#allocation41_spill] sm:$0xff] }
 0x8b8   : > { %6623 = vmatprep.mubr.bf16.mxu1 %v2385_v5  ;;  %7148 = vpow2.f32 %v1303_v37  ;;  %v1459_v5 = vld [vmem:[#allocation4 + $0x10] sm:$0xff]  ;;  %v11481_v56 = vsub.f32 %v11479_v52, %v11480_v40  ;;  %v11483_v13 = vld [vmem:[#allocation53_spill] sm:$0xff] }
 0x8b9   : > { %6624 = vmatmul.mubr.bf16.gmra.mrb[24].mxu1 %v2386_v41  ;;  %v2782_v17 = vpop.permute.xlu1 %2781  ;;  %7150 = vpow2.f32 %v1299_v14 }
 0x8ba   : > { %v2752_v53 = vpop.permute.xlu0 %2751  ;;  %v2829_v33 = vsel %vm1071_vm3, %v2782_v17, 0  ;;  %7152 = vpow2.f32 %v1307_v0  ;;  %v1317_v37 = vmul.f32 1.442695, %v11481_v56  ;;  %v1462_v0 = vld [vmem:[#allocation4 + $0x28] sm:$0xff] }
 0x8bb   : > { %6642 = vmatpush3.bf16.xpose.msra.mxu1 %v2823_v20  ;;  %7154 = vpow2.f32 %v1305_v3  ;;  %v11472_v20 = vsub.f32 %v11470_v26, %v11471_v30 }
 0x8bc   : > { %v9027_v23 = vpop.eup %7138  ;;  %6885 = vmatprep.subr.msk.bf16.mxu1 %vm1071_vm3, %v2780_v8  ;;  %7156 = vpow2.f32 %v1311_v12  ;;  %v11482_v12 = vld [vmem:[#allocation52_spill] sm:$0xff] }
 0x8bd   : > { %v9030_v25 = vpop.eup %7140  ;;  %v2754_v54 = vpop.permute.xlu1 %2753  ;;  %v1315_v8 = vmul.f32 1.442695, %v11472_v20  ;;  %7158 = vpow2.f32 %v1309_v51  ;;  %v11484_v16 = vsub.f32 %v11482_v12, %v11483_v13 }
 0x8be   : > { %v2387_v29 = vpack.c.bf16 %v9030_v25, %v9027_v23  ;;  %v9034_v39 = vpop.eup %7142  ;;  %v2756_v18 = vpop.permute.xlu0 %2755 }
 0x8bf   : > { %7160 = vpow2.f32 %v1315_v8  ;;  %v1323_v4 = vmul.f32 1.442695, %v11484_v16 }
 0x8c0   : > { %v9036_v43 = vpop.eup %7144  ;;  %6627 = vmatprep.mubr.bf16.mxu1 %v2387_v29  ;;  %v11475_v29 = vsub.f32 %v11473_v31, %v11474_v36  ;;  %v1464_v31 = vld [vmem:[#allocation4 + $0x38] sm:$0xff] }
 0x8c1   : > { %v2388_v19 = vpack.c.bf16 %v9036_v43, %v9034_v39  ;;  %v2758_v49 = vpop.permute.xlu1 %2757  ;;  %v9073_v1 = vpop.eup %7146 }
 0x8c2   : > { %v2760_v46 = vpop.permute.xlu0 %2759  ;;  %v9083_v57 = vpop.eup %7148 }
 0x8c3   : > { %6628 = vmatmul.mubr.bf16.gmra.mrb[28].mxu1 %v2388_v19  ;;  %v1313_v19 = vmul.f32 1.442695, %v11475_v29 }
 0x8c4   : > { %6644 = vmatpush3.bf16.xpose.msra.mxu1 %v2826_v38  ;;  %6647 = vmatprep.mubr.msk.bf16.mxu1 %vm1071_vm3, %v2752_v53  ;;  %v1475_v53 = vmul.f32 %v9073_v1, %v1459_v5 }
 0x8c5   : > { %6886 = vmatprep.subr.msk.bf16.mxu1 %vm1071_vm3, %v2782_v17  ;;  %v2762_v11 = vpop.permute.xlu1 %2761  ;;  %v1460_v17 = vld [vmem:[#allocation4 + $0x18] sm:$0xff]  ;;  %7162 = vpow2.f32 %v1313_v19 }
 0x8c6   : > { %v2764_v42 = vpop.permute.xlu0 %2763 }
 0x8c9   : > { %v2766_v48 = vpop.permute.xlu1 %2765 }
 0x8cc   : > { %6646 = vmatpush3.bf16.xpose.msra.mxu1 %v2829_v33  ;;  %v9085_v33 = vpop.eup %7150 }
 0x8cd   : > { %v9095_v55 = vpop.eup %7152 }
 0x8ce   : > { %v9098_v2 = vpop.eup %7154  ;;  %v1478_v26 = vmul.f32 %v9095_v55, %v1462_v0 }
 0x8cf   : > { %v9108_v30 = vpop.eup %7156  ;;  %v1477_v8 = vmul.f32 %v9098_v2, %v1461_v7 }
 0x8d0   : > { %v9112_v36 = vpop.eup %7158  ;;  %v1480_v40 = vmul.f32 %v9108_v30, %v1464_v31 }
 0x8d1   : > { %v9122_v56 = vpop.eup %7160 }
 0x8d3   : > { %6648 = vmatmul.mubr.msk.bf16.vlgmr.msra.gmra.mrb[32].mxu1 %vm1071_vm3, %v2754_v54 }
 0x8d4   : > { %6651 = vmatprep.mubr.msk.bf16.mxu1 %vm1071_vm3, %v2756_v18  ;;  %v1458_v18 = vld [vmem:[#allocation4 + $0x8] sm:$0xff] }
 0x8d5   : > { %v1474_v35 = vmul.f32 %v9085_v33, %v1458_v18 }
 0x8db   : > { %6652 = vmatmul.mubr.msk.bf16.gmra.mrb[36].mxu1 %vm1071_vm3, %v2758_v49  ;;  %v11476_v49 = vld [vmem:[#allocation42_spill] sm:$0xff] }
 0x8dc   : > { %6655 = vmatprep.mubr.msk.bf16.mxu1 %vm1071_vm3, %v2760_v46  ;;  %v11477_v46 = vld [vmem:[#allocation43_spill] sm:$0xff] }
 0x8e3   : > { %6656 = vmatmul.mubr.msk.bf16.gmra.mrb[40].mxu1 %vm1071_vm3, %v2762_v11  ;;  %v11478_v11 = vsub.f32 %v11476_v49, %v11477_v46  ;;  %v11491_v46 = vld [vmem:[#allocation46_spill] sm:$0xff] }
 0x8e4   : > { %6659 = vmatprep.mubr.msk.bf16.mxu1 %vm1071_vm3, %v2764_v42 }
 0x8e5   : > { %v1319_v42 = vmul.f32 1.442695, %v11478_v11  ;;  %v11492_v11 = vld [vmem:[#allocation47_spill] sm:$0xff] }
 0x8e7   : > { %7164 = vpow2.f32 %v1319_v42  ;;  %v11493_v42 = vsub.f32 %v11491_v46, %v11492_v11 }
 0x8e8   : > { %7166 = vpow2.f32 %v1317_v37 }
 0x8e9   : > { %7168 = vpow2.f32 %v1323_v4  ;;  %v1325_v52 = vmul.f32 1.442695, %v11493_v42 }
 0x8eb   : > { %6660 = vmatmul.mubr.msk.bf16.gmra.mrb[44].mxu1 %vm1071_vm3, %v2766_v48  ;;  %v1476_v48 = vmul.f32 %v9083_v57, %v1460_v17  ;;  %v11489_v17 = vld [vmem:[#allocation51_spill] sm:$0xff] }
 0x8f2   : > { %v1490_v15 = vpop.xlane.xlu0 %1489 }
 0x8f3   : > { %v1521_v41 = vadd.f32 %v1490_v15, %v1473_v24  ;;  %v11485_v24 = vld [vmem:[#allocation48_spill] sm:$0xff]  ;;  %v11486_v15 = vld [vmem:[#allocation49_spill] sm:$0xff] }
 0x8f4   : > { %v11487_v5 = vsub.f32 %v11485_v24, %v11486_v15 }
 0x8f5   : > { %1538 = vst.msk [vmem:[#allocation4] sm:$0xff] %vm1537_vm4, %v1521_v41 }
 0x8f6   : > { %v1494_v38 = vpop.xlane.xlu0 %1493  ;;  %v1321_v41 = vmul.f32 1.442695, %v11487_v5 }
 0x8f7   : > { %v1523_v54 = vadd.f32 %v1494_v38, %v1475_v53  ;;  %v1463_v53 = vld [vmem:[#allocation4 + $0x30] sm:$0xff]  ;;  %v11488_v38 = vld [vmem:[#allocation50_spill] sm:$0xff] }
 0x8f8   : > { %7170 = vpow2.f32 %v1321_v41  ;;  %v1467_v41 = vld [vmem:[#allocation4 + $0x50] sm:$0xff] }
 0x8f9   : > { %1540 = vst.msk [vmem:[#allocation4 + $0x10] sm:$0xff] %vm1537_vm4, %v1523_v54  ;;  %v11490_v54 = vsub.f32 %v11488_v38, %v11489_v17 }
 0x8fa   : > { %v1496_v14 = vpop.xlane.xlu0 %1495 }
 0x8fb   : > { %v1524_v3 = vadd.f32 %v1496_v14, %v1476_v48  ;;  %v1492_v6 = vpop.xlane.xlu1 %1491  ;;  %v1327_v18 = vmul.f32 1.442695, %v11490_v54  ;;  %v1479_v48 = vmul.f32 %v9112_v36, %v1463_v53  ;;  %v1466_v14 = vld [vmem:[#allocation4 + $0x48] sm:$0xff]  ;;  %v1469_v54 = vld [vmem:[#allocation4 + $0x60] sm:$0xff] }
 0x8fc   : > { %v1522_v51 = vadd.f32 %v1492_v6, %v1474_v35  ;;  %v9126_v35 = vpop.eup %7162  ;;  %v1465_v6 = vld [vmem:[#allocation4 + $0x40] sm:$0xff]  ;;  %v1482_v12 = vmul.f32 %v9122_v56, %v1466_v14  ;;  %v1471_v14 = vld [vmem:[#allocation4 + $0x70] sm:$0xff] }
 0x8fd   : > { %1541 = vst.msk [vmem:[#allocation4 + $0x18] sm:$0xff] %vm1537_vm4, %v1524_v3  ;;  %7172 = vpow2.f32 %v1327_v18  ;;  %v9130_v13 = vpop.eup %7164  ;;  %v1481_v4 = vmul.f32 %v9126_v35, %v1465_v6 }
 0x8fe   : > { %1539 = vst.msk [vmem:[#allocation4 + $0x8] sm:$0xff] %vm1537_vm4, %v1522_v51  ;;  %v1500_v20 = vpop.xlane.xlu0 %1499  ;;  %7174 = vpow2.f32 %v1325_v52  ;;  %v1468_v51 = vld [vmem:[#allocation4 + $0x58] sm:$0xff]  ;;  %v9134_v24 = vpop.eup %7166 }
 0x8ff   : > { %v1526_v29 = vadd.f32 %v1500_v20, %v1478_v26  ;;  %v1498_v19 = vpop.xlane.xlu1 %1497  ;;  %v1484_v20 = vmul.f32 %v9130_v13, %v1468_v51  ;;  %v1472_v52 = vld [vmem:[#allocation4 + $0x78] sm:$0xff]  ;;  %v1691_v51 = vld [vmem:[#allocation5] sm:$0xff] }
 0x900   : > { %v1525_v49 = vadd.f32 %v1498_v19, %v1477_v8  ;;  %v9138_v8 = vpop.eup %7168  ;;  %v1470_v19 = vld [vmem:[#allocation4 + $0x68] sm:$0xff] }
 0x901   : > { %1543 = vst.msk [vmem:[#allocation4 + $0x28] sm:$0xff] %vm1537_vm4, %v1526_v29  ;;  %v1483_v29 = vmul.f32 %v9134_v24, %v1467_v41 }
 0x902   : > { %1542 = vst.msk [vmem:[#allocation4 + $0x20] sm:$0xff] %vm1537_vm4, %v1525_v49  ;;  %v1504_v37 = vpop.xlane.xlu0 %1503  ;;  %v9142_v53 = vpop.eup %7170  ;;  %v1486_v49 = vmul.f32 %v9138_v8, %v1470_v19 }
 0x903   : > { %v1528_v0 = vadd.f32 %v1504_v37, %v1480_v40  ;;  %v1502_v3 = vpop.xlane.xlu1 %1501  ;;  %v1485_v42 = vmul.f32 %v9142_v53, %v1469_v54 }
 0x904   : > { %v1527_v7 = vadd.f32 %v1502_v3, %v1479_v48 }
 0x905   : > { %1545 = vst.msk [vmem:[#allocation4 + $0x38] sm:$0xff] %vm1537_vm4, %v1528_v0 }
 0x906   : > { %1544 = vst.msk [vmem:[#allocation4 + $0x30] sm:$0xff] %vm1537_vm4, %v1527_v7  ;;  %v1508_v16 = vpop.xlane.xlu0 %1507 }
 0x907   : > { %v1530_v15 = vadd.f32 %v1508_v16, %v1482_v12  ;;  %v1506_v5 = vpop.xlane.xlu1 %1505  ;;  %v9146_v46 = vpop.eup %7172 }
 0x908   : > { %v1529_v26 = vadd.f32 %v1506_v5, %v1481_v4  ;;  %v9150_v40 = vpop.eup %7174  ;;  %v1488_v3 = vmul.f32 %v9146_v46, %v1472_v52 }
 0x909   : > { %1547 = vst.msk [vmem:[#allocation4 + $0x48] sm:$0xff] %vm1537_vm4, %v1530_v15  ;;  %v1487_v7 = vmul.f32 %v9150_v40, %v1471_v14 }
 0x90a   : > { %1546 = vst.msk [vmem:[#allocation4 + $0x40] sm:$0xff] %vm1537_vm4, %v1529_v26  ;;  %v1512_v31 = vpop.xlane.xlu0 %1511  ;;  %v11494_v26 = vld [vmem:[#allocation55_spill] sm:$0xff] }
 0x90b   : > { %v1532_v38 = vadd.f32 %v1512_v31, %v1484_v20  ;;  %v1510_v17 = vpop.xlane.xlu1 %1509 }
 0x90c   : > { %v1531_v18 = vadd.f32 %v1510_v17, %v1483_v29 }
 0x90d   : > { %1549 = vst.msk [vmem:[#allocation4 + $0x58] sm:$0xff] %vm1537_vm4, %v1532_v38 }
 0x90e   : > { %1548 = vst.msk [vmem:[#allocation4 + $0x50] sm:$0xff] %vm1537_vm4, %v1531_v18  ;;  %v1516_v11 = vpop.xlane.xlu0 %1515 }
 0x90f   : > { %v1534_v37 = vadd.f32 %v1516_v11, %v1486_v49  ;;  %v1514_v48 = vpop.xlane.xlu1 %1513 }
 0x910   : > { %v1533_v0 = vadd.f32 %v1514_v48, %v1485_v42 }
 0x911   : > { %1551 = vst.msk [vmem:[#allocation4 + $0x68] sm:$0xff] %vm1537_vm4, %v1534_v37 }
 0x912   : > { %1550 = vst.msk [vmem:[#allocation4 + $0x60] sm:$0xff] %vm1537_vm4, %v1533_v0  ;;  %v1520_v6 = vpop.xlane.xlu0 %1519 }
 0x913   : > { %v1536_v12 = vadd.f32 %v1520_v6, %v1488_v3  ;;  %v1518_v16 = vpop.xlane.xlu1 %1517 }
 0x914   : > { %v1535_v4 = vadd.f32 %v1518_v16, %v1487_v7 }
 0x915   : > { %1553 = vst.msk [vmem:[#allocation4 + $0x78] sm:$0xff] %vm1537_vm4, %v1536_v12 }
 0x916   : > { %1552 = vst.msk [vmem:[#allocation4 + $0x70] sm:$0xff] %vm1537_vm4, %v1535_v4  ;;  %v3274_v15 = vpop.permute.xlu0 %3273 }
 0x917   : > { %6663 = vmatprep.subr.bf16.mxu0 %v3274_v15  ;;  %v1710_v5 = vpop.permute.xlu1 %1709 }
 0x918   : > { %v1787_v41 = vmul.f32 %v1710_v5, %v1691_v51  ;;  %6664 = vmatpush3.bf16.msra.mxu0 %v3274_v15 }
 0x91a   : > { %v1803_v20 = vadd.f32 %v1787_v41, %v11494_v26  ;;  %v3278_v29 = vpop.permute.xlu0 %3277 }
 0x91b   : > { %v3276_v31 = vpop.permute.xlu1 %3275 }
 0x91c   : > { %1819 = vst.msk [vmem:[#allocation5] sm:$0xff] %vm1071_vm3, %v1803_v20  ;;  %6665 = vmatprep.subr.bf16.mxu0 %v3276_v31 }
 0x91d   : > { %6666 = vmatpush3.bf16.msra.mxu0 %v3276_v31  ;;  %v11264_v31 = vmov 2  }
 0x91e   : > { %6667 = vmatprep.subr.bf16.mxu0 %v3278_v29  ;;  %7064 = vset.pattern.permute.xlu1 %v11264_v31 }
 0x91f   : > { %7065 = vset.pattern.permute.xlu0 %v11264_v31 }
 0x921   : > { %6668 = vmatpush3.bf16.msra.mxu0 %v3278_v29 }
 0x94c   : > { %v9160_v19 = vpop.f32.mrb[16].mxu1 }
 0x94d   : > { %11495 = vst [vmem:[#allocation36_spill] sm:$0xff] %v9160_v19  ;;  %v9162_v38 = vpop.f32.mrb[17].mxu1 }
 0x94e   : > { %11496 = vst [vmem:[#allocation38_spill] sm:$0xff] %v9162_v38  ;;  %v9164_v17 = vpop.f32.mrb[18].mxu1 }
 0x94f   : > { %11497 = vst [vmem:[#allocation44_spill] sm:$0xff] %v9164_v17  ;;  %v9166_v54 = vpop.f32.mrb[19].mxu1 }
 0x950   : > { %11498 = vst [vmem:[#allocation45_spill] sm:$0xff] %v9166_v54 }
 0x983   : > { %v9168_v18 = vpop.f32.mrb[20].mxu1 }
 0x984   : > { %11499 = vst [vmem:[#allocation37_spill] sm:$0xff] %v9168_v18  ;;  %v9170_v49 = vpop.f32.mrb[21].mxu1  ;;  %v9259_v18 = vld [vmem:[#allocation3] sm:$0xff] }
 0x985   : > { %11500 = vst [vmem:[#allocation39_spill] sm:$0xff] %v9170_v49  ;;  %v9172_v11 = vpop.f32.mrb[22].mxu1  ;;  %11517 = vst [vmem:[#allocation112_spill] sm:$0xff] %v9259_v18 }
 0x986   : > { %11501 = vst [vmem:[#allocation42_spill] sm:$0xff] %v9172_v11  ;;  %v9174_v42 = vpop.f32.mrb[23].mxu1 }
 0x987   : > { %11502 = vst [vmem:[#allocation43_spill] sm:$0xff] %v9174_v42  ;;  %v9244_v42 = vld [vmem:[#allocation3 + $0x10] sm:$0xff] }
 0x988   : > { %11513 = vst [vmem:[#allocation55_spill] sm:$0xff] %v9244_v42 }
 0x98c   : > { %v9176_v52 = vpop.f32.mrb[24].mxu1 }
 0x98d   : > { %11503 = vst [vmem:[#allocation40_spill] sm:$0xff] %v9176_v52  ;;  %v9178_v37 = vpop.f32.mrb[25].mxu1  ;;  %v9268_v52 = vld [vmem:[#allocation3 + $0x8] sm:$0xff] }
 0x98e   : > { %11504 = vst [vmem:[#allocation41_spill] sm:$0xff] %v9178_v37  ;;  %v9180_v48 = vpop.f32.mrb[26].mxu1  ;;  %11519 = vst [vmem:[#allocation114_spill] sm:$0xff] %v9268_v52 }
 0x98f   : > { %11505 = vst [vmem:[#allocation52_spill] sm:$0xff] %v9180_v48  ;;  %v9182_v14 = vpop.f32.mrb[27].mxu1 }
 0x990   : > { %11506 = vst [vmem:[#allocation53_spill] sm:$0xff] %v9182_v14 }
 0x996   : > { %v9184_v0 = vpop.f32.mrb[28].mxu1 }
 0x997   : > { %11507 = vst [vmem:[#allocation48_spill] sm:$0xff] %v9184_v0  ;;  %v9186_v3 = vpop.f32.mrb[29].mxu1  ;;  %v9249_v0 = vld [vmem:[#allocation3 + $0x18] sm:$0xff] }
 0x998   : > { %11508 = vst [vmem:[#allocation49_spill] sm:$0xff] %v9186_v3  ;;  %v9188_v6 = vpop.f32.mrb[30].mxu1  ;;  %11515 = vst [vmem:[#allocation110_spill] sm:$0xff] %v9249_v0 }
 0x999   : > { %11509 = vst [vmem:[#allocation50_spill] sm:$0xff] %v9188_v6  ;;  %v9190_v7 = vpop.f32.mrb[31].mxu1 }
 0x99a   : > { %11510 = vst [vmem:[#allocation51_spill] sm:$0xff] %v9190_v7 }
 0x9a6   : > { %v9192_v12 = vpop.f32.mrb[32].mxu1 }
 0x9a7   : > { %2948 = vmax.xlane.f32.xlu0 %v9192_v12  ;;  %v9195_v16 = vpop.f32.mrb[33].mxu1 }
 0x9a8   : > { %v9197_v4 = vpop.f32.mrb[34].mxu1 }
 0x9a9   : > { %2950 = vmax.xlane.f32.xlu1 %v9197_v4  ;;  %v9200_v51 = vpop.f32.mrb[35].mxu1 }
 0x9ab   : > { %2944 = vmax.xlane.f32.xlu0 %v9195_v16 }
 0x9ad   : > { %2946 = vmax.xlane.f32.xlu1 %v9200_v51 }
 0x9ae   : > { %v9204_v15 = vpop.f32.mrb[36].mxu1 }
 0x9af   : > { %2956 = vmax.xlane.f32.xlu0 %v9204_v15  ;;  %v9207_v5 = vpop.f32.mrb[37].mxu1 }
 0x9b0   : > { %v9209_v41 = vpop.f32.mrb[38].mxu1 }
 0x9b1   : > { %v9211_v26 = vpop.f32.mrb[39].mxu1 }
 0x9b3   : > { %2952 = vmax.xlane.f32.xlu0 %v9207_v5 }
 0x9b6   : > { %v9214_v20 = vpop.f32.mrb[40].mxu1 }
 0x9b7   : > { %2958 = vmax.xlane.f32.xlu0 %v9209_v41  ;;  %v9219_v29 = vpop.f32.mrb[41].mxu1 }
 0x9b8   : > { %v9221_v6 = vpop.f32.mrb[42].mxu1 }
 0x9b9   : > { %v9223_v7 = vpop.f32.mrb[43].mxu1 }
 0x9bb   : > { %2954 = vmax.xlane.f32.xlu0 %v9211_v26 }
 0x9be   : > { %3279 = vrot.lane.b32.xlu1 %v8218_v9, %s7687_s10  ;;  %v9228_v48 = vpop.f32.mrb[44].mxu1 }
 0x9bf   : > { %2964 = vmax.xlane.f32.xlu0 %v9214_v20  ;;  %v9231_v14 = vpop.f32.mrb[45].mxu1 }
 0x9c0   : > { %11511 = vst [vmem:[#allocation46_spill] sm:$0xff] %v9231_v14  ;;  %v9233_v31 = vpop.f32.mrb[46].mxu1 }
 0x9c1   : > { %11512 = vst [vmem:[#allocation47_spill] sm:$0xff] %v9233_v31  ;;  %v9235_v11 = vpop.f32.mrb[47].mxu1 }
 0x9c3   : > { %2960 = vmax.xlane.f32.xlu0 %v9219_v29 }
 0x9c7   : > { %2966 = vmax.xlane.f32.xlu0 %v9221_v6 }
 0x9cb   : > { %2972 = vmax.xlane.f32.xlu0 %v9228_v48 }
 0x9cf   : > { %2968 = vmax.xlane.f32.xlu0 %v9231_v14 }
 0x9d3   : > { %2974 = vmax.xlane.f32.xlu0 %v9233_v31 }
 0x9d7   : > { %2970 = vmax.xlane.f32.xlu0 %v9235_v11 }
 0x9e2   : > { %2962 = vmax.xlane.f32.xlu1 %v9223_v7 }
 0xa34   : > { %v2949_v17 = vpop.xlane.xlu0 %2948 }
 0xa35   : > { %v9247_v54 = vmax.f32 %v9244_v42, %v2949_v17  ;;  %v9278_v17 = vld [vmem:[#allocation3 + $0x30] sm:$0xff] }
 0xa36   : > { %v2951_v3 = vpop.xlane.xlu1 %2950  ;;  %11521 = vst [vmem:[#allocation116_spill] sm:$0xff] %v9278_v17 }
 0xa37   : > { %11514 = vst [vmem:[#allocation109_spill] sm:$0xff] %v9247_v54  ;;  %3605 = vst.msk [vmem:[#allocation3 + $0x10] sm:$0xff] %vm3248_vm6, %v9247_v54  ;;  %v9256_v37 = vmax.f32 %v9249_v0, %v2951_v3  ;;  %3052 = vperm.xlu1 %7064, %v9247_v54  }
 0xa38   : > { %v2945_v49 = vpop.xlane.xlu0 %2944 }
 0xa39   : > { %11516 = vst [vmem:[#allocation111_spill] sm:$0xff] %v9256_v37  ;;  %3606 = vst.msk [vmem:[#allocation3 + $0x18] sm:$0xff] %vm3248_vm6, %v9256_v37  ;;  %v9266_v19 = vmax.f32 %v9259_v18, %v2945_v49 }
 0xa3a   : > { %v2947_v42 = vpop.xlane.xlu1 %2946 }
 0xa3b   : > { %11518 = vst [vmem:[#allocation113_spill] sm:$0xff] %v9266_v19  ;;  %3603 = vst.msk [vmem:[#allocation3] sm:$0xff] %vm3248_vm6, %v9266_v19  ;;  %v9275_v54 = vmax.f32 %v9268_v52, %v2947_v42  ;;  %3042 = vperm.xlu0 %7065, %v9266_v19   ;;  %v9293_v19 = vld [vmem:[#allocation3 + $0x20] sm:$0xff]  ;;  %v9332_v52 = vld [vmem:[#allocation3 + $0x50] sm:$0xff] }
 0xa3c   : > { %v2957_v0 = vpop.xlane.xlu0 %2956  ;;  %11523 = vst [vmem:[#allocation118_spill] sm:$0xff] %v9293_v19  ;;  %v11524_v42 = vld [vmem:[#allocation33_spill] sm:$0xff] }
 0xa3d   : > { %11520 = vst [vmem:[#allocation115_spill] sm:$0xff] %v9275_v54  ;;  %3604 = vst.msk [vmem:[#allocation3 + $0x8] sm:$0xff] %vm3248_vm6, %v9275_v54  ;;  %v9285_v38 = vmax.f32 %v9278_v17, %v2957_v0  ;;  %3047 = vperm.xlu1 %7064, %v9275_v54   ;;  %v9306_v17 = vld [vmem:[#allocation3 + $0x38] sm:$0xff]  ;;  %v11527_v0 = vld [vmem:[#allocation34_spill] sm:$0xff] }
 0xa3e   : > { %v3280_v3 = vpop.permute.xlu1 %3279  ;;  %11525 = vst [vmem:[#allocation33_spill] sm:$0xff] %v9306_v17 }
 0xa3f   : > { %11522 = vst [vmem:[#allocation117_spill] sm:$0xff] %v9285_v38  ;;  %3609 = vst.msk [vmem:[#allocation3 + $0x30] sm:$0xff] %vm3248_vm6, %v9285_v38  ;;  %3057 = vperm.xlu0 %7065, %v9256_v37   ;;  %6669 = vmatprep.subr.bf16.mxu0 %v3280_v3 }
 0xa40   : > { %v2953_v49 = vpop.xlane.xlu0 %2952  ;;  %6670 = vmatpush3.bf16.msra.mxu0 %v3280_v3 }
 0xa41   : > { %v9296_v18 = vmax.f32 %v9293_v19, %v2953_v49  ;;  %3281 = vrot.lane.b32.xlu1 %v8232_v22, %s7687_s10  ;;  %v11526_v49 = vld [vmem:[#allocation35_spill] sm:$0xff]  ;;  %v9319_v19 = vld [vmem:[#allocation3 + $0x28] sm:$0xff] }
 0xa42   : > { %11528 = vst [vmem:[#allocation35_spill] sm:$0xff] %v9332_v52 }
 0xa43   : > { %3607 = vst.msk [vmem:[#allocation3 + $0x20] sm:$0xff] %vm3248_vm6, %v9296_v18  ;;  %3283 = vrot.lane.b32.xlu0 %v11524_v42, %s7687_s10 }
 0xa44   : > { %v2959_v54 = vpop.xlane.xlu0 %2958 }
 0xa45   : > { %v9309_v3 = vmax.f32 %v9306_v17, %v2959_v54  ;;  %3285 = vrot.lane.b32.xlu1 %v11526_v49, %s7687_s10  ;;  %v9344_v54 = vld [vmem:[#allocation3 + $0x40] sm:$0xff] }
 0xa46   : > { %11530 = vst [vmem:[#allocation119_spill] sm:$0xff] %v9344_v54 }
 0xa47   : > { %3610 = vst.msk [vmem:[#allocation3 + $0x38] sm:$0xff] %vm3248_vm6, %v9309_v3  ;;  %3287 = vrot.lane.b32.xlu0 %v11527_v0, %s7687_s10 }
 0xa48   : > { %v2955_v37 = vpop.xlane.xlu0 %2954 }
 0xa49   : > { %v9322_v14 = vmax.f32 %v9319_v19, %v2955_v37  ;;  %3651 = vrot.lane.b32.xlu1 %v8208_v62, %s7689_s9  ;;  %v9355_v37 = vld [vmem:[#allocation3 + $0x58] sm:$0xff] }
 0xa4a   : > { %11532 = vst [vmem:[#allocation121_spill] sm:$0xff] %v9355_v37 }
 0xa4b   : > { %3608 = vst.msk [vmem:[#allocation3 + $0x28] sm:$0xff] %vm3248_vm6, %v9322_v14  ;;  %3653 = vrot.lane.b32.xlu0 %v8206_v61, %s7689_s9 }
 0xa4c   : > { %v2965_v17 = vpop.xlane.xlu0 %2964 }
 0xa4d   : > { %v9335_v31 = vmax.f32 %v9332_v52, %v2965_v17  ;;  %3655 = vrot.lane.b32.xlu1 %v8220_v10, %s7689_s9  ;;  %v9366_v17 = vld [vmem:[#allocation3 + $0x70] sm:$0xff] }
 0xa4e   : > { %11534 = vst [vmem:[#allocation123_spill] sm:$0xff] %v9366_v17 }
 0xa4f   : > { %11529 = vst [vmem:[#allocation34_spill] sm:$0xff] %v9335_v31  ;;  %3613 = vst.msk [vmem:[#allocation3 + $0x50] sm:$0xff] %vm3248_vm6, %v9335_v31  ;;  %3077 = vperm.xlu0 %7065, %v9309_v3  }
 0xa50   : > { %v2961_v61 = vpop.xlane.xlu0 %2960 }
 0xa51   : > { %v9347_v62 = vmax.f32 %v9344_v54, %v2961_v61  ;;  %3072 = vperm.xlu1 %7064, %v9285_v38   ;;  %v9377_v61 = vld [vmem:[#allocation3 + $0x60] sm:$0xff] }
 0xa52   : > { %11536 = vst [vmem:[#allocation125_spill] sm:$0xff] %v9377_v61 }
 0xa53   : > { %11531 = vst [vmem:[#allocation120_spill] sm:$0xff] %v9347_v62  ;;  %3611 = vst.msk [vmem:[#allocation3 + $0x40] sm:$0xff] %vm3248_vm6, %v9347_v62  ;;  %3067 = vperm.xlu0 %7065, %v9322_v14  }
 0xa54   : > { %v2967_v52 = vpop.xlane.xlu0 %2966 }
 0xa55   : > { %v9358_v10 = vmax.f32 %v9355_v37, %v2967_v52  ;;  %3062 = vperm.xlu1 %7064, %v9296_v18   ;;  %v9388_v52 = vld [vmem:[#allocation3 + $0x78] sm:$0xff] }
 0xa56   : > { %11538 = vst [vmem:[#allocation127_spill] sm:$0xff] %v9388_v52 }
 0xa57   : > { %11533 = vst [vmem:[#allocation122_spill] sm:$0xff] %v9358_v10  ;;  %3614 = vst.msk [vmem:[#allocation3 + $0x58] sm:$0xff] %vm3248_vm6, %v9358_v10  ;;  %3092 = vperm.xlu0 %7065, %v9335_v31  }
 0xa58   : > { %v2973_v54 = vpop.xlane.xlu0 %2972 }
 0xa59   : > { %v9369_v38 = vmax.f32 %v9366_v17, %v2973_v54  ;;  %3097 = vperm.xlu1 %7064, %v9358_v10  }
 0xa5b   : > { %11535 = vst [vmem:[#allocation124_spill] sm:$0xff] %v9369_v38  ;;  %3617 = vst.msk [vmem:[#allocation3 + $0x70] sm:$0xff] %vm3248_vm6, %v9369_v38  ;;  %3082 = vperm.xlu0 %7065, %v9347_v62  }
 0xa5c   : > { %v2969_v37 = vpop.xlane.xlu0 %2968 }
 0xa5d   : > { %v9380_v31 = vmax.f32 %v9377_v61, %v2969_v37  ;;  %v9397_v37 = vld [vmem:[#allocation3 + $0x68] sm:$0xff] }
 0xa5e   : > { %11540 = vst [vmem:[#allocation129_spill] sm:$0xff] %v9397_v37 }
 0xa5f   : > { %11537 = vst [vmem:[#allocation126_spill] sm:$0xff] %v9380_v31  ;;  %3615 = vst.msk [vmem:[#allocation3 + $0x60] sm:$0xff] %vm3248_vm6, %v9380_v31  ;;  %3657 = vrot.lane.b32.xlu0 %v8218_v9, %s7689_s9  ;;  %v11545_v9 = vld [vmem:[#allocation108_spill] sm:$0xff] }
 0xa60   : > { %v2975_v17 = vpop.xlane.xlu0 %2974 }
 0xa61   : > { %v9391_v10 = vmax.f32 %v9388_v52, %v2975_v17  ;;  %v9410_v17 = vld [vmem:[#allocation3 + $0x48] sm:$0xff] }
 0xa63   : > { %11539 = vst [vmem:[#allocation128_spill] sm:$0xff] %v9391_v10  ;;  %3618 = vst.msk [vmem:[#allocation3 + $0x78] sm:$0xff] %vm3248_vm6, %v9391_v10 }
 0xa64   : > { %v2971_v54 = vpop.xlane.xlu0 %2970 }
 0xa65   : > { %v9400_v61 = vmax.f32 %v9397_v37, %v2971_v54  ;;  %v11542_v54 = vmov 0  }
 0xa67   : > { %11541 = vst [vmem:[#allocation130_spill] sm:$0xff] %v9400_v61  ;;  %3616 = vst.msk [vmem:[#allocation3 + $0x68] sm:$0xff] %vm3248_vm6, %v9400_v61  ;;  %3107 = vperm.xlu0 %7065, %v9400_v61  }
 0xa6b   : > { %3117 = vperm.xlu0 %7065, %v9391_v10   ;;  %v11543_v10 = vld [vmem:[#allocation104_spill] sm:$0xff] }
 0xa6f   : > { %3661 = vrot.lane.b32.xlu0 %v11524_v42, %s7689_s9  ;;  %v2963_v62 = vpop.xlane.xlu1 %2962 }
 0xa70   : > { %v9413_v52 = vmax.f32 %v9410_v17, %v2963_v62  ;;  %7067 = vset.pattern.permute.xlu0 %v11542_v54  ;;  %v11544_v62 = vld [vmem:[#allocation106_spill] sm:$0xff] }
 0xa72   : > { %3612 = vst.msk [vmem:[#allocation3 + $0x48] sm:$0xff] %vm3248_vm6, %v9413_v52  ;;  %3087 = vperm.xlu1 %7064, %v9413_v52  }
 0xa73   : > { %3665 = vrot.lane.b32.xlu0 %v11527_v0, %s7689_s9 }
 0xa76   : > { %3112 = vperm.xlu1 %7064, %v9369_v38  }
 0xa77   : > { %3637 = vrot.lane.b32.xlu0 %v11543_v10, %s7689_s9  ;;  %v11546_v10 = vld [vmem:[#allocation102_spill] sm:$0xff] }
 0xa7a   : > { %3102 = vperm.xlu1 %7064, %v9380_v31   ;;  %v11609_v31 = vld [vmem:[#allocation64_spill] sm:$0xff] }
 0xa7b   : > { %3641 = vrot.lane.b32.xlu0 %v11544_v62, %s7689_s9  ;;  %v11547_v62 = vld [vmem:[#allocation103_spill] sm:$0xff] }
 0xa7e   : > { %3659 = vrot.lane.b32.xlu1 %v8232_v22, %s7689_s9 }
 0xa7f   : > { %3645 = vrot.lane.b32.xlu0 %v11545_v9, %s7689_s9  ;;  %7066 = vset.pattern.permute.xlu1 %v11542_v54  ;;  %v11548_v9 = vld [vmem:[#allocation105_spill] sm:$0xff]  ;;  %v11549_v54 = vld [vmem:[#allocation107_spill] sm:$0xff] }
 0xa82   : > { %3663 = vrot.lane.b32.xlu1 %v11526_v49, %s7689_s9 }
 0xa83   : > { %3649 = vrot.lane.b32.xlu0 %v8931_v27, %s7689_s9  ;;  %v11550_v27 = vmov 1  }
 0xa86   : > { %3635 = vrot.lane.b32.xlu1 %v11546_v10, %s7689_s9 }
 0xa87   : > { %1719 = vperm.xlu0 %7067, %v9073_v1  }
 0xa8a   : > { %3639 = vrot.lane.b32.xlu1 %v11547_v62, %s7689_s9 }
 0xa8b   : > { %1734 = vperm.xlu0 %7067, %v9095_v55  }
 0xa8e   : > { %3643 = vrot.lane.b32.xlu1 %v11548_v9, %s7689_s9 }
 0xa8f   : > { %1744 = vperm.xlu0 %7067, %v9108_v30  }
 0xa92   : > { %3647 = vrot.lane.b32.xlu1 %v11549_v54, %s7689_s9 }
 0xa93   : > { %1754 = vperm.xlu0 %7067, %v9122_v56  }
 0xa96   : > { %1714 = vperm.xlu1 %7066, %v9085_v33  }
 0xa97   : > { %1764 = vperm.xlu0 %7067, %v9130_v13  }
 0xa9a   : > { %1724 = vperm.xlu1 %7066, %v9083_v57  }
 0xa9b   : > { %1774 = vperm.xlu0 %7067, %v9138_v8  }
 0xa9e   : > { %1729 = vperm.xlu1 %7066, %v9098_v2  }
 0xa9f   : > { %1784 = vperm.xlu0 %7067, %v9146_v46  }
 0xaa2   : > { %1739 = vperm.xlu1 %7066, %v9112_v36  }
 0xaa3   : > { %7069 = vset.pattern.permute.xlu0 %v11550_v27 }
 0xaa6   : > { %1749 = vperm.xlu1 %7066, %v9126_v35  }
 0xaaa   : > { %1759 = vperm.xlu1 %7066, %v9134_v24  }
 0xaae   : > { %1769 = vperm.xlu1 %7066, %v9142_v53  }
 0xab2   : > { %1779 = vperm.xlu1 %7066, %v9150_v40  }
 0xab6   : > { %7068 = vset.pattern.permute.xlu1 %v11550_v27  ;;  %v3053_v1 = vpop.permute.xlu1 %3052 }
 0xab7   : > { %v3122_v57 = vsub.f32 %v9192_v12, %v3053_v1 }
 0xab9   : > { %v3140_v56 = vmul.f32 1.442695, %v3122_v57 }
 0xaba   : > { %v3043_v33 = vpop.permute.xlu0 %3042 }
 0xabb   : > { %v3120_v55 = vsub.f32 %v9195_v16, %v3043_v33 }
 0xabc   : > { %v3048_v2 = vpop.permute.xlu1 %3047 }
 0xabd   : > { %v3136_v30 = vmul.f32 1.442695, %v3120_v55  ;;  %v3121_v36 = vsub.f32 %v9200_v51, %v3048_v2 }
 0xabe   : > { %2318 = vadd.xlane.f32.xlu0 %v8944_v34  ;;  %v3058_v35 = vpop.permute.xlu0 %3057 }
 0xabf   : > { %v3138_v13 = vmul.f32 1.442695, %v3121_v36  ;;  %v3123_v24 = vsub.f32 %v9197_v4, %v3058_v35  ;;  %7176 = vpow2.f32 %v3136_v30  ;;  %v11552_v35 = vld [vmem:[#allocation75_spill] sm:$0xff] }
 0xac0   : > { %v3282_v8 = vpop.permute.xlu1 %3281 }
 0xac1   : > { %7178 = vpow2.f32 %v3138_v13  ;;  %v3142_v53 = vmul.f32 1.442695, %v3123_v24  ;;  %6671 = vmatprep.subr.bf16.mxu0 %v3282_v8 }
 0xac2   : > { %7180 = vpow2.f32 %v3140_v56  ;;  %2320 = vadd.xlane.f32.xlu0 %v8951_v28  ;;  %v3284_v46 = vpop.permute.xlu0 %3283  ;;  %6672 = vmatpush3.bf16.msra.mxu0 %v3282_v8 }
 0xac3   : > { %7182 = vpow2.f32 %v3142_v53  ;;  %6673 = vmatprep.subr.bf16.mxu0 %v3284_v46 }
 0xac4   : > { %v3286_v40 = vpop.permute.xlu1 %3285 }
 0xac6   : > { %2322 = vadd.xlane.f32.xlu0 %v8954_v44  ;;  %v3288_v34 = vpop.permute.xlu0 %3287  ;;  %6674 = vmatpush3.bf16.msra.mxu0 %v3284_v46  ;;  %v11554_v46 = vld [vmem:[#allocation86_spill] sm:$0xff] }
 0xac7   : > { %6675 = vmatprep.subr.bf16.mxu0 %v3286_v40 }
 0xac8   : > { %v3652_v12 = vpop.permute.xlu1 %3651 }
 0xac9   : > { %v9470_v16 = vpop.eup %7176 }
 0xaca   : > { %2326 = vadd.xlane.f32.xlu0 %v9001_v45  ;;  %v3654_v4 = vpop.permute.xlu0 %3653  ;;  %6676 = vmatpush3.bf16.msra.mxu0 %v3286_v40  ;;  %v11555_v40 = vld [vmem:[#allocation87_spill] sm:$0xff] }
 0xacb   : > { %v9473_v51 = vpop.eup %7178  ;;  %6677 = vmatprep.subr.bf16.mxu0 %v3288_v34 }
 0xacc   : > { %v9475_v28 = vpop.eup %7180  ;;  %v3656_v10 = vpop.permute.xlu1 %3655  ;;  %v3265_v62 = vpack.c.bf16 %v9473_v51, %v9470_v16 }
 0xacd   : > { %v9479_v44 = vpop.eup %7182 }
 0xace   : > { %2330 = vadd.xlane.f32.xlu0 %v8995_v50  ;;  %v3078_v9 = vpop.permute.xlu0 %3077  ;;  %6678 = vmatpush3.bf16.msra.mxu0 %v3288_v34  ;;  %v3266_v45 = vpack.c.bf16 %v9479_v44, %v9475_v28  ;;  %v11556_v34 = vsub.f32 %v11554_v46, %v11555_v40  ;;  %v11569_v40 = vld [vmem:[#allocation76_spill] sm:$0xff] }
 0xacf   : > { %6679 = vmatprep.mubr.bf16.mxu0 %v3265_v62  ;;  %6887 = vmatprep.subr.msk.bf16.mxu0 %vm1071_vm3, %v3652_v12  ;;  %v3127_v1 = vsub.f32 %v9209_v41, %v3078_v9 }
 0xad0   : > { %v3073_v54 = vpop.permute.xlu1 %3072 }
 0xad1   : > { %v3126_v27 = vsub.f32 %v9204_v15, %v3073_v54  ;;  %6680 = vmatmul.mubr.bf16.vlgmr.msra.gmra.mrb[48].mxu0 %v3266_v45  ;;  %v3150_v36 = vmul.f32 1.442695, %v3127_v1  ;;  %v3692_v15 = vsel %vm1071_vm3, %v3652_v12, 0  ;;  %v2144_v12 = vmul.f32 1.442695, %v11556_v34  ;;  %v11558_v45 = vld [vmem:[#allocation99_spill] sm:$0xff] }
 0xad2   : > { %2334 = vadd.xlane.f32.xlu0 %v9017_v59  ;;  %v3068_v57 = vpop.permute.xlu0 %3067  ;;  %v11560_v1 = vld [vmem:[#allocation72_spill] sm:$0xff]  ;;  %v11570_v34 = vld [vmem:[#allocation77_spill] sm:$0xff] }
 0xad3   : > { %v3148_v33 = vmul.f32 1.442695, %v3126_v27  ;;  %v3125_v50 = vsub.f32 %v9211_v26, %v3068_v57  ;;  %v11561_v57 = vld [vmem:[#allocation73_spill] sm:$0xff] }
 0xad4   : > { %v3063_v55 = vpop.permute.xlu1 %3062 }
 0xad5   : > { %v3146_v2 = vmul.f32 1.442695, %v3125_v50  ;;  %v3124_v30 = vsub.f32 %v9207_v5, %v3063_v55  ;;  %7184 = vpow2.f32 %v3148_v33  ;;  %v11562_v33 = vsub.f32 %v11560_v1, %v11561_v57 }
 0xad6   : > { %2338 = vadd.xlane.f32.xlu0 %v9010_v60  ;;  %v3093_v56 = vpop.permute.xlu0 %3092  ;;  %2316 = vadd.xlane.f32.xlu1 %v8947_v21  ;;  %v3695_v21 = vsel %vm1071_vm3, %v3654_v4, 0 }
 0xad7   : > { %v3144_v41 = vmul.f32 1.442695, %v3124_v30  ;;  %6696 = vmatpush3.bf16.xpose.msra.mxu0 %v3692_v15  ;;  %7186 = vpow2.f32 %v3146_v2  ;;  %v2124_v50 = vmul.f32 1.442695, %v11562_v33  ;;  %v11563_v2 = vld [vmem:[#allocation94_spill] sm:$0xff]  ;;  %v11564_v30 = vld [vmem:[#allocation95_spill] sm:$0xff] }
 0xad8   : > { %6888 = vmatprep.subr.msk.bf16.mxu0 %vm1071_vm3, %v3654_v4  ;;  %v3098_v4 = vpop.permute.xlu1 %3097  ;;  %v11574_v33 = vld [vmem:[#allocation82_spill] sm:$0xff] }
 0xad9   : > { %7188 = vpow2.f32 %v3144_v41  ;;  %v3131_v9 = vsub.f32 %v9221_v6, %v3098_v4  ;;  %v3130_v6 = vsub.f32 %v9214_v20, %v3093_v56 }
 0xada   : > { %7190 = vpow2.f32 %v3150_v36  ;;  %2342 = vadd.xlane.f32.xlu0 %v9030_v25  ;;  %2324 = vadd.xlane.f32.xlu1 %v8999_v58  ;;  %v3083_v59 = vpop.permute.xlu0 %3082 }
 0xadb   : > { %v3158_v41 = vmul.f32 1.442695, %v3131_v9  ;;  %v11572_v9 = vld [vmem:[#allocation47_spill] sm:$0xff] }
 0xade   : > { %2346 = vadd.xlane.f32.xlu0 %v9036_v43  ;;  %2328 = vadd.xlane.f32.xlu1 %v8993_v47  ;;  %v3658_v26 = vpop.permute.xlu0 %3657  ;;  %v11551_v47 = vld [vmem:[#allocation74_spill] sm:$0xff] }
 0xadf   : > { %6698 = vmatpush3.bf16.xpose.msra.mxu0 %v3695_v21  ;;  %v9500_v60 = vpop.eup %7184  ;;  %v11553_v13 = vsub.f32 %v11551_v47, %v11552_v35  ;;  %v3701_v15 = vsel %vm1071_vm3, %v3658_v26, 0  ;;  %v11566_v35 = vld [vmem:[#allocation70_spill] sm:$0xff] }
 0xae0   : > { %6889 = vmatprep.subr.msk.bf16.mxu0 %vm1071_vm3, %v3656_v10 }
 0xae1   : > { %v9502_v5 = vpop.eup %7186  ;;  %v2126_v24 = vmul.f32 1.442695, %v11553_v13  ;;  %v11567_v13 = vld [vmem:[#allocation71_spill] sm:$0xff] }
 0xae2   : > { %2332 = vadd.xlane.f32.xlu1 %v9019_v32  ;;  %v3698_v32 = vsel %vm1071_vm3, %v3656_v10, 0  ;;  %v3128_v10 = vsub.f32 %v9219_v29, %v3083_v59 }
 0xae3   : > { %v9505_v25 = vpop.eup %7188  ;;  %7192 = vpow2.f32 %v2126_v24  ;;  %v11568_v24 = vsub.f32 %v11566_v35, %v11567_v13 }
 0xae4   : > { %v9507_v58 = vpop.eup %7190  ;;  %v3267_v43 = vpack.c.bf16 %v9502_v5, %v9505_v25  ;;  %7194 = vpow2.f32 %v2144_v12  ;;  %v3152_v29 = vmul.f32 1.442695, %v3128_v10  ;;  %v11571_v12 = vsub.f32 %v11569_v40, %v11570_v34  ;;  %v11580_v40 = vld [vmem:[#allocation78_spill] sm:$0xff]  ;;  %v11581_v34 = vld [vmem:[#allocation79_spill] sm:$0xff] }
 0xae5   : > { %v3268_v8 = vpack.c.bf16 %v9507_v58, %v9500_v60  ;;  %v2128_v20 = vmul.f32 1.442695, %v11568_v24 }
 0xae6   : > { %v3108_v53 = vpop.permute.xlu0 %3107  ;;  %2336 = vadd.xlane.f32.xlu1 %v9015_v63  ;;  %6683 = vmatprep.mubr.bf16.mxu0 %v3267_v43  ;;  %v11557_v63 = vld [vmem:[#allocation98_spill] sm:$0xff]  ;;  %v2130_v4 = vmul.f32 1.442695, %v11571_v12  ;;  %v11582_v12 = vsub.f32 %v11580_v40, %v11581_v34 }
 0xae7   : > { %6684 = vmatmul.mubr.bf16.gmra.mrb[52].mxu0 %v3268_v8  ;;  %v11559_v54 = vsub.f32 %v11557_v63, %v11558_v45  ;;  %v3133_v56 = vsub.f32 %v9235_v11, %v3108_v53 }
 0xae8   : > { %6700 = vmatpush3.bf16.xpose.msra.mxu0 %v3698_v32 }
 0xae9   : > { %6890 = vmatprep.subr.msk.bf16.mxu0 %vm1071_vm3, %v3658_v26  ;;  %v2148_v27 = vmul.f32 1.442695, %v11559_v54  ;;  %v3162_v11 = vmul.f32 1.442695, %v3133_v56  ;;  %v11573_v54 = vld [vmem:[#allocation46_spill] sm:$0xff] }
 0xaea   : > { %v3118_v62 = vpop.permute.xlu0 %3117  ;;  %2340 = vadd.xlane.f32.xlu1 %v9027_v23  ;;  %v11565_v23 = vsub.f32 %v11563_v2, %v11564_v30 }
 0xaeb   : > { %7196 = vpow2.f32 %v2148_v27  ;;  %v3135_v63 = vsub.f32 %v11572_v9, %v3118_v62  ;;  %v11583_v9 = vld [vmem:[#allocation38_spill] sm:$0xff] }
 0xaec   : > { %v2152_v36 = vmul.f32 1.442695, %v11565_v23  ;;  %7198 = vpow2.f32 %v2124_v50  ;;  %v11575_v50 = vld [vmem:[#allocation83_spill] sm:$0xff] }
 0xaed   : > { %v9542_v47 = vpop.eup %7192  ;;  %v3166_v1 = vmul.f32 1.442695, %v3135_v63  ;;  %v11576_v2 = vsub.f32 %v11574_v33, %v11575_v50  ;;  %v1693_v63 = vld [vmem:[#allocation5 + $0x10] sm:$0xff] }
 0xaee   : > { %v9531_v55 = vpop.permute.xlu0 %3661  ;;  %2344 = vadd.xlane.f32.xlu1 %v9034_v39  ;;  %7200 = vpow2.f32 %v2152_v36  ;;  %v3156_v39 = vmul.f32 1.442695, %v3130_v6  ;;  %v9552_v46 = vpop.eup %7194 }
 0xaef   : > { %7202 = vpow2.f32 %v3158_v41  ;;  %v2132_v62 = vmul.f32 1.442695, %v11576_v2  ;;  %v11584_v2 = vld [vmem:[#allocation80_spill] sm:$0xff] }
 0xaf0   : > { %6702 = vmatpush3.bf16.xpose.msra.mxu0 %v3701_v15  ;;  %7204 = vpow2.f32 %v3152_v29 }
 0xaf1   : > { %v3088_v59 = vpop.permute.xlu1 %3087 }
 0xaf2   : > { %v3129_v21 = vsub.f32 %v9223_v7, %v3088_v59  ;;  %v9540_v43 = vpop.permute.xlu0 %3665 }
 0xaf4   : > { %v3154_v26 = vmul.f32 1.442695, %v3129_v21  ;;  %2533 = vperm.xlu0 %7069, %v9542_v47   ;;  %v11577_v21 = vld [vmem:[#allocation84_spill] sm:$0xff] }
 0xaf5   : > { %v3113_v8 = vpop.permute.xlu1 %3112  ;;  %v9562_v10 = vpop.eup %7196 }
 0xaf6   : > { %7206 = vpow2.f32 %v3154_v26  ;;  %v3134_v7 = vsub.f32 %v9228_v48, %v3113_v8  ;;  %v9550_v32 = vpop.permute.xlu0 %3637  ;;  %v9564_v57 = vpop.eup %7198 }
 0xaf7   : > { %7208 = vpow2.f32 %v3156_v39  ;;  %v11578_v39 = vld [vmem:[#allocation85_spill] sm:$0xff] }
 0xaf8   : > { %7210 = vpow2.f32 %v2128_v20  ;;  %2578 = vperm.xlu0 %7069, %v9552_v46   ;;  %v3164_v53 = vmul.f32 1.442695, %v3134_v7  ;;  %v9570_v23 = vpop.eup %7200  ;;  %v11579_v35 = vsub.f32 %v11577_v21, %v11578_v39  ;;  %v1696_v21 = vld [vmem:[#allocation5 + $0x28] sm:$0xff] }
 0xaf9   : > { %v3103_v45 = vpop.permute.xlu1 %3102  ;;  %7212 = vpow2.f32 %v2130_v4  ;;  %v9572_v6 = vpop.eup %7202  ;;  %v2136_v4 = vmul.f32 1.442695, %v11582_v12  ;;  %v11588_v39 = vld [vmem:[#allocation54_spill] sm:$0xff] }
 0xafa   : > { %v3132_v27 = vsub.f32 %v11573_v54, %v3103_v45  ;;  %v9560_v48 = vpop.permute.xlu0 %3641  ;;  %7214 = vpow2.f32 %v3162_v11  ;;  %v9578_v29 = vpop.eup %7204  ;;  %v2134_v13 = vmul.f32 1.442695, %v11579_v35 }
 0xafb   : > { %7216 = vpow2.f32 %v3164_v53 }
 0xafc   : > { %v3160_v30 = vmul.f32 1.442695, %v3132_v27  ;;  %2588 = vperm.xlu0 %7069, %v9562_v10   ;;  %v3707_v27 = vsel %vm1071_vm3, %v9531_v55, 0 }
 0xafd   : > { %v3660_v36 = vpop.permute.xlu1 %3659 }
 0xafe   : > { %7218 = vpow2.f32 %v3160_v30  ;;  %v9574_v15 = vpop.permute.xlu0 %3645  ;;  %6891 = vmatprep.subr.msk.bf16.mxu0 %vm1071_vm3, %v3660_v36  ;;  %v3704_v41 = vsel %vm1071_vm3, %v3660_v36, 0 }
 0xaff   : > { %7220 = vpow2.f32 %v3166_v1  ;;  %2528 = vperm.xlu1 %7068, %v9564_v57   ;;  %6704 = vmatpush3.bf16.xpose.msra.mxu0 %v3704_v41  ;;  %v11587_v41 = vld [vmem:[#allocation36_spill] sm:$0xff] }
 0xb00   : > { %v9581_v59 = vpop.eup %7206  ;;  %7222 = vpow2.f32 %v2132_v62  ;;  %2598 = vperm.xlu0 %7069, %v9570_v23   ;;  %6892 = vmatprep.subr.msk.bf16.mxu0 %vm1071_vm3, %v9531_v55  ;;  %v11585_v62 = vld [vmem:[#allocation81_spill] sm:$0xff] }
 0xb01   : > { %v9589_v24 = vpop.eup %7208  ;;  %v3664_v20 = vpop.permute.xlu1 %3663  ;;  %v3269_v56 = vpack.c.bf16 %v9581_v59, %v9578_v29  ;;  %7224 = vpow2.f32 %v2134_v13  ;;  %v11586_v30 = vsub.f32 %v11584_v2, %v11585_v62  ;;  %v11593_v2 = vld [vmem:[#allocation61_spill] sm:$0xff] }
 0xb02   : > { %v9593_v26 = vpop.eup %7210  ;;  %v9595_v8 = vpop.permute.xlu0 %3649  ;;  %v3270_v7 = vpack.c.bf16 %v9572_v6, %v9589_v24  ;;  %7226 = vpow2.f32 %v2136_v4  ;;  %v11589_v4 = vld [vmem:[#allocation90_spill] sm:$0xff] }
 0xb03   : > { %2538 = vperm.xlu1 %7068, %v9593_v26   ;;  %6687 = vmatprep.mubr.bf16.mxu0 %v3269_v56  ;;  %v9605_v11 = vpop.eup %7212  ;;  %v2138_v36 = vmul.f32 1.442695, %v11586_v30 }
 0xb04   : > { %2638 = vrot.lane.b32.xlu0 %v11583_v9, %s7690_s19  ;;  %6688 = vmatmul.mubr.bf16.gmra.mrb[56].mxu0 %v3270_v7  ;;  %v9607_v45 = vpop.eup %7214  ;;  %v11590_v9 = vld [vmem:[#allocation91_spill] sm:$0xff] }
 0xb05   : > { %v3636_v53 = vpop.permute.xlu1 %3635  ;;  %v9611_v1 = vpop.eup %7216  ;;  %7228 = vpow2.f32 %v2138_v36  ;;  %v3710_v36 = vsel %vm1071_vm3, %v3664_v20, 0 }
 0xb06   : > { %v1720_v54 = vpop.permute.xlu0 %1719 }
 0xb07   : > { %v1789_v33 = vmul.f32 %v1720_v54, %v1693_v63  ;;  %2543 = vperm.xlu1 %7068, %v9605_v11   ;;  %6706 = vmatpush3.bf16.xpose.msra.mxu0 %v3707_v27  ;;  %v11591_v63 = vsub.f32 %v11589_v4, %v11590_v9  ;;  %v11592_v27 = vld [vmem:[#allocation39_spill] sm:$0xff]  ;;  %v11598_v4 = vld [vmem:[#allocation60_spill] sm:$0xff] }
 0xb08   : > { %v9614_v50 = vpop.eup %7218  ;;  %2642 = vrot.lane.b32.xlu0 %v11587_v41, %s7690_s19  ;;  %6893 = vmatprep.subr.msk.bf16.mxu0 %vm1071_vm3, %v3664_v20 }
 0xb09   : > { %v9622_v55 = vpop.eup %7220  ;;  %v1805_v35 = vadd.f32 %v11588_v39, %v1789_v33  ;;  %v9625_v13 = vpop.permute.xlu1 %3639  ;;  %v3271_v56 = vpack.c.bf16 %v9607_v45, %v9614_v50  ;;  %v2140_v54 = vmul.f32 1.442695, %v11591_v63  ;;  %v1698_v33 = vld [vmem:[#allocation5 + $0x38] sm:$0xff] }
 0xb0a   : > { %v9629_v7 = vpop.eup %7222  ;;  %v1735_v40 = vpop.permute.xlu0 %1734  ;;  %v3272_v34 = vpack.c.bf16 %v9622_v55, %v9611_v1 }
 0xb0b   : > { %1821 = vst.msk [vmem:[#allocation5 + $0x10] sm:$0xff] %vm1071_vm3, %v1805_v35  ;;  %v1792_v12 = vmul.f32 %v1735_v40, %v1696_v21  ;;  %2548 = vperm.xlu1 %7068, %v9629_v7   ;;  %6691 = vmatprep.mubr.bf16.mxu0 %v3271_v56  ;;  %v9644_v41 = vpop.eup %7224  ;;  %7230 = vpow2.f32 %v2140_v54  ;;  %v11594_v35 = vld [vmem:[#allocation92_spill] sm:$0xff]  ;;  %v11595_v56 = vld [vmem:[#allocation93_spill] sm:$0xff] }
 0xb0c   : > { %2646 = vrot.lane.b32.xlu0 %v11592_v27, %s7690_s19  ;;  %6692 = vmatmul.mubr.bf16.gmra.mrb[60].mxu0 %v3272_v34  ;;  %v11596_v40 = vsub.f32 %v11594_v35, %v11595_v56  ;;  %v9659_v63 = vpop.eup %7226  ;;  %v11602_v35 = vld [vmem:[#allocation41_spill] sm:$0xff] }
 0xb0d   : > { %v1808_v62 = vadd.f32 %v1792_v12, %v11593_v2  ;;  %v9641_v30 = vpop.permute.xlu1 %3643  ;;  %6711 = vmatprep.mubr.msk.bf16.mxu0 %vm1071_vm3, %v3636_v53  ;;  %v11597_v12 = vld [vmem:[#allocation37_spill] sm:$0xff]  ;;  %v1700_v53 = vld [vmem:[#allocation5 + $0x48] sm:$0xff]  ;;  %v11599_v2 = vld [vmem:[#allocation88_spill] sm:$0xff] }
 0xb0e   : > { %v1745_v21 = vpop.permute.xlu0 %1744  ;;  %v2142_v34 = vmul.f32 1.442695, %v11596_v40  ;;  %v11603_v56 = vld [vmem:[#allocation65_spill] sm:$0xff] }
 0xb0f   : > { %1824 = vst.msk [vmem:[#allocation5 + $0x28] sm:$0xff] %vm1071_vm3, %v1808_v62  ;;  %v1794_v39 = vmul.f32 %v1745_v21, %v1698_v33  ;;  %2553 = vperm.xlu1 %7068, %v9644_v41   ;;  %6708 = vmatpush3.bf16.xpose.msra.mxu0 %v3710_v36  ;;  %v1692_v33 = vld [vmem:[#allocation5 + $0x8] sm:$0xff]  ;;  %v11600_v62 = vld [vmem:[#allocation89_spill] sm:$0xff] }
 0xb10   : > { %2650 = vrot.lane.b32.xlu0 %v11597_v12, %s7690_s19  ;;  %6894 = vmatprep.subr.msk.bf16.mxu0 %vm1071_vm3, %v9540_v43  ;;  %v11601_v21 = vsub.f32 %v11599_v2, %v11600_v62  ;;  %7232 = vpow2.f32 %v2142_v34  ;;  %v1694_v34 = vld [vmem:[#allocation5 + $0x18] sm:$0xff]  ;;  %v11605_v62 = vld [vmem:[#allocation101_spill] sm:$0xff] }
 0xb11   : > { %v1810_v20 = vadd.f32 %v11598_v4, %v1794_v39  ;;  %v9657_v9 = vpop.permute.xlu1 %3647  ;;  %v1702_v39 = vld [vmem:[#allocation5 + $0x58] sm:$0xff]  ;;  %v9669_v4 = vpop.eup %7228 }
 0xb12   : > { %v1755_v27 = vpop.permute.xlu0 %1754  ;;  %v2146_v36 = vmul.f32 1.442695, %v11601_v21  ;;  %v11604_v2 = vld [vmem:[#allocation100_spill] sm:$0xff] }
 0xb13   : > { %1826 = vst.msk [vmem:[#allocation5 + $0x38] sm:$0xff] %vm1071_vm3, %v1810_v20  ;;  %v1796_v54 = vmul.f32 %v1755_v27, %v1700_v53  ;;  %2558 = vperm.xlu1 %7068, %v9659_v63   ;;  %v3713_v53 = vsel %vm1071_vm3, %v9540_v43, 0  ;;  %v11606_v21 = vsub.f32 %v11604_v2, %v11605_v62  ;;  %v11611_v2 = vld [vmem:[#allocation97_spill] sm:$0xff] }
 0xb14   : > { %2654 = vrot.lane.b32.xlu0 %v11602_v35, %s7690_s19  ;;  %7234 = vpow2.f32 %v2146_v36  ;;  %v11607_v35 = vld [vmem:[#allocation57_spill] sm:$0xff] }
 0xb15   : > { %v1812_v40 = vadd.f32 %v1796_v54, %v11603_v56  ;;  %v1715_v12 = vpop.permute.xlu1 %1714  ;;  %v2150_v54 = vmul.f32 1.442695, %v11606_v21 }
 0xb16   : > { %v1788_v38 = vmul.f32 %v1715_v12, %v1692_v33  ;;  %v1765_v20 = vpop.permute.xlu0 %1764  ;;  %v11608_v33 = vld [vmem:[#allocation40_spill] sm:$0xff]  ;;  %v1704_v12 = vld [vmem:[#allocation5 + $0x68] sm:$0xff] }
 0xb17   : > { %1828 = vst.msk [vmem:[#allocation5 + $0x48] sm:$0xff] %vm1071_vm3, %v1812_v40  ;;  %v1798_v27 = vmul.f32 %v1765_v20, %v1702_v39  ;;  %2563 = vperm.xlu1 %7068, %v9669_v4   ;;  %6710 = vmatpush3.bf16.xpose.msra.mxu0 %v3713_v53  ;;  %v9682_v40 = vpop.eup %7230  ;;  %v1695_v53 = vld [vmem:[#allocation5 + $0x20] sm:$0xff]  ;;  %7236 = vpow2.f32 %v2150_v54 }
 0xb18   : > { %v1804_v56 = vadd.f32 %v1788_v38, %v11607_v35  ;;  %2658 = vrot.lane.b32.xlu0 %v11608_v33, %s7690_s19  ;;  %v11610_v38 = vld [vmem:[#allocation96_spill] sm:$0xff] }
 0xb19   : > { %v1814_v43 = vadd.f32 %v11609_v31, %v1798_v27  ;;  %v1725_v61 = vpop.permute.xlu1 %1724  ;;  %v11612_v62 = vsub.f32 %v11610_v38, %v11611_v2  ;;  %v11613_v35 = vld [vmem:[#allocation56_spill] sm:$0xff]  ;;  %v11614_v27 = vld [vmem:[#allocation49_spill] sm:$0xff] }
 0xb1a   : > { %1820 = vst.msk [vmem:[#allocation5 + $0x8] sm:$0xff] %vm1071_vm3, %v1804_v56  ;;  %v1790_v39 = vmul.f32 %v1725_v61, %v1694_v34  ;;  %v1775_v20 = vpop.permute.xlu0 %1774  ;;  %v1706_v33 = vld [vmem:[#allocation5 + $0x78] sm:$0xff]  ;;  %v11615_v56 = vld [vmem:[#allocation69_spill] sm:$0xff]  ;;  %v9694_v37 = vpop.eup %7232 }
 0xb1b   : > { %1830 = vst.msk [vmem:[#allocation5 + $0x58] sm:$0xff] %vm1071_vm3, %v1814_v43  ;;  %v1800_v36 = vmul.f32 %v1775_v20, %v1704_v12  ;;  %2568 = vperm.xlu1 %7068, %v9682_v40   ;;  %v2154_v21 = vmul.f32 1.442695, %v11612_v62  ;;  %v11616_v20 = vld [vmem:[#allocation59_spill] sm:$0xff]  ;;  %v11617_v38 = vld [vmem:[#allocation48_spill] sm:$0xff] }
 0xb1c   : > { %v1806_v31 = vadd.f32 %v11613_v35, %v1790_v39  ;;  %2662 = vrot.lane.b32.xlu0 %v11614_v27, %s7690_s19  ;;  %v1697_v39 = vld [vmem:[#allocation5 + $0x30] sm:$0xff] }
 0xb1d   : > { %v1816_v61 = vadd.f32 %v1800_v36, %v11615_v56  ;;  %v1730_v34 = vpop.permute.xlu1 %1729  ;;  %7238 = vpow2.f32 %v2154_v21 }
 0xb1e   : > { %1822 = vst.msk [vmem:[#allocation5 + $0x18] sm:$0xff] %vm1071_vm3, %v1806_v31  ;;  %v1791_v12 = vmul.f32 %v1730_v34, %v1695_v53  ;;  %v1785_v43 = vpop.permute.xlu0 %1784  ;;  %6712 = vmatmul.mubr.msk.bf16.vlgmr.msra.gmra.mrb[64].mxu0 %vm1071_vm3, %v9550_v32  ;;  %v11618_v53 = vld [vmem:[#allocation68_spill] sm:$0xff]  ;;  %v9707_v35 = vpop.eup %7234  ;;  %v1699_v31 = vld [vmem:[#allocation5 + $0x40] sm:$0xff]  ;;  %v11620_v34 = vld [vmem:[#allocation63_spill] sm:$0xff] }
 0xb1f   : > { %1832 = vst.msk [vmem:[#allocation5 + $0x68] sm:$0xff] %vm1071_vm3, %v1816_v61  ;;  %v1802_v54 = vmul.f32 %v1785_v43, %v1706_v33  ;;  %2573 = vperm.xlu1 %7068, %v9694_v37   ;;  %6715 = vmatprep.mubr.msk.bf16.mxu0 %vm1071_vm3, %v9625_v13  ;;  %v11619_v13 = vld [vmem:[#allocation58_spill] sm:$0xff]  ;;  %v1701_v61 = vld [vmem:[#allocation5 + $0x50] sm:$0xff] }
 0xb20   : > { %v1807_v36 = vadd.f32 %v1791_v12, %v11616_v20  ;;  %2666 = vrot.lane.b32.xlu0 %v11617_v38, %s7690_s19  ;;  %v1703_v20 = vld [vmem:[#allocation5 + $0x60] sm:$0xff] }
 0xb21   : > { %v1818_v2 = vadd.f32 %v11618_v53, %v1802_v54  ;;  %v1740_v62 = vpop.permute.xlu1 %1739  ;;  %v9713_v33 = vpop.eup %7236 }
 0xb22   : > { %1823 = vst.msk [vmem:[#allocation5 + $0x20] sm:$0xff] %vm1071_vm3, %v1807_v36  ;;  %v1793_v32 = vmul.f32 %v1740_v62, %v1697_v39  ;;  %v11621_v36 = vld [vmem:[#allocation62_spill] sm:$0xff]  ;;  %v11623_v62 = vld [vmem:[#allocation67_spill] sm:$0xff] }
 0xb23   : > { %1834 = vst.msk [vmem:[#allocation5 + $0x78] sm:$0xff] %vm1071_vm3, %v1818_v2  ;;  %2583 = vperm.xlu1 %7068, %v9707_v35   ;;  %v1705_v2 = vld [vmem:[#allocation5 + $0x70] sm:$0xff] }
 0xb24   : > { %v1809_v21 = vadd.f32 %v11619_v13, %v1793_v32 }
 0xb25   : > { %v1750_v27 = vpop.permute.xlu1 %1749 }
 0xb26   : > { %1825 = vst.msk [vmem:[#allocation5 + $0x30] sm:$0xff] %vm1071_vm3, %v1809_v21  ;;  %v1795_v56 = vmul.f32 %v1750_v27, %v1699_v31  ;;  %6716 = vmatmul.mubr.msk.bf16.gmra.mrb[68].mxu0 %vm1071_vm3, %v9560_v48  ;;  %v11624_v21 = vld [vmem:[#allocation44_spill] sm:$0xff]  ;;  %v11625_v27 = vld [vmem:[#allocation66_spill] sm:$0xff] }
 0xb27   : > { %2593 = vperm.xlu1 %7068, %v9713_v33   ;;  %6719 = vmatprep.mubr.msk.bf16.mxu0 %vm1071_vm3, %v9641_v30  ;;  %v9722_v54 = vpop.eup %7238  ;;  %v11622_v30 = vld [vmem:[#allocation45_spill] sm:$0xff] }
 0xb28   : > { %v1811_v12 = vadd.f32 %v1795_v56, %v11620_v34  ;;  %v11629_v34 = vld [vmem:[#allocation52_spill] sm:$0xff] }
 0xb29   : > { %v1760_v43 = vpop.permute.xlu1 %1759 }
 0xb2a   : > { %1827 = vst.msk [vmem:[#allocation5 + $0x40] sm:$0xff] %vm1071_vm3, %v1811_v12  ;;  %v1797_v39 = vmul.f32 %v1760_v43, %v1701_v61  ;;  %v11628_v61 = vld [vmem:[#allocation53_spill] sm:$0xff]  ;;  %v2285_v12 = vld [vmem:[#allocation4 + $0x8] sm:$0xff] }
 0xb2b   : > { %2603 = vperm.xlu1 %7068, %v9722_v54   ;;  %v2301_v43 = vmul.f32 %v9542_v47, %v2285_v12 }
 0xb2c   : > { %v1813_v38 = vadd.f32 %v11621_v36, %v1797_v39 }
 0xb2d   : > { %v1770_v48 = vpop.permute.xlu1 %1769 }
 0xb2e   : > { %1829 = vst.msk [vmem:[#allocation5 + $0x50] sm:$0xff] %vm1071_vm3, %v1813_v38  ;;  %v1799_v53 = vmul.f32 %v1770_v48, %v1703_v20  ;;  %6720 = vmatmul.mubr.msk.bf16.gmra.mrb[72].mxu0 %vm1071_vm3, %v9574_v15  ;;  %v11626_v15 = vld [vmem:[#allocation43_spill] sm:$0xff] }
 0xb2f   : > { %2640 = vrot.lane.b32.xlu1 %v11622_v30, %s7690_s19  ;;  %6723 = vmatprep.mubr.msk.bf16.mxu0 %vm1071_vm3, %v9657_v9  ;;  %v11627_v9 = vld [vmem:[#allocation42_spill] sm:$0xff]  ;;  %v2286_v20 = vld [vmem:[#allocation4 + $0x10] sm:$0xff] }
 0xb30   : > { %v1815_v32 = vadd.f32 %v1799_v53, %v11623_v62  ;;  %v2289_v30 = vld [vmem:[#allocation4 + $0x28] sm:$0xff] }
 0xb31   : > { %v1780_v31 = vpop.permute.xlu1 %1779 }
 0xb32   : > { %1831 = vst.msk [vmem:[#allocation5 + $0x60] sm:$0xff] %vm1071_vm3, %v1815_v32  ;;  %v1801_v13 = vmul.f32 %v1780_v31, %v1705_v2  ;;  %v2291_v32 = vld [vmem:[#allocation4 + $0x38] sm:$0xff] }
 0xb33   : > { %2644 = vrot.lane.b32.xlu1 %v11624_v21, %s7690_s19  ;;  %v2293_v21 = vld [vmem:[#allocation4 + $0x48] sm:$0xff] }
 0xb34   : > { %v1817_v56 = vadd.f32 %v11625_v27, %v1801_v13 }
 0xb36   : > { %1833 = vst.msk [vmem:[#allocation5 + $0x70] sm:$0xff] %vm1071_vm3, %v1817_v56  ;;  %6724 = vmatmul.mubr.msk.bf16.gmra.mrb[76].mxu0 %vm1071_vm3, %v9595_v8  ;;  %v11630_v8 = vld [vmem:[#allocation51_spill] sm:$0xff] }
 0xb37   : > { %2648 = vrot.lane.b32.xlu1 %v11626_v15, %s7690_s19  ;;  %v2295_v15 = vld [vmem:[#allocation4 + $0x58] sm:$0xff] }
 0xb3b   : > { %2652 = vrot.lane.b32.xlu1 %v11627_v9, %s7690_s19  ;;  %v2284_v9 = vld [vmem:[#allocation4] sm:$0xff] }
 0xb3f   : > { %3206 = vadd.xlane.f32.xlu0 %v9479_v44  ;;  %2656 = vrot.lane.b32.xlu1 %v11628_v61, %s7690_s19  ;;  %v11631_v44 = vld [vmem:[#allocation50_spill] sm:$0xff] }
 0xb43   : > { %3202 = vadd.xlane.f32.xlu0 %v9473_v51  ;;  %2660 = vrot.lane.b32.xlu1 %v11629_v34, %s7690_s19  ;;  %v2302_v51 = vmul.f32 %v9593_v26, %v2286_v20  ;;  %v2307_v26 = vmul.f32 %v9669_v4, %v2291_v32  ;;  %v2300_v34 = vmul.f32 %v9564_v57, %v2284_v9  ;;  %v2297_v4 = vld [vmem:[#allocation4 + $0x68] sm:$0xff]  ;;  %v2294_v32 = vld [vmem:[#allocation4 + $0x50] sm:$0xff] }
 0xb47   : > { %3214 = vadd.xlane.f32.xlu0 %v9507_v58  ;;  %2664 = vrot.lane.b32.xlu1 %v11630_v8, %s7690_s19  ;;  %v2287_v58 = vld [vmem:[#allocation4 + $0x18] sm:$0xff] }
 0xb48   : > { %v2303_v53 = vmul.f32 %v9605_v11, %v2287_v58  ;;  %v2309_v11 = vmul.f32 %v9694_v37, %v2293_v21  ;;  %v2313_v37 = vmul.f32 %v9713_v33, %v2297_v4  ;;  %v2512_v4 = vld [vmem:[#allocation5 + $0x10] sm:$0xff] }
 0xb4b   : > { %v2319_v39 = vpop.xlane.xlu0 %2318  ;;  %3210 = vadd.xlane.f32.xlu0 %v9502_v5  ;;  %2668 = vrot.lane.b32.xlu1 %v11631_v44, %s7690_s19  ;;  %v2305_v5 = vmul.f32 %v9644_v41, %v2289_v30  ;;  %v2311_v41 = vmul.f32 %v9707_v35, %v2295_v15  ;;  %v2290_v35 = vld [vmem:[#allocation4 + $0x30] sm:$0xff] }
 0xb4c   : > { %v2349_v36 = vadd.f32 %v2319_v39, %v2301_v43  ;;  %v2288_v43 = vld [vmem:[#allocation4 + $0x20] sm:$0xff] }
 0xb4d   : > { %v2304_v20 = vmul.f32 %v9629_v7, %v2288_v43 }
 0xb4e   : > { %2366 = vst.msk [vmem:[#allocation4 + $0x8] sm:$0xff] %vm2364_vm5, %v2349_v36 }
 0xb4f   : > { %v2321_v38 = vpop.xlane.xlu0 %2320 }
 0xb50   : > { %v2350_v48 = vadd.f32 %v2321_v38, %v2302_v51  ;;  %v2299_v38 = vld [vmem:[#allocation4 + $0x78] sm:$0xff] }
 0xb52   : > { %2367 = vst.msk [vmem:[#allocation4 + $0x10] sm:$0xff] %vm2364_vm5, %v2350_v48  ;;  %v2315_v48 = vmul.f32 %v9722_v54, %v2299_v38 }
 0xb53   : > { %v2323_v47 = vpop.xlane.xlu0 %2322 }
 0xb54   : > { %v2351_v2 = vadd.f32 %v2323_v47, %v2303_v53  ;;  %v2306_v53 = vmul.f32 %v9659_v63, %v2290_v35  ;;  %v2310_v63 = vmul.f32 %v9552_v46, %v2294_v32 }
 0xb56   : > { %2368 = vst.msk [vmem:[#allocation4 + $0x18] sm:$0xff] %vm2364_vm5, %v2351_v2  ;;  %v2292_v2 = vld [vmem:[#allocation4 + $0x40] sm:$0xff] }
 0xb57   : > { %v2327_v62 = vpop.xlane.xlu0 %2326  ;;  %v2308_v7 = vmul.f32 %v9682_v40, %v2292_v2 }
 0xb58   : > { %v2353_v31 = vadd.f32 %v2327_v62, %v2305_v5 }
 0xb5a   : > { %2370 = vst.msk [vmem:[#allocation4 + $0x28] sm:$0xff] %vm2364_vm5, %v2353_v31 }
 0xb5b   : > { %v2331_v13 = vpop.xlane.xlu0 %2330 }
 0xb5c   : > { %v2355_v27 = vadd.f32 %v2331_v13, %v2307_v26  ;;  %v2296_v13 = vld [vmem:[#allocation4 + $0x60] sm:$0xff] }
 0xb5d   : > { %v2312_v40 = vmul.f32 %v9562_v10, %v2296_v13 }
 0xb5e   : > { %2372 = vst.msk [vmem:[#allocation4 + $0x38] sm:$0xff] %vm2364_vm5, %v2355_v27 }
 0xb5f   : > { %v2335_v56 = vpop.xlane.xlu0 %2334 }
 0xb60   : > { %v2357_v61 = vadd.f32 %v2335_v56, %v2309_v11  ;;  %v2298_v11 = vld [vmem:[#allocation4 + $0x70] sm:$0xff] }
 0xb61   : > { %v2314_v46 = vmul.f32 %v9570_v23, %v2298_v11 }
 0xb62   : > { %2374 = vst.msk [vmem:[#allocation4 + $0x48] sm:$0xff] %vm2364_vm5, %v2357_v61 }
 0xb63   : > { %v2339_v8 = vpop.xlane.xlu0 %2338  ;;  %v2317_v12 = vpop.xlane.xlu1 %2316 }
 0xb64   : > { %v2359_v39 = vadd.f32 %v2339_v8, %v2311_v41  ;;  %v2348_v44 = vadd.f32 %v2317_v12, %v2300_v34  ;;  %v2510_v41 = vld [vmem:[#allocation5] sm:$0xff] }
 0xb66   : > { %2376 = vst.msk [vmem:[#allocation4 + $0x58] sm:$0xff] %vm2364_vm5, %v2359_v39  ;;  %2365 = vst.msk [vmem:[#allocation4] sm:$0xff] %vm2364_vm5, %v2348_v44 }
 0xb67   : > { %v2343_v36 = vpop.xlane.xlu0 %2342  ;;  %v2325_v51 = vpop.xlane.xlu1 %2324 }
 0xb68   : > { %v2361_v58 = vadd.f32 %v2343_v36, %v2313_v37  ;;  %v2352_v57 = vadd.f32 %v2325_v51, %v2304_v20  ;;  %v2514_v37 = vld [vmem:[#allocation5 + $0x20] sm:$0xff] }
 0xb6a   : > { %2378 = vst.msk [vmem:[#allocation4 + $0x68] sm:$0xff] %vm2364_vm5, %v2361_v58  ;;  %2369 = vst.msk [vmem:[#allocation4 + $0x20] sm:$0xff] %vm2364_vm5, %v2352_v57  ;;  %v2516_v58 = vld [vmem:[#allocation5 + $0x30] sm:$0xff] }
 0xb6b   : > { %v2347_v47 = vpop.xlane.xlu0 %2346  ;;  %v2329_v30 = vpop.xlane.xlu1 %2328 }
 0xb6c   : > { %v2363_v33 = vadd.f32 %v2347_v47, %v2315_v48  ;;  %v2354_v5 = vadd.f32 %v2329_v30, %v2306_v53  ;;  %v2520_v53 = vld [vmem:[#allocation5 + $0x50] sm:$0xff] }
 0xb6e   : > { %2380 = vst.msk [vmem:[#allocation4 + $0x78] sm:$0xff] %vm2364_vm5, %v2363_v33  ;;  %2371 = vst.msk [vmem:[#allocation4 + $0x30] sm:$0xff] %vm2364_vm5, %v2354_v5 }
 0xb6f   : > { %3204 = vadd.xlane.f32.xlu1 %v9475_v28  ;;  %v2333_v62 = vpop.xlane.xlu1 %2332 }
 0xb70   : > { %v2356_v31 = vadd.f32 %v2333_v62, %v2308_v7  ;;  %v2522_v7 = vld [vmem:[#allocation5 + $0x60] sm:$0xff] }
 0xb72   : > { %2373 = vst.msk [vmem:[#allocation4 + $0x40] sm:$0xff] %vm2364_vm5, %v2356_v31  ;;  %v2518_v31 = vld [vmem:[#allocation5 + $0x40] sm:$0xff] }
 0xb73   : > { %v9786_v54 = vpop.permute.xlu0 %2533  ;;  %3200 = vadd.xlane.f32.xlu1 %v9470_v16  ;;  %v2337_v26 = vpop.xlane.xlu1 %2336 }
 0xb74   : > { %v2358_v21 = vadd.f32 %v2337_v26, %v2310_v63 }
 0xb76   : > { %2375 = vst.msk [vmem:[#allocation4 + $0x50] sm:$0xff] %vm2364_vm5, %v2358_v21  ;;  %v2524_v21 = vld [vmem:[#allocation5 + $0x70] sm:$0xff] }
 0xb77   : > { %v2579_v27 = vpop.permute.xlu0 %2578  ;;  %3212 = vadd.xlane.f32.xlu1 %v9500_v60  ;;  %v2341_v28 = vpop.xlane.xlu1 %2340 }
 0xb78   : > { %v2360_v56 = vadd.f32 %v2341_v28, %v2312_v40  ;;  %v2616_v47 = vmul.f32 %v2579_v27, %v2520_v53 }
 0xb7a   : > { %2377 = vst.msk [vmem:[#allocation4 + $0x60] sm:$0xff] %vm2364_vm5, %v2360_v56 }
 0xb7b   : > { %v2589_v15 = vpop.permute.xlu0 %2588  ;;  %3208 = vadd.xlane.f32.xlu1 %v9505_v25  ;;  %v2345_v16 = vpop.xlane.xlu1 %2344 }
 0xb7c   : > { %v2362_v9 = vadd.f32 %v2345_v16, %v2314_v46  ;;  %v2618_v62 = vmul.f32 %v2589_v15, %v2522_v7  ;;  %v11635_v7 = vld [vmem:[#allocation114_spill] sm:$0xff] }
 0xb7e   : > { %2379 = vst.msk [vmem:[#allocation4 + $0x70] sm:$0xff] %vm2364_vm5, %v2362_v9 }
 0xb7f   : > { %v2599_v61 = vpop.permute.xlu0 %2598  ;;  %3216 = vadd.xlane.f32.xlu1 %v9578_v29  ;;  %v2529_v10 = vpop.permute.xlu1 %2528 }
 0xb80   : > { %v2606_v60 = vmul.f32 %v2529_v10, %v2510_v41  ;;  %v2620_v40 = vmul.f32 %v2599_v61, %v2524_v21 }
 0xb83   : > { %v2639_v34 = vpop.permute.xlu0 %2638  ;;  %v2539_v8 = vpop.permute.xlu1 %2538 }
 0xb84   : > { %v2686_v12 = vadd.f32 %v2639_v34, %v2606_v60  ;;  %v2608_v23 = vmul.f32 %v2539_v8, %v2512_v4  ;;  %v2511_v60 = vld [vmem:[#allocation5 + $0x8] sm:$0xff]  ;;  %v2513_v4 = vld [vmem:[#allocation5 + $0x18] sm:$0xff] }
 0xb85   : > { %v2607_v34 = vmul.f32 %v9786_v54, %v2511_v60 }
 0xb86   : > { %2703 = vst.msk [vmem:[#allocation5] sm:$0xff] %vm2702_vm7, %v2686_v12 }
 0xb87   : > { %v2643_v43 = vpop.permute.xlu0 %2642  ;;  %v2544_v25 = vpop.permute.xlu1 %2543 }
 0xb88   : > { %v2688_v39 = vadd.f32 %v2643_v43, %v2608_v23  ;;  %v2609_v23 = vmul.f32 %v2544_v25, %v2513_v4  ;;  %v11632_v25 = vld [vmem:[#allocation110_spill] sm:$0xff]  ;;  %v3171_v4 = vld [vmem:[#allocation4 + $0x18] sm:$0xff] }
 0xb8a   : > { %2705 = vst.msk [vmem:[#allocation5 + $0x10] sm:$0xff] %vm2702_vm7, %v2688_v39 }
 0xb8b   : > { %v2647_v44 = vpop.permute.xlu0 %2646  ;;  %v2549_v20 = vpop.permute.xlu1 %2548 }
 0xb8c   : > { %v2610_v29 = vmul.f32 %v2549_v20, %v2514_v37 }
 0xb8e   : > { %v2690_v36 = vadd.f32 %v2647_v44, %v2610_v29  ;;  %v2515_v44 = vld [vmem:[#allocation5 + $0x28] sm:$0xff] }
 0xb8f   : > { %v2651_v51 = vpop.permute.xlu0 %2650  ;;  %v2554_v38 = vpop.permute.xlu1 %2553 }
 0xb90   : > { %2707 = vst.msk [vmem:[#allocation5 + $0x20] sm:$0xff] %vm2702_vm7, %v2690_v36  ;;  %v2611_v37 = vmul.f32 %v2554_v38, %v2515_v44  ;;  %v2517_v36 = vld [vmem:[#allocation5 + $0x38] sm:$0xff]  ;;  %v2519_v38 = vld [vmem:[#allocation5 + $0x48] sm:$0xff] }
 0xb93   : > { %v2655_v35 = vpop.permute.xlu0 %2654  ;;  %v2559_v57 = vpop.permute.xlu1 %2558 }
 0xb94   : > { %v2612_v48 = vmul.f32 %v2559_v57, %v2516_v58  ;;  %v11633_v57 = vld [vmem:[#allocation111_spill] sm:$0xff] }
 0xb96   : > { %v2692_v30 = vadd.f32 %v2651_v51, %v2612_v48  ;;  %v11634_v48 = vsub.f32 %v11632_v25, %v11633_v57 }
 0xb97   : > { %v2659_v2 = vpop.permute.xlu0 %2658  ;;  %v2564_v33 = vpop.permute.xlu1 %2563 }
 0xb98   : > { %2709 = vst.msk [vmem:[#allocation5 + $0x30] sm:$0xff] %vm2702_vm7, %v2692_v30  ;;  %v2696_v5 = vadd.f32 %v2659_v2, %v2616_v47  ;;  %v2613_v51 = vmul.f32 %v2564_v33, %v2517_v36  ;;  %v3014_v53 = vmul.f32 1.442695, %v11634_v48  ;;  %v3173_v48 = vld [vmem:[#allocation4 + $0x28] sm:$0xff] }
 0xb9a   : > { %2713 = vst.msk [vmem:[#allocation5 + $0x50] sm:$0xff] %vm2702_vm7, %v2696_v5  ;;  %7240 = vpow2.f32 %v3014_v53 }
 0xb9b   : > { %v2663_v32 = vpop.permute.xlu0 %2662  ;;  %v2569_v63 = vpop.permute.xlu1 %2568 }
 0xb9c   : > { %v2698_v26 = vadd.f32 %v2663_v32, %v2618_v62  ;;  %v2614_v13 = vmul.f32 %v2569_v63, %v2518_v31  ;;  %v11636_v62 = vld [vmem:[#allocation115_spill] sm:$0xff] }
 0xb9d   : > { %v11637_v32 = vsub.f32 %v11635_v7, %v11636_v62 }
 0xb9e   : > { %2715 = vst.msk [vmem:[#allocation5 + $0x60] sm:$0xff] %vm2702_vm7, %v2698_v26  ;;  %v2694_v27 = vadd.f32 %v2655_v35, %v2614_v13  ;;  %v2521_v26 = vld [vmem:[#allocation5 + $0x58] sm:$0xff] }
 0xb9f   : > { %v2667_v28 = vpop.permute.xlu0 %2666  ;;  %v2574_v11 = vpop.permute.xlu1 %2573  ;;  %v3010_v31 = vmul.f32 1.442695, %v11637_v32 }
 0xba0   : > { %2711 = vst.msk [vmem:[#allocation5 + $0x40] sm:$0xff] %vm2702_vm7, %v2694_v27  ;;  %v2700_v56 = vadd.f32 %v2667_v28, %v2620_v40  ;;  %v2615_v5 = vmul.f32 %v2574_v11, %v2519_v38  ;;  %v11638_v40 = vld [vmem:[#allocation33_spill] sm:$0xff] }
 0xba1   : > { %7242 = vpow2.f32 %v3010_v31  ;;  %v11639_v27 = vsub.f32 %v11638_v40, %v9309_v3  ;;  %v11644_v40 = vld [vmem:[#allocation55_spill] sm:$0xff] }
 0xba2   : > { %2717 = vst.msk [vmem:[#allocation5 + $0x70] sm:$0xff] %vm2702_vm7, %v2700_v56  ;;  %v2523_v56 = vld [vmem:[#allocation5 + $0x68] sm:$0xff] }
 0xba3   : > { %v2584_v46 = vpop.permute.xlu1 %2583  ;;  %v3022_v28 = vmul.f32 1.442695, %v11639_v27  ;;  %v11645_v27 = vld [vmem:[#allocation109_spill] sm:$0xff] }
 0xba4   : > { %v9805_v15 = vpop.f32.mrb[48].mxu0  ;;  %v2617_v13 = vmul.f32 %v2584_v46, %v2521_v26 }
 0xba5   : > { %v9807_v16 = vpop.f32.mrb[49].mxu0  ;;  %7244 = vpow2.f32 %v3022_v28  ;;  %v11646_v28 = vsub.f32 %v11644_v40, %v11645_v27  ;;  %v3168_v40 = vld [vmem:[#allocation4] sm:$0xff] }
 0xba6   : > { %v9809_v9 = vpop.f32.mrb[50].mxu0 }
 0xba7   : > { %v9811_v10 = vpop.f32.mrb[51].mxu0  ;;  %v2594_v61 = vpop.permute.xlu1 %2593 }
 0xba8   : > { %v2619_v60 = vmul.f32 %v2594_v61, %v2523_v56  ;;  %v11647_v56 = vld [vmem:[#allocation112_spill] sm:$0xff] }
 0xbab   : > { %v2604_v41 = vpop.permute.xlu1 %2603 }
 0xbaf   : > { %v2641_v8 = vpop.permute.xlu1 %2640 }
 0xbb0   : > { %v2687_v12 = vadd.f32 %v2641_v8, %v2607_v34  ;;  %v11640_v8 = vsub.f32 %v9319_v19, %v9322_v14 }
 0xbb2   : > { %2704 = vst.msk [vmem:[#allocation5 + $0x8] sm:$0xff] %vm2702_vm7, %v2687_v12  ;;  %v3018_v12 = vmul.f32 1.442695, %v11640_v8 }
 0xbb3   : > { %v2645_v43 = vpop.permute.xlu1 %2644 }
 0xbb4   : > { %v2689_v39 = vadd.f32 %v2645_v43, %v2609_v23  ;;  %v2525_v23 = vld [vmem:[#allocation5 + $0x78] sm:$0xff]  ;;  %v9840_v43 = vpop.eup %7240  ;;  %7246 = vpow2.f32 %v3018_v12 }
 0xbb5   : > { %v3187_v44 = vmul.f32 %v9840_v43, %v3171_v4  ;;  %v9844_v36 = vpop.eup %7242 }
 0xbb6   : > { %2706 = vst.msk [vmem:[#allocation5 + $0x18] sm:$0xff] %vm2702_vm7, %v2689_v39  ;;  %v2621_v39 = vmul.f32 %v2604_v41, %v2525_v23  ;;  %v3175_v41 = vld [vmem:[#allocation4 + $0x38] sm:$0xff] }
 0xbb7   : > { %v2649_v20 = vpop.permute.xlu1 %2648  ;;  %v11650_v23 = vld [vmem:[#allocation116_spill] sm:$0xff] }
 0xbb8   : > { %v2691_v29 = vadd.f32 %v2649_v20, %v2611_v37  ;;  %v3169_v20 = vld [vmem:[#allocation4 + $0x8] sm:$0xff] }
 0xbb9   : > { %v3185_v19 = vmul.f32 %v9844_v36, %v3169_v20 }
 0xbba   : > { %2708 = vst.msk [vmem:[#allocation5 + $0x28] sm:$0xff] %vm2702_vm7, %v2691_v29  ;;  %v9817_v35 = vpop.f32.mrb[52].mxu0 }
 0xbbb   : > { %v9819_v54 = vpop.f32.mrb[53].mxu0  ;;  %v2653_v58 = vpop.permute.xlu1 %2652 }
 0xbbc   : > { %v2693_v47 = vadd.f32 %v2653_v58, %v2613_v51  ;;  %v9824_v30 = vpop.f32.mrb[54].mxu0  ;;  %v9849_v58 = vpop.eup %7244 }
 0xbbd   : > { %v9826_v2 = vpop.f32.mrb[55].mxu0  ;;  %v3191_v25 = vmul.f32 %v9849_v58, %v3175_v41 }
 0xbbe   : > { %2710 = vst.msk [vmem:[#allocation5 + $0x38] sm:$0xff] %vm2702_vm7, %v2693_v47  ;;  %v9853_v47 = vpop.eup %7246 }
 0xbbf   : > { %v2657_v33 = vpop.permute.xlu1 %2656 }
 0xbc0   : > { %v2695_v63 = vadd.f32 %v2657_v33, %v2615_v5  ;;  %v3189_v5 = vmul.f32 %v9853_v47, %v3173_v48  ;;  %v11655_v48 = vld [vmem:[#allocation119_spill] sm:$0xff] }
 0xbc2   : > { %2712 = vst.msk [vmem:[#allocation5 + $0x48] sm:$0xff] %vm2702_vm7, %v2695_v63 }
 0xbc3   : > { %v2661_v21 = vpop.permute.xlu1 %2660 }
 0xbc4   : > { %v2697_v11 = vadd.f32 %v2661_v21, %v2617_v13 }
 0xbc6   : > { %2714 = vst.msk [vmem:[#allocation5 + $0x58] sm:$0xff] %vm2702_vm7, %v2697_v11  ;;  %v3012_v11 = vmul.f32 1.442695, %v11646_v28 }
 0xbc7   : > { %v2665_v34 = vpop.permute.xlu1 %2664 }
 0xbc8   : > { %v2699_v46 = vadd.f32 %v2665_v34, %v2619_v60  ;;  %7248 = vpow2.f32 %v3012_v11  ;;  %v11648_v60 = vld [vmem:[#allocation113_spill] sm:$0xff] }
 0xbc9   : > { %v11649_v34 = vsub.f32 %v11647_v56, %v11648_v60  ;;  %v3174_v60 = vld [vmem:[#allocation4 + $0x30] sm:$0xff] }
 0xbca   : > { %2716 = vst.msk [vmem:[#allocation5 + $0x68] sm:$0xff] %vm2702_vm7, %v2699_v46 }
 0xbcb   : > { %v2669_v3 = vpop.permute.xlu1 %2668  ;;  %v3008_v8 = vmul.f32 1.442695, %v11649_v34 }
 0xbcc   : > { %v2701_v61 = vadd.f32 %v2669_v3, %v2621_v39  ;;  %v3207_v37 = vpop.xlane.xlu0 %3206  ;;  %v11651_v39 = vld [vmem:[#allocation117_spill] sm:$0xff] }
 0xbcd   : > { %v3235_v29 = vadd.f32 %v3207_v37, %v3187_v44  ;;  %7250 = vpow2.f32 %v3008_v8  ;;  %v11652_v3 = vsub.f32 %v11650_v23, %v11651_v39  ;;  %v11653_v37 = vld [vmem:[#allocation118_spill] sm:$0xff] }
 0xbce   : > { %2718 = vst.msk [vmem:[#allocation5 + $0x78] sm:$0xff] %vm2702_vm7, %v2701_v61  ;;  %v11654_v20 = vsub.f32 %v11653_v37, %v9296_v18  ;;  %v11298_v37 = vmov 3  }
 0xbcf   : > { %3252 = vst.msk [vmem:[#allocation4 + $0x18] sm:$0xff] %vm3248_vm6, %v3235_v29  ;;  %v3020_v44 = vmul.f32 1.442695, %v11652_v3  ;;  %7070 = vset.pattern.permute.xlu0 %v11298_v37  ;;  %7071 = vset.pattern.permute.xlu1 %v11298_v37 }
 0xbd0   : > { %v3203_v14 = vpop.xlane.xlu0 %3202  ;;  %v3016_v29 = vmul.f32 1.442695, %v11654_v20 }
 0xbd1   : > { %v3233_v51 = vadd.f32 %v3203_v14, %v3185_v19  ;;  %7252 = vpow2.f32 %v3020_v44  ;;  %v3170_v19 = vld [vmem:[#allocation4 + $0x10] sm:$0xff] }
 0xbd2   : > { %v9899_v41 = vpop.eup %7248  ;;  %7254 = vpow2.f32 %v3016_v29 }
 0xbd3   : > { %3250 = vst.msk [vmem:[#allocation4 + $0x8] sm:$0xff] %vm3248_vm6, %v3233_v51 }
 0xbd4   : > { %v3215_v57 = vpop.xlane.xlu0 %3214 }
 0xbd5   : > { %v3239_v53 = vadd.f32 %v3215_v57, %v3191_v25  ;;  %v3186_v25 = vmul.f32 %v9899_v41, %v3170_v19  ;;  %v3172_v19 = vld [vmem:[#allocation4 + $0x20] sm:$0xff] }
 0xbd7   : > { %3256 = vst.msk [vmem:[#allocation4 + $0x38] sm:$0xff] %vm3248_vm6, %v3239_v53  ;;  %v9856_v38 = vpop.f32.mrb[56].mxu0  ;;  %v11656_v53 = vld [vmem:[#allocation120_spill] sm:$0xff]  ;;  %v9913_v28 = vpop.eup %7250 }
 0xbd8   : > { %11641 = vst [vmem:[#allocation104_spill] sm:$0xff] %v9856_v38  ;;  %v3211_v33 = vpop.xlane.xlu0 %3210  ;;  %v9859_v7 = vpop.f32.mrb[57].mxu0  ;;  %v11657_v18 = vsub.f32 %v11655_v48, %v11656_v53  ;;  %v3184_v11 = vmul.f32 %v9913_v28, %v3168_v40 }
 0xbd9   : > { %v3237_v62 = vadd.f32 %v3211_v33, %v3189_v5  ;;  %v9861_v32 = vpop.f32.mrb[58].mxu0 }
 0xbda   : > { %v9863_v31 = vpop.f32.mrb[59].mxu0  ;;  %v3024_v5 = vmul.f32 1.442695, %v11657_v18 }
 0xbdb   : > { %3254 = vst.msk [vmem:[#allocation4 + $0x28] sm:$0xff] %vm3248_vm6, %v3237_v62  ;;  %v9921_v23 = vpop.eup %7252 }
 0xbdc   : > { %7256 = vpow2.f32 %v3024_v5  ;;  %v3190_v3 = vmul.f32 %v9921_v23, %v3174_v60  ;;  %v9935_v48 = vpop.eup %7254  ;;  %v3176_v5 = vld [vmem:[#allocation4 + $0x40] sm:$0xff] }
 0xbdd   : > { %v3188_v53 = vmul.f32 %v9935_v48, %v3172_v19  ;;  %v11661_v19 = vld [vmem:[#allocation30_spill] sm:$0xff] }
 0xbdf   : > { %v9866_v63 = vpop.f32.mrb[60].mxu0 }
 0xbe0   : > { %11642 = vst [vmem:[#allocation106_spill] sm:$0xff] %v9866_v63  ;;  %v9868_v26 = vpop.f32.mrb[61].mxu0 }
 0xbe1   : > { %11643 = vst [vmem:[#allocation108_spill] sm:$0xff] %v9868_v26  ;;  %v9870_v13 = vpop.f32.mrb[62].mxu0 }
 0xbe2   : > { %v9872_v21 = vpop.f32.mrb[63].mxu0 }
 0xbf1   : > { %v9880_v12 = vpop.f32.mrb[64].mxu0 }
 0xbf2   : > { %3832 = vmax.xlane.f32.xlu0 %v9880_v12  ;;  %v9883_v46 = vpop.f32.mrb[65].mxu0 }
 0xbf3   : > { %v9885_v4 = vpop.f32.mrb[66].mxu0 }
 0xbf4   : > { %v9890_v61 = vpop.f32.mrb[67].mxu0 }
 0xbf5   : > { %3830 = vmax.xlane.f32.xlu1 %v9890_v61 }
 0xbf6   : > { %3828 = vmax.xlane.f32.xlu0 %v9883_v46 }
 0xbf9   : > { %v9897_v14 = vpop.f32.mrb[68].mxu0 }
 0xbfa   : > { %3834 = vmax.xlane.f32.xlu0 %v9885_v4  ;;  %3840 = vmax.xlane.f32.xlu1 %v9897_v14  ;;  %v9903_v51 = vpop.f32.mrb[69].mxu0 }
 0xbfb   : > { %v9906_v57 = vpop.f32.mrb[70].mxu0 }
 0xbfc   : > { %v3205_v33 = vpop.xlane.xlu1 %3204  ;;  %v9911_v62 = vpop.f32.mrb[71].mxu0 }
 0xbfd   : > { %v3234_v27 = vadd.f32 %v3205_v33, %v3186_v25 }
 0xbfe   : > { %3836 = vmax.xlane.f32.xlu1 %v9903_v51  ;;  %3842 = vmax.xlane.f32.xlu0 %v9906_v57 }
 0xbff   : > { %3251 = vst.msk [vmem:[#allocation4 + $0x10] sm:$0xff] %vm3248_vm6, %v3234_v27  ;;  %v9943_v27 = vpop.eup %7256 }
 0xc00   : > { %v3201_v56 = vpop.xlane.xlu1 %3200 }
 0xc01   : > { %v3232_v34 = vadd.f32 %v3201_v56, %v3184_v11  ;;  %v9919_v8 = vpop.f32.mrb[72].mxu0  ;;  %v3192_v56 = vmul.f32 %v9943_v27, %v3176_v5  ;;  %v9972_v5 = vld [vmem:[#allocation3 + $0x10] sm:$0xff] }
 0xc02   : > { %3838 = vmax.xlane.f32.xlu0 %v9911_v62  ;;  %3848 = vmax.xlane.f32.xlu1 %v9919_v8  ;;  %v9925_v39 = vpop.f32.mrb[73].mxu0 }
 0xc03   : > { %3249 = vst.msk [vmem:[#allocation4] sm:$0xff] %vm3248_vm6, %v3232_v34  ;;  %v9929_v44 = vpop.f32.mrb[74].mxu0 }
 0xc04   : > { %v3213_v20 = vpop.xlane.xlu1 %3212  ;;  %v9933_v29 = vpop.f32.mrb[75].mxu0 }
 0xc05   : > { %v3238_v25 = vadd.f32 %v3213_v20, %v3190_v3 }
 0xc06   : > { %3844 = vmax.xlane.f32.xlu1 %v9925_v39  ;;  %3850 = vmax.xlane.f32.xlu0 %v9929_v44 }
 0xc07   : > { %3255 = vst.msk [vmem:[#allocation4 + $0x30] sm:$0xff] %vm3248_vm6, %v3238_v25  ;;  %v11662_v25 = vld [vmem:[#allocation32_spill] sm:$0xff] }
 0xc08   : > { %v3209_v18 = vpop.xlane.xlu1 %3208 }
 0xc09   : > { %v3236_v33 = vadd.f32 %v3209_v18, %v3188_v53  ;;  %v9941_v40 = vpop.f32.mrb[76].mxu0  ;;  %v11663_v53 = vld [vmem:[#allocation29_spill] sm:$0xff]  ;;  %v11664_v18 = vld [vmem:[#allocation31_spill] sm:$0xff] }
 0xc0a   : > { %11658 = vst [vmem:[#allocation102_spill] sm:$0xff] %v9941_v40  ;;  %3846 = vmax.xlane.f32.xlu0 %v9933_v29  ;;  %3856 = vmax.xlane.f32.xlu1 %v9941_v40  ;;  %v9947_v11 = vpop.f32.mrb[77].mxu0  ;;  %v10022_v40 = vld [vmem:[#allocation3 + $0x20] sm:$0xff] }
 0xc0b   : > { %3253 = vst.msk [vmem:[#allocation4 + $0x20] sm:$0xff] %vm3248_vm6, %v3236_v33  ;;  %v9951_v60 = vpop.f32.mrb[78].mxu0  ;;  %11671 = vst [vmem:[#allocation99_spill] sm:$0xff] %v10022_v40 }
 0xc0c   : > { %11659 = vst [vmem:[#allocation103_spill] sm:$0xff] %v9951_v60  ;;  %v3217_v34 = vpop.xlane.xlu1 %3216  ;;  %v9953_v3 = vpop.f32.mrb[79].mxu0 }
 0xc0d   : > { %11660 = vst [vmem:[#allocation105_spill] sm:$0xff] %v9953_v3  ;;  %v3240_v20 = vadd.f32 %v3217_v34, %v3192_v56  ;;  %v10003_v56 = vld [vmem:[#allocation3 + $0x30] sm:$0xff] }
 0xc0e   : > { %3852 = vmax.xlane.f32.xlu1 %v9947_v11  ;;  %3858 = vmax.xlane.f32.xlu0 %v9951_v60  ;;  %11667 = vst [vmem:[#allocation75_spill] sm:$0xff] %v10003_v56  ;;  %v10020_v60 = vld [vmem:[#allocation3 + $0x38] sm:$0xff] }
 0xc0f   : > { %3257 = vst.msk [vmem:[#allocation4 + $0x40] sm:$0xff] %vm3248_vm6, %v3240_v20  ;;  %v9987_v20 = vld [vmem:[#allocation3] sm:$0xff]  ;;  %11670 = vst [vmem:[#allocation98_spill] sm:$0xff] %v10020_v60 }
 0xc12   : > { %3854 = vmax.xlane.f32.xlu0 %v9953_v3 }
 0xc16   : > { %3218 = vadd.xlane.f32.xlu0 %v9581_v59 }
 0xc1f   : > { %4157 = vrot.lane.b32.xlu1 %v11661_v19, %s7690_s19 }
 0xc23   : > { %4161 = vrot.lane.b32.xlu1 %v11662_v25, %s7690_s19 }
 0xc27   : > { %4165 = vrot.lane.b32.xlu1 %v8232_v22, %s7690_s19  ;;  %v9982_v22 = vld [vmem:[#allocation3 + $0x8] sm:$0xff] }
 0xc2c   : > { %4159 = vrot.lane.b32.xlu0 %v11663_v53, %s7690_s19 }
 0xc30   : > { %4163 = vrot.lane.b32.xlu0 %v11664_v18, %s7690_s19 }
 0xc34   : > { %4167 = vrot.lane.b32.xlu0 %v11524_v42, %s7690_s19 }
 0xc7f   : > { %v3833_v59 = vpop.xlane.xlu0 %3832 }
 0xc80   : > { %v9975_v33 = vmax.f32 %v9972_v5, %v3833_v59  ;;  %v10001_v59 = vld [vmem:[#allocation3 + $0x18] sm:$0xff] }
 0xc81   : > { %11666 = vst [vmem:[#allocation74_spill] sm:$0xff] %v10001_v59 }
 0xc82   : > { %11665 = vst [vmem:[#allocation107_spill] sm:$0xff] %v9975_v33  ;;  %4489 = vst.msk [vmem:[#allocation3 + $0x10] sm:$0xff] %vm4132_vm8, %v9975_v33  ;;  %3936 = vperm.xlu0 %7070, %v9975_v33   ;;  %v3831_v34 = vpop.xlane.xlu1 %3830 }
 0xc83   : > { %v9985_v42 = vmax.f32 %v9982_v22, %v3831_v34  ;;  %v3829_v19 = vpop.xlane.xlu0 %3828 }
 0xc84   : > { %v9990_v25 = vmax.f32 %v9987_v20, %v3829_v19 }
 0xc85   : > { %4488 = vst.msk [vmem:[#allocation3 + $0x8] sm:$0xff] %vm4132_vm8, %v9985_v42 }
 0xc86   : > { %4487 = vst.msk [vmem:[#allocation3] sm:$0xff] %vm4132_vm8, %v9990_v25  ;;  %3926 = vperm.xlu1 %7071, %v9990_v25  }
 0xc87   : > { %v3835_v34 = vpop.xlane.xlu0 %3834  ;;  %v3841_v19 = vpop.xlane.xlu1 %3840 }
 0xc88   : > { %v10006_v37 = vmax.f32 %v10001_v59, %v3835_v34  ;;  %v10009_v53 = vmax.f32 %v10003_v56, %v3841_v19 }
 0xc8a   : > { %11668 = vst [vmem:[#allocation86_spill] sm:$0xff] %v10006_v37  ;;  %11669 = vst [vmem:[#allocation87_spill] sm:$0xff] %v10009_v53  ;;  %3941 = vperm.xlu1 %7071, %v10006_v37  }
 0xc8b   : > { %4490 = vst.msk [vmem:[#allocation3 + $0x18] sm:$0xff] %vm4132_vm8, %v10006_v37  ;;  %4493 = vst.msk [vmem:[#allocation3 + $0x30] sm:$0xff] %vm4132_vm8, %v10009_v53  ;;  %v3843_v34 = vpop.xlane.xlu0 %3842  ;;  %v3837_v19 = vpop.xlane.xlu1 %3836  ;;  %v10042_v37 = vld [vmem:[#allocation3 + $0x50] sm:$0xff] }
 0xc8c   : > { %v10025_v26 = vmax.f32 %v10020_v60, %v3843_v34  ;;  %v10028_v18 = vmax.f32 %v10022_v40, %v3837_v19  ;;  %v10040_v34 = vld [vmem:[#allocation3 + $0x28] sm:$0xff]  ;;  %v10063_v40 = vld [vmem:[#allocation3 + $0x58] sm:$0xff] }
 0xc8d   : > { %11674 = vst [vmem:[#allocation94_spill] sm:$0xff] %v10040_v34  ;;  %11677 = vst [vmem:[#allocation70_spill] sm:$0xff] %v10063_v40 }
 0xc8e   : > { %11672 = vst [vmem:[#allocation72_spill] sm:$0xff] %v10025_v26  ;;  %11673 = vst [vmem:[#allocation73_spill] sm:$0xff] %v10028_v18  ;;  %3961 = vperm.xlu0 %7070, %v10025_v26   ;;  %3931 = vperm.xlu1 %7071, %v9985_v42  }
 0xc8f   : > { %4494 = vst.msk [vmem:[#allocation3 + $0x38] sm:$0xff] %vm4132_vm8, %v10025_v26  ;;  %4491 = vst.msk [vmem:[#allocation3 + $0x20] sm:$0xff] %vm4132_vm8, %v10028_v18  ;;  %v3839_v19 = vpop.xlane.xlu0 %3838  ;;  %v3849_v59 = vpop.xlane.xlu1 %3848 }
 0xc90   : > { %v10045_v63 = vmax.f32 %v10040_v34, %v3839_v19  ;;  %v10048_v60 = vmax.f32 %v10042_v37, %v3849_v59  ;;  %v11676_v59 = vsub.f32 %v9410_v17, %v9413_v52  ;;  %v10065_v34 = vld [vmem:[#allocation3 + $0x40] sm:$0xff]  ;;  %v10083_v17 = vld [vmem:[#allocation3 + $0x48] sm:$0xff] }
 0xc91   : > { %11678 = vst [vmem:[#allocation71_spill] sm:$0xff] %v10065_v34  ;;  %11681 = vst [vmem:[#allocation47_spill] sm:$0xff] %v10083_v17 }
 0xc92   : > { %11675 = vst [vmem:[#allocation95_spill] sm:$0xff] %v10045_v63  ;;  %4492 = vst.msk [vmem:[#allocation3 + $0x28] sm:$0xff] %vm4132_vm8, %v10045_v63  ;;  %3951 = vperm.xlu0 %7070, %v10045_v63   ;;  %3956 = vperm.xlu1 %7071, %v10009_v53   ;;  %v3026_v19 = vmul.f32 1.442695, %v11676_v59 }
 0xc93   : > { %4497 = vst.msk [vmem:[#allocation3 + $0x50] sm:$0xff] %vm4132_vm8, %v10048_v60  ;;  %v3851_v56 = vpop.xlane.xlu0 %3850  ;;  %v3845_v38 = vpop.xlane.xlu1 %3844 }
 0xc94   : > { %v10068_v3 = vmax.f32 %v10063_v40, %v3851_v56  ;;  %v10071_v26 = vmax.f32 %v10065_v34, %v3845_v38  ;;  %7258 = vpow2.f32 %v3026_v19  ;;  %v10085_v56 = vld [vmem:[#allocation3 + $0x70] sm:$0xff] }
 0xc96   : > { %11679 = vst [vmem:[#allocation76_spill] sm:$0xff] %v10068_v3  ;;  %11680 = vst [vmem:[#allocation77_spill] sm:$0xff] %v10071_v26  ;;  %3981 = vperm.xlu0 %7070, %v10068_v3   ;;  %3946 = vperm.xlu1 %7071, %v10028_v18   ;;  %v3177_v18 = vld [vmem:[#allocation4 + $0x48] sm:$0xff] }
 0xc97   : > { %4498 = vst.msk [vmem:[#allocation3 + $0x58] sm:$0xff] %vm4132_vm8, %v10068_v3  ;;  %4495 = vst.msk [vmem:[#allocation3 + $0x40] sm:$0xff] %vm4132_vm8, %v10071_v26  ;;  %v3847_v38 = vpop.xlane.xlu0 %3846  ;;  %v3857_v59 = vpop.xlane.xlu1 %3856  ;;  %v10105_v3 = vld [vmem:[#allocation3 + $0x60] sm:$0xff] }
 0xc98   : > { %v10088_v63 = vmax.f32 %v10083_v17, %v3847_v38  ;;  %v10091_v40 = vmax.f32 %v10085_v56, %v3857_v59  ;;  %v10103_v38 = vld [vmem:[#allocation3 + $0x78] sm:$0xff] }
 0xc99   : > { %11683 = vst [vmem:[#allocation82_spill] sm:$0xff] %v10103_v38 }
 0xc9a   : > { %11682 = vst [vmem:[#allocation46_spill] sm:$0xff] %v10088_v63  ;;  %4496 = vst.msk [vmem:[#allocation3 + $0x48] sm:$0xff] %vm4132_vm8, %v10088_v63  ;;  %3971 = vperm.xlu0 %7070, %v10088_v63   ;;  %3976 = vperm.xlu1 %7071, %v10048_v60   ;;  %v11685_v63 = vmov 2  }
 0xc9b   : > { %4501 = vst.msk [vmem:[#allocation3 + $0x70] sm:$0xff] %vm4132_vm8, %v10091_v40  ;;  %v3859_v59 = vpop.xlane.xlu0 %3858  ;;  %v3853_v34 = vpop.xlane.xlu1 %3852 }
 0xc9c   : > { %v10108_v52 = vmax.f32 %v10103_v38, %v3859_v59  ;;  %v10111_v17 = vmax.f32 %v10105_v3, %v3853_v34  ;;  %v10124_v59 = vld [vmem:[#allocation3 + $0x68] sm:$0xff] }
 0xc9e   : > { %4502 = vst.msk [vmem:[#allocation3 + $0x78] sm:$0xff] %vm4132_vm8, %v10108_v52  ;;  %4499 = vst.msk [vmem:[#allocation3 + $0x60] sm:$0xff] %vm4132_vm8, %v10111_v17  ;;  %4171 = vrot.lane.b32.xlu0 %v11527_v0, %s7690_s19  ;;  %3966 = vperm.xlu1 %7071, %v10071_v26   ;;  %v7259_v38 = vpop.eup %7258 }
 0xc9f   : > { %v3855_v34 = vpop.xlane.xlu0 %3854  ;;  %v4158_v53 = vpop.permute.xlu1 %4157  ;;  %v3193_v0 = vmul.f32 %v7259_v38, %v3177_v18 }
 0xca0   : > { %v10127_v19 = vmax.f32 %v10124_v59, %v3855_v34  ;;  %6727 = vmatprep.subr.bf16.mxu1 %v4158_v53 }
 0xca1   : > { %6728 = vmatpush3.bf16.msra.mxu1 %v4158_v53 }
 0xca2   : > { %11684 = vst [vmem:[#allocation83_spill] sm:$0xff] %v10127_v19  ;;  %4500 = vst.msk [vmem:[#allocation3 + $0x68] sm:$0xff] %vm4132_vm8, %v10127_v19  ;;  %3991 = vperm.xlu0 %7070, %v10127_v19   ;;  %4169 = vrot.lane.b32.xlu1 %v11526_v49, %s7690_s19 }
 0xca3   : > { %v3219_v26 = vpop.xlane.xlu0 %3218  ;;  %v4162_v34 = vpop.permute.xlu1 %4161 }
 0xca4   : > { %v3241_v33 = vadd.f32 %v3219_v26, %v3193_v0  ;;  %v11689_v0 = vld [vmem:[#allocation129_spill] sm:$0xff] }
 0xca6   : > { %3258 = vst.msk [vmem:[#allocation4 + $0x48] sm:$0xff] %vm3248_vm6, %v3241_v33  ;;  %4001 = vperm.xlu0 %7070, %v10108_v52   ;;  %3986 = vperm.xlu1 %7071, %v10111_v17   ;;  %v11687_v33 = vld [vmem:[#allocation122_spill] sm:$0xff] }
 0xca7   : > { %v4160_v53 = vpop.permute.xlu0 %4159  ;;  %v4166_v49 = vpop.permute.xlu1 %4165 }
 0xca8   : > { %6729 = vmatprep.subr.bf16.mxu1 %v4160_v53 }
 0xca9   : > { %6730 = vmatpush3.bf16.msra.mxu1 %v4160_v53  ;;  %v11690_v53 = vld [vmem:[#allocation130_spill] sm:$0xff] }
 0xcaa   : > { %3996 = vperm.xlu1 %7071, %v10091_v40   ;;  %6731 = vmatprep.subr.bf16.mxu1 %v4162_v34 }
 0xcab   : > { %7072 = vset.pattern.permute.xlu0 %v11685_v63  ;;  %v4164_v19 = vpop.permute.xlu0 %4163 }
 0xcad   : > { %6732 = vmatpush3.bf16.msra.mxu1 %v4162_v34  ;;  %v11691_v34 = vsub.f32 %v11689_v0, %v11690_v53 }
 0xcae   : > { %6733 = vmatprep.subr.bf16.mxu1 %v4164_v19  ;;  %7073 = vset.pattern.permute.xlu1 %v11685_v63  ;;  %v11686_v63 = vld [vmem:[#allocation121_spill] sm:$0xff] }
 0xcaf   : > { %v4168_v26 = vpop.permute.xlu0 %4167  ;;  %v11688_v18 = vsub.f32 %v11686_v63, %v11687_v33  ;;  %v11698_v63 = vmov 3   ;;  %v11700_v33 = vld [vmem:[#allocation126_spill] sm:$0xff] }
 0xcb1   : > { %6734 = vmatpush3.bf16.msra.mxu1 %v4164_v19  ;;  %v3030_v19 = vmul.f32 1.442695, %v11688_v18 }
 0xcb2   : > { %6735 = vmatprep.subr.bf16.mxu1 %v4166_v49 }
 0xcb3   : > { %7260 = vpow2.f32 %v3030_v19 }
 0xcb5   : > { %6736 = vmatpush3.bf16.msra.mxu1 %v4166_v49  ;;  %v3034_v49 = vmul.f32 1.442695, %v11691_v34 }
 0xcb6   : > { %6737 = vmatprep.subr.bf16.mxu1 %v4168_v26 }
 0xcb7   : > { %7262 = vpow2.f32 %v3034_v49 }
 0xcb9   : > { %6738 = vmatpush3.bf16.msra.mxu1 %v4168_v26 }
 0xcc5   : > { %3222 = vadd.xlane.f32.xlu0 %v9572_v6  ;;  %v11692_v6 = vld [vmem:[#allocation127_spill] sm:$0xff] }
 0xcc9   : > { %3224 = vadd.xlane.f32.xlu0 %v9614_v50  ;;  %v11693_v50 = vld [vmem:[#allocation128_spill] sm:$0xff] }
 0xccd   : > { %3228 = vadd.xlane.f32.xlu0 %v9611_v1  ;;  %v11694_v1 = vsub.f32 %v11692_v6, %v11693_v50 }
 0xcce   : > { %3220 = vadd.xlane.f32.xlu1 %v9589_v24  ;;  %v10159_v24 = vpop.eup %7260 }
 0xccf   : > { %v3038_v26 = vmul.f32 1.442695, %v11694_v1 }
 0xcd1   : > { %7264 = vpow2.f32 %v3038_v26 }
 0xcd2   : > { %3226 = vadd.xlane.f32.xlu1 %v9607_v45  ;;  %v10163_v45 = vpop.eup %7262 }
 0xcd6   : > { %3230 = vadd.xlane.f32.xlu1 %v9622_v55 }
 0xcdb   : > { %v10167_v55 = vpop.eup %7264 }
 0xce3   : > { %3412 = vperm.xlu0 %7072, %v9913_v28   ;;  %v11696_v28 = vld [vmem:[#allocation34_spill] sm:$0xff] }
 0xce7   : > { %3457 = vperm.xlu0 %7072, %v7259_v38   ;;  %3417 = vperm.xlu1 %7073, %v9844_v36   ;;  %v11695_v36 = vld [vmem:[#allocation35_spill] sm:$0xff] }
 0xceb   : > { %3467 = vperm.xlu0 %7072, %v10159_v24   ;;  %3422 = vperm.xlu1 %7073, %v9899_v41   ;;  %v11697_v41 = vsub.f32 %v11695_v36, %v11696_v28 }
 0xced   : > { %v3028_v38 = vmul.f32 1.442695, %v11697_v41 }
 0xcef   : > { %3477 = vperm.xlu0 %7072, %v10163_v45   ;;  %3427 = vperm.xlu1 %7073, %v9840_v43   ;;  %7266 = vpow2.f32 %v3028_v38  ;;  %v11699_v43 = vld [vmem:[#allocation125_spill] sm:$0xff] }
 0xcf3   : > { %3487 = vperm.xlu0 %7072, %v10167_v55   ;;  %3432 = vperm.xlu1 %7073, %v9935_v48   ;;  %v11701_v48 = vsub.f32 %v11699_v43, %v11700_v33 }
 0xcf5   : > { %v3032_v18 = vmul.f32 1.442695, %v11701_v48 }
 0xcf7   : > { %3524 = vrot.lane.b32.xlu0 %v9811_v10, %s7687_s10  ;;  %3437 = vperm.xlu1 %7073, %v9853_v47   ;;  %v11702_v10 = vld [vmem:[#allocation123_spill] sm:$0xff]  ;;  %v11703_v47 = vld [vmem:[#allocation124_spill] sm:$0xff]  ;;  %7268 = vpow2.f32 %v3032_v18 }
 0xcf8   : > { %7075 = vset.pattern.permute.xlu0 %v11698_v63  ;;  %v11704_v19 = vsub.f32 %v11702_v10, %v11703_v47 }
 0xcf9   : > { %v10194_v34 = vpop.eup %7266 }
 0xcfa   : > { %v3036_v0 = vmul.f32 1.442695, %v11704_v19 }
 0xcfb   : > { %3528 = vrot.lane.b32.xlu0 %v9809_v9, %s7687_s10  ;;  %3442 = vperm.xlu1 %7073, %v9921_v23  }
 0xcfc   : > { %7270 = vpow2.f32 %v3036_v0 }
 0xcff   : > { %3532 = vrot.lane.b32.xlu0 %v9826_v2, %s7687_s10  ;;  %3447 = vperm.xlu1 %7073, %v9849_v58   ;;  %v11705_v2 = vsub.f32 %v9982_v22, %v9985_v42 }
 0xd01   : > { %v3937_v53 = vpop.permute.xlu0 %3936  ;;  %v3894_v58 = vmul.f32 1.442695, %v11705_v2 }
 0xd02   : > { %v4006_v9 = vsub.f32 %v9880_v12, %v3937_v53 }
 0xd03   : > { %3536 = vrot.lane.b32.xlu0 %v9824_v30, %s7687_s10  ;;  %3452 = vperm.xlu1 %7073, %v9943_v27   ;;  %v10202_v30 = vpop.eup %7268  ;;  %7272 = vpow2.f32 %v3894_v58 }
 0xd04   : > { %v4024_v49 = vmul.f32 1.442695, %v4006_v9 }
 0xd05   : > { %v3927_v23 = vpop.permute.xlu1 %3926 }
 0xd06   : > { %v4004_v27 = vsub.f32 %v9883_v46, %v3927_v23  ;;  %7274 = vpow2.f32 %v4024_v49  ;;  %v10212_v26 = vpop.eup %7270 }
 0xd07   : > { %3540 = vrot.lane.b32.xlu0 %v9863_v31, %s7687_s10  ;;  %3462 = vperm.xlu1 %7073, %v10194_v34   ;;  %v11706_v31 = vsub.f32 %v10042_v37, %v10048_v60 }
 0xd08   : > { %v4020_v36 = vmul.f32 1.442695, %v4004_v27 }
 0xd09   : > { %v3942_v6 = vpop.permute.xlu1 %3941  ;;  %v3912_v50 = vmul.f32 1.442695, %v11706_v31 }
 0xd0a   : > { %v4007_v12 = vsub.f32 %v9885_v4, %v3942_v6 }
 0xd0b   : > { %3544 = vrot.lane.b32.xlu0 %v9861_v32, %s7687_s10  ;;  %3472 = vperm.xlu1 %7073, %v10202_v30   ;;  %v11707_v32 = vsub.f32 %v10085_v56, %v10091_v40 }
 0xd0c   : > { %v4026_v22 = vmul.f32 1.442695, %v4007_v12 }
 0xd0d   : > { %v3962_v42 = vpop.permute.xlu0 %3961  ;;  %v3932_v1 = vpop.permute.xlu1 %3931  ;;  %v3920_v4 = vmul.f32 1.442695, %v11707_v32 }
 0xd0e   : > { %7276 = vpow2.f32 %v4026_v22  ;;  %v4005_v46 = vsub.f32 %v9890_v61, %v3932_v1  ;;  %v10231_v41 = vpop.eup %7272  ;;  %v4011_v19 = vsub.f32 %v9906_v57, %v3962_v42  ;;  %v11712_v22 = vld [vmem:[#allocation105_spill] sm:$0xff]  ;;  %v11713_v42 = vld [vmem:[#allocation104_spill] sm:$0xff] }
 0xd0f   : > { %3548 = vrot.lane.b32.xlu0 %v9872_v21, %s7687_s10  ;;  %3482 = vperm.xlu1 %7073, %v10212_v26   ;;  %7278 = vpow2.f32 %v3912_v50  ;;  %v11708_v21 = vsub.f32 %v10105_v3, %v10111_v17  ;;  %v11710_v50 = vld [vmem:[#allocation107_spill] sm:$0xff] }
 0xd10   : > { %v4022_v37 = vmul.f32 1.442695, %v4005_v46  ;;  %7280 = vpow2.f32 %v4020_v36  ;;  %v10234_v43 = vpop.eup %7274  ;;  %v4034_v57 = vmul.f32 1.442695, %v4011_v19 }
 0xd11   : > { %v3952_v60 = vpop.permute.xlu0 %3951  ;;  %v3957_v28 = vpop.permute.xlu1 %3956  ;;  %v3916_v61 = vmul.f32 1.442695, %v11708_v21 }
 0xd12   : > { %7282 = vpow2.f32 %v4022_v37  ;;  %v11714_v37 = vld [vmem:[#allocation108_spill] sm:$0xff] }
 0xd13   : > { %3552 = vrot.lane.b32.xlu0 %v9870_v13, %s7687_s10  ;;  %3522 = vrot.lane.b32.xlu1 %v9807_v16, %s7687_s10  ;;  %7284 = vpow2.f32 %v3920_v4  ;;  %v4009_v13 = vsub.f32 %v9911_v62, %v3952_v60  ;;  %v11715_v60 = vld [vmem:[#allocation74_spill] sm:$0xff] }
 0xd14   : > { %7074 = vset.pattern.permute.xlu1 %v11698_v63  ;;  %7286 = vpow2.f32 %v3916_v61 }
 0xd15   : > { %v10229_v40 = vpop.permute.xlu0 %3981  ;;  %v3947_v56 = vpop.permute.xlu1 %3946 }
 0xd16   : > { %v4008_v38 = vsub.f32 %v9903_v51, %v3947_v56  ;;  %v4030_v51 = vmul.f32 1.442695, %v4009_v13  ;;  %v4015_v12 = vsub.f32 %v9929_v44, %v10229_v40  ;;  %v11718_v40 = vld [vmem:[#allocation102_spill] sm:$0xff]  ;;  %v11719_v13 = vld [vmem:[#allocation103_spill] sm:$0xff] }
 0xd17   : > { %4301 = vperm.xlu0 %7075, %v10231_v41   ;;  %3526 = vrot.lane.b32.xlu1 %v9805_v15, %s7687_s10  ;;  %v4010_v15 = vsub.f32 %v9897_v14, %v3957_v28  ;;  %v11716_v28 = vld [vmem:[#allocation86_spill] sm:$0xff] }
 0xd18   : > { %v10240_v16 = vpop.eup %7276  ;;  %v4028_v3 = vmul.f32 1.442695, %v4008_v38  ;;  %v11717_v21 = vsub.f32 %v11715_v60, %v11716_v28  ;;  %v11734_v60 = vld [vmem:[#allocation77_spill] sm:$0xff] }
 0xd19   : > { %v3972_v17 = vpop.permute.xlu0 %3971  ;;  %v3977_v63 = vpop.permute.xlu1 %3976  ;;  %v4150_v33 = vpack.c.bf16 %v10240_v16, %v10234_v43  ;;  %v4032_v14 = vmul.f32 1.442695, %v4010_v15 }
 0xd1a   : > { %v10244_v48 = vpop.eup %7278  ;;  %7288 = vpow2.f32 %v4028_v3  ;;  %v3898_v61 = vmul.f32 1.442695, %v11717_v21 }
 0xd1b   : > { %4346 = vperm.xlu0 %7075, %v10244_v48   ;;  %3530 = vrot.lane.b32.xlu1 %v9819_v54, %s7687_s10  ;;  %v10249_v62 = vpop.eup %7280  ;;  %7290 = vpow2.f32 %v4030_v51  ;;  %v4013_v54 = vsub.f32 %v9933_v29, %v3972_v17  ;;  %v11709_v29 = vsub.f32 %v9987_v20, %v9990_v25  ;;  %v11711_v20 = vsub.f32 %v9972_v5, %v11710_v50 }
 0xd1c   : > { %v10252_v18 = vpop.eup %7282  ;;  %7292 = vpow2.f32 %v4032_v14 }
 0xd1d   : > { %v3967_v10 = vpop.permute.xlu1 %3966  ;;  %v10254_v47 = vpop.eup %7284  ;;  %v4149_v9 = vpack.c.bf16 %v10252_v18, %v10249_v62  ;;  %v3892_v49 = vmul.f32 1.442695, %v11709_v29  ;;  %v3896_v25 = vmul.f32 1.442695, %v11711_v20 }
 0xd1e   : > { %v4172_v0 = vpop.permute.xlu0 %4171  ;;  %v4012_v53 = vsub.f32 %v9925_v39, %v3967_v10  ;;  %v10264_v58 = vpop.eup %7286  ;;  %v4038_v39 = vmul.f32 1.442695, %v4013_v54  ;;  %v11723_v10 = vld [vmem:[#allocation106_spill] sm:$0xff] }
 0xd1f   : > { %4366 = vperm.xlu0 %7075, %v10254_v47   ;;  %3534 = vrot.lane.b32.xlu1 %v9817_v35, %s7687_s10  ;;  %v4014_v35 = vsub.f32 %v9919_v8, %v3977_v63  ;;  %v11720_v63 = vld [vmem:[#allocation99_spill] sm:$0xff] }
 0xd20   : > { %6743 = vmatprep.mubr.bf16.mxu1 %v4149_v9  ;;  %v4036_v23 = vmul.f32 1.442695, %v4012_v53 }
 0xd21   : > { %v4170_v2 = vpop.permute.xlu1 %4169  ;;  %v4040_v1 = vmul.f32 1.442695, %v4014_v35 }
 0xd22   : > { %6739 = vmatprep.subr.bf16.mxu1 %v4170_v2  ;;  %v3992_v6 = vpop.permute.xlu0 %3991  ;;  %7294 = vpow2.f32 %v4036_v23 }
 0xd23   : > { %3538 = vrot.lane.b32.xlu1 %v9859_v7, %s7687_s10  ;;  %4356 = vperm.xlu0 %7075, %v10264_v58   ;;  %7296 = vpow2.f32 %v4034_v57  ;;  %v4017_v8 = vsub.f32 %v11712_v22, %v3992_v6  ;;  %v11725_v57 = vld [vmem:[#allocation95_spill] sm:$0xff] }
 0xd24   : > { %6740 = vmatpush3.bf16.msra.mxu1 %v4170_v2  ;;  %v10276_v31 = vpop.eup %7288  ;;  %7298 = vpow2.f32 %v4038_v39  ;;  %v11724_v2 = vld [vmem:[#allocation94_spill] sm:$0xff] }
 0xd25   : > { %6741 = vmatprep.subr.bf16.mxu1 %v4172_v0  ;;  %v3987_v27 = vpop.permute.xlu1 %3986  ;;  %7300 = vpow2.f32 %v3892_v49  ;;  %v10284_v36 = vpop.eup %7290  ;;  %v4046_v5 = vmul.f32 1.442695, %v4017_v8  ;;  %v11726_v39 = vsub.f32 %v11724_v2, %v11725_v57  ;;  %v11744_v57 = vld [vmem:[#allocation83_spill] sm:$0xff] }
 0xd26   : > { %v4016_v7 = vsub.f32 %v9947_v11, %v3987_v27  ;;  %v4042_v11 = vmul.f32 1.442695, %v4015_v12  ;;  %v4151_v32 = vpack.c.bf16 %v10284_v36, %v10276_v31  ;;  %7302 = vpow2.f32 %v3896_v25  ;;  %v4002_v4 = vpop.permute.xlu0 %4001  ;;  %v10294_v38 = vpop.eup %7292  ;;  %v11727_v12 = vld [vmem:[#allocation75_spill] sm:$0xff] }
 0xd27   : > { %3542 = vrot.lane.b32.xlu1 %v11713_v42, %s7687_s10  ;;  %7304 = vpow2.f32 %v4040_v1  ;;  %v4019_v3 = vsub.f32 %v11719_v13, %v4002_v4  ;;  %v3902_v29 = vmul.f32 1.442695, %v11726_v39  ;;  %v11730_v1 = vld [vmem:[#allocation98_spill] sm:$0xff]  ;;  %v11737_v13 = vld [vmem:[#allocation76_spill] sm:$0xff]  ;;  %v11745_v39 = vsub.f32 %v10124_v59, %v11744_v57 }
 0xd28   : > { %6742 = vmatpush3.bf16.msra.mxu1 %v4172_v0  ;;  %v4044_v44 = vmul.f32 1.442695, %v4016_v7  ;;  %v11728_v7 = vld [vmem:[#allocation87_spill] sm:$0xff] }
 0xd29   : > { %v3997_v46 = vpop.permute.xlu1 %3996  ;;  %v4050_v14 = vmul.f32 1.442695, %v4019_v3  ;;  %v11729_v50 = vsub.f32 %v11727_v12, %v11728_v7 }
 0xd2a   : > { %v4018_v56 = vsub.f32 %v11718_v40, %v3997_v46  ;;  %7306 = vpow2.f32 %v4044_v44  ;;  %v11731_v44 = vld [vmem:[#allocation72_spill] sm:$0xff] }
 0xd2b   : > { %6744 = vmatmul.mubr.bf16.vlgmr.msra.gmra.mrb[48].mxu1 %v4150_v33  ;;  %3546 = vrot.lane.b32.xlu1 %v11714_v37, %s7687_s10  ;;  %7308 = vpow2.f32 %v4042_v11  ;;  %v11721_v33 = vld [vmem:[#allocation73_spill] sm:$0xff]  ;;  %v3904_v20 = vmul.f32 1.442695, %v11729_v50  ;;  %v11732_v46 = vsub.f32 %v11730_v1, %v11731_v44  ;;  %v11733_v37 = vld [vmem:[#allocation71_spill] sm:$0xff] }
 0xd2c   : > { %6747 = vmatprep.mubr.bf16.mxu1 %v4151_v32  ;;  %v10297_v17 = vpop.eup %7294  ;;  %v11722_v51 = vsub.f32 %v11720_v63, %v11721_v33  ;;  %7310 = vpow2.f32 %v4046_v5  ;;  %v4048_v0 = vmul.f32 1.442695, %v4018_v56  ;;  %v11735_v28 = vsub.f32 %v11733_v37, %v11734_v60  ;;  %v11736_v56 = vld [vmem:[#allocation70_spill] sm:$0xff] }
 0xd2d   : > { %v7297_v19 = vpop.eup %7296  ;;  %7312 = vpow2.f32 %v3898_v61  ;;  %v3906_v11 = vmul.f32 1.442695, %v11732_v46  ;;  %v11738_v3 = vsub.f32 %v11736_v56, %v11737_v13 }
 0xd2e   : > { %v3900_v15 = vmul.f32 1.442695, %v11722_v51  ;;  %v10304_v53 = vpop.eup %7298  ;;  %v4152_v9 = vpack.c.bf16 %v7297_v19, %v10294_v38  ;;  %v3908_v21 = vmul.f32 1.442695, %v11735_v28  ;;  %v11739_v51 = vld [vmem:[#allocation47_spill] sm:$0xff]  ;;  %v3183_v28 = vld [vmem:[#allocation4 + $0x78] sm:$0xff] }
 0xd2f   : > { %3550 = vrot.lane.b32.xlu1 %v11723_v10, %s7687_s10  ;;  %v10307_v54 = vpop.eup %7300  ;;  %v4153_v23 = vpack.c.bf16 %v10304_v53, %v10297_v17  ;;  %v3914_v63 = vmul.f32 1.442695, %v11738_v3  ;;  %s11748_s10 = sld [smem:[#allocation140_spill]] (!%p6220_p6) }
 0xd30   : > { %7314 = vpow2.f32 %v3900_v15  ;;  %v10315_v49 = vpop.eup %7302  ;;  %v11740_v15 = vld [vmem:[#allocation46_spill] sm:$0xff] }
 0xd31   : > { %7316 = vpow2.f32 %v4048_v0  ;;  %v10317_v35 = vpop.eup %7304  ;;  %v11741_v10 = vsub.f32 %v11739_v51, %v11740_v15 }
 0xd32   : > { %7318 = vpow2.f32 %v4050_v14 }
 0xd33   : > { %6748 = vmatmul.mubr.bf16.gmra.mrb[52].mxu1 %v4152_v9  ;;  %4296 = vperm.xlu1 %7074, %v10307_v54   ;;  %7320 = vpow2.f32 %v3902_v29  ;;  %v3910_v0 = vmul.f32 1.442695, %v11741_v10  ;;  %v11742_v9 = vld [vmem:[#allocation82_spill] sm:$0xff]  ;;  %v3918_v29 = vmul.f32 1.442695, %v11745_v39 }
 0xd34   : > { %6751 = vmatprep.mubr.bf16.mxu1 %v4153_v23  ;;  %v10319_v6 = vpop.eup %7306  ;;  %7322 = vpow2.f32 %v3904_v20  ;;  %v11743_v14 = vsub.f32 %v11742_v9, %v10108_v52  ;;  %v3180_v52 = vld [vmem:[#allocation4 + $0x60] sm:$0xff]  ;;  %v3395_v9 = vld [vmem:[#allocation5 + $0x8] sm:$0xff] }
 0xd35   : > { %v7309_v27 = vpop.eup %7308  ;;  %7324 = vpow2.f32 %v3906_v11  ;;  %v3181_v11 = vld [vmem:[#allocation4 + $0x68] sm:$0xff] }
 0xd36   : > { %v10325_v25 = vpop.eup %7310  ;;  %v4154_v22 = vpack.c.bf16 %v7309_v27, %v10317_v35  ;;  %7326 = vpow2.f32 %v3908_v21  ;;  %v3922_v23 = vmul.f32 1.442695, %v11743_v14 }
 0xd37   : > { %4306 = vperm.xlu1 %7074, %v10315_v49   ;;  %v10328_v8 = vpop.eup %7312  ;;  %v4155_v42 = vpack.c.bf16 %v10325_v25, %v10319_v6  ;;  %7328 = vpow2.f32 %v3914_v63 }
 0xd38   : > { %7330 = vpow2.f32 %v3910_v0 }
 0xd39   : > { %7332 = vpow2.f32 %v3922_v23 }
 0xd3a   : > { %v10336_v32 = vpop.eup %7314  ;;  %7334 = vpow2.f32 %v3918_v29 }
 0xd3b   : > { %6752 = vmatmul.mubr.bf16.gmra.mrb[56].mxu1 %v4154_v22  ;;  %4311 = vperm.xlu1 %7074, %v10328_v8   ;;  %v10338_v5 = vpop.eup %7316  ;;  %v3182_v22 = vld [vmem:[#allocation4 + $0x70] sm:$0xff] }
 0xd3c   : > { %6755 = vmatprep.mubr.bf16.mxu1 %v4155_v42  ;;  %v7319_v4 = vpop.eup %7318  ;;  %v3178_v42 = vld [vmem:[#allocation4 + $0x50] sm:$0xff] }
 0xd3d   : > { %v4156_v61 = vpack.c.bf16 %v7319_v4, %v10338_v5  ;;  %v10345_v40 = vpop.eup %7320 }
 0xd3e   : > { %v10352_v33 = vpop.eup %7322 }
 0xd3f   : > { %4316 = vperm.xlu1 %7074, %v10336_v32  }
 0xd42   : > { %4088 = vadd.xlane.f32.xlu0 %v10234_v43  ;;  %v10359_v43 = vpop.eup %7324 }
 0xd43   : > { %6756 = vmatmul.mubr.bf16.gmra.mrb[60].mxu1 %v4156_v61  ;;  %4321 = vperm.xlu1 %7074, %v10345_v40   ;;  %v10366_v2 = vpop.eup %7326  ;;  %v3199_v61 = vmul.f32 %v10167_v55, %v3183_v28 }
 0xd44   : > { %v10373_v12 = vpop.eup %7328 }
 0xd45   : > { %v10379_v20 = vpop.eup %7330 }
 0xd46   : > { %4090 = vadd.xlane.f32.xlu0 %v10240_v16  ;;  %v3179_v16 = vld [vmem:[#allocation4 + $0x58] sm:$0xff]  ;;  %v10384_v1 = vpop.eup %7332 }
 0xd47   : > { %4326 = vperm.xlu1 %7074, %v10352_v33   ;;  %v10390_v60 = vpop.eup %7334 }
 0xd4a   : > { %4086 = vadd.xlane.f32.xlu0 %v10252_v18  ;;  %v3195_v18 = vmul.f32 %v10159_v24, %v3179_v16  ;;  %v3397_v16 = vld [vmem:[#allocation5 + $0x18] sm:$0xff] }
 0xd4b   : > { %4331 = vperm.xlu1 %7074, %v10359_v43  }
 0xd4e   : > { %4098 = vadd.xlane.f32.xlu0 %v7297_v19  ;;  %v3196_v19 = vmul.f32 %v10202_v30, %v3180_v52  ;;  %v3194_v30 = vmul.f32 %v10194_v34, %v3178_v42 }
 0xd4f   : > { %4336 = vperm.xlu1 %7074, %v10366_v2  }
 0xd52   : > { %v3223_v7 = vpop.xlane.xlu0 %3222  ;;  %4094 = vadd.xlane.f32.xlu0 %v10284_v36  ;;  %v3198_v36 = vmul.f32 %v10212_v26, %v3182_v22  ;;  %v3197_v26 = vmul.f32 %v10163_v45, %v3181_v11 }
 0xd53   : > { %v3243_v50 = vadd.f32 %v3223_v7, %v3195_v18  ;;  %4351 = vperm.xlu1 %7074, %v10373_v12   ;;  %v3399_v7 = vld [vmem:[#allocation5 + $0x28] sm:$0xff] }
 0xd55   : > { %3260 = vst.msk [vmem:[#allocation4 + $0x58] sm:$0xff] %vm3248_vm6, %v3243_v50 }
 0xd56   : > { %v3225_v59 = vpop.xlane.xlu0 %3224  ;;  %4106 = vadd.xlane.f32.xlu0 %v7309_v27 }
 0xd57   : > { %v3244_v24 = vadd.f32 %v3225_v59, %v3196_v19  ;;  %4341 = vperm.xlu1 %7074, %v10379_v20   ;;  %v3401_v59 = vld [vmem:[#allocation5 + $0x38] sm:$0xff] }
 0xd59   : > { %3261 = vst.msk [vmem:[#allocation4 + $0x60] sm:$0xff] %vm3248_vm6, %v3244_v24 }
 0xd5a   : > { %v3229_v44 = vpop.xlane.xlu0 %3228  ;;  %4102 = vadd.xlane.f32.xlu0 %v10304_v53 }
 0xd5b   : > { %v3246_v46 = vadd.f32 %v3229_v44, %v3198_v36  ;;  %4371 = vperm.xlu1 %7074, %v10384_v1   ;;  %v3221_v27 = vpop.xlane.xlu1 %3220 }
 0xd5c   : > { %v3242_v37 = vadd.f32 %v3221_v27, %v3194_v30  ;;  %v3403_v30 = vld [vmem:[#allocation5 + $0x48] sm:$0xff] }
 0xd5d   : > { %3263 = vst.msk [vmem:[#allocation4 + $0x70] sm:$0xff] %vm3248_vm6, %v3246_v46 }
 0xd5e   : > { %3259 = vst.msk [vmem:[#allocation4 + $0x50] sm:$0xff] %vm3248_vm6, %v3242_v37  ;;  %4114 = vadd.xlane.f32.xlu0 %v7319_v4 }
 0xd5f   : > { %4361 = vperm.xlu1 %7074, %v10390_v60   ;;  %v3227_v53 = vpop.xlane.xlu1 %3226 }
 0xd60   : > { %v3245_v34 = vadd.f32 %v3227_v53, %v3197_v26  ;;  %v3405_v26 = vld [vmem:[#allocation5 + $0x58] sm:$0xff] }
 0xd62   : > { %3262 = vst.msk [vmem:[#allocation4 + $0x68] sm:$0xff] %vm3248_vm6, %v3245_v34  ;;  %v10396_v21 = vpop.permute.xlu0 %3412  ;;  %4110 = vadd.xlane.f32.xlu0 %v10325_v25 }
 0xd63   : > { %v3231_v56 = vpop.xlane.xlu1 %3230 }
 0xd64   : > { %v3247_v13 = vadd.f32 %v3231_v56, %v3199_v61 }
 0xd66   : > { %3264 = vst.msk [vmem:[#allocation4 + $0x78] sm:$0xff] %vm3248_vm6, %v3247_v13  ;;  %v3458_v4 = vpop.permute.xlu0 %3457 }
 0xd67   : > { %v3418_v3 = vpop.permute.xlu1 %3417  ;;  %v3499_v46 = vmul.f32 %v3458_v4, %v3403_v30  ;;  %v3408_v30 = vld [vmem:[#allocation5 + $0x70] sm:$0xff] }
 0xd68   : > { %v3491_v14 = vmul.f32 %v3418_v3, %v3395_v9 }
 0xd6a   : > { %v3468_v45 = vpop.permute.xlu0 %3467 }
 0xd6b   : > { %v10401_v63 = vpop.permute.xlu1 %3422  ;;  %v3501_v53 = vmul.f32 %v3468_v45, %v3405_v26 }
 0xd6e   : > { %v3478_v51 = vpop.permute.xlu0 %3477 }
 0xd6f   : > { %v3428_v15 = vpop.permute.xlu1 %3427 }
 0xd70   : > { %v3493_v57 = vmul.f32 %v3428_v15, %v3397_v16  ;;  %v3394_v15 = vld [vmem:[#allocation5] sm:$0xff] }
 0xd71   : > { %v3490_v45 = vmul.f32 %v10396_v21, %v3394_v15  ;;  %v3398_v16 = vld [vmem:[#allocation5 + $0x20] sm:$0xff] }
 0xd72   : > { %v3488_v10 = vpop.permute.xlu0 %3487 }
 0xd73   : > { %v10403_v0 = vpop.permute.xlu1 %3432 }
 0xd74   : > { %v3494_v21 = vmul.f32 %v10403_v0, %v3398_v16 }
 0xd76   : > { %v3525_v25 = vpop.permute.xlu0 %3524 }
 0xd77   : > { %v3571_v23 = vadd.f32 %v3525_v25, %v3491_v14  ;;  %v3438_v55 = vpop.permute.xlu1 %3437 }
 0xd78   : > { %v3495_v52 = vmul.f32 %v3438_v55, %v3399_v7 }
 0xd79   : > { %3588 = vst.msk [vmem:[#allocation5 + $0x8] sm:$0xff] %vm3586_vm9, %v3571_v23  ;;  %v3396_v23 = vld [vmem:[#allocation5 + $0x10] sm:$0xff] }
 0xd7a   : > { %v3529_v39 = vpop.permute.xlu0 %3528  ;;  %v3492_v55 = vmul.f32 %v10401_v63, %v3396_v23 }
 0xd7b   : > { %v3573_v29 = vadd.f32 %v3529_v39, %v3493_v57  ;;  %v3443_v18 = vpop.permute.xlu1 %3442  ;;  %v3400_v39 = vld [vmem:[#allocation5 + $0x30] sm:$0xff] }
 0xd7d   : > { %3590 = vst.msk [vmem:[#allocation5 + $0x18] sm:$0xff] %vm3586_vm9, %v3573_v29  ;;  %v3496_v29 = vmul.f32 %v3443_v18, %v3400_v39 }
 0xd7e   : > { %v3533_v50 = vpop.permute.xlu0 %3532 }
 0xd7f   : > { %v3575_v19 = vadd.f32 %v3533_v50, %v3495_v52  ;;  %v3448_v22 = vpop.permute.xlu1 %3447  ;;  %v3402_v52 = vld [vmem:[#allocation5 + $0x40] sm:$0xff] }
 0xd80   : > { %v3497_v24 = vmul.f32 %v3448_v22, %v3401_v59  ;;  %v3404_v59 = vld [vmem:[#allocation5 + $0x50] sm:$0xff] }
 0xd81   : > { %3592 = vst.msk [vmem:[#allocation5 + $0x28] sm:$0xff] %vm3586_vm9, %v3575_v19 }
 0xd82   : > { %v3537_v42 = vpop.permute.xlu0 %3536 }
 0xd83   : > { %v3577_v36 = vadd.f32 %v3537_v42, %v3497_v24  ;;  %4084 = vadd.xlane.f32.xlu1 %v10249_v62  ;;  %v3453_v44 = vpop.permute.xlu1 %3452  ;;  %v3407_v62 = vld [vmem:[#allocation5 + $0x68] sm:$0xff]  ;;  %v3406_v24 = vld [vmem:[#allocation5 + $0x60] sm:$0xff] }
 0xd84   : > { %v3503_v56 = vmul.f32 %v3478_v51, %v3407_v62  ;;  %v3498_v50 = vmul.f32 %v3453_v44, %v3402_v52  ;;  %v4067_v52 = vld [vmem:[#allocation4 + $0x78] sm:$0xff] }
 0xd85   : > { %3594 = vst.msk [vmem:[#allocation5 + $0x38] sm:$0xff] %vm3586_vm9, %v3577_v36 }
 0xd86   : > { %v3541_v27 = vpop.permute.xlu0 %3540 }
 0xd87   : > { %v3579_v11 = vadd.f32 %v3541_v27, %v3499_v46  ;;  %4096 = vadd.xlane.f32.xlu1 %v10294_v38  ;;  %v3463_v37 = vpop.permute.xlu1 %3462  ;;  %v3409_v38 = vld [vmem:[#allocation5 + $0x78] sm:$0xff] }
 0xd88   : > { %v3505_v9 = vmul.f32 %v3488_v10, %v3409_v38  ;;  %v3500_v0 = vmul.f32 %v3463_v37, %v3404_v59  ;;  %v4065_v59 = vld [vmem:[#allocation4 + $0x68] sm:$0xff] }
 0xd89   : > { %3596 = vst.msk [vmem:[#allocation5 + $0x48] sm:$0xff] %vm3586_vm9, %v3579_v11 }
 0xd8a   : > { %v3545_v28 = vpop.permute.xlu0 %3544 }
 0xd8b   : > { %v3581_v34 = vadd.f32 %v3545_v28, %v3501_v53  ;;  %4092 = vadd.xlane.f32.xlu1 %v10276_v31  ;;  %v3473_v61 = vpop.permute.xlu1 %3472 }
 0xd8c   : > { %v3502_v42 = vmul.f32 %v3473_v61, %v3406_v24 }
 0xd8d   : > { %3598 = vst.msk [vmem:[#allocation5 + $0x58] sm:$0xff] %vm3586_vm9, %v3581_v34  ;;  %v4054_v34 = vld [vmem:[#allocation4 + $0x10] sm:$0xff] }
 0xd8e   : > { %v3549_v13 = vpop.permute.xlu0 %3548  ;;  %v4070_v61 = vmul.f32 %v10315_v49, %v4054_v34 }
 0xd8f   : > { %v3583_v4 = vadd.f32 %v3549_v13, %v3503_v56  ;;  %4104 = vadd.xlane.f32.xlu1 %v10317_v35  ;;  %v3483_v3 = vpop.permute.xlu1 %3482 }
 0xd90   : > { %v3504_v46 = vmul.f32 %v3483_v3, %v3408_v30 }
 0xd91   : > { %3600 = vst.msk [vmem:[#allocation5 + $0x68] sm:$0xff] %vm3586_vm9, %v3583_v4  ;;  %v4055_v4 = vld [vmem:[#allocation4 + $0x18] sm:$0xff] }
 0xd92   : > { %v3553_v14 = vpop.permute.xlu0 %3552  ;;  %v4071_v3 = vmul.f32 %v10328_v8, %v4055_v4  ;;  %v4052_v4 = vld [vmem:[#allocation4] sm:$0xff] }
 0xd93   : > { %v3585_v25 = vadd.f32 %v3553_v14, %v3505_v9  ;;  %4100 = vadd.xlane.f32.xlu1 %v10297_v17  ;;  %v3523_v31 = vpop.permute.xlu1 %3522  ;;  %v4053_v9 = vld [vmem:[#allocation4 + $0x8] sm:$0xff] }
 0xd94   : > { %v3570_v51 = vadd.f32 %v3523_v31, %v3490_v45  ;;  %v4069_v14 = vmul.f32 %v10231_v41, %v4053_v9  ;;  %v4059_v31 = vld [vmem:[#allocation4 + $0x38] sm:$0xff] }
 0xd95   : > { %3602 = vst.msk [vmem:[#allocation5 + $0x78] sm:$0xff] %vm3586_vm9, %v3585_v25 }
 0xd96   : > { %3587 = vst.msk [vmem:[#allocation5] sm:$0xff] %vm3586_vm9, %v3570_v51  ;;  %v10431_v11 = vpop.permute.xlu0 %4301  ;;  %v4075_v51 = vmul.f32 %v10359_v43, %v4059_v31  ;;  %v4061_v43 = vld [vmem:[#allocation4 + $0x48] sm:$0xff] }
 0xd97   : > { %4112 = vadd.xlane.f32.xlu1 %v10338_v5  ;;  %v3527_v35 = vpop.permute.xlu1 %3526 }
 0xd98   : > { %v3572_v10 = vadd.f32 %v3527_v35, %v3492_v55  ;;  %v4057_v35 = vld [vmem:[#allocation4 + $0x28] sm:$0xff] }
 0xd9a   : > { %3589 = vst.msk [vmem:[#allocation5 + $0x10] sm:$0xff] %vm3586_vm9, %v3572_v10  ;;  %v10433_v37 = vpop.permute.xlu0 %4346  ;;  %v4073_v10 = vmul.f32 %v10345_v40, %v4057_v35  ;;  %v4056_v35 = vld [vmem:[#allocation4 + $0x20] sm:$0xff] }
 0xd9b   : > { %4108 = vadd.xlane.f32.xlu1 %v10319_v6  ;;  %v3531_v17 = vpop.permute.xlu1 %3530 }
 0xd9c   : > { %v3574_v57 = vadd.f32 %v3531_v17, %v3494_v21  ;;  %v4063_v21 = vld [vmem:[#allocation4 + $0x58] sm:$0xff] }
 0xd9e   : > { %3591 = vst.msk [vmem:[#allocation5 + $0x20] sm:$0xff] %vm3586_vm9, %v3574_v57  ;;  %v10435_v26 = vpop.permute.xlu0 %4366  ;;  %v4079_v57 = vmul.f32 %v10373_v12, %v4063_v21 }
 0xd9f   : > { %v3535_v63 = vpop.permute.xlu1 %3534 }
 0xda0   : > { %v3576_v7 = vadd.f32 %v3535_v63, %v3496_v29  ;;  %v4077_v63 = vmul.f32 %v10379_v20, %v4061_v43 }
 0xda2   : > { %3593 = vst.msk [vmem:[#allocation5 + $0x30] sm:$0xff] %vm3586_vm9, %v3576_v7  ;;  %v10439_v28 = vpop.permute.xlu0 %4356 }
 0xda3   : > { %v3539_v5 = vpop.permute.xlu1 %3538 }
 0xda4   : > { %v3578_v19 = vadd.f32 %v3539_v5, %v3498_v50  ;;  %v4083_v5 = vmul.f32 %v10384_v1, %v4067_v52  ;;  %v4066_v52 = vld [vmem:[#allocation4 + $0x70] sm:$0xff] }
 0xda6   : > { %3595 = vst.msk [vmem:[#allocation5 + $0x40] sm:$0xff] %vm3586_vm9, %v3578_v19 }
 0xda7   : > { %v3543_v22 = vpop.permute.xlu1 %3542 }
 0xda8   : > { %v3580_v6 = vadd.f32 %v3543_v22, %v3500_v0  ;;  %v4081_v22 = vmul.f32 %v10390_v60, %v4065_v59 }
 0xdaa   : > { %3597 = vst.msk [vmem:[#allocation5 + $0x50] sm:$0xff] %vm3586_vm9, %v3580_v6 }
 0xdab   : > { %v3547_v18 = vpop.permute.xlu1 %3546 }
 0xdac   : > { %v3582_v36 = vadd.f32 %v3547_v18, %v3502_v42 }
 0xdae   : > { %3599 = vst.msk [vmem:[#allocation5 + $0x60] sm:$0xff] %vm3586_vm9, %v3582_v36 }
 0xdaf   : > { %v3551_v44 = vpop.permute.xlu1 %3550 }
 0xdb0   : > { %v3584_v27 = vadd.f32 %v3551_v44, %v3504_v46 }
 0xdb2   : > { %3601 = vst.msk [vmem:[#allocation5 + $0x70] sm:$0xff] %vm3586_vm9, %v3584_v27 }
 0xdb3   : > { %v10437_v53 = vpop.permute.xlu1 %4296 }
 0xdb7   : > { %v10442_v56 = vpop.permute.xlu1 %4306 }
 0xdbb   : > { %v10446_v45 = vpop.permute.xlu1 %4311 }
 0xdbf   : > { %v10452_v55 = vpop.permute.xlu1 %4316 }
 0xdc3   : > { %v10456_v41 = vpop.permute.xlu1 %4321 }
 0xdc7   : > { %v10462_v50 = vpop.permute.xlu1 %4326 }
 0xdcb   : > { %v10466_v12 = vpop.permute.xlu1 %4331 }
 0xdcf   : > { %v4089_v62 = vpop.xlane.xlu0 %4088  ;;  %v10471_v24 = vpop.permute.xlu1 %4336 }
 0xdd0   : > { %v4118_v13 = vadd.f32 %v4089_v62, %v4070_v61 }
 0xdd2   : > { %4135 = vst.msk [vmem:[#allocation4 + $0x10] sm:$0xff] %vm4132_vm8, %v4118_v13 }
 0xdd3   : > { %v4091_v38 = vpop.xlane.xlu0 %4090  ;;  %v10473_v42 = vpop.permute.xlu1 %4351 }
 0xdd4   : > { %v4119_v15 = vadd.f32 %v4091_v38, %v4071_v3  ;;  %v4068_v38 = vmul.f32 %v10307_v54, %v4052_v4  ;;  %v4284_v4 = vld [vmem:[#allocation5 + $0x30] sm:$0xff] }
 0xdd6   : > { %4136 = vst.msk [vmem:[#allocation4 + $0x18] sm:$0xff] %vm4132_vm8, %v4119_v15 }
 0xdd7   : > { %v4087_v25 = vpop.xlane.xlu0 %4086  ;;  %v10476_v36 = vpop.permute.xlu1 %4341 }
 0xdd8   : > { %v4117_v49 = vadd.f32 %v4087_v25, %v4069_v14 }
 0xdda   : > { %4134 = vst.msk [vmem:[#allocation4 + $0x8] sm:$0xff] %vm4132_vm8, %v4117_v49  ;;  %v4058_v49 = vld [vmem:[#allocation4 + $0x30] sm:$0xff] }
 0xddb   : > { %v4099_v23 = vpop.xlane.xlu0 %4098  ;;  %v10481_v60 = vpop.permute.xlu1 %4371  ;;  %v4074_v31 = vmul.f32 %v10352_v33, %v4058_v49 }
 0xddc   : > { %v4123_v8 = vadd.f32 %v4099_v23, %v4075_v51 }
 0xdde   : > { %4140 = vst.msk [vmem:[#allocation4 + $0x38] sm:$0xff] %vm4132_vm8, %v4123_v8 }
 0xddf   : > { %v4095_v16 = vpop.xlane.xlu0 %4094  ;;  %v10486_v62 = vpop.permute.xlu1 %4361 }
 0xde0   : > { %v4121_v17 = vadd.f32 %v4095_v16, %v4073_v10  ;;  %v4072_v10 = vmul.f32 %v10336_v32, %v4056_v35  ;;  %v4060_v32 = vld [vmem:[#allocation4 + $0x40] sm:$0xff] }
 0xde2   : > { %4138 = vst.msk [vmem:[#allocation4 + $0x28] sm:$0xff] %vm4132_vm8, %v4121_v17  ;;  %v4062_v17 = vld [vmem:[#allocation4 + $0x50] sm:$0xff] }
 0xde3   : > { %v4107_v39 = vpop.xlane.xlu0 %4106  ;;  %v4078_v33 = vmul.f32 %v10244_v48, %v4062_v17  ;;  %v4064_v48 = vld [vmem:[#allocation4 + $0x60] sm:$0xff] }
 0xde4   : > { %v4127_v29 = vadd.f32 %v4107_v39, %v4079_v57 }
 0xde6   : > { %4144 = vst.msk [vmem:[#allocation4 + $0x58] sm:$0xff] %vm4132_vm8, %v4127_v29 }
 0xde7   : > { %v4103_v7 = vpop.xlane.xlu0 %4102 }
 0xde8   : > { %v4125_v40 = vadd.f32 %v4103_v7, %v4077_v63  ;;  %v4076_v63 = vmul.f32 %v10366_v2, %v4060_v32 }
 0xdea   : > { %4142 = vst.msk [vmem:[#allocation4 + $0x48] sm:$0xff] %vm4132_vm8, %v4125_v40 }
 0xdeb   : > { %v4115_v19 = vpop.xlane.xlu0 %4114 }
 0xdec   : > { %v4131_v0 = vadd.f32 %v4115_v19, %v4083_v5  ;;  %v4082_v5 = vmul.f32 %v10254_v47, %v4066_v52 }
 0xdee   : > { %4148 = vst.msk [vmem:[#allocation4 + $0x78] sm:$0xff] %vm4132_vm8, %v4131_v0  ;;  %v4080_v0 = vmul.f32 %v10264_v58, %v4064_v48 }
 0xdef   : > { %v4111_v6 = vpop.xlane.xlu0 %4110 }
 0xdf0   : > { %v4129_v20 = vadd.f32 %v4111_v6, %v4081_v22 }
 0xdf2   : > { %4146 = vst.msk [vmem:[#allocation4 + $0x68] sm:$0xff] %vm4132_vm8, %v4129_v20  ;;  %v4280_v20 = vld [vmem:[#allocation5 + $0x10] sm:$0xff] }
 0xdf3   : > { %v4376_v2 = vmul.f32 %v10442_v56, %v4280_v20 }
 0xdfe   : > { %v6745_v18 = vpop.f32.mrb[48].mxu1 }
 0xdff   : > { %4410 = vrot.lane.b32.xlu0 %v6745_v18, %s7684_s4  ;;  %v4215_v1 = vpop.f32.mrb[49].mxu1  ;;  %v4281_v18 = vld [vmem:[#allocation5 + $0x18] sm:$0xff] }
 0xe00   : > { %v6746_v30 = vpop.f32.mrb[50].mxu1 }
 0xe01   : > { %v4218_v46 = vpop.f32.mrb[51].mxu1  ;;  %4412 = vrot.lane.b32.xlu1 %v6746_v30, %s7684_s4  ;;  %v4377_v30 = vmul.f32 %v10446_v45, %v4281_v18 }
 0xe03   : > { %4406 = vrot.lane.b32.xlu0 %v4215_v1, %s7684_s4 }
 0xe05   : > { %4408 = vrot.lane.b32.xlu1 %v4218_v46, %s7684_s4  ;;  %v4278_v46 = vld [vmem:[#allocation5] sm:$0xff] }
 0xe06   : > { %v6749_v44 = vpop.f32.mrb[52].mxu1 }
 0xe07   : > { %4418 = vrot.lane.b32.xlu0 %v6749_v44, %s7684_s4  ;;  %v4231_v27 = vpop.f32.mrb[53].mxu1 }
 0xe08   : > { %v6750_v34 = vpop.f32.mrb[54].mxu1 }
 0xe09   : > { %v4234_v61 = vpop.f32.mrb[55].mxu1  ;;  %4420 = vrot.lane.b32.xlu1 %v6750_v34, %s7684_s4  ;;  %v4279_v34 = vld [vmem:[#allocation5 + $0x8] sm:$0xff] }
 0xe0b   : > { %4414 = vrot.lane.b32.xlu0 %v4231_v27, %s7684_s4  ;;  %v4374_v27 = vmul.f32 %v10437_v53, %v4278_v46 }
 0xe0d   : > { %4416 = vrot.lane.b32.xlu1 %v4234_v61, %s7684_s4 }
 0xe0e   : > { %v6753_v13 = vpop.f32.mrb[56].mxu1 }
 0xe0f   : > { %4426 = vrot.lane.b32.xlu0 %v6753_v13, %s7684_s4  ;;  %v4247_v3 = vpop.f32.mrb[57].mxu1  ;;  %v4375_v13 = vmul.f32 %v10431_v11, %v4279_v34  ;;  %v4532_v34 = vld [vmem:[#allocation4 + $0x48] sm:$0xff] (!%p6220_p6) }
 0xe10   : > { %v6754_v15 = vpop.f32.mrb[58].mxu1  ;;  %v4085_v9 = vpop.xlane.xlu1 %4084 }
 0xe11   : > { %v4250_v14 = vpop.f32.mrb[59].mxu1  ;;  %4428 = vrot.lane.b32.xlu1 %v6754_v15, %s7684_s4  ;;  %v4116_v25 = vadd.f32 %v4085_v9, %v4068_v38  ;;  %v4380_v38 = vmul.f32 %v10462_v50, %v4284_v4  ;;  %v4285_v15 = vld [vmem:[#allocation5 + $0x38] sm:$0xff]  ;;  %v4288_v50 = vld [vmem:[#allocation5 + $0x50] sm:$0xff] }
 0xe12   : > { %v4381_v53 = vmul.f32 %v10466_v12, %v4285_v15  ;;  %v4538_v15 = vld [vmem:[#allocation4 + $0x78] sm:$0xff] (!%p6220_p6) }
 0xe13   : > { %4133 = vst.msk [vmem:[#allocation4] sm:$0xff] %vm4132_vm8, %v4116_v25  ;;  %4422 = vrot.lane.b32.xlu0 %v4247_v3, %s7684_s4  ;;  %v4282_v25 = vld [vmem:[#allocation5 + $0x20] sm:$0xff] }
 0xe14   : > { %v4097_v51 = vpop.xlane.xlu1 %4096  ;;  %v4378_v11 = vmul.f32 %v10452_v55, %v4282_v25 }
 0xe15   : > { %4424 = vrot.lane.b32.xlu1 %v4250_v14, %s7684_s4  ;;  %v4122_v23 = vadd.f32 %v4097_v51, %v4074_v31  ;;  %v4283_v51 = vld [vmem:[#allocation5 + $0x28] sm:$0xff] }
 0xe16   : > { %v6757_v8 = vpop.f32.mrb[60].mxu1 }
 0xe17   : > { %4139 = vst.msk [vmem:[#allocation4 + $0x30] sm:$0xff] %vm4132_vm8, %v4122_v23  ;;  %v4263_v54 = vpop.f32.mrb[61].mxu1 }
 0xe18   : > { %4430 = vrot.lane.b32.xlu0 %v4263_v54, %s7684_s4  ;;  %v6758_v16 = vpop.f32.mrb[62].mxu1  ;;  %v4093_v21 = vpop.xlane.xlu1 %4092 }
 0xe19   : > { %v4266_v57 = vpop.f32.mrb[63].mxu1  ;;  %v4120_v39 = vadd.f32 %v4093_v21, %v4072_v10  ;;  %v4384_v10 = vmul.f32 %v10433_v37, %v4288_v50 }
 0xe1a   : > { %4432 = vrot.lane.b32.xlu1 %v4266_v57, %s7684_s4  ;;  %v4286_v57 = vld [vmem:[#allocation5 + $0x40] sm:$0xff] }
 0xe1b   : > { %4137 = vst.msk [vmem:[#allocation4 + $0x20] sm:$0xff] %vm4132_vm8, %v4120_v39 }
 0xe1c   : > { %4434 = vrot.lane.b32.xlu0 %v6757_v8, %s7684_s4  ;;  %v4105_v43 = vpop.xlane.xlu1 %4104  ;;  %v4379_v8 = vmul.f32 %v10456_v41, %v4283_v51  ;;  %v4382_v41 = vmul.f32 %v10471_v24, %v4286_v57  ;;  %v7357_v57 = vld [vmem:[%s11747_s2 + $0x10] sm:$0xff] (!%p6220_p6)  }
 0xe1d   : > { %v4126_v29 = vadd.f32 %v4105_v43, %v4078_v33  ;;  %v4287_v43 = vld [vmem:[#allocation5 + $0x48] sm:$0xff] }
 0xe1e   : > { %4436 = vrot.lane.b32.xlu1 %v6758_v16, %s7684_s4  ;;  %v4289_v16 = vld [vmem:[#allocation5 + $0x58] sm:$0xff]  ;;  %v4383_v32 = vmul.f32 %v10476_v36, %v4287_v43 }
 0xe1f   : > { %4143 = vst.msk [vmem:[#allocation4 + $0x50] sm:$0xff] %vm4132_vm8, %v4126_v29  ;;  %v4385_v55 = vmul.f32 %v10473_v42, %v4289_v16 }
 0xe20   : > { %v4101_v7 = vpop.xlane.xlu1 %4100 }
 0xe21   : > { %v4124_v40 = vadd.f32 %v4101_v7, %v4076_v63  ;;  %v4290_v63 = vld [vmem:[#allocation5 + $0x60] sm:$0xff] }
 0xe22   : > { %v4386_v52 = vmul.f32 %v10439_v28, %v4290_v63  ;;  %v4527_v46 = vld [vmem:[#allocation4 + $0x20] sm:$0xff] (!%p6220_p6) }
 0xe23   : > { %4141 = vst.msk [vmem:[#allocation4 + $0x40] sm:$0xff] %vm4132_vm8, %v4124_v40  ;;  %v4291_v40 = vld [vmem:[#allocation5 + $0x68] sm:$0xff] }
 0xe24   : > { %v4113_v19 = vpop.xlane.xlu1 %4112 }
 0xe25   : > { %v4130_v59 = vadd.f32 %v4113_v19, %v4082_v5  ;;  %v4292_v5 = vld [vmem:[#allocation5 + $0x70] sm:$0xff]  ;;  %v4387_v19 = vmul.f32 %v10486_v62, %v4291_v40 }
 0xe26   : > { %v4525_v62 = vld [vmem:[#allocation4 + $0x10] sm:$0xff] (!%p6220_p6) }
 0xe27   : > { %4147 = vst.msk [vmem:[#allocation4 + $0x70] sm:$0xff] %vm4132_vm8, %v4130_v59  ;;  %7371 = vrcp.f32 (!%p6220_p6), %v4525_v62  ;;  %v4533_v25 = vld [vmem:[#allocation4 + $0x50] sm:$0xff] (!%p6220_p6) }
 0xe28   : > { %v4109_v22 = vpop.xlane.xlu1 %4108 }
 0xe29   : > { %v4128_v6 = vadd.f32 %v4109_v22, %v4080_v0  ;;  %v4388_v0 = vmul.f32 %v10435_v26, %v4292_v5  ;;  %v4293_v22 = vld [vmem:[#allocation5 + $0x78] sm:$0xff]  ;;  %v7692_v26 = vmov (!%p6220_p6), 0  }
 0xe2a   : > { %v4389_v20 = vmul.f32 %v10481_v60, %v4293_v22  ;;  %7337 = vset.pattern.permute.xlu1 (!%p6220_p6), %v7692_v26  ;;  %7336 = vset.pattern.permute.xlu0 (!%p6220_p6), %v7692_v26  ;;  %v4524_v60 = vld [vmem:[#allocation4 + $0x8] sm:$0xff] (!%p6220_p6) }
 0xe2b   : > { %4145 = vst.msk [vmem:[#allocation4 + $0x60] sm:$0xff] %vm4132_vm8, %v4128_v6 }
 0xe71   : > { %v4411_v1 = vpop.permute.xlu0 %4410 }
 0xe72   : > { %v4456_v47 = vadd.f32 %v4411_v1, %v4376_v2  ;;  %v4523_v1 = vld [vmem:[#allocation4] sm:$0xff] (!%p6220_p6) }
 0xe73   : > { %v4413_v44 = vpop.permute.xlu1 %4412  ;;  %7373 = vrcp.f32 (!%p6220_p6), %v4523_v1 }
 0xe74   : > { %4473 = vst.msk [vmem:[#allocation5 + $0x10] sm:$0xff] %vm4470_vm10, %v4456_v47  ;;  %v4457_v58 = vadd.f32 %v4413_v44, %v4377_v30  ;;  %v4526_v30 = vld [vmem:[#allocation4 + $0x18] sm:$0xff] (!%p6220_p6)  ;;  %v4528_v47 = vld [vmem:[#allocation4 + $0x28] sm:$0xff] (!%p6220_p6) }
 0xe75   : > { %v4407_v61 = vpop.permute.xlu0 %4406  ;;  %7375 = vrcp.f32 (!%p6220_p6), %v4526_v30  ;;  %v4530_v44 = vld [vmem:[#allocation4 + $0x38] sm:$0xff] (!%p6220_p6) }
 0xe76   : > { %4474 = vst.msk [vmem:[#allocation5 + $0x18] sm:$0xff] %vm4470_vm10, %v4457_v58  ;;  %v4454_v56 = vadd.f32 %v4407_v61, %v4374_v27  ;;  %7377 = vrcp.f32 (!%p6220_p6), %v4524_v60  ;;  %v4529_v27 = vld [vmem:[#allocation4 + $0x30] sm:$0xff] (!%p6220_p6)  ;;  %v10546_v58 = vpop.eup (!%p6220_p6), %7371 }
 0xe77   : > { %v4409_v3 = vpop.permute.xlu1 %4408  ;;  %7379 = vrcp.f32 (!%p6220_p6), %v4528_v47  ;;  %4567 = vperm.xlu1 (!%p6220_p6), %7337, %v10546_v58  }
 0xe78   : > { %4471 = vst.msk [vmem:[#allocation5] sm:$0xff] %vm4470_vm10, %v4454_v56  ;;  %v4455_v45 = vadd.f32 %v4409_v3, %v4375_v13  ;;  %7381 = vrcp.f32 (!%p6220_p6), %v4527_v46  ;;  %v4535_v3 = vld [vmem:[#allocation4 + $0x60] sm:$0xff] (!%p6220_p6) }
 0xe79   : > { %v4419_v9 = vpop.permute.xlu0 %4418  ;;  %7383 = vrcp.f32 (!%p6220_p6), %v4530_v44 }
 0xe7a   : > { %4472 = vst.msk [vmem:[#allocation5 + $0x8] sm:$0xff] %vm4470_vm10, %v4455_v45  ;;  %v4460_v14 = vadd.f32 %v4419_v9, %v4380_v38  ;;  %7385 = vrcp.f32 (!%p6220_p6), %v4529_v27 }
 0xe7b   : > { %v4421_v49 = vpop.permute.xlu1 %4420  ;;  %7387 = vrcp.f32 (!%p6220_p6), %v4532_v34 }
 0xe7c   : > { %4477 = vst.msk [vmem:[#allocation5 + $0x30] sm:$0xff] %vm4470_vm10, %v4460_v14  ;;  %v4461_v31 = vadd.f32 %v4421_v49, %v4381_v53  ;;  %7389 = vrcp.f32 (!%p6220_p6), %v4535_v3  ;;  %v4531_v53 = vld [vmem:[#allocation4 + $0x40] sm:$0xff] (!%p6220_p6)  ;;  %v7693_v49 = vmov (!%p6220_p6), 1  }
 0xe7d   : > { %v4415_v23 = vpop.permute.xlu0 %4414  ;;  %v10548_v61 = vpop.eup (!%p6220_p6), %7373  ;;  %7391 = vrcp.f32 (!%p6220_p6), %v4538_v15  ;;  %v4510_v63 = vld [vmem:[#allocation5 + $0x18] sm:$0xff] (!%p6220_p6) }
 0xe7e   : > { %4478 = vst.msk [vmem:[#allocation5 + $0x38] sm:$0xff] %vm4470_vm10, %v4461_v31  ;;  %v4458_v35 = vadd.f32 %v4415_v23, %v4378_v11  ;;  %4557 = vperm.xlu0 (!%p6220_p6), %7336, %v10548_v61   ;;  %7393 = vrcp.f32 (!%p6220_p6), %v4531_v53  ;;  %v4534_v31 = vld [vmem:[#allocation4 + $0x58] sm:$0xff] (!%p6220_p6) }
 0xe7f   : > { %v4417_v54 = vpop.permute.xlu1 %4416  ;;  %v10551_v13 = vpop.eup (!%p6220_p6), %7375  ;;  %7395 = vrcp.f32 (!%p6220_p6), %v4533_v25 }
 0xe80   : > { %4475 = vst.msk [vmem:[#allocation5 + $0x20] sm:$0xff] %vm4470_vm10, %v4458_v35  ;;  %v4459_v12 = vadd.f32 %v4417_v54, %v4379_v8  ;;  %v10554_v56 = vpop.eup (!%p6220_p6), %7377  ;;  %4572 = vperm.xlu1 (!%p6220_p6), %7337, %v10551_v13   ;;  %7397 = vrcp.f32 (!%p6220_p6), %v4534_v31  ;;  %v7694_v8 = vmov (!%p6220_p6), 3   ;;  %v4536_v54 = vld [vmem:[#allocation4 + $0x68] sm:$0xff] (!%p6220_p6) }
 0xe81   : > { %v4427_v21 = vpop.permute.xlu0 %4426  ;;  %v10557_v4 = vpop.eup (!%p6220_p6), %7379  ;;  %7399 = vrcp.f32 (!%p6220_p6), %v4536_v54 }
 0xe82   : > { %4476 = vst.msk [vmem:[#allocation5 + $0x28] sm:$0xff] %vm4470_vm10, %v4459_v12  ;;  %v4464_v17 = vadd.f32 %v4427_v21, %v4384_v10  ;;  %4562 = vperm.xlu0 (!%p6220_p6), %7336, %v10554_v56   ;;  %v10560_v38 = vpop.eup (!%p6220_p6), %7381  ;;  %v7695_v12 = vmov (!%p6220_p6), 2   ;;  %v4537_v10 = vld [vmem:[#allocation4 + $0x70] sm:$0xff] (!%p6220_p6) }
 0xe83   : > { %v4429_v39 = vpop.permute.xlu1 %4428  ;;  %v10563_v45 = vpop.eup (!%p6220_p6), %7383  ;;  %7401 = vrcp.f32 (!%p6220_p6), %v4537_v10 }
 0xe84   : > { %4481 = vst.msk [vmem:[#allocation5 + $0x50] sm:$0xff] %vm4470_vm10, %v4464_v17  ;;  %v4465_v33 = vadd.f32 %v4429_v39, %v4385_v55  ;;  %4582 = vperm.xlu1 (!%p6220_p6), %7337, %v10557_v4   ;;  %v10566_v9 = vpop.eup (!%p6220_p6), %7385  ;;  %v7355_v55 = vld [vmem:[%s11747_s2] sm:$0xff] (!%p6220_p6)   ;;  %v7356_v17 = vld [vmem:[%s11747_s2 + $0x8] sm:$0xff] (!%p6220_p6)   ;;  %v7358_v39 = vld [vmem:[%s11747_s2 + $0x18] sm:$0xff] (!%p6220_p6)  }
 0xe85   : > { %v4423_v29 = vpop.permute.xlu0 %4422  ;;  %v10570_v14 = vpop.eup (!%p6220_p6), %7387  ;;  %6759 = vmatprep.subr.bf16.mxu0 (!%p6220_p6), %v7355_v55  ;;  %v4514_v22 = vld [vmem:[#allocation5 + $0x38] sm:$0xff] (!%p6220_p6) }
 0xe86   : > { %4482 = vst.msk [vmem:[#allocation5 + $0x58] sm:$0xff] %vm4470_vm10, %v4465_v33  ;;  %v4462_v37 = vadd.f32 %v4423_v29, %v4382_v41  ;;  %4577 = vperm.xlu0 (!%p6220_p6), %7336, %v10560_v38   ;;  %v10575_v11 = vpop.eup (!%p6220_p6), %7389  ;;  %6760 = vmatpush3.bf16.msra.mxu0 (!%p6220_p6), %v7355_v55  ;;  %v4509_v41 = vld [vmem:[#allocation5 + $0x10] sm:$0xff] (!%p6220_p6)  ;;  %v4507_v33 = vld [vmem:[#allocation5] sm:$0xff] (!%p6220_p6) }
 0xe87   : > { %v4425_v7 = vpop.permute.xlu1 %4424  ;;  %v10579_v51 = vpop.eup (!%p6220_p6), %7391  ;;  %6761 = vmatprep.subr.bf16.mxu0 (!%p6220_p6), %v7356_v17 }
 0xe88   : > { %4479 = vst.msk [vmem:[#allocation5 + $0x40] sm:$0xff] %vm4470_vm10, %v4462_v37  ;;  %v4463_v42 = vadd.f32 %v4425_v7, %v4383_v32  ;;  %4592 = vperm.xlu1 (!%p6220_p6), %7337, %v10563_v45   ;;  %v10581_v23 = vpop.eup (!%p6220_p6), %7393  ;;  %v4508_v7 = vld [vmem:[#allocation5 + $0x8] sm:$0xff] (!%p6220_p6) }
 0xe89   : > { %v10586_v50 = vpop.eup (!%p6220_p6), %7395  ;;  %v4512_v5 = vld [vmem:[#allocation5 + $0x28] sm:$0xff] (!%p6220_p6) }
 0xe8a   : > { %4480 = vst.msk [vmem:[#allocation5 + $0x48] sm:$0xff] %vm4470_vm10, %v4463_v42  ;;  %v4431_v24 = vpop.permute.xlu0 %4430  ;;  %4587 = vperm.xlu0 (!%p6220_p6), %7336, %v10566_v9   ;;  %v10591_v35 = vpop.eup (!%p6220_p6), %7397  ;;  %6762 = vmatpush3.bf16.msra.mxu0 (!%p6220_p6), %v7356_v17 }
 0xe8b   : > { %v4466_v48 = vadd.f32 %v4431_v24, %v4386_v52  ;;  %v7400_v16 = vpop.eup (!%p6220_p6), %7399  ;;  %6763 = vmatprep.subr.bf16.mxu0 (!%p6220_p6), %v7357_v57  ;;  %v4517_v15 = vld [vmem:[#allocation5 + $0x50] sm:$0xff] (!%p6220_p6) }
 0xe8c   : > { %v4433_v59 = vpop.permute.xlu1 %4432  ;;  %7338 = vset.pattern.permute.xlu1 (!%p6220_p6), %v7693_v49 }
 0xe8d   : > { %4483 = vst.msk [vmem:[#allocation5 + $0x60] sm:$0xff] %vm4470_vm10, %v4466_v48  ;;  %v4467_v36 = vadd.f32 %v4433_v59, %v4387_v19  ;;  %4506 = sbr.rel (%p6220_p6) target bundleno = 5107 (0x13f3), region = 96  ;;  %4722 = vperm.xlu1 (!%p6220_p6), %7338, %v10554_v56   ;;  %v10610_v21 = vpop.eup (!%p6220_p6), %7401  ;;  %v4511_v19 = vld [vmem:[#allocation5 + $0x20] sm:$0xff] (!%p6220_p6)  ;;  %v4518_v25 = vld [vmem:[#allocation5 + $0x58] sm:$0xff] (!%p6220_p6) }
 0xe8e   : > { %v4435_v6 = vpop.permute.xlu0 %4434  ;;  %4602 = vperm.xlu0 (!%p6220_p6), %7336, %v10570_v14   ;;  %6764 = vmatpush3.bf16.msra.mxu0 (!%p6220_p6), %v7357_v57 }
 0xe8f   : > { %4484 = vst.msk [vmem:[#allocation5 + $0x68] sm:$0xff] %vm4470_vm10, %v4467_v36  ;;  %v4468_v28 = vadd.f32 %v4435_v6, %v4388_v0  ;;  %6765 = vmatprep.subr.bf16.mxu0 (!%p6220_p6), %v7358_v39  ;;  %v4513_v6 = vld [vmem:[#allocation5 + $0x30] sm:$0xff] (!%p6220_p6) }
 0xe90   : > { %v4437_v2 = vpop.permute.xlu1 %4436 }
 0xe91   : > { %4485 = vst.msk [vmem:[#allocation5 + $0x70] sm:$0xff] %vm4470_vm10, %v4468_v28  ;;  %v4469_v18 = vadd.f32 %v4437_v2, %v4389_v20  ;;  %4727 = vperm.xlu1 (!%p6220_p6), %7338, %v10546_v58   ;;  %v4516_v1 = vld [vmem:[#allocation5 + $0x48] sm:$0xff] (!%p6220_p6) }
 0xe92   : > { %4617 = vperm.xlu0 (!%p6220_p6), %7336, %v10575_v11   ;;  %6766 = vmatpush3.bf16.msra.mxu0 (!%p6220_p6), %v7358_v39 }
 0xe93   : > { %4486 = vst.msk [vmem:[#allocation5 + $0x78] sm:$0xff] %vm4470_vm10, %v4469_v18 }
 0xe94   : > { %v4519_v46 = vld [vmem:[#allocation5 + $0x60] sm:$0xff] }
 0xe95   : > { %7339 = vset.pattern.permute.xlu1 %v7692_v26 }
 0xe96   : > { %4632 = vperm.xlu0 %7336, %v10579_v51   ;;  %4597 = vperm.xlu1 %7339, %v10581_v23  }
 0xe9a   : > { %7346 = vset.pattern.permute.xlu0 %v7694_v8  ;;  %4607 = vperm.xlu1 %7339, %v10586_v50  }
 0xe9b   : > { %5042 = vperm.xlu0 %7346, %v10554_v56  }
 0xe9e   : > { %4612 = vperm.xlu1 %7339, %v10591_v35  }
 0xe9f   : > { %7347 = vset.pattern.permute.xlu0 %v7693_v49 }
 0xea0   : > { %4717 = vperm.xlu0 %7347, %v10548_v61  }
 0xea2   : > { %7340 = vset.pattern.permute.xlu1 %v7693_v49 }
 0xea3   : > { %4742 = vperm.xlu1 %7340, %v10557_v4  }
 0xea4   : > { %4732 = vperm.xlu0 %7347, %v10551_v13  }
 0xea7   : > { %4747 = vperm.xlu1 %7340, %v10566_v9  }
 0xea8   : > { %4737 = vperm.xlu0 %7347, %v10560_v38  }
 0xeab   : > { %7341 = vset.pattern.permute.xlu1 %v7695_v12 }
 0xeac   : > { %4752 = vperm.xlu0 %7347, %v10563_v45   ;;  %4877 = vperm.xlu1 %7341, %v10548_v61  }
 0xeb0   : > { %4762 = vperm.xlu0 %7347, %v10570_v14   ;;  %4887 = vperm.xlu1 %7341, %v10546_v58  }
 0xeb4   : > { %4777 = vperm.xlu0 %7347, %v10575_v11   ;;  %4892 = vperm.xlu1 %7341, %v10551_v13  }
 0xeb8   : > { %4792 = vperm.xlu0 %7347, %v10579_v51   ;;  %7342 = vset.pattern.permute.xlu1 %v7692_v26 }
 0xeb9   : > { %4622 = vperm.xlu1 %7342, %v7400_v16  }
 0xebc   : > { %7349 = vset.pattern.permute.xlu0 %v7695_v12 }
 0xebd   : > { %4882 = vperm.xlu0 %7349, %v10554_v56   ;;  %4627 = vperm.xlu1 %7342, %v10610_v21   ;;  %v4515_v56 = vld [vmem:[#allocation5 + $0x40] sm:$0xff] }
 0xec1   : > { %4897 = vperm.xlu0 %7349, %v10560_v38   ;;  %7343 = vset.pattern.permute.xlu1 %v7693_v49 }
 0xec2   : > { %4757 = vperm.xlu1 %7343, %v10581_v23  }
 0xec5   : > { %4912 = vperm.xlu0 %7349, %v10563_v45  }
 0xec6   : > { %4767 = vperm.xlu1 %7343, %v10586_v50  }
 0xec9   : > { %4922 = vperm.xlu0 %7349, %v10570_v14  }
 0xeca   : > { %4772 = vperm.xlu1 %7343, %v10591_v35  }
 0xecd   : > { %4942 = vperm.xlu0 %7349, %v7400_v16  }
 0xece   : > { %7344 = vset.pattern.permute.xlu1 %v7695_v12 }
 0xecf   : > { %4902 = vperm.xlu1 %7344, %v10557_v4  }
 0xed1   : > { %7353 = vset.pattern.permute.xlu0 %v7694_v8 }
 0xed2   : > { %5057 = vperm.xlu0 %7353, %v10560_v38  }
 0xed3   : > { %4907 = vperm.xlu1 %7344, %v10566_v9  }
 0xed6   : > { %5072 = vperm.xlu0 %7353, %v10563_v45  }
 0xed7   : > { %7345 = vset.pattern.permute.xlu1 %v7694_v8 }
 0xed8   : > { %5037 = vperm.xlu1 %7345, %v10548_v61  }
 0xeda   : > { %5077 = vperm.xlu0 %7353, %v10581_v23  }
 0xedc   : > { %5047 = vperm.xlu1 %7345, %v10546_v58  }
 0xede   : > { %5092 = vperm.xlu0 %7353, %v10591_v35  }
 0xee0   : > { %5052 = vperm.xlu1 %7345, %v10551_v13   ;;  %v4522_v13 = vld [vmem:[#allocation5 + $0x78] sm:$0xff] }
 0xee2   : > { %5102 = vperm.xlu0 %7353, %v7400_v16  }
 0xee4   : > { %7348 = vset.pattern.permute.xlu1 %v7693_v49 }
 0xee5   : > { %4782 = vperm.xlu1 %7348, %v7400_v16  }
 0xee6   : > { %5112 = vperm.xlu0 %7353, %v10579_v51  }
 0xee9   : > { %4787 = vperm.xlu1 %7348, %v10610_v21  }
 0xeed   : > { %7350 = vset.pattern.permute.xlu1 %v7695_v12 }
 0xeee   : > { %4917 = vperm.xlu1 %7350, %v10581_v23  }
 0xef2   : > { %4927 = vperm.xlu1 %7350, %v10586_v50  }
 0xef6   : > { %4932 = vperm.xlu1 %7350, %v10591_v35   ;;  %v4568_v43 = vpop.permute.xlu1 %4567 }
 0xef7   : > { %v4637_v29 = vmul.f32 %v4568_v43, %v4509_v41  ;;  %v7360_v43 = vld [vmem:[#allocation11 + $0x8] sm:$0xff]  }
 0xef9   : > { %4653 = vst.msk [vmem:[#allocation5 + $0x10] sm:$0xff] %vm1071_vm3, %v4637_v29 }
 0xefa   : > { %7351 = vset.pattern.permute.xlu1 %v7694_v8 }
 0xefb   : > { %5062 = vperm.xlu1 %7351, %v10557_v4  }
 0xefd   : > { %v4558_v32 = vpop.permute.xlu0 %4557 }
 0xefe   : > { %v4635_v37 = vmul.f32 %v4558_v32, %v4507_v33  ;;  %v7359_v33 = vld [vmem:[#allocation11] sm:$0xff]  }
 0xeff   : > { %5067 = vperm.xlu1 %7351, %v10566_v9   ;;  %v4573_v42 = vpop.permute.xlu1 %4572  ;;  %6783 = vmatprep.subr.bf16.mxu1 %v7359_v33 }
 0xf00   : > { %4651 = vst.msk [vmem:[#allocation5] sm:$0xff] %vm1071_vm3, %v4635_v37  ;;  %v4638_v52 = vmul.f32 %v4573_v42, %v4510_v63  ;;  %v4669_v27 = vld [vmem:[#allocation5 + $0x10] sm:$0xff]  ;;  %6784 = vmatpush3.bf16.msra.mxu1 %v7359_v33 }
 0xf01   : > { %v4563_v40 = vpop.permute.xlu0 %4562  ;;  %6785 = vmatprep.subr.bf16.mxu1 %v7360_v43 }
 0xf02   : > { %v4636_v24 = vmul.f32 %v4563_v40, %v4508_v7  ;;  %4654 = vst.msk [vmem:[#allocation5 + $0x18] sm:$0xff] %vm1071_vm3, %v4638_v52 }
 0xf03   : > { %7352 = vset.pattern.permute.xlu1 %v7695_v12  ;;  %v4583_v48 = vpop.permute.xlu1 %4582 }
 0xf04   : > { %4652 = vst.msk [vmem:[#allocation5 + $0x8] sm:$0xff] %vm1071_vm3, %v4636_v24  ;;  %v4640_v59 = vmul.f32 %v4583_v48, %v4512_v5  ;;  %4937 = vperm.xlu1 %7352, %v10575_v11   ;;  %6786 = vmatpush3.bf16.msra.mxu1 %v7360_v43 }
 0xf05   : > { %v4578_v36 = vpop.permute.xlu0 %4577 }
 0xf06   : > { %v4639_v0 = vmul.f32 %v4578_v36, %v4511_v19  ;;  %4656 = vst.msk [vmem:[#allocation5 + $0x28] sm:$0xff] %vm1071_vm3, %v4640_v59 }
 0xf07   : > { %v4593_v20 = vpop.permute.xlu1 %4592  ;;  %v4667_v49 = vld [vmem:[#allocation5] sm:$0xff] }
 0xf08   : > { %4655 = vst.msk [vmem:[#allocation5 + $0x20] sm:$0xff] %vm1071_vm3, %v4639_v0  ;;  %v4642_v28 = vmul.f32 %v4593_v20, %v4514_v22  ;;  %4947 = vperm.xlu1 %7352, %v10610_v21  }
 0xf09   : > { %v4588_v2 = vpop.permute.xlu0 %4587 }
 0xf0a   : > { %v4641_v18 = vmul.f32 %v4588_v2, %v4513_v6  ;;  %4658 = vst.msk [vmem:[#allocation5 + $0x38] sm:$0xff] %vm1071_vm3, %v4642_v28  ;;  %v4520_v2 = vld [vmem:[#allocation5 + $0x68] sm:$0xff] }
 0xf0b   : > { %v4668_v62 = vld [vmem:[#allocation5 + $0x8] sm:$0xff] }
 0xf0c   : > { %4657 = vst.msk [vmem:[#allocation5 + $0x30] sm:$0xff] %vm1071_vm3, %v4641_v18  ;;  %4952 = vperm.xlu1 %7352, %v10579_v51   ;;  %v4723_v30 = vpop.permute.xlu1 %4722 }
 0xf0d   : > { %v4603_v26 = vpop.permute.xlu0 %4602  ;;  %v4796_v60 = vmul.f32 %v4723_v30, %v4668_v62  ;;  %v4672_v54 = vld [vmem:[#allocation5 + $0x28] sm:$0xff]  ;;  %v4521_v30 = vld [vmem:[#allocation5 + $0x70] sm:$0xff] }
 0xf0e   : > { %v4644_v47 = vmul.f32 %v4603_v26, %v4516_v1 }
 0xf0f   : > { %4812 = vst.msk [vmem:[#allocation5 + $0x8] sm:$0xff] %vm2702_vm7, %v4796_v60  ;;  %v4671_v16 = vld [vmem:[#allocation5 + $0x20] sm:$0xff] }
 0xf10   : > { %4660 = vst.msk [vmem:[#allocation5 + $0x48] sm:$0xff] %vm1071_vm3, %v4644_v47  ;;  %7354 = vset.pattern.permute.xlu1 %v7694_v8  ;;  %v4728_v44 = vpop.permute.xlu1 %4727 }
 0xf11   : > { %v4618_v58 = vpop.permute.xlu0 %4617  ;;  %v4797_v34 = vmul.f32 %v4728_v44, %v4669_v27  ;;  %5082 = vperm.xlu1 %7354, %v10570_v14   ;;  %v4674_v32 = vld [vmem:[#allocation5 + $0x38] sm:$0xff] }
 0xf12   : > { %v4647_v61 = vmul.f32 %v4618_v58, %v4519_v46 }
 0xf13   : > { %4813 = vst.msk [vmem:[#allocation5 + $0x10] sm:$0xff] %vm2702_vm7, %v4797_v34  ;;  %v4673_v55 = vld [vmem:[#allocation5 + $0x30] sm:$0xff] }
 0xf14   : > { %4663 = vst.msk [vmem:[#allocation5 + $0x60] sm:$0xff] %vm1071_vm3, %v4647_v61 }
 0xf15   : > { %v4633_v4 = vpop.permute.xlu0 %4632  ;;  %5087 = vperm.xlu1 %7354, %v10586_v50   ;;  %v4598_v3 = vpop.permute.xlu1 %4597 }
 0xf16   : > { %v4650_v38 = vmul.f32 %v4633_v4, %v4522_v13  ;;  %v4643_v45 = vmul.f32 %v4598_v3, %v4515_v56  ;;  %v4828_v60 = vld [vmem:[#allocation5 + $0x8] sm:$0xff] }
 0xf17   : > { %v4676_v42 = vld [vmem:[#allocation5 + $0x48] sm:$0xff] }
 0xf18   : > { %4666 = vst.msk [vmem:[#allocation5 + $0x78] sm:$0xff] %vm1071_vm3, %v4650_v38  ;;  %4659 = vst.msk [vmem:[#allocation5 + $0x40] sm:$0xff] %vm1071_vm3, %v4643_v45 }
 0xf19   : > { %5097 = vperm.xlu1 %7354, %v10575_v11   ;;  %v4608_v9 = vpop.permute.xlu1 %4607  ;;  %v4670_v11 = vld [vmem:[#allocation5 + $0x18] sm:$0xff] }
 0xf1a   : > { %v10678_v53 = vpop.permute.xlu0 %5042  ;;  %v4645_v14 = vmul.f32 %v4608_v9, %v4517_v15  ;;  %v4829_v5 = vld [vmem:[#allocation5 + $0x10] sm:$0xff] }
 0xf1b   : > { %v4679_v48 = vld [vmem:[#allocation5 + $0x60] sm:$0xff] }
 0xf1c   : > { %4661 = vst.msk [vmem:[#allocation5 + $0x50] sm:$0xff] %vm1071_vm3, %v4645_v14 }
 0xf1d   : > { %5107 = vperm.xlu1 %7354, %v10610_v21   ;;  %v4613_v31 = vpop.permute.xlu1 %4612 }
 0xf1e   : > { %v4646_v51 = vmul.f32 %v4613_v31, %v4518_v25 }
 0xf1f   : > { %v4718_v23 = vpop.permute.xlu0 %4717  ;;  %v4682_v28 = vld [vmem:[#allocation5 + $0x78] sm:$0xff]  ;;  %v4675_v13 = vld [vmem:[#allocation5 + $0x40] sm:$0xff] }
 0xf20   : > { %v4795_v50 = vmul.f32 %v4718_v23, %v4667_v49  ;;  %4662 = vst.msk [vmem:[#allocation5 + $0x58] sm:$0xff] %vm1071_vm3, %v4646_v51 }
 0xf22   : > { %4811 = vst.msk [vmem:[#allocation5] sm:$0xff] %vm2702_vm7, %v4795_v50  ;;  %v4743_v35 = vpop.permute.xlu1 %4742 }
 0xf23   : > { %v4733_v8 = vpop.permute.xlu0 %4732  ;;  %v4800_v10 = vmul.f32 %v4743_v35, %v4672_v54  ;;  %v4677_v9 = vld [vmem:[#allocation5 + $0x50] sm:$0xff] }
 0xf24   : > { %v4798_v12 = vmul.f32 %v4733_v8, %v4670_v11 }
 0xf25   : > { %4816 = vst.msk [vmem:[#allocation5 + $0x28] sm:$0xff] %vm2702_vm7, %v4800_v10 }
 0xf26   : > { %4814 = vst.msk [vmem:[#allocation5 + $0x18] sm:$0xff] %vm2702_vm7, %v4798_v12  ;;  %v4748_v17 = vpop.permute.xlu1 %4747 }
 0xf27   : > { %v4738_v21 = vpop.permute.xlu0 %4737  ;;  %v4801_v39 = vmul.f32 %v4748_v17, %v4673_v55  ;;  %v4678_v50 = vld [vmem:[#allocation5 + $0x58] sm:$0xff] }
 0xf28   : > { %v4799_v57 = vmul.f32 %v4738_v21, %v4671_v16 }
 0xf29   : > { %4817 = vst.msk [vmem:[#allocation5 + $0x30] sm:$0xff] %vm2702_vm7, %v4801_v39  ;;  %v4827_v41 = vld [vmem:[#allocation5] sm:$0xff] }
 0xf2a   : > { %4815 = vst.msk [vmem:[#allocation5 + $0x20] sm:$0xff] %vm2702_vm7, %v4799_v57 }
 0xf2b   : > { %v4753_v29 = vpop.permute.xlu0 %4752  ;;  %v4878_v63 = vpop.permute.xlu1 %4877 }
 0xf2c   : > { %v4802_v37 = vmul.f32 %v4753_v29, %v4674_v32  ;;  %v4955_v7 = vmul.f32 %v4878_v63, %v4827_v41 }
 0xf2d   : > { %v4830_v22 = vld [vmem:[#allocation5 + $0x18] sm:$0xff] }
 0xf2e   : > { %4818 = vst.msk [vmem:[#allocation5 + $0x38] sm:$0xff] %vm2702_vm7, %v4802_v37 }
 0xf2f   : > { %4971 = vst.msk [vmem:[#allocation5] sm:$0xff] %vm3586_vm9, %v4955_v7  ;;  %v4763_v52 = vpop.permute.xlu0 %4762  ;;  %v4888_v24 = vpop.permute.xlu1 %4887 }
 0xf30   : > { %v4804_v40 = vmul.f32 %v4763_v52, %v4676_v42  ;;  %v4957_v19 = vmul.f32 %v4888_v24, %v4829_v5  ;;  %v4833_v21 = vld [vmem:[#allocation5 + $0x30] sm:$0xff] }
 0xf31   : > { %v4831_v58 = vld [vmem:[#allocation5 + $0x20] sm:$0xff] }
 0xf32   : > { %4820 = vst.msk [vmem:[#allocation5 + $0x48] sm:$0xff] %vm2702_vm7, %v4804_v40 }
 0xf33   : > { %4973 = vst.msk [vmem:[#allocation5 + $0x10] sm:$0xff] %vm3586_vm9, %v4957_v19  ;;  %v4778_v59 = vpop.permute.xlu0 %4777  ;;  %v4893_v0 = vpop.permute.xlu1 %4892 }
 0xf34   : > { %v4807_v36 = vmul.f32 %v4778_v59, %v4679_v48  ;;  %v4958_v6 = vmul.f32 %v4893_v0, %v4830_v22 }
 0xf35   : > { %v4834_v3 = vld [vmem:[#allocation5 + $0x38] sm:$0xff] }
 0xf36   : > { %4823 = vst.msk [vmem:[#allocation5 + $0x60] sm:$0xff] %vm2702_vm7, %v4807_v36  ;;  %v4987_v43 = vld [vmem:[#allocation5] sm:$0xff] }
 0xf37   : > { %4974 = vst.msk [vmem:[#allocation5 + $0x18] sm:$0xff] %vm3586_vm9, %v4958_v6  ;;  %v4793_v20 = vpop.permute.xlu0 %4792 }
 0xf38   : > { %v4810_v18 = vmul.f32 %v4793_v20, %v4682_v28  ;;  %v4623_v62 = vpop.permute.xlu1 %4622 }
 0xf39   : > { %v4648_v1 = vmul.f32 %v4623_v62, %v4520_v2  ;;  %v4836_v31 = vld [vmem:[#allocation5 + $0x48] sm:$0xff] }
 0xf3a   : > { %4826 = vst.msk [vmem:[#allocation5 + $0x78] sm:$0xff] %vm2702_vm7, %v4810_v18  ;;  %v4989_v37 = vld [vmem:[#allocation5 + $0x10] sm:$0xff] }
 0xf3b   : > { %4664 = vst.msk [vmem:[#allocation5 + $0x68] sm:$0xff] %vm1071_vm3, %v4648_v1 }
 0xf3c   : > { %v4883_v26 = vpop.permute.xlu0 %4882  ;;  %v4628_v46 = vpop.permute.xlu1 %4627 }
 0xf3d   : > { %v4956_v47 = vmul.f32 %v4883_v26, %v4828_v60  ;;  %v4649_v44 = vmul.f32 %v4628_v46, %v4521_v30 }
 0xf3e   : > { %v4990_v42 = vld [vmem:[#allocation5 + $0x18] sm:$0xff] }
 0xf3f   : > { %4972 = vst.msk [vmem:[#allocation5 + $0x8] sm:$0xff] %vm3586_vm9, %v4956_v47 }
 0xf40   : > { %4665 = vst.msk [vmem:[#allocation5 + $0x70] sm:$0xff] %vm1071_vm3, %v4649_v44  ;;  %v4898_v27 = vpop.permute.xlu0 %4897 }
 0xf41   : > { %v4959_v34 = vmul.f32 %v4898_v27, %v4831_v58  ;;  %v4758_v61 = vpop.permute.xlu1 %4757 }
 0xf42   : > { %v4803_v56 = vmul.f32 %v4758_v61, %v4675_v13  ;;  %v4680_v48 = vld [vmem:[#allocation5 + $0x68] sm:$0xff] }
 0xf43   : > { %4975 = vst.msk [vmem:[#allocation5 + $0x20] sm:$0xff] %vm3586_vm9, %v4959_v34 }
 0xf44   : > { %v4913_v4 = vpop.permute.xlu0 %4912  ;;  %4819 = vst.msk [vmem:[#allocation5 + $0x40] sm:$0xff] %vm2702_vm7, %v4803_v56 }
 0xf45   : > { %v4962_v38 = vmul.f32 %v4913_v4, %v4834_v3  ;;  %v4768_v15 = vpop.permute.xlu1 %4767 }
 0xf46   : > { %v4988_v45 = vld [vmem:[#allocation5 + $0x8] sm:$0xff]  ;;  %v4805_v25 = vmul.f32 %v4768_v15, %v4677_v9 }
 0xf47   : > { %v5116_v14 = vmul.f32 %v10678_v53, %v4988_v45  ;;  %4978 = vst.msk [vmem:[#allocation5 + $0x38] sm:$0xff] %vm3586_vm9, %v4962_v38  ;;  %v4832_v53 = vld [vmem:[#allocation5 + $0x28] sm:$0xff]  ;;  %v4681_v0 = vld [vmem:[#allocation5 + $0x70] sm:$0xff] }
 0xf48   : > { %v4923_v49 = vpop.permute.xlu0 %4922  ;;  %4821 = vst.msk [vmem:[#allocation5 + $0x50] sm:$0xff] %vm2702_vm7, %v4805_v25 }
 0xf49   : > { %5132 = vst.msk [vmem:[#allocation5 + $0x8] sm:$0xff] %vm4470_vm10, %v5116_v14  ;;  %v4964_v51 = vmul.f32 %v4923_v49, %v4836_v31  ;;  %v4773_v23 = vpop.permute.xlu1 %4772 }
 0xf4a   : > { %v4806_v8 = vmul.f32 %v4773_v23, %v4678_v50  ;;  %v4991_v10 = vld [vmem:[#allocation5 + $0x20] sm:$0xff] }
 0xf4b   : > { %4980 = vst.msk [vmem:[#allocation5 + $0x48] sm:$0xff] %vm3586_vm9, %v4964_v51  ;;  %v4835_v62 = vld [vmem:[#allocation5 + $0x40] sm:$0xff] }
 0xf4c   : > { %v4943_v11 = vpop.permute.xlu0 %4942  ;;  %4822 = vst.msk [vmem:[#allocation5 + $0x58] sm:$0xff] %vm2702_vm7, %v4806_v8  ;;  %v4839_v23 = vld [vmem:[#allocation5 + $0x60] sm:$0xff] }
 0xf4e   : > { %v4903_v35 = vpop.permute.xlu1 %4902  ;;  %v4994_v39 = vld [vmem:[#allocation5 + $0x38] sm:$0xff] }
 0xf4f   : > { %v4960_v54 = vmul.f32 %v4903_v35, %v4832_v53  ;;  %v4837_v46 = vld [vmem:[#allocation5 + $0x50] sm:$0xff] }
 0xf50   : > { %v5148_v24 = vld [vmem:[#allocation5 + $0x8] sm:$0xff] }
 0xf51   : > { %v5058_v12 = vpop.permute.xlu0 %5057  ;;  %4976 = vst.msk [vmem:[#allocation5 + $0x28] sm:$0xff] %vm3586_vm9, %v4960_v54 }
 0xf52   : > { %v5119_v16 = vmul.f32 %v5058_v12, %v4991_v10  ;;  %v4908_v55 = vpop.permute.xlu1 %4907 }
 0xf53   : > { %v4961_v17 = vmul.f32 %v4908_v55, %v4833_v21  ;;  %v4838_v58 = vld [vmem:[#allocation5 + $0x58] sm:$0xff] }
 0xf54   : > { %5135 = vst.msk [vmem:[#allocation5 + $0x20] sm:$0xff] %vm4470_vm10, %v5119_v16 }
 0xf55   : > { %v5073_v57 = vpop.permute.xlu0 %5072  ;;  %4977 = vst.msk [vmem:[#allocation5 + $0x30] sm:$0xff] %vm3586_vm9, %v4961_v17  ;;  %v4842_v17 = vld [vmem:[#allocation5 + $0x78] sm:$0xff] }
 0xf56   : > { %v5122_v41 = vmul.f32 %v5073_v57, %v4994_v39 }
 0xf57   : > { %v5038_v33 = vpop.permute.xlu1 %5037 }
 0xf58   : > { %5138 = vst.msk [vmem:[#allocation5 + $0x38] sm:$0xff] %vm4470_vm10, %v5122_v41  ;;  %v5115_v29 = vmul.f32 %v5038_v33, %v4987_v43  ;;  %v4992_v45 = vld [vmem:[#allocation5 + $0x28] sm:$0xff] }
 0xf59   : > { %v5078_v2 = vpop.permute.xlu0 %5077  ;;  %v4996_v41 = vld [vmem:[#allocation5 + $0x48] sm:$0xff] }
 0xf5a   : > { %5131 = vst.msk [vmem:[#allocation5] sm:$0xff] %vm4470_vm10, %v5115_v29 }
 0xf5b   : > { %v5048_v32 = vpop.permute.xlu1 %5047  ;;  %v5151_v8 = vld [vmem:[#allocation5 + $0x20] sm:$0xff] }
 0xf5c   : > { %v5117_v63 = vmul.f32 %v5048_v32, %v4989_v37  ;;  %v4993_v14 = vld [vmem:[#allocation5 + $0x30] sm:$0xff] }
 0xf5d   : > { %v5093_v60 = vpop.permute.xlu0 %5092 }
 0xf5e   : > { %5133 = vst.msk [vmem:[#allocation5 + $0x10] sm:$0xff] %vm4470_vm10, %v5117_v63 }
 0xf5f   : > { %v5053_v7 = vpop.permute.xlu1 %5052  ;;  %v5154_v16 = vld [vmem:[#allocation5 + $0x38] sm:$0xff] }
 0xf60   : > { %v5118_v52 = vmul.f32 %v5053_v7, %v4990_v42 }
 0xf61   : > { %v5147_v40 = vld [vmem:[#allocation5] sm:$0xff]  ;;  %v5103_v61 = vpop.permute.xlu0 %5102 }
 0xf62   : > { %5134 = vst.msk [vmem:[#allocation5 + $0x18] sm:$0xff] %vm4470_vm10, %v5118_v52  ;;  %v5163_v5 = vpack.c.bf16 %v5148_v24, %v5147_v40 }
 0xf64   : > { %v4783_v19 = vpop.permute.xlu1 %4782  ;;  %6767 = vmatprep.mubr.msk.bf16.mxu0 %vm933_vm2, %v5163_v5 }
 0xf65   : > { %v4808_v59 = vmul.f32 %v4783_v19, %v4680_v48  ;;  %v5149_v6 = vld [vmem:[#allocation5 + $0x10] sm:$0xff]  ;;  %v5113_v32 = vpop.permute.xlu0 %5112 }
 0xf67   : > { %4824 = vst.msk [vmem:[#allocation5 + $0x68] sm:$0xff] %vm2702_vm7, %v4808_v59 }
 0xf68   : > { %v4788_v36 = vpop.permute.xlu1 %4787 }
 0xf69   : > { %v4809_v22 = vmul.f32 %v4788_v36, %v4681_v0  ;;  %v5150_v20 = vld [vmem:[#allocation5 + $0x18] sm:$0xff] }
 0xf6a   : > { %v5164_v28 = vpack.c.bf16 %v5150_v20, %v5149_v6 }
 0xf6b   : > { %4825 = vst.msk [vmem:[#allocation5 + $0x70] sm:$0xff] %vm2702_vm7, %v4809_v22 }
 0xf6c   : > { %6768 = vmatmul.mubr.msk.bf16.vlgmr.msra.gmra.mrb[0].mxu0 %vm933_vm2, %v5164_v28 }
 0xf6d   : > { %v4918_v18 = vpop.permute.xlu1 %4917 }
 0xf6e   : > { %v4963_v1 = vmul.f32 %v4918_v18, %v4835_v62  ;;  %v4840_v30 = vld [vmem:[#allocation5 + $0x68] sm:$0xff] }
 0xf6f   : > { %v4968_v26 = vmul.f32 %v4943_v11, %v4840_v30  ;;  %v7361_v30 = vld [vmem:[#allocation11 + $0x10] sm:$0xff]  }
 0xf70   : > { %4979 = vst.msk [vmem:[#allocation5 + $0x40] sm:$0xff] %vm3586_vm9, %v4963_v1  ;;  %6787 = vmatprep.subr.bf16.mxu1 %v7361_v30 }
 0xf71   : > { %v4928_v47 = vpop.permute.xlu1 %4927  ;;  %4984 = vst.msk [vmem:[#allocation5 + $0x68] sm:$0xff] %vm3586_vm9, %v4968_v26  ;;  %6788 = vmatpush3.bf16.msra.mxu1 %v7361_v30  ;;  %v7362_v26 = vld [vmem:[#allocation11 + $0x18] sm:$0xff]  }
 0xf72   : > { %v4965_v44 = vmul.f32 %v4928_v47, %v4837_v46  ;;  %v4841_v54 = vld [vmem:[#allocation5 + $0x70] sm:$0xff]  ;;  %6789 = vmatprep.subr.bf16.mxu1 %v7362_v26  ;;  %v7364_v47 = vld [vmem:[%s11748_s10 + $0x8] sm:$0xff]  }
 0xf73   : > { %v7365_v46 = vld [vmem:[%s11748_s10 + $0x10] sm:$0xff]  }
 0xf74   : > { %4981 = vst.msk [vmem:[#allocation5 + $0x50] sm:$0xff] %vm3586_vm9, %v4965_v44  ;;  %v7366_v44 = vld [vmem:[%s11748_s10 + $0x18] sm:$0xff]  }
 0xf75   : > { %v4933_v27 = vpop.permute.xlu1 %4932  ;;  %6790 = vmatpush3.bf16.msra.mxu1 %v7362_v26 }
 0xf76   : > { %v4966_v34 = vmul.f32 %v4933_v27, %v4838_v58  ;;  %v7367_v27 = vld [vmem:[%s11748_s10 + $0x20] sm:$0xff]   ;;  %v7368_v58 = vld [vmem:[%s11748_s10 + $0x28] sm:$0xff]  }
 0xf77   : > { %v4995_v13 = vld [vmem:[#allocation5 + $0x40] sm:$0xff] }
 0xf78   : > { %v5123_v56 = vmul.f32 %v5078_v2, %v4995_v13  ;;  %4982 = vst.msk [vmem:[#allocation5 + $0x58] sm:$0xff] %vm3586_vm9, %v4966_v34  ;;  %v5000_v4 = vld [vmem:[#allocation5 + $0x68] sm:$0xff] }
 0xf79   : > { %v5128_v3 = vmul.f32 %v5103_v61, %v5000_v4  ;;  %v6221_v61 = vld [vmem:[%s11749_s20] ss:$0 sm:$0xff]  ;;  %s11752_s20 = sld [smem:[#allocation142_spill]] }
 0xf7a   : > { %5139 = vst.msk [vmem:[#allocation5 + $0x40] sm:$0xff] %vm4470_vm10, %v5123_v56  ;;  %v5063_v38 = vpop.permute.xlu1 %5062 }
 0xf7b   : > { %5144 = vst.msk [vmem:[#allocation5 + $0x68] sm:$0xff] %vm4470_vm10, %v5128_v3  ;;  %v5120_v15 = vmul.f32 %v5063_v38, %v4992_v45  ;;  %v4997_v29 = vld [vmem:[#allocation5 + $0x50] sm:$0xff] }
 0xf7d   : > { %5136 = vst.msk [vmem:[#allocation5 + $0x28] sm:$0xff] %vm4470_vm10, %v5120_v15 }
 0xf7e   : > { %v5068_v9 = vpop.permute.xlu1 %5067 }
 0xf7f   : > { %v4998_v25 = vld [vmem:[#allocation5 + $0x58] sm:$0xff]  ;;  %v5121_v49 = vmul.f32 %v5068_v9, %v4993_v14 }
 0xf80   : > { %v5126_v31 = vmul.f32 %v5093_v60, %v4998_v25  ;;  %v7363_v60 = vld [vmem:[%s11748_s10] sm:$0xff]  }
 0xf81   : > { %5137 = vst.msk [vmem:[#allocation5 + $0x30] sm:$0xff] %vm4470_vm10, %v5121_v49  ;;  %v5155_v24 = vld [vmem:[#allocation5 + $0x40] sm:$0xff]  ;;  %6807 = vmatprep.subr.bf16.mxu0 %v7363_v60  ;;  %6847 = vmatprep.subr.bf16.mxu1 %v7363_v60 }
 0xf82   : > { %5142 = vst.msk [vmem:[#allocation5 + $0x58] sm:$0xff] %vm4470_vm10, %v5126_v31  ;;  %v5160_v28 = vld [vmem:[#allocation5 + $0x68] sm:$0xff]  ;;  %6808 = vmatpush3.bf16.msra.mxu0 %v7363_v60 }
 0xf83   : > { %v4938_v51 = vpop.permute.xlu1 %4937  ;;  %6809 = vmatprep.subr.bf16.mxu0 %v7364_v47 }
 0xf84   : > { %v4967_v50 = vmul.f32 %v4938_v51, %v4839_v23  ;;  %v5152_v11 = vld [vmem:[#allocation5 + $0x28] sm:$0xff] }
 0xf85   : > { %v5165_v35 = vpack.c.bf16 %v5152_v11, %v5151_v8 }
 0xf86   : > { %4983 = vst.msk [vmem:[#allocation5 + $0x60] sm:$0xff] %vm3586_vm9, %v4967_v50  ;;  %6810 = vmatpush3.bf16.msra.mxu0 %v7364_v47 }
 0xf87   : > { %v4948_v53 = vpop.permute.xlu1 %4947  ;;  %6771 = vmatprep.mubr.msk.bf16.mxu0 %vm933_vm2, %v5165_v35  ;;  %6811 = vmatprep.subr.bf16.mxu0 %v7365_v46 }
 0xf88   : > { %v4969_v12 = vmul.f32 %v4948_v53, %v4841_v54  ;;  %v5153_v10 = vld [vmem:[#allocation5 + $0x30] sm:$0xff] }
 0xf89   : > { %v5166_v55 = vpack.c.bf16 %v5154_v16, %v5153_v10  ;;  %v5158_v22 = vld [vmem:[#allocation5 + $0x58] sm:$0xff] }
 0xf8a   : > { %4985 = vst.msk [vmem:[#allocation5 + $0x70] sm:$0xff] %vm3586_vm9, %v4969_v12  ;;  %6812 = vmatpush3.bf16.msra.mxu0 %v7365_v46 }
 0xf8b   : > { %v4953_v21 = vpop.permute.xlu1 %4952  ;;  %6772 = vmatmul.mubr.msk.bf16.gmra.mrb[4].mxu0 %vm933_vm2, %v5166_v55  ;;  %6813 = vmatprep.subr.bf16.mxu0 %v7366_v44 }
 0xf8c   : > { %v4970_v57 = vmul.f32 %v4953_v21, %v4842_v17 }
 0xf8d   : > { %v4999_v52 = vld [vmem:[#allocation5 + $0x60] sm:$0xff] }
 0xf8e   : > { %4986 = vst.msk [vmem:[#allocation5 + $0x78] sm:$0xff] %vm3586_vm9, %v4970_v57  ;;  %6814 = vmatpush3.bf16.msra.mxu0 %v7366_v44 }
 0xf8f   : > { %6815 = vmatprep.subr.bf16.mxu0 %v7367_v27 }
 0xf90   : > { %v5083_v39 = vpop.permute.xlu1 %5082 }
 0xf91   : > { %v5124_v33 = vmul.f32 %v5083_v39, %v4996_v41  ;;  %v5001_v59 = vld [vmem:[#allocation5 + $0x70] sm:$0xff] }
 0xf92   : > { %6816 = vmatpush3.bf16.msra.mxu0 %v7367_v27 }
 0xf93   : > { %5140 = vst.msk [vmem:[#allocation5 + $0x48] sm:$0xff] %vm4470_vm10, %v5124_v33  ;;  %6817 = vmatprep.subr.bf16.mxu0 %v7368_v58 }
 0xf94   : > { %v5088_v43 = vpop.permute.xlu1 %5087 }
 0xf95   : > { %v5002_v37 = vld [vmem:[#allocation5 + $0x78] sm:$0xff]  ;;  %v5125_v63 = vmul.f32 %v5088_v43, %v4997_v29 }
 0xf96   : > { %v5130_v7 = vmul.f32 %v5113_v32, %v5002_v37  ;;  %6818 = vmatpush3.bf16.msra.mxu0 %v7368_v58 }
 0xf97   : > { %5141 = vst.msk [vmem:[#allocation5 + $0x50] sm:$0xff] %vm4470_vm10, %v5125_v63 }
 0xf98   : > { %5146 = vst.msk [vmem:[#allocation5 + $0x78] sm:$0xff] %vm4470_vm10, %v5130_v7  ;;  %v5098_v42 = vpop.permute.xlu1 %5097 }
 0xf99   : > { %v5127_v40 = vmul.f32 %v5098_v42, %v4999_v52 }
 0xf9a   : > { %v5156_v5 = vld [vmem:[#allocation5 + $0x48] sm:$0xff] }
 0xf9b   : > { %5143 = vst.msk [vmem:[#allocation5 + $0x60] sm:$0xff] %vm4470_vm10, %v5127_v40  ;;  %v5167_v19 = vpack.c.bf16 %v5156_v5, %v5155_v24  ;;  %v7369_v24 = vld [vmem:[%s11748_s10 + $0x30] sm:$0xff]   ;;  %v7370_v5 = vld [vmem:[%s11748_s10 + $0x38] sm:$0xff]  }
 0xf9c   : > { %v5108_v48 = vpop.permute.xlu1 %5107  ;;  %6819 = vmatprep.subr.bf16.mxu0 %v7369_v24 }
 0xf9d   : > { %v5129_v36 = vmul.f32 %v5108_v48, %v5001_v59  ;;  %6775 = vmatprep.mubr.msk.bf16.mxu0 %vm933_vm2, %v5167_v19  ;;  %6820 = vmatpush3.bf16.msra.mxu0 %v7369_v24  ;;  %v6234_v19 = vld [vmem:[%s11750_s16] ss:$0 sm:$0xff] }
 0xf9e   : > { %v5157_v0 = vld [vmem:[#allocation5 + $0x50] sm:$0xff]  ;;  %6821 = vmatprep.subr.bf16.mxu0 %v7370_v5 }
 0xf9f   : > { %5145 = vst.msk [vmem:[#allocation5 + $0x70] sm:$0xff] %vm4470_vm10, %v5129_v36  ;;  %v5168_v6 = vpack.c.bf16 %v5158_v22, %v5157_v0  ;;  %v5162_v62 = vld [vmem:[#allocation5 + $0x78] sm:$0xff] }
 0xfa1   : > { %6776 = vmatmul.mubr.msk.bf16.gmra.mrb[8].mxu0 %vm933_vm2, %v5168_v6 }
 0xfa2   : > { %v5159_v20 = vld [vmem:[#allocation5 + $0x60] sm:$0xff]  ;;  %6822 = vmatpush3.bf16.msra.mxu0 %v7370_v5 }
 0xfa3   : > { %v5169_v2 = vpack.c.bf16 %v5160_v28, %v5159_v20 }
 0xfa5   : > { %6779 = vmatprep.mubr.msk.bf16.mxu0 %vm933_vm2, %v5169_v2 }
 0xfa6   : > { %v5161_v18 = vld [vmem:[#allocation5 + $0x70] sm:$0xff] }
 0xfa7   : > { %v5170_v1 = vpack.c.bf16 %v5162_v62, %v5161_v18 }
 0xfa9   : > { %6780 = vmatmul.mubr.msk.bf16.gmra.mrb[12].mxu0 %vm933_vm2, %v5170_v1 }
0x103f   : > { %v6769_v34 = vpop.f32.mrb[0].mxu0 }
0x1040   : > { %v5268_v13 = vpop.f32.mrb[1].mxu0  ;;  %v5277_v4 = vadd.f32 %v6769_v34, %v6221_v61 }
0x1041   : > { %v6770_v56 = vpop.f32.mrb[2].mxu0  ;;  %v5269_v45 = vadd.f32 %v6221_v61, %v5268_v13 }
0x1042   : > { %v5280_v3 = vadd.f32 %v6770_v56, %v6221_v61  ;;  %v5271_v38 = vpop.f32.mrb[3].mxu0 }
0x1043   : > { %v5272_v15 = vadd.f32 %v6221_v61, %v5271_v38 }
0x1044   : > { %v5332_v9 = vpack.c.bf16 %v5280_v3, %v5277_v4 }
0x1045   : > { %v5331_v14 = vpack.c.bf16 %v5272_v15, %v5269_v45 }
0x1047   : > { %6791 = vmatprep.mubr.msk.bf16.mxu1 %vm933_vm2, %v5331_v14 }
0x1048   : > { %6792 = vmatmul.mubr.msk.bf16.vlgmr.msra.gmra.mrb[0].mxu1 %vm933_vm2, %v5332_v9 }
0x1049   : > { %6855 = vmatpush3.bf16.msra.mxu1 %v7363_v60 }
0x104a   : > { %6848 = vmatprep.subr.bf16.mxu1 %v7364_v47 }
0x104d   : > { %6856 = vmatpush3.bf16.msra.mxu1 %v7364_v47 }
0x104e   : > { %6849 = vmatprep.subr.bf16.mxu1 %v7365_v46 }
0x1051   : > { %6857 = vmatpush3.bf16.msra.mxu1 %v7365_v46 }
0x1052   : > { %6850 = vmatprep.subr.bf16.mxu1 %v7366_v44 }
0x1055   : > { %6858 = vmatpush3.bf16.msra.mxu1 %v7366_v44 }
0x1056   : > { %6851 = vmatprep.subr.bf16.mxu1 %v7367_v27 }
0x1059   : > { %6859 = vmatpush3.bf16.msra.mxu1 %v7367_v27 }
0x105a   : > { %6852 = vmatprep.subr.bf16.mxu1 %v7368_v58 }
0x105d   : > { %6860 = vmatpush3.bf16.msra.mxu1 %v7368_v58 }
0x105e   : > { %v6773_v25 = vpop.f32.mrb[4].mxu0  ;;  %6853 = vmatprep.subr.bf16.mxu1 %v7369_v24 }
0x105f   : > { %v5284_v49 = vpop.f32.mrb[5].mxu0  ;;  %v5293_v51 = vadd.f32 %v6773_v25, %v6221_v61 }
0x1060   : > { %v6774_v31 = vpop.f32.mrb[6].mxu0  ;;  %v5285_v8 = vadd.f32 %v6221_v61, %v5284_v49 }
0x1061   : > { %v5296_v23 = vadd.f32 %v6774_v31, %v6221_v61  ;;  %v5287_v50 = vpop.f32.mrb[7].mxu0  ;;  %6861 = vmatpush3.bf16.msra.mxu1 %v7369_v24 }
0x1062   : > { %v5288_v11 = vadd.f32 %v6221_v61, %v5287_v50  ;;  %6854 = vmatprep.subr.bf16.mxu1 %v7370_v5 }
0x1063   : > { %v5334_v35 = vpack.c.bf16 %v5296_v23, %v5293_v51 }
0x1064   : > { %v5333_v53 = vpack.c.bf16 %v5288_v11, %v5285_v8 }
0x1065   : > { %6862 = vmatpush3.bf16.msra.mxu1 %v7370_v5 }
0x1066   : > { %6795 = vmatprep.mubr.msk.bf16.mxu1 %vm933_vm2, %v5333_v53 }
0x1067   : > { %6796 = vmatmul.mubr.msk.bf16.gmra.mrb[4].mxu1 %vm933_vm2, %v5334_v35 }
0x1074   : > { %v6777_v54 = vpop.f32.mrb[8].mxu0 }
0x1075   : > { %v5300_v12 = vpop.f32.mrb[9].mxu0  ;;  %v5309_v16 = vadd.f32 %v6777_v54, %v6221_v61 }
0x1076   : > { %v6778_v10 = vpop.f32.mrb[10].mxu0  ;;  %v5301_v17 = vadd.f32 %v6221_v61, %v5300_v12 }
0x1077   : > { %v5312_v55 = vadd.f32 %v6778_v10, %v6221_v61  ;;  %v5303_v21 = vpop.f32.mrb[11].mxu0 }
0x1078   : > { %v5304_v57 = vadd.f32 %v6221_v61, %v5303_v21 }
0x1079   : > { %v5336_v39 = vpack.c.bf16 %v5312_v55, %v5309_v16 }
0x107a   : > { %v5335_v41 = vpack.c.bf16 %v5304_v57, %v5301_v17 }
0x107c   : > { %v6781_v33 = vpop.f32.mrb[12].mxu0  ;;  %6799 = vmatprep.mubr.msk.bf16.mxu1 %vm933_vm2, %v5335_v41 }
0x107d   : > { %v5316_v43 = vpop.f32.mrb[13].mxu0  ;;  %6800 = vmatmul.mubr.msk.bf16.gmra.mrb[8].mxu1 %vm933_vm2, %v5336_v39  ;;  %v5325_v32 = vadd.f32 %v6781_v33, %v6221_v61 }
0x107e   : > { %v6782_v29 = vpop.f32.mrb[14].mxu0  ;;  %v5317_v7 = vadd.f32 %v6221_v61, %v5316_v43 }
0x107f   : > { %v5328_v37 = vadd.f32 %v6782_v29, %v6221_v61  ;;  %v5319_v63 = vpop.f32.mrb[15].mxu0 }
0x1080   : > { %v5320_v42 = vadd.f32 %v6221_v61, %v5319_v63  ;;  %v10781_v63 = vld [vmem:[%s11751_s7] ss:$0 sm:$0xff] }
0x1081   : > { %v5338_v52 = vpack.c.bf16 %v5328_v37, %v5325_v32 }
0x1082   : > { %v5337_v40 = vpack.c.bf16 %v5320_v42, %v5317_v7 }
0x1084   : > { %6803 = vmatprep.mubr.msk.bf16.mxu1 %vm933_vm2, %v5337_v40 }
0x1085   : > { %6804 = vmatmul.mubr.msk.bf16.gmra.mrb[12].mxu1 %vm933_vm2, %v5338_v52 }
0x111b   : > { %v6793_v48 = vpop.f32.mrb[0].mxu1 }
0x111c   : > { %v5445_v59 = vadd.f32 %v6793_v48, %v6234_v19  ;;  %v5436_v36 = vpop.f32.mrb[1].mxu1 }
0x111d   : > { %v5437_v0 = vadd.f32 %v6234_v19, %v5436_v36  ;;  %v6794_v22 = vpop.f32.mrb[2].mxu1 }
0x111e   : > { %v5448_v6 = vadd.f32 %v6794_v22, %v6234_v19  ;;  %v5439_v20 = vpop.f32.mrb[3].mxu1  ;;  %v5501_v2 = vmax.f32 %v5445_v59, 0.0 }
0x111f   : > { %v5440_v28 = vadd.f32 %v6234_v19, %v5439_v20  ;;  %v5499_v62 = vmax.f32 %v5437_v0, 0.0 }
0x1120   : > { %v5502_v18 = vmax.f32 %v5448_v6, 0.0 }
0x1121   : > { %v5500_v1 = vmax.f32 %v5440_v28, 0.0 }
0x1122   : > { %v5516_v30 = vpack.c.bf16 %v5502_v18, %v5501_v2 }
0x1123   : > { %v5515_v26 = vpack.c.bf16 %v5500_v1, %v5499_v62 }
0x1125   : > { %6823 = vmatprep.mubr.bf16.mxu0 %v5515_v26 }
0x1126   : > { %6824 = vmatmul.mubr.bf16.vlgmr.msra.gmra.mrb[16].mxu0 %v5516_v30 }
0x113a   : > { %v6797_v60 = vpop.f32.mrb[4].mxu1 }
0x113b   : > { %v5461_v47 = vadd.f32 %v6797_v60, %v6234_v19  ;;  %v5452_v46 = vpop.f32.mrb[5].mxu1 }
0x113c   : > { %v5453_v44 = vadd.f32 %v6234_v19, %v5452_v46  ;;  %v6798_v27 = vpop.f32.mrb[6].mxu1 }
0x113d   : > { %v5464_v58 = vadd.f32 %v6798_v27, %v6234_v19  ;;  %v5455_v34 = vpop.f32.mrb[7].mxu1  ;;  %v5505_v13 = vmax.f32 %v5461_v47, 0.0 }
0x113e   : > { %v5456_v61 = vadd.f32 %v6234_v19, %v5455_v34  ;;  %v5503_v4 = vmax.f32 %v5453_v44, 0.0 }
0x113f   : > { %v5506_v56 = vmax.f32 %v5464_v58, 0.0 }
0x1140   : > { %v5504_v3 = vmax.f32 %v5456_v61, 0.0 }
0x1141   : > { %v5518_v38 = vpack.c.bf16 %v5506_v56, %v5505_v13 }
0x1142   : > { %v5517_v45 = vpack.c.bf16 %v5504_v3, %v5503_v4 }
0x1144   : > { %6827 = vmatprep.mubr.bf16.mxu0 %v5517_v45 }
0x1145   : > { %6828 = vmatmul.mubr.bf16.gmra.mrb[20].mxu0 %v5518_v38 }
0x1150   : > { %v6801_v15 = vpop.f32.mrb[8].mxu1 }
0x1151   : > { %v5477_v9 = vadd.f32 %v6801_v15, %v6234_v19  ;;  %v5468_v14 = vpop.f32.mrb[9].mxu1 }
0x1152   : > { %v5469_v25 = vadd.f32 %v6234_v19, %v5468_v14  ;;  %v6802_v49 = vpop.f32.mrb[10].mxu1 }
0x1153   : > { %v5480_v31 = vadd.f32 %v6802_v49, %v6234_v19  ;;  %v5471_v51 = vpop.f32.mrb[11].mxu1  ;;  %v5509_v50 = vmax.f32 %v5477_v9, 0.0 }
0x1154   : > { %v5472_v23 = vadd.f32 %v6234_v19, %v5471_v51  ;;  %v5507_v11 = vmax.f32 %v5469_v25, 0.0 }
0x1155   : > { %v5510_v8 = vmax.f32 %v5480_v31, 0.0 }
0x1156   : > { %v5508_v35 = vmax.f32 %v5472_v23, 0.0 }
0x1157   : > { %v5520_v53 = vpack.c.bf16 %v5510_v8, %v5509_v50 }
0x1158   : > { %v5519_v54 = vpack.c.bf16 %v5508_v35, %v5507_v11  ;;  %v6805_v12 = vpop.f32.mrb[12].mxu1 }
0x1159   : > { %v5493_v10 = vadd.f32 %v6805_v12, %v6234_v19  ;;  %v5484_v16 = vpop.f32.mrb[13].mxu1 }
0x115a   : > { %v5485_v55 = vadd.f32 %v6234_v19, %v5484_v16  ;;  %v6806_v21 = vpop.f32.mrb[14].mxu1  ;;  %6831 = vmatprep.mubr.bf16.mxu1 %v5519_v54 }
0x115b   : > { %v5496_v17 = vadd.f32 %v6806_v21, %v6234_v19  ;;  %v5487_v57 = vpop.f32.mrb[15].mxu1  ;;  %6832 = vmatmul.mubr.bf16.vlgmr.msra.gmra.mrb[16].mxu1 %v5520_v53  ;;  %v5513_v41 = vmax.f32 %v5493_v10, 0.0 }
0x115c   : > { %v5488_v39 = vadd.f32 %v6234_v19, %v5487_v57  ;;  %v5511_v43 = vmax.f32 %v5485_v55, 0.0 }
0x115d   : > { %v5514_v33 = vmax.f32 %v5496_v17, 0.0 }
0x115e   : > { %v5512_v29 = vmax.f32 %v5488_v39, 0.0 }
0x115f   : > { %v5522_v32 = vpack.c.bf16 %v5514_v33, %v5513_v41 }
0x1160   : > { %v5521_v37 = vpack.c.bf16 %v5512_v29, %v5511_v43 }
0x1162   : > { %6835 = vmatprep.mubr.bf16.mxu1 %v5521_v37 }
0x1163   : > { %6836 = vmatmul.mubr.bf16.gmra.mrb[20].mxu1 %v5522_v32 }
0x11f9   : > { %v6825_v7 = vpop.f32.mrb[16].mxu0 }
0x11fa   : > { %v5628_v42 = vpop.f32.mrb[17].mxu0  ;;  %v10790_v19 = vadd.f32 %v6825_v7, %v10781_v63 }
0x11fb   : > { %v10784_v52 = vadd.f32 %v10781_v63, %v5628_v42  ;;  %v6826_v40 = vpop.f32.mrb[18].mxu0 }
0x11fc   : > { %v10787_v24 = vadd.f32 %v6826_v40, %v10781_v63  ;;  %v5631_v5 = vpop.f32.mrb[19].mxu0  ;;  %v5693_v6 = vmax.f32 %v10790_v19, 0.0 }
0x11fd   : > { %v5691_v48 = vmax.f32 %v10784_v52, 0.0  ;;  %v10794_v59 = vadd.f32 %v10781_v63, %v5631_v5 }
0x11fe   : > { %v5694_v36 = vmax.f32 %v10787_v24, 0.0  ;;  %v5713_v2 = vsel %vm933_vm2, %v5693_v6, 0.0 }
0x11ff   : > { %v5692_v0 = vmax.f32 %v10794_v59, 0.0  ;;  %v5707_v22 = vsel %vm933_vm2, %v5691_v48, 0.0 }
0x1200   : > { %5708 = vadd.xlane.f32.xlu1 %v5707_v22  ;;  %v5716_v28 = vsel %vm933_vm2, %v5694_v36, 0.0 }
0x1201   : > { %v5710_v20 = vsel %vm933_vm2, %v5692_v0, 0.0 }
0x1202   : > { %5711 = vadd.xlane.f32.xlu0 %v5710_v20 }
0x1204   : > { %5717 = vadd.xlane.f32.xlu1 %v5716_v28 }
0x1206   : > { %5714 = vadd.xlane.f32.xlu0 %v5713_v2 }
0x1218   : > { %v6829_v18 = vpop.f32.mrb[20].mxu0 }
0x1219   : > { %v5644_v62 = vpop.f32.mrb[21].mxu0  ;;  %v10812_v1 = vadd.f32 %v6829_v18, %v10781_v63 }
0x121a   : > { %v10815_v30 = vadd.f32 %v10781_v63, %v5644_v62  ;;  %v6830_v26 = vpop.f32.mrb[22].mxu0 }
0x121b   : > { %v5647_v60 = vpop.f32.mrb[23].mxu0  ;;  %v10819_v46 = vadd.f32 %v6830_v26, %v10781_v63  ;;  %v5697_v27 = vmax.f32 %v10812_v1, 0.0 }
0x121c   : > { %v5695_v47 = vmax.f32 %v10815_v30, 0.0  ;;  %v10822_v44 = vadd.f32 %v10781_v63, %v5647_v60 }
0x121d   : > { %v5698_v61 = vmax.f32 %v10819_v46, 0.0  ;;  %v5725_v56 = vsel %vm933_vm2, %v5697_v27, 0.0 }
0x121e   : > { %v5696_v58 = vmax.f32 %v10822_v44, 0.0  ;;  %v5719_v34 = vsel %vm933_vm2, %v5695_v47, 0.0 }
0x121f   : > { %5720 = vadd.xlane.f32.xlu0 %v5719_v34  ;;  %v5728_v4 = vsel %vm933_vm2, %v5698_v61, 0.0 }
0x1220   : > { %v5722_v13 = vsel %vm933_vm2, %v5696_v58, 0.0 }
0x1221   : > { %5723 = vadd.xlane.f32.xlu1 %v5722_v13 }
0x1223   : > { %5726 = vadd.xlane.f32.xlu0 %v5725_v56 }
0x1225   : > { %5729 = vadd.xlane.f32.xlu1 %v5728_v4 }
0x122e   : > { %v6833_v3 = vpop.f32.mrb[16].mxu1 }
0x122f   : > { %v5660_v38 = vpop.f32.mrb[17].mxu1  ;;  %v10840_v45 = vadd.f32 %v6833_v3, %v10781_v63 }
0x1230   : > { %v10843_v15 = vadd.f32 %v10781_v63, %v5660_v38  ;;  %v6834_v9 = vpop.f32.mrb[18].mxu1 }
0x1231   : > { %v5663_v14 = vpop.f32.mrb[19].mxu1  ;;  %v10847_v49 = vadd.f32 %v6834_v9, %v10781_v63  ;;  %v5701_v51 = vmax.f32 %v10840_v45, 0.0 }
0x1232   : > { %v5699_v25 = vmax.f32 %v10843_v15, 0.0  ;;  %v10850_v31 = vadd.f32 %v10781_v63, %v5663_v14 }
0x1233   : > { %v5702_v8 = vmax.f32 %v10847_v49, 0.0  ;;  %v5737_v16 = vsel %vm933_vm2, %v5701_v51, 0.0 }
0x1234   : > { %v5700_v23 = vmax.f32 %v10850_v31, 0.0  ;;  %v5731_v50 = vsel %vm933_vm2, %v5699_v25, 0.0 }
0x1235   : > { %5732 = vadd.xlane.f32.xlu0 %v5731_v50  ;;  %v5740_v39 = vsel %vm933_vm2, %v5702_v8, 0.0 }
0x1236   : > { %v6837_v11 = vpop.f32.mrb[20].mxu1  ;;  %v5734_v35 = vsel %vm933_vm2, %v5700_v23, 0.0 }
0x1237   : > { %v10862_v53 = vadd.f32 %v6837_v11, %v10781_v63  ;;  %v5676_v54 = vpop.f32.mrb[21].mxu1  ;;  %5735 = vadd.xlane.f32.xlu1 %v5734_v35 }
0x1238   : > { %v10865_v12 = vadd.f32 %v10781_v63, %v5676_v54  ;;  %v6838_v10 = vpop.f32.mrb[22].mxu1 }
0x1239   : > { %v10871_v55 = vadd.f32 %v6838_v10, %v10781_v63  ;;  %v5679_v21 = vpop.f32.mrb[23].mxu1  ;;  %5738 = vadd.xlane.f32.xlu0 %v5737_v16  ;;  %v5705_v41 = vmax.f32 %v10862_v53, 0.0 }
0x123a   : > { %v5703_v17 = vmax.f32 %v10865_v12, 0.0  ;;  %v10875_v57 = vadd.f32 %v10781_v63, %v5679_v21 }
0x123b   : > { %5741 = vadd.xlane.f32.xlu1 %v5740_v39  ;;  %v5706_v29 = vmax.f32 %v10871_v55, 0.0  ;;  %v5749_v37 = vsel %vm933_vm2, %v5705_v41, 0.0 }
0x123c   : > { %v5704_v33 = vmax.f32 %v10875_v57, 0.0  ;;  %v5743_v43 = vsel %vm933_vm2, %v5703_v17, 0.0 }
0x123d   : > { %5744 = vadd.xlane.f32.xlu0 %v5743_v43  ;;  %v5752_v63 = vsel %vm933_vm2, %v5706_v29, 0.0 }
0x123e   : > { %v5746_v32 = vsel %vm933_vm2, %v5704_v33, 0.0 }
0x123f   : > { %5747 = vadd.xlane.f32.xlu1 %v5746_v32 }
0x1241   : > { %5750 = vadd.xlane.f32.xlu0 %v5749_v37 }
0x1243   : > { %5753 = vadd.xlane.f32.xlu1 %v5752_v63 }
0x128d   : > { %v5709_v7 = vpop.xlane.xlu1 %5708 }
0x128e   : > { %v5756_v22 = vmul.f32 0.015625, %v5709_v7 }
0x128f   : > { %v5712_v42 = vpop.xlane.xlu0 %5711 }
0x1290   : > { %v5757_v40 = vmul.f32 0.015625, %v5712_v42  ;;  %v10907_v60 = vsub.f32 %v5691_v48, %v5756_v22 }
0x1291   : > { %v5718_v5 = vpop.xlane.xlu1 %5717 }
0x1292   : > { %v10897_v20 = vsub.f32 %v5692_v0, %v5757_v40  ;;  %v5759_v28 = vmul.f32 0.015625, %v5718_v5  ;;  %v5788_v52 = vmul.f32 %v10907_v60, %v10907_v60 }
0x1293   : > { %v5715_v2 = vpop.xlane.xlu0 %5714 }
0x1294   : > { %v10901_v18 = vsub.f32 %v5694_v36, %v5759_v28  ;;  %v5758_v62 = vmul.f32 0.015625, %v5715_v2  ;;  %v5789_v26 = vmul.f32 %v10897_v20, %v10897_v20  ;;  %v5804_v19 = vsel %vm933_vm2, %v5788_v52, 0.0 }
0x1296   : > { %v10911_v34 = vsub.f32 %v5693_v6, %v5758_v62  ;;  %v5807_v59 = vsel %vm933_vm2, %v5789_v26, 0.0  ;;  %v5791_v0 = vmul.f32 %v10901_v18, %v10901_v18 }
0x1297   : > { %5808 = vadd.xlane.f32.xlu1 %v5807_v59 }
0x1298   : > { %v5790_v24 = vmul.f32 %v10911_v34, %v10911_v34  ;;  %v5813_v13 = vsel %vm933_vm2, %v5791_v0, 0.0 }
0x129a   : > { %v5810_v36 = vsel %vm933_vm2, %v5790_v24, 0.0 }
0x129b   : > { %5811 = vadd.xlane.f32.xlu0 %v5810_v36  ;;  %5814 = vadd.xlane.f32.xlu1 %v5813_v13 }
0x129f   : > { %5805 = vadd.xlane.f32.xlu0 %v5804_v19 }
0x12ac   : > { %v5721_v48 = vpop.xlane.xlu0 %5720 }
0x12ad   : > { %v5760_v56 = vmul.f32 0.015625, %v5721_v48 }
0x12ae   : > { %v5724_v6 = vpop.xlane.xlu1 %5723 }
0x12af   : > { %v5761_v4 = vmul.f32 0.015625, %v5724_v6  ;;  %v10929_v50 = vsub.f32 %v5695_v47, %v5760_v56 }
0x12b0   : > { %v5727_v3 = vpop.xlane.xlu0 %5726 }
0x12b1   : > { %v10925_v38 = vsub.f32 %v5696_v58, %v5761_v4  ;;  %v5762_v9 = vmul.f32 0.015625, %v5727_v3  ;;  %v5792_v47 = vmul.f32 %v10929_v50, %v10929_v50 }
0x12b2   : > { %v5730_v14 = vpop.xlane.xlu1 %5729 }
0x12b3   : > { %v10933_v11 = vsub.f32 %v5697_v27, %v5762_v9  ;;  %v5763_v35 = vmul.f32 0.015625, %v5730_v14  ;;  %v5793_v54 = vmul.f32 %v10925_v38, %v10925_v38  ;;  %v5816_v46 = vsel %vm933_vm2, %v5792_v47, 0.0 }
0x12b5   : > { %v10939_v10 = vsub.f32 %v5698_v61, %v5763_v35  ;;  %v5819_v44 = vsel %vm933_vm2, %v5793_v54, 0.0  ;;  %v5794_v58 = vmul.f32 %v10933_v11, %v10933_v11 }
0x12b6   : > { %5820 = vadd.xlane.f32.xlu1 %v5819_v44 }
0x12b7   : > { %v5822_v30 = vsel %vm933_vm2, %v5794_v58, 0.0  ;;  %v5795_v1 = vmul.f32 %v10939_v10, %v10939_v10 }
0x12b8   : > { %5823 = vadd.xlane.f32.xlu0 %v5822_v30 }
0x12b9   : > { %v5825_v27 = vsel %vm933_vm2, %v5795_v1, 0.0 }
0x12ba   : > { %5826 = vadd.xlane.f32.xlu1 %v5825_v27 }
0x12bc   : > { %5817 = vadd.xlane.f32.xlu0 %v5816_v46 }
0x12c2   : > { %v5733_v61 = vpop.xlane.xlu0 %5732 }
0x12c3   : > { %v5764_v16 = vmul.f32 0.015625, %v5733_v61 }
0x12c4   : > { %v5736_v21 = vpop.xlane.xlu1 %5735 }
0x12c5   : > { %v5765_v39 = vmul.f32 0.015625, %v5736_v21  ;;  %v10957_v63 = vsub.f32 %v5699_v25, %v5764_v16  ;;  %v11012_v16 = vld [vmem:[%s11752_s20] ss:$0 sm:$0xff] }
0x12c6   : > { %v5739_v43 = vpop.xlane.xlu0 %5738 }
0x12c7   : > { %v10953_v32 = vsub.f32 %v5700_v23, %v5765_v39  ;;  %v5766_v37 = vmul.f32 0.015625, %v5739_v43  ;;  %v5796_v45 = vmul.f32 %v10957_v63, %v10957_v63  ;;  %v11018_v39 = vld [vmem:[%s11753_s8] ss:$0 sm:$0xff] }
0x12c8   : > { %v5742_v7 = vpop.xlane.xlu1 %5741 }
0x12c9   : > { %v10961_v42 = vsub.f32 %v5701_v51, %v5766_v37  ;;  %v5767_v40 = vmul.f32 0.015625, %v5742_v7  ;;  %v5797_v5 = vmul.f32 %v10953_v32, %v10953_v32  ;;  %v5828_v24 = vsel %vm933_vm2, %v5796_v45, 0.0 }
0x12ca   : > { %v5745_v22 = vpop.xlane.xlu0 %5744 }
0x12cb   : > { %v10967_v31 = vsub.f32 %v5702_v8, %v5767_v40  ;;  %v5831_v23 = vsel %vm933_vm2, %v5797_v5, 0.0  ;;  %v5798_v15 = vmul.f32 %v10961_v42, %v10961_v42  ;;  %v5768_v51 = vmul.f32 0.015625, %v5745_v22 }
0x12cc   : > { %5832 = vadd.xlane.f32.xlu1 %v5831_v23  ;;  %v5748_v25 = vpop.xlane.xlu1 %5747 }
0x12cd   : > { %v5769_v28 = vmul.f32 0.015625, %v5748_v25  ;;  %v5834_v2 = vsel %vm933_vm2, %v5798_v15, 0.0  ;;  %v5799_v62 = vmul.f32 %v10967_v31, %v10967_v31  ;;  %v10985_v36 = vsub.f32 %v5703_v17, %v5768_v51 }
0x12ce   : > { %v5751_v49 = vpop.xlane.xlu0 %5750  ;;  %5835 = vadd.xlane.f32.xlu0 %v5834_v2 }
0x12cf   : > { %v10979_v8 = vsub.f32 %v5704_v33, %v5769_v28  ;;  %v5770_v26 = vmul.f32 0.015625, %v5751_v49  ;;  %v5837_v59 = vsel %vm933_vm2, %v5799_v62, 0.0 }
0x12d0   : > { %5838 = vadd.xlane.f32.xlu1 %v5837_v59  ;;  %v5754_v0 = vpop.xlane.xlu1 %5753 }
0x12d1   : > { %v10989_v13 = vsub.f32 %v5705_v41, %v5770_v26  ;;  %v5771_v52 = vmul.f32 0.015625, %v5754_v0  ;;  %v5801_v57 = vmul.f32 %v10979_v8, %v10979_v8  ;;  %v5800_v41 = vmul.f32 %v10985_v36, %v10985_v36 }
0x12d2   : > { %5829 = vadd.xlane.f32.xlu0 %v5828_v24 }
0x12d3   : > { %v10995_v33 = vsub.f32 %v5706_v29, %v5771_v52  ;;  %v5843_v19 = vsel %vm933_vm2, %v5801_v57, 0.0  ;;  %v5802_v12 = vmul.f32 %v10989_v13, %v10989_v13  ;;  %v5840_v55 = vsel %vm933_vm2, %v5800_v41, 0.0 }
0x12d4   : > { %5844 = vadd.xlane.f32.xlu1 %v5843_v19 }
0x12d5   : > { %v5846_v17 = vsel %vm933_vm2, %v5802_v12, 0.0  ;;  %v5803_v53 = vmul.f32 %v10995_v33, %v10995_v33 }
0x12d6   : > { %5847 = vadd.xlane.f32.xlu0 %v5846_v17 }
0x12d7   : > { %v5849_v48 = vsel %vm933_vm2, %v5803_v53, 0.0 }
0x12d8   : > { %5850 = vadd.xlane.f32.xlu1 %v5849_v48 }
0x12da   : > { %5841 = vadd.xlane.f32.xlu0 %v5840_v55 }
0x1324   : > { %v5809_v29 = vpop.xlane.xlu1 %5808 }
0x1325   : > { %v5853_v6 = vmul.f32 0.015625, %v5809_v29 }
0x1327   : > { %v5869_v4 = vadd.f32 1e-05, %v5853_v6 }
0x1328   : > { %v5812_v56 = vpop.xlane.xlu0 %5811  ;;  %v5815_v9 = vpop.xlane.xlu1 %5814 }
0x1329   : > { %v5854_v3 = vmul.f32 0.015625, %v5812_v56  ;;  %v5855_v54 = vmul.f32 0.015625, %v5815_v9  ;;  %7403 = vrsqrt.f32 %v5869_v4 }
0x132b   : > { %v5870_v44 = vadd.f32 1e-05, %v5854_v3  ;;  %v5871_v30 = vadd.f32 1e-05, %v5855_v54 }
0x132c   : > { %v5806_v14 = vpop.xlane.xlu0 %5805 }
0x132d   : > { %v5852_v35 = vmul.f32 0.015625, %v5806_v14 }
0x132f   : > { %v5868_v58 = vadd.f32 1e-05, %v5852_v35 }
0x1331   : > { %7405 = vrsqrt.f32 %v5868_v58 }
0x1332   : > { %7407 = vrsqrt.f32 %v5870_v44 }
0x1333   : > { %7409 = vrsqrt.f32 %v5871_v30  ;;  %v7404_v1 = vpop.eup %7403 }
0x1334   : > { %v5901_v46 = vmul.f32 %v7404_v1, %v10897_v20 }
0x133b   : > { %v7406_v47 = vpop.eup %7405 }
0x133c   : > { %v5900_v27 = vmul.f32 %v7406_v47, %v10907_v60  ;;  %v7408_v61 = vpop.eup %7407  ;;  %v5924_v60 = vmul.f32 %v11012_v16, %v5901_v46 }
0x133d   : > { %v7410_v43 = vpop.eup %7409  ;;  %v5902_v20 = vmul.f32 %v7408_v61, %v10911_v34 }
0x133e   : > { %v5923_v21 = vmul.f32 %v11012_v16, %v5900_v27  ;;  %v5903_v40 = vmul.f32 %v7410_v43, %v10901_v18  ;;  %v5947_v22 = vadd.f32 %v11018_v39, %v5924_v60 }
0x133f   : > { %v5925_v23 = vmul.f32 %v11012_v16, %v5902_v20 }
0x1340   : > { %v5946_v37 = vadd.f32 %v11018_v39, %v5923_v21  ;;  %v5926_v25 = vmul.f32 %v11012_v16, %v5903_v40 }
0x1341   : > { %v5948_v28 = vadd.f32 %v11018_v39, %v5925_v23 }
0x1342   : > { %5962 = vxpose.xlu0.b32.start [1/16] (narrow) %v5946_v37, 64  ;;  %v5949_v49 = vadd.f32 %v11018_v39, %v5926_v25 }
0x1343   : > { %v5821_v7 = vpop.xlane.xlu1 %5820 }
0x1344   : > { %v5857_v5 = vmul.f32 0.015625, %v5821_v7 }
0x1345   : > { %v5824_v15 = vpop.xlane.xlu0 %5823 }
0x1346   : > { %5963 = vxpose.xlu0.b32.cont [2/16] (narrow) %v5947_v22, 64  ;;  %v5873_v45 = vadd.f32 1e-05, %v5857_v5  ;;  %v5858_v51 = vmul.f32 0.015625, %v5824_v15 }
0x1347   : > { %v5827_v2 = vpop.xlane.xlu1 %5826 }
0x1348   : > { %7411 = vrsqrt.f32 %v5873_v45  ;;  %v5874_v18 = vadd.f32 1e-05, %v5858_v51  ;;  %v5859_v26 = vmul.f32 0.015625, %v5827_v2 }
0x1349   : > { %v5818_v62 = vpop.xlane.xlu0 %5817 }
0x134a   : > { %v5856_v34 = vmul.f32 0.015625, %v5818_v62  ;;  %5964 = vxpose.xlu0.b32.cont [3/16] (narrow) %v5948_v28, 64  ;;  %v5875_v0 = vadd.f32 1e-05, %v5859_v26 }
0x134c   : > { %v5872_v59 = vadd.f32 1e-05, %v5856_v34 }
0x134e   : > { %7413 = vrsqrt.f32 %v5872_v59  ;;  %5965 = vxpose.xlu0.b32.cont [4/16] (narrow) %v5949_v49, 64 }
0x134f   : > { %7415 = vrsqrt.f32 %v5874_v18 }
0x1350   : > { %7417 = vrsqrt.f32 %v5875_v0 }
0x1352   : > { %v7412_v24 = vpop.eup %7411 }
0x1353   : > { %v5905_v12 = vmul.f32 %v7412_v24, %v10925_v38 }
0x1355   : > { %v5928_v29 = vmul.f32 %v11012_v16, %v5905_v12 }
0x1357   : > { %v5951_v38 = vadd.f32 %v11018_v39, %v5928_v29 }
0x1358   : > { %v7414_v52 = vpop.eup %7413 }
0x1359   : > { %v5833_v57 = vpop.xlane.xlu1 %5832  ;;  %v5904_v19 = vmul.f32 %v7414_v52, %v10929_v50  ;;  %v7416_v17 = vpop.eup %7415 }
0x135a   : > { %v5861_v53 = vmul.f32 0.015625, %v5833_v57  ;;  %v5906_v6 = vmul.f32 %v7416_v17, %v10933_v11  ;;  %v7418_v56 = vpop.eup %7417 }
0x135b   : > { %v5836_v41 = vpop.xlane.xlu0 %5835  ;;  %v5927_v48 = vmul.f32 %v11012_v16, %v5904_v19  ;;  %v5907_v54 = vmul.f32 %v7418_v56, %v10939_v10 }
0x135c   : > { %v5877_v4 = vadd.f32 1e-05, %v5861_v53  ;;  %v5862_v3 = vmul.f32 0.015625, %v5836_v41  ;;  %v5929_v35 = vmul.f32 %v11012_v16, %v5906_v6 }
0x135d   : > { %v5950_v55 = vadd.f32 %v11018_v39, %v5927_v48  ;;  %v5839_v9 = vpop.xlane.xlu1 %5838  ;;  %v5930_v47 = vmul.f32 %v11012_v16, %v5907_v54 }
0x135e   : > { %7419 = vrsqrt.f32 %v5877_v4  ;;  %v5878_v44 = vadd.f32 1e-05, %v5862_v3  ;;  %v5863_v58 = vmul.f32 0.015625, %v5839_v9  ;;  %v5952_v11 = vadd.f32 %v11018_v39, %v5929_v35 }
0x135f   : > { %v5830_v14 = vpop.xlane.xlu0 %5829  ;;  %5966 = vxpose.xlu0.b32.cont [5/16] (narrow) %v5950_v55, 64  ;;  %v5953_v43 = vadd.f32 %v11018_v39, %v5930_v47 }
0x1360   : > { %v5860_v50 = vmul.f32 0.015625, %v5830_v14  ;;  %v5879_v27 = vadd.f32 1e-05, %v5863_v58 }
0x1361   : > { %v5845_v46 = vpop.xlane.xlu1 %5844 }
0x1362   : > { %v5876_v30 = vadd.f32 1e-05, %v5860_v50  ;;  %v5865_v10 = vmul.f32 0.015625, %v5845_v46 }
0x1363   : > { %v5848_v1 = vpop.xlane.xlu0 %5847  ;;  %5967 = vxpose.xlu0.b32.cont [6/16] (narrow) %v5951_v38, 64 }
0x1364   : > { %7421 = vrsqrt.f32 %v5876_v30  ;;  %v5881_v7 = vadd.f32 1e-05, %v5865_v10  ;;  %v5866_v40 = vmul.f32 0.015625, %v5848_v1 }
0x1365   : > { %7423 = vrsqrt.f32 %v5878_v44  ;;  %v5851_v5 = vpop.xlane.xlu1 %5850 }
0x1366   : > { %7425 = vrsqrt.f32 %v5879_v27  ;;  %v5882_v45 = vadd.f32 1e-05, %v5866_v40  ;;  %v5867_v51 = vmul.f32 0.015625, %v5851_v5 }
0x1367   : > { %v5842_v61 = vpop.xlane.xlu0 %5841  ;;  %5968 = vxpose.xlu0.b32.cont [7/16] (narrow) %v5952_v11, 64 }
0x1368   : > { %v5864_v21 = vmul.f32 0.015625, %v5842_v61  ;;  %v7420_v60 = vpop.eup %7419  ;;  %v5883_v49 = vadd.f32 1e-05, %v5867_v51 }
0x1369   : > { %v5909_v23 = vmul.f32 %v7420_v60, %v10953_v32 }
0x136a   : > { %v5880_v37 = vadd.f32 1e-05, %v5864_v21 }
0x136b   : > { %5969 = vxpose.xlu0.b32.cont [8/16] (narrow) %v5953_v43, 64  ;;  %v5932_v2 = vmul.f32 %v11012_v16, %v5909_v23 }
0x136c   : > { %7427 = vrsqrt.f32 %v5880_v37 }
0x136d   : > { %7429 = vrsqrt.f32 %v5881_v7 }
0x136e   : > { %v7422_v20 = vpop.eup %7421  ;;  %7431 = vrsqrt.f32 %v5882_v45 }
0x136f   : > { %v5908_v22 = vmul.f32 %v7422_v20, %v10957_v63  ;;  %v7424_v15 = vpop.eup %7423  ;;  %v5955_v63 = vadd.f32 %v11018_v39, %v5932_v2  ;;  %7433 = vrsqrt.f32 %v5883_v49 }
0x1370   : > { %v5910_v62 = vmul.f32 %v7424_v15, %v10961_v42  ;;  %v7426_v34 = vpop.eup %7425 }
0x1371   : > { %v5931_v25 = vmul.f32 %v11012_v16, %v5908_v22  ;;  %v5911_v18 = vmul.f32 %v7426_v34, %v10967_v31 }
0x1372   : > { %v5933_v32 = vmul.f32 %v11012_v16, %v5910_v62 }
0x1373   : > { %v5954_v28 = vadd.f32 %v11018_v39, %v5931_v25  ;;  %v5934_v0 = vmul.f32 %v11012_v16, %v5911_v18 }
0x1374   : > { %v5956_v59 = vadd.f32 %v11018_v39, %v5933_v32 }
0x1375   : > { %5970 = vxpose.xlu0.b32.cont [9/16] (narrow) %v5954_v28, 64  ;;  %v5957_v52 = vadd.f32 %v11018_v39, %v5934_v0 }
0x1376   : > { %v7428_v26 = vpop.eup %7427 }
0x1377   : > { %v5912_v24 = vmul.f32 %v7428_v26, %v10985_v36  ;;  %v7430_v42 = vpop.eup %7429 }
0x1378   : > { %v5913_v19 = vmul.f32 %v7430_v42, %v10979_v8  ;;  %v7432_v12 = vpop.eup %7431 }
0x1379   : > { %5971 = vxpose.xlu0.b32.cont [10/16] (narrow) %v5955_v63, 64  ;;  %v5935_v57 = vmul.f32 %v11012_v16, %v5912_v24  ;;  %v5914_v53 = vmul.f32 %v7432_v12, %v10989_v13  ;;  %v7434_v41 = vpop.eup %7433 }
0x137a   : > { %v5936_v17 = vmul.f32 %v11012_v16, %v5913_v19  ;;  %v5915_v8 = vmul.f32 %v7434_v41, %v10995_v33 }
0x137b   : > { %v5958_v31 = vadd.f32 %v11018_v39, %v5935_v57  ;;  %v5937_v48 = vmul.f32 %v11012_v16, %v5914_v53 }
0x137c   : > { %v5959_v36 = vadd.f32 %v11018_v39, %v5936_v17  ;;  %v5938_v29 = vmul.f32 %v11012_v16, %v5915_v8 }
0x137d   : > { %5972 = vxpose.xlu0.b32.cont [11/16] (narrow) %v5956_v59, 64  ;;  %v5960_v55 = vadd.f32 %v11018_v39, %v5937_v48 }
0x137e   : > { %v5961_v13 = vadd.f32 %v11018_v39, %v5938_v29 }
0x1381   : > { %5973 = vxpose.xlu0.b32.cont [12/16] (narrow) %v5957_v52, 64 }
0x1385   : > { %5974 = vxpose.xlu0.b32.cont [13/16] (narrow) %v5958_v31, 64 }
0x1389   : > { %5975 = vxpose.xlu0.b32.cont [14/16] (narrow) %v5959_v36, 64 }
0x138d   : > { %5976 = vxpose.xlu0.b32.cont [15/16] (narrow) %v5960_v55, 64 }
0x1391   : > { %5977 = vxpose.xlu0.b32.end [16/16] (narrow) %v5961_v13, 64 }
0x13d5   : > { %v5978_v6 = vpop.trf.xlu0 }
0x13d6   : > { %5994 = vst [vmem:[%s8069_s30] sm:$0xff] %v5978_v6 }
0x13d9   : > { %v5979_v56 = vpop.trf.xlu0 }
0x13da   : > { %5995 = vst [vmem:[%s8069_s30 + $0x8] sm:$0xff] %v5979_v56 }
0x13dd   : > { %v5980_v4 = vpop.trf.xlu0 }
0x13de   : > { %5996 = vst [vmem:[%s8069_s30 + $0x10] sm:$0xff] %v5980_v4 }
0x13e1   : > { %v5981_v33 = vpop.trf.xlu0 }
0x13e2   : > { %5997 = vst [vmem:[%s8069_s30 + $0x18] sm:$0xff] %v5981_v33 }
0x13e5   : > { %v5982_v3 = vpop.trf.xlu0 }
0x13e6   : > { %5998 = vst [vmem:[%s8069_s30 + $0x20] sm:$0xff] %v5982_v3 }
0x13e9   : > { %v5983_v9 = vpop.trf.xlu0 }
0x13ea   : > { %5999 = vst [vmem:[%s8069_s30 + $0x28] sm:$0xff] %v5983_v9 }
0x13ed   : > { %v5984_v14 = vpop.trf.xlu0 }
0x13ee   : > { %6000 = vst [vmem:[%s8069_s30 + $0x30] sm:$0xff] %v5984_v14 }
0x13f1   : > { %v5985_v16 = vpop.trf.xlu0 }
0x13f2   : > { %6001 = vst [vmem:[%s8069_s30 + $0x38] sm:$0xff] %v5985_v16 }
0x13f3 PF: > { %s11754_s29 = sld [smem:[#allocation21_spill]]  ;;  %s11755_s12 = sld [smem:[#allocation20_spill]] }
0x13f4   : > { %s6017_s27 = sshll.u32 %s8069_s30, 4  ;;  %s11757_s20 = sld [smem:[#allocation144_spill]]  ;;  %s11076_s27 = int_to_ptr.vmem [resolvable:$true] %s6017_s27 }
0x13f5   : > { %s6003_s8 = scalar_lea.sflag [#allocation8], %s8047_s26  ;;  %s7523_s0 = scalar_lea.vmem %s11076_s27, 1024 }
0x13f6   : > { %p7524_p8 = scmp.ne.s32.totalorder %s11076_s27, %s7523_s0 }
0x13f8   : > { %p7525_p11 = pnand %p7524_p8, %p7931_p13 }
0x13f9   : > { %s6259_s16 = sshll.u32 %s11754_s29, 4  ;;  %s7696_s29 = smov [#allocation12]  }
0x13fa   : > { %s6014_s5 = sadd.s32 %s11755_s12, %s6259_s16  ;;  %s11758_s9 = smov %s11757_s20 }
0x13fb   : > { %s6260_s7 = sshll.u32 %s6014_s5, 7  ;;  %p7526_p12 = pneg %p7525_p11 }
0x13fc   : > { %s11081_s19 = scalar_lea.hbm %s11757_s20, %s6260_s7  ;;  %s7527_s12 = sshll.u32 %s7696_s29, 4  ;;  %s7528_s12 = int_to_ptr.vmem [resolvable:$false] %s7527_s12 }
0x13fd   : > { %s7529_s30 = scalar_lea.vmem %s7528_s12, 2048  ;;  %p7530_p1 = scmp.lt.s32.totalorder %s11076_s27, %s7528_s12 }
0x13fe   : > { %p7531_p9 = scmp.lt.s32.totalorder %s7529_s30, %s7523_s0 }
0x1400   : > { %p7532_p10 = por %p7531_p9, %p7530_p1 }
0x1402   : > { %p7533_p2 = pnand %p7532_p10, %p7526_p12 }
0x1404   : > { %7536 = shalt.err (!%p7533_p2)
}
0x1405   : > { %s7537_s16 = scalar_lea.hbm %s11081_s19, 1024  ;;  %s7541_s6 = scalar_lea.hbm %s11758_s9, 4096 }
0x1406   : > { %p7538_p4 = scmp.ne.s32.totalorder %s11081_s19, %s7537_s16  ;;  %p7542_p0 = scmp.lt.u32.totalorder %s11081_s19, %s11758_s9 }
0x1407   : > { %p7543_p5 = scmp.lt.u32.totalorder %s7541_s6, %s7537_s16  ;;  %p7545_p8 = scmp.lt.u32.totalorder %s7537_s16, %s11081_s19 }
0x1408   : > { %p7539_p7 = pnand %p7538_p4, %p7931_p13 }
0x1409   : > { %p7544_p6 = por %p7543_p5, %p7542_p0 }
0x140a   : > { %p7540_p3 = pneg %p7539_p7 }
0x140b   : > { %p7546_p11 = por %p7545_p8, %p7544_p6 }
0x140d   : > { %p7547_p12 = pnand %p7546_p11, %p7540_p3 }
0x140f   : > { %7550 = shalt.err (!%p7547_p12)
}
0x1410   : > { %s7697_s0 = smov 128   ;;  %s7698_s29 = smov 256  }
0x1411   : > { %s7699_s12 = smov 8  }
0x1412   : > { %6903 = dma.vmem_to_hbm [thread:$0]  (%p7931_p13), %s11076_s27, 1024, %s11081_s19, %s6003_s8, %s7697_s0, %s7698_s29, %s7699_s12  }
0x1413 PF: > { %s11759_s30 = sld [smem:[#allocation18_spill]]  ;;  %s11760_s5 = sld [smem:[#allocation25_spill]] }
0x1414   : > { %p6923_p1 = scmp.ge.s32.totalorder %s7669_s25, 2 }
0x1419   : > { %s6032_s7 = sand.u32 1, %s11759_s30   ;;  %p11761_p9 = scmp.ne.s32.totalorder %s11760_s5, 0 }
0x141a   : > { %s6033_s16 = scalar_lea.sflag [#allocation8], %s6032_s7 }
0x141b   : > { %p6917_p10 = pnand %p6923_p1, %p11761_p9 }
0x141d   : > { %7616 = dma.done.wait (!%p6917_p10), %s6033_s16, 1024  }
0x141e   : > { %7618 = vsyncadd (!%p6917_p10), %s6033_s16, 4294966272  ;;  %s33_s25 = sadd.s32 1, %s7669_s25   ;;  %s11763_s29 = sld [smem:[#allocation17_spill]] }
0x141f   : > { %p11112_p2 = scmp.ge.s32.totalorder %s33_s25, 10   ;;  %s11764_s26 = sld [smem:[#allocation26_spill]] }
0x1420   : > { %s11765_s3 = sld [smem:[#allocation28_spill]]  ;;  %s11766_s27 = smov %s11787_s21 }
0x1421   : > { %s11767_s30 = smov %s7629_s15  ;;  %s11768_s15 = smov %s7958_s11 }
0x1422   : > { %s11769_s16 = smov %s7637_s17  ;;  %s11770_s17 = smov %s7641_s18 }
0x1423   : > { %s11771_s18 = smov %s7955_s28  ;;  %s11772_s19 = smov %s7657_s22 }
0x1424   : > { %s11773_s20 = smov %s7661_s23  ;;  %s11774_s21 = smov %s7665_s24 }
0x1425   : > { %s11775_s22 = smov %s11764_s26  ;;  %s11777_s24 = smov %s11766_s27 }
0x1426   : > { %s11776_s23 = smov %s11765_s3  ;;  %32 = sbr.rel (!%p11112_p2) target bundleno = 27 (0x1b), region = 146 }
0x142d   :  { %6038 = vsyncpa [#allocation7], 1 }
0x142e   :  { %6040 = vsyncpa [#allocation7 + $0x1], 1 }
0x142f   :  { %6041 = vsyncpa [#allocation10], 1 }
0x1430   :  { %6043 = vsyncpa [#allocation10 + $0x1], 1 }
0x1431   :  { %6044 = vsyncpa [#allocation8], 1 }
0x1432   :  { %6046 = vsyncpa [#allocation8 + $0x1], 1 }

</bundles_post_ra>
